<compile_context>
chip_gen: v7x
topology: tpu7x:2x2x1
jax: 0.10.0
libtpu: 0.0.40
codegen_flags: <defaults>
</compile_context>

<pallas_src>
import math
import functools

import jax
import jax.numpy as jnp
from jax.experimental import pallas as pl
from jax.experimental.pallas import tpu as pltpu


def _round_up(x, m):
    return pl.cdiv(x, m) * m


def _pe_kernel(freq_ref, sub_ref, sin_ref, cos_ref, *, fold, block_r):
    """Compute one (block_r, fold * d_half) tile of sin/cos tables.

    Kernel row r, lane l encode sequence position p = (i*block_r + r)*fold + l//d_half
    and frequency index j = l % d_half.  Positions are exact integers in f32, so
    `arg` matches the reference's single f32 multiply position * div_term.
    """
    i = pl.program_id(0)
    rows = sin_ref.shape[0]

    row = jax.lax.broadcasted_iota(jnp.int32, (rows, 1), 0) + i * block_r
    pos = (row * fold).astype(jnp.float32) + sub_ref[...]      # (rows, L), exact
    arg = pos * freq_ref[...]                                   # single rounding
    sin_ref[...] = jnp.sin(arg)
    cos_ref[...] = jnp.cos(arg)


@functools.lru_cache(maxsize=None)
def _pe_table(d_model, max_len, dtype=jnp.float32):
    """Build the (1, max_len, d_model) positional-embedding buffer once (cached).

    NOTE: the cached table is a device array pinned to the default device of the
    first call (mirrors the PyTorch registered buffer).
    """
    assert d_model % 2 == 0, "d_model must be even (as in the PyTorch module)"
    d_half = d_model // 2

    # Lane-dense layout: pack `fold` consecutive positions into the lane axis so
    # the kernel's last dim (fold * d_half == lcm(d_half, 128)) is a multiple of 128.
    fold = 128 // math.gcd(d_half, 128)
    lane_w = fold * d_half

    rows_needed = pl.cdiv(max_len, fold)
    rows_out = _round_up(rows_needed, 8)            # sublane-aligned output rows

    # Balanced row tiling: ~1 MiB per output block (2 outputs x 2 buffers plus
    # full-tile f32 temporaries stays well inside v5e's 16 MiB scoped-VMEM
    # default), split into an even number of roughly equal blocks, with >= 2
    # grid steps when there is enough work so v7x's two TensorCores both run.
    budget_bytes = 1 * 1024 * 1024
    max_rows = max(8, (budget_bytes // (lane_w * 4)) // 8 * 8)
    num_blocks = pl.cdiv(rows_out, max_rows)
    if rows_out >= 16:
        num_blocks = max(2, num_blocks)
        num_blocks = 2 * pl.cdiv(num_blocks, 2)     # even block count for 2 TCs
    block_r = min(rows_out, _round_up(pl.cdiv(rows_out, num_blocks), 8))
    grid = (pl.cdiv(rows_out, block_r),)

    # Per-lane constants (tiny, computed once in XLA so div_term is identical to
    # the reference): frequency and in-fold position offset for lane l.
    lane = jnp.arange(lane_w, dtype=jnp.int32)
    div_term = jnp.exp(jnp.arange(0, d_model, 2, dtype=jnp.float32)
                       * (-(math.log(10000.0) / d_model)))
    freq_lane = div_term[lane % d_half][None, :]                   # (1, lane_w)
    sub_lane = (lane // d_half).astype(jnp.float32)[None, :]       # (1, lane_w)

    lane_spec = pl.BlockSpec((1, lane_w), lambda i: (0, 0))
    tile_spec = pl.BlockSpec((block_r, lane_w), lambda i: (i, 0))

    sin_tab, cos_tab = pl.pallas_call(
        functools.partial(_pe_kernel, fold=fold, block_r=block_r),
        out_shape=(jax.ShapeDtypeStruct((rows_out, lane_w), jnp.float32),
                   jax.ShapeDtypeStruct((rows_out, lane_w), jnp.float32)),
        grid=grid,
        in_specs=[lane_spec, lane_spec],
        out_specs=(tile_spec, tile_spec),
        compiler_params=pltpu.CompilerParams(
            dimension_semantics=("parallel",),
            vmem_limit_bytes=32 * 1024 * 1024),
    )(freq_lane, sub_lane)

    # One-time un-fold (contiguous reshape), interleave [s0, c0, s1, c1, ...],
    # and trim the fold/sublane padding down to max_len.
    n_pos = rows_out * fold
    sin2d = sin_tab.reshape(n_pos, d_half)
    cos2d = cos_tab.reshape(n_pos, d_half)
    pe = jnp.stack([sin2d, cos2d], axis=-1).reshape(n_pos, d_model)
    pe = pe[:max_len].astype(dtype)
    return pe[None]                                  # (1, max_len, d_model)


def positional_embedding(x, d_model, max_len=5000):
    """Equivalent of PositionalEmbedding(d_model, max_len).forward(x)."""
    seq_len = x.shape[1]
    assert seq_len <= max_len, "sequence longer than max_len"
    pe = _pe_table(int(d_model), int(max_len))
    # Prefix view of the cached max_len buffer (fuses into downstream consumers
    # under jit), exactly like `self.pe[:, :x.size(1)]`.
    return pe[:, :seq_len]


def _reference_pe(seq_len, d_model):
    """Pure-JAX reference mirroring the PyTorch buffer construction."""
    position = jnp.arange(seq_len, dtype=jnp.float32)[:, None]
    div_term = jnp.exp(jnp.arange(0, d_model, 2, dtype=jnp.float32)
                       * (-(math.log(10000.0) / d_model)))
    pe = jnp.zeros((seq_len, d_model), jnp.float32)
    pe = pe.at[:, 0::2].set(jnp.sin(position * div_term))
    pe = pe.at[:, 1::2].set(jnp.cos(position * div_term))
    return pe[None]


if __name__ == "__main__":
    d_model = 32
    batch, seq_len = 2, 8
    max_len = 5000

    key = jax.random.PRNGKey(0)
    x = jax.random.normal(key, (batch, seq_len, d_model), dtype=jnp.float32)

    out = positional_embedding(x, d_model, max_len=max_len)
    out = jax.block_until_ready(out)
    assert out.shape == (1, seq_len, d_model), out.shape
    assert out.dtype == jnp.float32

    # Tight check on the demo shape.
    ref = _reference_pe(seq_len, d_model)
    assert jnp.allclose(out, ref, atol=1e-5, rtol=1e-5)

    # Exercise the multi-block grid, the ragged last block, and the padding
    # trim by comparing a larger prefix of the cached max_len table.
    check_len = 1000
    big = positional_embedding(jnp.zeros((1, check_len, d_model), jnp.float32),
                               d_model, max_len=max_len)
    big = jax.block_until_ready(big)
    ref_big = _reference_pe(check_len, d_model)
    assert big.shape == (1, check_len, d_model)
    max_err = float(jnp.max(jnp.abs(big - ref_big)))
    assert jnp.allclose(big, ref_big, atol=1e-3, rtol=1e-3), max_err

    print("KERNEL_OK")
</pallas_src>

<mosaic_0001>
module attributes {stable_mosaic.version = 11 : i64} {
  func.func @_pe_kernel(%arg0: i32, %arg1: memref<1x128xf32, #tpu.memory_space<vmem>>, %arg2: memref<1x128xf32, #tpu.memory_space<vmem>>, %arg3: memref<320x128xf32, #tpu.memory_space<vmem>>, %arg4: memref<320x128xf32, #tpu.memory_space<vmem>>) attributes {dimension_semantics = [#tpu.dimension_semantics<parallel>], iteration_bounds = array<i64: 2>, scalar_prefetch = 0 : i64, scratch_operands = 0 : i64, tpu.core_type = #tpu.core_type<tc>, window_params = [{pipeline_mode = #tpu.pipeline_mode<synchronous>, transform_indices = @transform_0, window_bounds = array<i64: 1, 128>}, {pipeline_mode = #tpu.pipeline_mode<synchronous>, transform_indices = @transform_1, window_bounds = array<i64: 1, 128>}, {transform_indices = @transform_2, window_bounds = array<i64: 320, 128>}, {transform_indices = @transform_3, window_bounds = array<i64: 320, 128>}]} {
    %0 = tpu.iota {dimensions = array<i32: 0>} : vector<320x1xi32>
    %c320_i32 = arith.constant 320 : i32
    %1 = arith.muli %arg0, %c320_i32 : i32
    %2 = vector.broadcast %1 : i32 to vector<320x1xi32>
    %3 = arith.addi %0, %2 : vector<320x1xi32>
    %c8_i32 = arith.constant 8 : i32
    %4 = vector.broadcast %c8_i32 : i32 to vector<320x1xi32>
    %5 = arith.muli %3, %4 : vector<320x1xi32>
    %6 = arith.sitofp %5 : vector<320x1xi32> to vector<320x1xf32>
    %c0 = arith.constant 0 : index
    %c0_0 = arith.constant 0 : index
    %7 = vector.load %arg2[%c0, %c0_0] : memref<1x128xf32, #tpu.memory_space<vmem>>, vector<1x128xf32>
    %8 = vector.broadcast %6 : vector<320x1xf32> to vector<320x128xf32>
    %9 = vector.broadcast %7 : vector<1x128xf32> to vector<320x128xf32>
    %10 = arith.addf %8, %9 : vector<320x128xf32>
    %c0_1 = arith.constant 0 : index
    %c0_2 = arith.constant 0 : index
    %11 = vector.load %arg1[%c0_1, %c0_2] : memref<1x128xf32, #tpu.memory_space<vmem>>, vector<1x128xf32>
    %12 = vector.broadcast %11 : vector<1x128xf32> to vector<320x128xf32>
    %13 = arith.mulf %10, %12 : vector<320x128xf32>
    %14 = math.sin %13 : vector<320x128xf32>
    %c0_3 = arith.constant 0 : index
    %c0_4 = arith.constant 0 : index
    %15 = vector.load %arg3[%c0_3, %c0_4] : memref<320x128xf32, #tpu.memory_space<vmem>>, vector<320x128xf32>
    tpu.vector_store %arg3[%c0_3, %c0_4], %14 {strides = array<i32>} : memref<320x128xf32, #tpu.memory_space<vmem>>, vector<320x128xf32>,
    %16 = math.cos %13 : vector<320x128xf32>
    %c0_5 = arith.constant 0 : index
    %c0_6 = arith.constant 0 : index
    %17 = vector.load %arg4[%c0_5, %c0_6] : memref<320x128xf32, #tpu.memory_space<vmem>>, vector<320x128xf32>
    tpu.vector_store %arg4[%c0_5, %c0_6], %16 {strides = array<i32>} : memref<320x128xf32, #tpu.memory_space<vmem>>, vector<320x128xf32>,
    return
  }
  func.func @transform_0(%arg0: i32) -> (i32, i32) {
    %c0_i32 = arith.constant 0 : i32
    %c0_i32_0 = arith.constant 0 : i32
    %c0_i32_1 = arith.constant 0 : i32
    return %c0_i32, %c0_i32_0 : i32, i32
  }
  func.func @transform_1(%arg0: i32) -> (i32, i32) {
    %c0_i32 = arith.constant 0 : i32
    %c0_i32_0 = arith.constant 0 : i32
    %c0_i32_1 = arith.constant 0 : i32
    return %c0_i32, %c0_i32_0 : i32, i32
  }
  func.func @transform_2(%arg0: i32) -> (i32, i32) {
    %c0_i32 = arith.constant 0 : i32
    %c0_i32_0 = arith.constant 0 : i32
    return %arg0, %c0_i32 : i32, i32
  }
  func.func @transform_3(%arg0: i32) -> (i32, i32) {
    %c0_i32 = arith.constant 0 : i32
    %c0_i32_0 = arith.constant 0 : i32
    return %arg0, %c0_i32 : i32, i32
  }
}

</mosaic_0001>

<bundles_post_ra>
// kernel: tpu_custom_call.1
= control target key start
LH: loop header
LB: loop body
LE: loop exit
PB: predicated region body
PF: predicated region fallthrough
CT: control target
= control target key end

     0   :  { %9 = vsyncpa [#allocation3], 0  ;;  %s14715_s0 = inlined_call_operand.hbm [shape: f32[1,128], index: 0, kind: input, shape index: {}]   ;;  %s14716_s1 = inlined_call_operand.vmem [shape: f32[1,128], index: 1, kind: input, shape index: {}]   ;;  %s14717_s2 = inlined_call_operand.hbm [shape: f32[632,128], index: 2, kind: output, shape index: {0}]   ;;  %s14718_s3 = inlined_call_operand.hbm [shape: f32[632,128], index: 3, kind: output, shape index: {1}]  }
   0x1   :  { %10 = vsyncpa [#allocation4], 0 }
   0x2   :  { %12 = vsyncpa [#allocation4 + $0x1], 0 }
   0x3   :  { %13 = vsyncpa [#allocation7], 0 }
   0x4   :  { %15 = vsyncpa [#allocation7 + $0x1], 0  ;;  %s9841_s12 = smov 0   ;;  %s9843_s13 = smov 0  }
   0x5   :  { %s9845_s14 = smov 0   ;;  %s9847_s15 = smov 0  }
   0x6 LB: > { %s9862_s16 = sadd.s32 4294967295, %s9806_s15   ;;  %s8941_s17 = sadd.s32 4294967294, %s9806_s15   ;;  %s9806_s15 = sphi %s9847_s15, %s15525_s15   ;;  %s9802_s14 = sphi %s9845_s14, %s15524_s14   ;;  %s9798_s13 = sphi %s9843_s13, %s15523_s13   ;;  %s9794_s12 = sphi %s9841_s12, %s15522_s12  }
   0x7   : > { %s9866_s18 = sadd.s32 1, %s9806_s15   ;;  %s70_s19 = sadd.s32 1, %s9802_s14 }
   0x8   : > { %s67_s20 = ssub.s32 %s9806_s15, %s9866_s18  ;;  %p80_p0 = scmp.ne.s32.totalorder %s9802_s14, %s9798_s13 }
   0x9   : > { %p68_p1 = scmp.eq.s32.totalorder %s67_s20, 0  ;;  %p81_p2 = scmp.eq.s32.totalorder %s9862_s16, 1 }
   0xa   : > { %p86_p3 = scmp.ne.s32.totalorder %s9798_s13, %s9794_s12  ;;  %p87_p4 = scmp.eq.s32.totalorder %s8941_s17, 1 }
   0xb   : > { %s9877_s21 = scalar_select %p68_p1, %s9802_s14, %s70_s19  }
   0xc   : > { %p9879_p5 = por %p81_p2, %p80_p0  ;;  %p9883_p6 = por %p87_p4, %p86_p3 }
   0xd   : > { %p8942_p7 = scmp.ge.s32.totalorder %s9806_s15, 1  ;;  %p120_p8 = scmp.lt.s32.totalorder %s9806_s15, 3 }
   0xe   : > { %s15043_s22 = scalar_select %p9879_p5, 1, 0 }
   0xf   : > { %s15044_s23 = scalar_select %p9883_p6, 1, 0 }
  0x10   : > { %p14719_p9 = scmp.eq.s32.totalorder %s9862_s16, 0  ;;  %p9890_p10 = pnand %p8942_p7, %p120_p8 }
  0x11   : > { %s9808_s25 = smov [#allocation2]   ;;  %s9680_s30 = scalar_lea.hbm %s14715_s0, 16 }
  0x12   : > { %s15045_s24 = scalar_select %p9890_p10, 1, 0 }
  0x13   : > { %s133_s26 = sshll.u32 %s9808_s25, 4  ;;  %p9449_p11 = pneg %p9890_p10  ;;  %s134_s26 = int_to_ptr.vmem [resolvable:$true] %s133_s26 }
  0x14   : > { %p9681_p13 = scmp.ne.s32.totalorder %s14715_s0, %s9680_s30  ;;  %p9687_p3 = scmp.lt.u32.totalorder %s9680_s30, %s14715_s0 }
  0x15   : > { %p9898_p12 = pnand %p14719_p9, %p9449_p11 }
  0x17   : > { %p9682_p0 = pneg %p9898_p12 }
  0x19   : > { %p9683_p1 = pnand %p9682_p0, %p9681_p13 }
  0x1b   : > { %p9684_p2 = pneg %p9683_p1 }
  0x1d   : > { %p9689_p4 = pnand %p9687_p3, %p9684_p2 }
  0x1f   : > { %9692 = shalt.err (!%p9689_p4)
}
  0x20   : > { %s9693_s8 = scalar_lea.vmem %s134_s26, 16  ;;  %s9700_s9 = scalar_lea.vmem %s134_s26, 32 }
  0x21   : > { %p9694_p7 = scmp.ne.s32.totalorder %s134_s26, %s9693_s8  ;;  %p9701_p9 = scmp.lt.s32.totalorder %s134_s26, %s134_s26 }
  0x22   : > { %p9702_p6 = scmp.lt.s32.totalorder %s9700_s9, %s9693_s8 }
  0x23   : > { %p9696_p8 = pnand %p9694_p7, %p9682_p0 }
  0x24   : > { %p9703_p5 = por %p9702_p6, %p9701_p9 }
  0x25   : > { %p9697_p11 = pneg %p9696_p8 }
  0x27   : > { %p9704_p10 = pnand %p9703_p5, %p9697_p11 }
  0x29   : > { %9707 = shalt.err (!%p9704_p10)
}
  0x2a   : > { %9452 = dma.hbm_to_vmem [thread:$0]  (!%p9898_p12), %s14715_s0, 16, %s134_s26, [#allocation3]  }
  0x2b   : > { %p15047_p13 = scmp.ne.s32.totalorder %s15045_s24, 0 }
  0x2d   : > { %149 = sbr.rel (%p15047_p13) target bundleno = 1290 (0x50a), region = 28 }
  0x34   : > { %p15048_p1 = scmp.eq.s32.totalorder %s9862_s16, 0 }
  0x36   : > { %9781 = dma.done.wait (%p15048_p1), [#allocation3], 16   ;;  %p15049_p0 = pmov %p15048_p1 }
  0x37   : > { %s9925_s17 = sand.u32 1, %s9798_s13   ;;  %v183_v0 = vlaneseq  ;;  %s224_s19 = smul.u32 320, %s9862_s16  ;;  %v9941_v9 = vld [vmem:[%s14716_s1] ss:$0 sm:$0xff]  ;;  %v14743_v59 = vmov 683565275  }
  0x38   : > { %9783 = vsyncadd (%p15049_p0), [#allocation3], 4294967280  ;;  %v9943_v13 = vld [vmem:[#allocation2] ss:$0 sm:$0xff]  ;;  %v14733_v61 = vmov 2475754826  }
  0x39   : > { %v9928_v1 = vshrl.u32 %v183_v0, 7  ;;  %v9930_v2 = vstv %s224_s19  ;;  %v14735_v63 = vmov 2131351028   ;;  %s9282_s25 = smul.u32 320, %s9925_s17  ;;  %s8806_s27 = scalar_lea.sflag [#allocation7], %s9925_s17 }
  0x3a   : > { %p15519_p5 = scmp.ne.s32.totalorder %s15043_s22, 0 }
  0x3b   : > { %v226_v3 = vadd.s32 %v9930_v2, %v9928_v1  ;;  %v185_v4 = vadd.s32 8, %v9928_v1  ;;  %v186_v5 = vadd.s32 16, %v9928_v1  ;;  %v187_v17 = vadd.s32 24, %v9928_v1  ;;  %s10284_s26 = scalar_lea.vmem [#allocation5], %s9282_s25  ;;  %s13897_s19 = scalar_lea.vmem [#allocation6], %s9282_s25 }
  0x3c   : > { %v188_v21 = vadd.s32 32, %v9928_v1  ;;  %v189_v24 = vadd.s32 40, %v9928_v1  ;;  %v190_v35 = vadd.s32 48, %v9928_v1  ;;  %s8801_s25 = scalar_lea.sflag [#allocation4], %s9925_s17  ;;  %s8813_s28 = smul.u32 (%p15519_p5), 40, %s9862_s16 }
  0x3d   : > { %v266_v6 = vmul.u32 8, %v226_v3  ;;  %v227_v7 = vadd.s32 %v9930_v2, %v185_v4  ;;  %v228_v8 = vadd.s32 %v9930_v2, %v186_v5  ;;  %v229_v27 = vadd.s32 %v9930_v2, %v187_v17 }
  0x3e   : > { %v230_v29 = vadd.s32 %v9930_v2, %v188_v21  ;;  %v9969_v34 = vadd.s32 %v9930_v2, %v189_v24  ;;  %v9976_v46 = vadd.s32 %v9930_v2, %v190_v35  ;;  %v14737_v3 = vmov 2102212464   ;;  %s8814_s29 = ssub.s32 (%p15519_p5), 79, %s8813_s28 }
  0x3f   : > { %v306_v10 = vcvt.s32.f32 %v266_v6  ;;  %v267_v11 = vmul.u32 8, %v227_v7  ;;  %v268_v12 = vmul.u32 8, %v228_v8  ;;  %v14741_v5 = vmov 920167782   ;;  %p8815_p6 = scmp.lt.s32.totalorder (%p15519_p5), %s8814_s29, 40 }
  0x40   : > { %v269_v39 = vmul.u32 8, %v229_v27  ;;  %v270_v41 = vmul.u32 8, %v230_v29 }
  0x41   : > { %v353_v14 = vadd.f32 %v9941_v9, %v306_v10  ;;  %v307_v15 = vcvt.s32.f32 %v267_v11  ;;  %v308_v16 = vcvt.s32.f32 %v268_v12  ;;  %v271_v50 = vmul.u32 8, %v9969_v34 }
  0x42   : > { %v9978_v49 = vcvt.s32.f32 %v269_v39  ;;  %v9982_v54 = vcvt.s32.f32 %v270_v41 }
  0x43   : > { %v9948_v18 = vmul.f32 %v9943_v13, %v353_v14  ;;  %v354_v19 = vadd.f32 %v9941_v9, %v307_v15  ;;  %v355_v20 = vadd.f32 %v9941_v9, %v308_v16  ;;  %v14739_v14 = vmov 1326507024  }
  0x45   : > { %v440_v22 = vand.u32 2147483647, %v9948_v18  ;;  %v443_v23 = vand.u32 2139095040, %v9948_v18  ;;  %v9957_v25 = vmul.f32 %v9943_v13, %v354_v19  ;;  %v9960_v26 = vmul.f32 %v9943_v13, %v355_v20 }
  0x46   : > { %vm442_vm12 = vcmp.lt.s32.totalorder %v9948_v18, 0 }
  0x47   : > { %v444_v28 = vshrl.u32 %v443_v23, 23  ;;  %v447_v30 = vand.u32 8388607, %v440_v22  ;;  %v544_v31 = vand.u32 2147483647, %v9957_v25  ;;  %v547_v32 = vand.u32 2139095040, %v9957_v25 }
  0x48   : > { %v651_v38 = vand.u32 2139095040, %v9960_v26  ;;  %v648_v53 = vand.u32 2147483647, %v9960_v26  ;;  %vm10101_vm14 = vcmp.le.f32.partialorder %v440_v22, 0.7853982 }
  0x49   : > { %v8948_v33 = vadd.s32 4294967169, %v444_v28  ;;  %v548_v36 = vshrl.u32 %v547_v32, 23  ;;  %v551_v37 = vand.u32 8388607, %v544_v31  ;;  %v448_v42 = vor.u32 8388608, %v447_v30 }
  0x4a   : > { %v652_v45 = vshrl.u32 %v651_v38, 23 }
  0x4b   : > { %v450_v40 = vadd.s32 1, %v8948_v33  ;;  %v8952_v43 = vadd.s32 4294967169, %v548_v36  ;;  %v552_v44 = vor.u32 8388608, %v551_v37  ;;  %v9984_v55 = vshll.u32 %v448_v42, 8 }
  0x4c   : > { %v9988_v57 = vadd.s32 4294967169, %v652_v45 }
  0x4d   : > { %vm451_vm0 = vcmp.gt.s32.totalorder %v450_v40, 0  ;;  %v554_v48 = vadd.s32 1, %v8952_v43  ;;  %v9986_v56 = vshll.u32 %v552_v44, 8 }
  0x4e   : > { %v452_v47 = vsel %vm451_vm0, %v450_v40, 0 }
  0x4f   : > { %v453_v51 = vshrl.u32 %v452_v47, 5  ;;  %v454_v52 = vand.u32 31, %v452_v47  ;;  %vm555_vm1 = vcmp.gt.s32.totalorder %v554_v48, 0 }
  0x50   : > { %v556_v20 = vsel %vm555_vm1, %v554_v48, 0 }
  0x51   : > { %v455_v58 = vsub.s32 32, %v454_v52  ;;  %v457_v60 = vshll.u32 %v14743_v59, %v454_v52  ;;  %v460_v62 = vshll.u32 %v14733_v61, %v454_v52  ;;  %v463_v0 = vshll.u32 %v14735_v63, %v454_v52 }
  0x52   : > { %v466_v4 = vshll.u32 %v14737_v3, %v454_v52  ;;  %v469_v6 = vshll.u32 %v14741_v5, %v454_v52  ;;  %vm472_vm2 = vcmp.lt.s32.totalorder %v453_v51, 1  ;;  %vm473_vm3 = vcmp.lt.s32.totalorder %v453_v51, 2 }
  0x53   : > { %v456_v7 = vshrl.u32 %v14743_v59, %v455_v58  ;;  %v458_v8 = vshrl.u32 %v14733_v61, %v455_v58  ;;  %v461_v10 = vshrl.u32 %v14735_v63, %v455_v58  ;;  %v464_v11 = vshrl.u32 %v14737_v3, %v455_v58 }
  0x54   : > { %v467_v12 = vshrl.u32 %v14741_v5, %v455_v58  ;;  %v470_v15 = vshrl.u32 %v14739_v14, %v455_v58  ;;  %vm474_vm4 = vcmp.lt.s32.totalorder %v453_v51, 3  ;;  %vm475_vm5 = vcmp.lt.s32.totalorder %v453_v51, 4 }
  0x55   : > { %v459_v16 = vor.u32 %v458_v8, %v457_v60  ;;  %v462_v17 = vor.u32 %v461_v10, %v460_v62  ;;  %v465_v19 = vor.u32 %v464_v11, %v463_v0  ;;  %v557_v24 = vshrl.u32 %v556_v20, 5 }
  0x56   : > { %v468_v21 = vor.u32 %v467_v12, %v466_v4  ;;  %v471_v23 = vor.u32 %v470_v15, %v469_v6  ;;  %v558_v27 = vand.u32 31, %v556_v20 }
  0x57   : > { %v476_v28 = vsel %vm472_vm2, %v456_v7, %v459_v16  ;;  %v477_v29 = vsel %vm475_vm5, %v465_v19, 2102212464  ;;  %v480_v30 = vsel %vm472_vm2, %v459_v16, %v462_v17  ;;  %v484_v32 = vsel %vm472_vm2, %v462_v17, %v465_v19 }
  0x58   : > { %v478_v33 = vsel %vm474_vm4, %v462_v17, %v477_v29  ;;  %v481_v35 = vsel %vm475_vm5, %v468_v21, 920167782  ;;  %v485_v36 = vsel %vm475_vm5, %v471_v23, 1326507024  ;;  %v559_v37 = vsub.s32 32, %v558_v27 }
  0x59   : > { %v479_v38 = vsel %vm473_vm3, %v476_v28, %v478_v33  ;;  %v482_v39 = vsel %vm474_vm4, %v465_v19, %v481_v35  ;;  %v486_v40 = vsel %vm474_vm4, %v468_v21, %v485_v36  ;;  %v561_v41 = vshll.u32 %v14743_v59, %v558_v27 }
  0x5a   : > { %v483_v42 = vsel %vm473_vm3, %v480_v30, %v482_v39  ;;  %v487_v43 = vsel %vm473_vm3, %v484_v32, %v486_v40  ;;  %v495_v44 = vmul.u32 %v9984_v55, %v479_v38  ;;  %v560_v45 = vshrl.u32 %v14743_v59, %v559_v37 }
  0x5b   : > { %v10015_v47 = vmul.u32.u64.low %v9984_v55, %v487_v43  ;;  %v10016_v48 = vmul.u32.u64.high %v9984_v55, %v487_v43, %v10015_v47  ;;  %v10019_v52 = vmul.u32.u64.low %v9984_v55, %v483_v42  ;;  %v10020_v58 = vmul.u32.u64.high %v9984_v55, %v483_v42, %v10019_v52 }
  0x5c   : > { %v562_v60 = vshrl.u32 %v14733_v61, %v559_v37  ;;  %v564_v62 = vshll.u32 %v14733_v61, %v558_v27  ;;  %v565_v51 = vshrl.u32 %v14735_v63, %v559_v37  ;;  %v567_v0 = vshll.u32 %v14735_v63, %v558_v27 }
  0x5d   : > { %v568_v4 = vshrl.u32 %v14737_v3, %v559_v37  ;;  %v570_v6 = vshll.u32 %v14737_v3, %v558_v27  ;;  %v571_v7 = vshrl.u32 %v14741_v5, %v559_v37  ;;  %v573_v8 = vshll.u32 %v14741_v5, %v558_v27 }
  0x5e   : > { %v563_v10 = vor.u32 %v562_v60, %v561_v41  ;;  %v566_v55 = vor.u32 %v565_v51, %v564_v62  ;;  %v574_v11 = vshrl.u32 %v14739_v14, %v559_v37  ;;  %vm576_vm6 = vcmp.lt.s32.totalorder %v557_v24, 1 }
  0x5f   : > { %vm497_vm7 = vc.u32 %v10016_v48, %v10019_v52  ;;  %v498_v12 = vadd.s32 1, %v10020_v58  ;;  %v569_v15 = vor.u32 %v568_v4, %v567_v0  ;;  %v658_v16 = vadd.s32 1, %v9988_v57 }
  0x60   : > { %v572_v17 = vor.u32 %v571_v7, %v570_v6  ;;  %v575_v19 = vor.u32 %v574_v11, %v573_v8  ;;  %vm577_vm8 = vcmp.lt.s32.totalorder %v557_v24, 2  ;;  %vm578_vm9 = vcmp.lt.s32.totalorder %v557_v24, 3 }
  0x61   : > { %v499_v20 = vsel %vm497_vm7, %v498_v12, %v10020_v58  ;;  %vm579_vm10 = vcmp.lt.s32.totalorder %v557_v24, 4  ;;  %v580_v21 = vsel %vm576_vm6, %v560_v45, %v563_v10  ;;  %v584_v23 = vsel %vm576_vm6, %v563_v10, %v566_v55 }
  0x62   : > { %v500_v27 = vadd.s32 %v499_v20, %v495_v44  ;;  %v581_v28 = vsel %vm579_vm10, %v569_v15, 2102212464  ;;  %v585_v29 = vsel %vm579_vm10, %v572_v17, 920167782  ;;  %v588_v30 = vsel %vm576_vm6, %v566_v55, %v569_v15 }
  0x63   : > { %v582_v32 = vsel %vm578_vm9, %v566_v55, %v581_v28  ;;  %v586_v33 = vsel %vm578_vm9, %v569_v15, %v585_v29  ;;  %v589_v35 = vsel %vm579_vm10, %v575_v19, 1326507024  ;;  %vm659_vm11 = vcmp.gt.s32.totalorder %v658_v16, 0 }
  0x64   : > { %v501_v57 = vadd.s32 536870912, %v500_v27  ;;  %v587_v36 = vsel %vm577_vm8, %v584_v23, %v586_v33  ;;  %v590_v37 = vsel %vm578_vm9, %v572_v17, %v589_v35  ;;  %v356_v38 = vadd.f32 %v9941_v9, %v9978_v49 }
  0x65   : > { %v583_v39 = vsel %vm577_vm8, %v580_v21, %v582_v32  ;;  %v591_v40 = vsel %vm577_vm8, %v588_v30, %v590_v37  ;;  %v10046_v41 = vmul.u32.u64.low %v9986_v56, %v587_v36  ;;  %v10047_v42 = vmul.u32.u64.high %v9986_v56, %v587_v36, %v10046_v41 }
  0x66   : > { %v502_v43 = vshrl.u32 %v501_v57, 30  ;;  %v10051_v44 = vmul.u32.u64.low %v9986_v56, %v591_v40  ;;  %v10052_v45 = vmul.u32.u64.high %v9986_v56, %v591_v40, %v10051_v44  ;;  %v660_v47 = vsel %vm659_vm11, %v658_v16, 0 }
  0x67   : > { %v655_v58 = vand.u32 8388607, %v648_v53  ;;  %v662_v60 = vand.u32 31, %v660_v47  ;;  %v357_v49 = vadd.f32 %v9941_v9, %v9982_v54  ;;  %v311_v24 = vcvt.s32.f32 %v271_v50 }
  0x68   : > { %v503_v62 = vshll.u32 %v502_v43, 30  ;;  %v599_v51 = vmul.u32 %v9986_v56, %v583_v39  ;;  %v10062_v0 = vmul.f32 %v9943_v13, %v356_v38  ;;  %v602_v4 = vadd.s32 1, %v10047_v42 }
  0x69   : > { %v272_v6 = vmul.u32 8, %v9976_v46  ;;  %vm601_vm13 = vc.u32 %v10052_v45, %v10046_v41  ;;  %v663_v54 = vsub.s32 32, %v662_v60  ;;  %v656_v50 = vor.u32 8388608, %v655_v58 }
  0x6a   : > { %15050 = vst [vmem:[#allocation11_spill] sm:$0xff] %v10062_v0  ;;  %v10067_v7 = vsub.s32 %v500_v27, %v503_v62  ;;  %v603_v34 = vsel %vm601_vm13, %v602_v4, %v10047_v42  ;;  %v10073_v56 = vmul.f32 %v9943_v13, %v357_v49  ;;  %v10076_v8 = vadd.f32 %v9941_v9, %v311_v24 }
  0x6b   : > { %v604_v55 = vadd.s32 %v603_v34, %v599_v51  ;;  %v10079_v11 = vshrl.u32 %v660_v47, 5  ;;  %v755_v12 = vand.u32 2139095040, %v10062_v0  ;;  %v526_v15 = vsub.s32 4, %v502_v43 }
  0x6c   : > { %15051 = vst [vmem:[#allocation12_spill] sm:$0xff] %v10073_v56  ;;  %v506_v10 = vsub.s32 0, %v10067_v7  ;;  %v665_v16 = vshll.u32 %v14743_v59, %v662_v60  ;;  %v668_v17 = vshll.u32 %v14733_v61, %v662_v60  ;;  %v674_v19 = vshll.u32 %v14737_v3, %v662_v60 }
  0x6d   : > { %v605_v21 = vadd.s32 536870912, %v604_v55  ;;  %v666_v23 = vshrl.u32 %v14733_v61, %v663_v54  ;;  %v669_v27 = vshrl.u32 %v14735_v63, %v663_v54  ;;  %v671_v28 = vshll.u32 %v14735_v63, %v662_v60 }
  0x6e   : > { %v8949_v20 = vmin.u32 %v506_v10, %v10067_v7  ;;  %v672_v29 = vshrl.u32 %v14737_v3, %v663_v54  ;;  %v675_v30 = vshrl.u32 %v14741_v5, %v663_v54  ;;  %v10091_v32 = vshll.u32 %v656_v50, 8 }
  0x6f   : > { %v496_v33 = vadd.s32 %v10019_v52, %v10016_v48  ;;  %v677_v57 = vshll.u32 %v14741_v5, %v662_v60  ;;  %v678_v36 = vshrl.u32 %v14739_v14, %v663_v54  ;;  %v527_v37 = vsel %vm442_vm12, %v526_v15, %v502_v43 }
  0x70   : > { %v508_v35 = vclz %v8949_v20  ;;  %v606_v38 = vshrl.u32 %v605_v21, 30  ;;  %v676_v39 = vor.u32 %v675_v30, %v674_v19  ;;  %v756_v40 = vshrl.u32 %v755_v12, 23 }
  0x71   : > { %v667_v47 = vor.u32 %v666_v23, %v665_v16  ;;  %v670_v48 = vor.u32 %v669_v27, %v668_v17  ;;  %vm683_vm15 = vcmp.lt.s32.totalorder %v10079_v11, 4  ;;  %v664_v58 = vshrl.u32 %v14743_v59, %v663_v54 }
  0x72   : > { %v8950_v44 = vadd.s32 4294967294, %v508_v35  ;;  %v607_v52 = vshll.u32 %v606_v38, 30  ;;  %v673_v60 = vor.u32 %v672_v29, %v671_v28  ;;  %vm680_vm0 = vcmp.lt.s32.totalorder %v10079_v11, 1 }
  0x73   : > { %v679_v43 = vor.u32 %v678_v36, %v677_v57  ;;  %vm682_vm2 = vcmp.lt.s32.totalorder %v10079_v11, 3  ;;  %v689_v22 = vsel %vm683_vm15, %v676_v39, 920167782  ;;  %vm681_vm3 = vcmp.lt.s32.totalorder %v10079_v11, 2 }
  0x74   : > { %vm8951_vm1 = vcmp.lt.s32.totalorder %v8950_v44, 0  ;;  %v10111_v24 = vsub.s32 %v604_v55, %v607_v52  ;;  %v685_v62 = vsel %vm683_vm15, %v673_v60, 2102212464  ;;  %v688_v34 = vsel %vm680_vm0, %v667_v47, %v670_v48 }
  0x75   : > { %v511_v49 = vsel %vm8951_vm1, 0, %v8950_v44  ;;  %v684_v10 = vsel %vm680_vm0, %v664_v58, %v667_v47  ;;  %v690_v55 = vsel %vm682_vm2, %v673_v60, %v689_v22  ;;  %v692_v12 = vsel %vm680_vm0, %v670_v48, %v673_v60 }
  0x76   : > { %v512_v51 = vsub.s32 32, %v511_v49  ;;  %v513_v4 = vshll.u32 %v10067_v7, %v511_v49  ;;  %v516_v54 = vsub.s32 4294967266, %v511_v49  ;;  %v610_v50 = vsub.s32 0, %v10111_v24 }
  0x77   : > { %v686_v7 = vsel %vm682_vm2, %v670_v48, %v685_v62  ;;  %v693_v17 = vsel %vm683_vm15, %v679_v43, 1326507024  ;;  %v691_v20 = vsel %vm681_vm3, %v688_v34, %v690_v55  ;;  %v752_v23 = vand.u32 2147483647, %v10062_v0 }
  0x78   : > { %v514_v15 = vshrl.u32 %v496_v33, %v512_v51  ;;  %v517_v16 = vadd.s32 127, %v516_v54  ;;  %v8953_v19 = vmin.u32 %v610_v50, %v10111_v24  ;;  %v694_v21 = vsel %vm682_vm2, %v676_v39, %v693_v17 }
  0x79   : > { %v695_v29 = vsel %vm681_vm3, %v692_v12, %v694_v21  ;;  %v8960_v30 = vadd.s32 4294967169, %v756_v40  ;;  %v10140_v33 = vsel %vm10101_vm14, 0, %v527_v37  ;;  %v630_v57 = vsub.s32 4, %v606_v38 }
  0x7a   : > { %v515_v27 = vor.u32 %v514_v15, %v513_v4  ;;  %v518_v28 = vshll.u32 %v517_v16, 23  ;;  %v612_v35 = vclz %v8953_v19  ;;  %v687_v36 = vsel %vm681_vm3, %v684_v10, %v686_v7 }
  0x7b   : > { %v10145_v39 = vmul.u32.u64.low %v10091_v32, %v695_v29  ;;  %v10146_v48 = vmul.u32.u64.high %v10091_v32, %v695_v29, %v10145_v39  ;;  %v10149_v58 = vmul.u32.u64.low %v10091_v32, %v691_v20  ;;  %v10150_v60 = vmul.u32.u64.high %v10091_v32, %v691_v20, %v10149_v58 }
  0x7c   : > { %v519_v44 = vor.u32 4788187, %v518_v28  ;;  %v522_v47 = vcvt.s32.f32 %v515_v27  ;;  %v8954_v52 = vadd.s32 4294967294, %v612_v35  ;;  %v762_v40 = vadd.s32 1, %v8960_v30 }
  0x7d   : > { %v533_v43 = vadd.s32 3, %v10140_v33  ;;  %vm546_vm4 = vcmp.lt.s32.totalorder %v9957_v25, 0  ;;  %v759_v11 = vand.u32 8388607, %v752_v23  ;;  %v600_v22 = vadd.s32 %v10046_v41, %v10052_v45 }
  0x7e   : > { %v520_v37 = vand.u32 2147483647, %v519_v44  ;;  %vm8955_vm5 = vcmp.lt.s32.totalorder %v8954_v52, 0  ;;  %v631_v49 = vsel %vm546_vm4, %v630_v57, %v606_v38  ;;  %vm763_vm6 = vcmp.gt.s32.totalorder %v762_v40, 0 }
  0x7f   : > { %v615_v51 = vsel %vm8955_vm5, 0, %v8954_v52  ;;  %v703_v4 = vmul.u32 %v10091_v32, %v687_v36  ;;  %vm705_vm7 = vc.u32 %v10146_v48, %v10149_v58  ;;  %v706_v10 = vadd.s32 1, %v10150_v60 }
  0x80   : > { %v523_v62 = vmul.f32 %v522_v47, %v520_v37  ;;  %v616_v54 = vsub.s32 32, %v615_v51  ;;  %v617_v34 = vshll.u32 %v10111_v24, %v615_v51  ;;  %v620_v50 = vsub.s32 4294967266, %v615_v51 }
  0x81   : > { %v10166_v41 = vand.u32 3, %v533_v43  ;;  %vm10170_vm8 = vcmp.le.f32.partialorder %v544_v31, 0.7853982  ;;  %v764_v38 = vsel %vm763_vm6, %v762_v40, 0  ;;  %v707_v24 = vsel %vm705_vm7, %v706_v10, %v10150_v60 }
  0x82   : > { %v524_v55 = vxor.u32 2147483648, %v523_v62  ;;  %v618_v32 = vshrl.u32 %v600_v22, %v616_v54  ;;  %v621_v12 = vadd.s32 127, %v620_v50  ;;  %v10176_v15 = vsel %vm10170_vm8, 0, %v631_v49 }
  0x83   : > { %v708_v7 = vadd.s32 %v707_v24, %v703_v4  ;;  %v766_v17 = vand.u32 31, %v764_v38  ;;  %v859_v19 = vand.u32 2139095040, %v10073_v56  ;;  %v760_v27 = vor.u32 8388608, %v759_v11 }
  0x84   : > { %v525_v16 = vsel %vm442_vm12, %v524_v55, %v523_v62  ;;  %v619_v20 = vor.u32 %v618_v32, %v617_v34  ;;  %v622_v21 = vshll.u32 %v621_v12, 23  ;;  %v856_v30 = vand.u32 2147483647, %v10073_v56 }
  0x85   : > { %v528_v31 = vsel %vm10101_vm14, %v9948_v18, %v525_v16  ;;  %v709_v28 = vadd.s32 536870912, %v708_v7  ;;  %v767_v29 = vsub.s32 32, %v766_v17  ;;  %v637_v36 = vadd.s32 3, %v10176_v15 }
  0x86   : > { %9506 = vcosq.f32 %v528_v31  ;;  %v623_v35 = vor.u32 4788187, %v622_v21  ;;  %v626_v57 = vcvt.s32.f32 %v619_v20  ;;  %vm539_vm9 = vcmp.eq.s32.totalorder %v10166_v41, 2 }
  0x87   : > { %9508 = vsinq.f32 %v528_v31  ;;  %v10188_v44 = vshrl.u32 %v709_v28, 30  ;;  %v769_v42 = vshll.u32 %v14743_v59, %v766_v17  ;;  %v772_v47 = vshll.u32 %v14733_v61, %v766_v17 }
  0x88   : > { %v860_v39 = vshrl.u32 %v859_v19, 23  ;;  %vm536_vm10 = vcmp.eq.s32.totalorder %v10166_v41, 0  ;;  %v624_v52 = vand.u32 2147483647, %v623_v35  ;;  %v770_v60 = vshrl.u32 %v14733_v61, %v767_v29 }
  0x89   : > { %v773_v40 = vshrl.u32 %v14735_v63, %v767_v29  ;;  %v778_v37 = vshll.u32 %v14737_v3, %v766_v17  ;;  %vm535_vm11 = vcmp.lt.s32.totalorder %v10166_v41, 2  ;;  %v711_v43 = vshll.u32 %v10188_v44, 30 }
  0x8a   : > { %v10198_v11 = vshrl.u32 %v764_v38, 5  ;;  %v775_v22 = vshll.u32 %v14735_v63, %v766_v17  ;;  %v776_v49 = vshrl.u32 %v14737_v3, %v767_v29  ;;  %vm532_vm12 = vweird.f32 %v9948_v18 }
  0x8b   : > { %v627_v62 = vmul.f32 %v626_v57, %v624_v52  ;;  %v10203_v51 = vand.u32 3, %v637_v36  ;;  %v779_v4 = vshrl.u32 %v14741_v5, %v767_v29  ;;  %v10206_v54 = vshll.u32 %v760_v27, 8 }
  0x8c   : > { %v10208_v34 = vsub.s32 %v708_v7, %v711_v43  ;;  %v781_v50 = vshll.u32 %v14741_v5, %v766_v17  ;;  %v782_v10 = vshrl.u32 %v14739_v14, %v767_v29  ;;  %v8964_v55 = vadd.s32 4294967169, %v860_v39 }
  0x8d   : > { %v628_v38 = vxor.u32 2147483648, %v627_v62  ;;  %v771_v32 = vor.u32 %v770_v60, %v769_v42  ;;  %v774_v12 = vor.u32 %v773_v40, %v772_v47  ;;  %v780_v24 = vor.u32 %v779_v4, %v778_v37 }
  0x8e   : > { %v714_v16 = vsub.s32 0, %v10208_v34  ;;  %v777_v19 = vor.u32 %v776_v49, %v775_v22  ;;  %vm784_vm13 = vcmp.lt.s32.totalorder %v10198_v11, 1  ;;  %vm787_vm14 = vcmp.lt.s32.totalorder %v10198_v11, 4 }
  0x8f   : > { %v629_v7 = vsel %vm546_vm4, %v628_v38, %v627_v62  ;;  %v768_v17 = vshrl.u32 %v14743_v59, %v767_v29  ;;  %vm785_vm15 = vcmp.lt.s32.totalorder %v10198_v11, 2  ;;  %vm786_vm0 = vcmp.lt.s32.totalorder %v10198_v11, 3 }
  0x90   : > { %v10220_v31 = vpop.eup %9506  ;;  %v632_v20 = vsel %vm10170_vm8, %v9957_v25, %v629_v7  ;;  %vm650_vm1 = vcmp.lt.s32.totalorder %v9960_v26, 0  ;;  %v8957_v21 = vmin.u32 %v714_v16, %v10208_v34  ;;  %v783_v27 = vor.u32 %v782_v10, %v781_v50 }
  0x91   : > { %v789_v28 = vsel %vm787_vm14, %v777_v19, 2102212464  ;;  %v10230_v29 = vpop.eup %9508  ;;  %v14727_v35 = vxor.u32 2147483648, %v10220_v31  ;;  %9510 = vcosq.f32 %v632_v20  ;;  %v792_v57 = vsel %vm784_vm13, %v771_v32, %v774_v12 }
  0x92   : > { %v793_v45 = vsel %vm787_vm14, %v780_v24, 920167782  ;;  %v14728_v36 = vxor.u32 2147483648, %v10230_v29  ;;  %9512 = vsinq.f32 %v632_v20  ;;  %v716_v42 = vclz %v8957_v21 }
  0x93   : > { %v734_v47 = vsub.s32 4, %v10188_v44  ;;  %v541_v39 = vsel %vm539_vm9, %v14727_v35, %v10230_v29  ;;  %vm10246_vm2 = vcmp.le.f32.partialorder %v648_v53, 0.7853982  ;;  %v788_v60 = vsel %vm784_vm13, %v768_v17, %v771_v32 }
  0x94   : > { %v790_v40 = vsel %vm786_vm0, %v774_v12, %v789_v28  ;;  %v794_v37 = vsel %vm786_vm0, %v777_v19, %v793_v45  ;;  %v538_v43 = vsel %vm536_vm10, %v10220_v31, %v14728_v36  ;;  %v8958_v53 = vadd.s32 4294967294, %v716_v42 }
  0x95   : > { %v795_v22 = vsel %vm785_vm15, %v792_v57, %v794_v37  ;;  %v796_v49 = vsel %vm784_vm13, %v774_v12, %v777_v19  ;;  %v542_v62 = vsel %vm535_vm11, %v538_v43, %v541_v39  ;;  %vm639_vm3 = vcmp.lt.s32.totalorder %v10203_v51, 2 }
  0x96   : > { %v797_v4 = vsel %vm787_vm14, %v783_v27, 1326507024  ;;  %v10271_v50 = vmul.u32.u64.low %v10206_v54, %v795_v22  ;;  %v10272_v10 = vmul.u32.u64.high %v10206_v54, %v795_v22, %v10271_v50  ;;  %v543_v38 = vsel %vm532_vm12, nan, %v542_v62 }
  0x97   : > { %vm636_vm4 = vweird.f32 %v9957_v25  ;;  %v704_v32 = vadd.s32 %v10149_v58, %v10146_v48  ;;  %vm8959_vm5 = vcmp.lt.s32.totalorder %v8958_v53, 0  ;;  %v798_v41 = vsel %vm786_vm0, %v780_v24, %v797_v4  ;;  %4600 = vst [vmem:[%s10284_s26] sm:$0xff] %v543_v38 }
  0x98   : > { %v719_v12 = vsel %vm8959_vm5, 0, %v8958_v53  ;;  %v799_v16 = vsel %vm785_vm15, %v796_v49, %v798_v41  ;;  %v863_v19 = vand.u32 8388607, %v856_v30  ;;  %v866_v7 = vadd.s32 1, %v8964_v55 }
  0x99   : > { %v720_v17 = vsub.s32 32, %v719_v12  ;;  %v721_v48 = vshll.u32 %v10208_v34, %v719_v12  ;;  %v724_v58 = vsub.s32 4294967266, %v719_v12  ;;  %v791_v24 = vsel %vm785_vm15, %v788_v60, %v790_v40 }
  0x9a   : > { %v735_v20 = vsel %vm650_vm1, %v734_v47, %v10188_v44  ;;  %v10298_v21 = vmul.u32.u64.low %v10206_v54, %v799_v16  ;;  %v10299_v27 = vmul.u32.u64.high %v10206_v54, %v799_v16, %v10298_v21  ;;  %vm867_vm6 = vcmp.gt.s32.totalorder %v866_v7, 0 }
  0x9b   : > { %v722_v28 = vshrl.u32 %v704_v32, %v720_v17  ;;  %v725_v57 = vadd.s32 127, %v724_v58  ;;  %v810_v55 = vadd.s32 1, %v10272_v10  ;;  %v868_v45 = vsel %vm867_vm6, %v866_v7, 0  ;;  %v10302_v42 = vpop.eup %9510 }
  0x9c   : > { %vm640_vm7 = vcmp.eq.s32.totalorder %v10203_v51, 0  ;;  %vm643_vm8 = vcmp.eq.s32.totalorder %v10203_v51, 2  ;;  %v807_v11 = vmul.u32 %v10206_v54, %v791_v24  ;;  %v870_v34 = vand.u32 31, %v868_v45  ;;  %v10307_v44 = vpop.eup %9512 }
  0x9d   : > { %v14723_v47 = vxor.u32 2147483648, %v10302_v42  ;;  %v723_v39 = vor.u32 %v722_v28, %v721_v48  ;;  %v726_v60 = vshll.u32 %v725_v57, 23  ;;  %v10312_v40 = vsel %vm10246_vm2, 0, %v735_v20 }
  0x9e   : > { %v14724_v37 = vxor.u32 2147483648, %v10307_v44  ;;  %vm809_vm9 = vc.u32 %v10299_v27, %v10271_v50  ;;  %v864_v43 = vor.u32 8388608, %v863_v19  ;;  %v871_v53 = vsub.s32 32, %v870_v34 }
  0x9f   : > { %v645_v54 = vsel %vm643_vm8, %v14723_v47, %v10307_v44  ;;  %v727_v22 = vor.u32 4788187, %v726_v60  ;;  %v730_v49 = vcvt.s32.f32 %v723_v39  ;;  %v811_v62 = vsel %vm809_vm9, %v810_v55, %v10272_v10 }
  0xa0   : > { %v642_v4 = vsel %vm640_vm7, %v10302_v42, %v14724_v37  ;;  %v741_v38 = vadd.s32 3, %v10312_v40  ;;  %v812_v32 = vadd.s32 %v811_v62, %v807_v11  ;;  %v873_v41 = vshll.u32 %v14743_v59, %v870_v34 }
  0xa1   : > { %v646_v12 = vsel %vm639_vm3, %v642_v4, %v645_v54  ;;  %v728_v16 = vand.u32 2147483647, %v727_v22  ;;  %v874_v19 = vshrl.u32 %v14733_v61, %v871_v53  ;;  %v876_v7 = vshll.u32 %v14733_v61, %v870_v34 }
  0xa2   : > { %v647_v10 = vsel %vm636_vm4, nan, %v646_v12  ;;  %v813_v17 = vadd.s32 536870912, %v812_v32  ;;  %v877_v48 = vshrl.u32 %v14735_v63, %v871_v53  ;;  %v879_v58 = vshll.u32 %v14735_v63, %v870_v34 }
  0xa3   : > { %4601 = vst [vmem:[%s10284_s26 + $0x8] sm:$0xff] %v647_v10  ;;  %v731_v24 = vmul.f32 %v730_v49, %v728_v16  ;;  %v869_v20 = vshrl.u32 %v868_v45, 5  ;;  %v880_v21 = vshrl.u32 %v14737_v3, %v871_v53  ;;  %v882_v51 = vshll.u32 %v14737_v3, %v870_v34 }
  0xa4   : > { %v10339_v28 = vand.u32 3, %v741_v38  ;;  %v814_v57 = vshrl.u32 %v813_v17, 30  ;;  %v883_v55 = vshrl.u32 %v14741_v5, %v871_v53  ;;  %v885_v11 = vshll.u32 %v14741_v5, %v870_v34 }
  0xa5   : > { %v732_v39 = vxor.u32 2147483648, %v731_v24  ;;  %v872_v60 = vshrl.u32 %v14743_v59, %v871_v53  ;;  %v886_v54 = vshrl.u32 %v14739_v14, %v871_v53  ;;  %v10345_v22 = vshll.u32 %v864_v43, 8 }
  0xa6   : > { %v815_v49 = vshll.u32 %v814_v57, 30  ;;  %v875_v45 = vor.u32 %v874_v19, %v873_v41  ;;  %v878_v62 = vor.u32 %v877_v48, %v876_v7  ;;  %v881_v4 = vor.u32 %v880_v21, %v879_v58 }
  0xa7   : > { %v733_v38 = vsel %vm650_vm1, %v732_v39, %v731_v24  ;;  %v884_v12 = vor.u32 %v883_v55, %v882_v51  ;;  %v887_v16 = vor.u32 %v886_v54, %v885_v11  ;;  %vm888_vm10 = vcmp.lt.s32.totalorder %v869_v20, 1 }
  0xa8   : > { %v736_v34 = vsel %vm10246_vm2, %v9960_v26, %v733_v38  ;;  %v10352_v10 = vsub.s32 %v812_v32, %v815_v49  ;;  %vm891_vm11 = vcmp.lt.s32.totalorder %v869_v20, 4  ;;  %v10356_v43 = vmul.f32 %v9943_v13, %v10076_v8 }
  0xa9   : > { %9514 = vcosq.f32 %v736_v34  ;;  %vm889_vm13 = vcmp.lt.s32.totalorder %v869_v20, 2  ;;  %vm890_vm14 = vcmp.lt.s32.totalorder %v869_v20, 3  ;;  %v893_v53 = vsel %vm891_vm11, %v881_v4, 2102212464 }
  0xaa   : > { %15058 = vst [vmem:[#allocation13_spill] sm:$0xff] %v10356_v43  ;;  %9516 = vsinq.f32 %v736_v34  ;;  %v818_v41 = vsub.s32 0, %v10352_v10  ;;  %v892_v19 = vsel %vm888_vm10, %v872_v60, %v875_v45  ;;  %v896_v7 = vsel %vm888_vm10, %v875_v45, %v878_v62 }
  0xab   : > { %v894_v17 = vsel %vm890_vm14, %v878_v62, %v893_v53  ;;  %v897_v48 = vsel %vm891_vm11, %v884_v12, 920167782  ;;  %v900_v52 = vsel %vm888_vm10, %v878_v62, %v881_v4  ;;  %v901_v58 = vsel %vm891_vm11, %v887_v16, 1326507024 }
  0xac   : > { %v8961_v32 = vmin.u32 %v818_v41, %v10352_v10  ;;  %v838_v24 = vsub.s32 4, %v814_v57  ;;  %v898_v21 = vsel %vm890_vm14, %v881_v4, %v897_v48  ;;  %v902_v51 = vsel %vm890_vm14, %v884_v12, %v901_v58 }
  0xad   : > { %v899_v8 = vsel %vm889_vm13, %v896_v7, %v898_v21  ;;  %v903_v55 = vsel %vm889_vm13, %v900_v52, %v902_v51  ;;  %v312_v11 = vcvt.s32.f32 %v272_v6  ;;  %v191_v39 = vadd.s32 56, %v9928_v1 }
  0xae   : > { %vm740_vm15 = vweird.f32 %v9960_v26  ;;  %vm10368_vm0 = vcmp.le.f32.partialorder %v752_v23, 0.7853982  ;;  %vm754_vm1 = vcmp.lt.s32.totalorder %v10062_v0, 0  ;;  %v820_v54 = vclz %v8961_v32 }
  0xaf   : > { %v895_v49 = vsel %vm889_vm13, %v892_v19, %v894_v17  ;;  %v10375_v45 = vmul.u32.u64.low %v10345_v22, %v903_v55  ;;  %v10376_v62 = vmul.u32.u64.high %v10345_v22, %v903_v55, %v10375_v45  ;;  %vm743_vm2 = vcmp.lt.s32.totalorder %v10339_v28, 2 }
  0xb0   : > { %v10379_v46 = vmul.u32.u64.low %v10345_v22, %v899_v8  ;;  %v10380_v6 = vmul.u32.u64.high %v10345_v22, %v899_v8, %v10379_v46  ;;  %v8962_v4 = vadd.s32 4294967294, %v820_v54  ;;  %v839_v23 = vsel %vm754_vm1, %v838_v24, %v814_v57 }
  0xb1   : > { %v963_v38 = vand.u32 2139095040, %v10356_v43  ;;  %vm744_vm3 = vcmp.eq.s32.totalorder %v10339_v28, 0  ;;  %vm747_vm5 = vcmp.eq.s32.totalorder %v10339_v28, 2  ;;  %v960_v20 = vand.u32 2147483647, %v10356_v43 }
  0xb2   : > { %v359_v12 = vadd.f32 %v9941_v9, %v312_v11  ;;  %v808_v16 = vadd.s32 %v10271_v50, %v10299_v27  ;;  %vm8963_vm6 = vcmp.lt.s32.totalorder %v8962_v4, 0  ;;  %v911_v34 = vmul.u32 %v10345_v22, %v895_v49 }
  0xb3   : > { %v964_v53 = vshrl.u32 %v963_v38, 23  ;;  %v10393_v41 = vpop.eup %9514  ;;  %v823_v57 = vsel %vm8963_vm6, 0, %v8962_v4  ;;  %v10397_v19 = vsel %vm10368_vm0, 0, %v839_v23  ;;  %vm913_vm7 = vc.u32 %v10376_v62, %v10379_v46 }
  0xb4   : > { %v914_v7 = vadd.s32 1, %v10380_v6  ;;  %v10401_v17 = vpop.eup %9516  ;;  %v14721_v9 = vxor.u32 2147483648, %v10393_v41  ;;  %v824_v50 = vsub.s32 32, %v823_v57  ;;  %v825_v27 = vshll.u32 %v10352_v10, %v823_v57 }
  0xb5   : > { %v828_v22 = vsub.s32 4294967266, %v823_v57  ;;  %v14722_v48 = vxor.u32 2147483648, %v10401_v17  ;;  %v8968_v58 = vadd.s32 4294967169, %v964_v53  ;;  %v967_v32 = vand.u32 8388607, %v960_v20 }
  0xb6   : > { %v915_v52 = vsel %vm913_vm7, %v914_v7, %v10380_v6  ;;  %v749_v24 = vsel %vm747_vm5, %v14721_v9, %v10401_v17  ;;  %v826_v21 = vshrl.u32 %v808_v16, %v824_v50  ;;  %v845_v55 = vadd.s32 3, %v10397_v19 }
  0xb7   : > { %v829_v51 = vadd.s32 127, %v828_v22  ;;  %v916_v8 = vadd.s32 %v915_v52, %v911_v34  ;;  %v746_v10 = vsel %vm744_vm3, %v10393_v41, %v14722_v48  ;;  %v970_v11 = vadd.s32 1, %v8968_v58 }
  0xb8   : > { %v10421_v54 = vadd.s32 %v9930_v2, %v191_v39  ;;  %v750_v49 = vsel %vm743_vm2, %v746_v10, %v749_v24  ;;  %v827_v45 = vor.u32 %v826_v21, %v825_v27  ;;  %v968_v38 = vor.u32 8388608, %v967_v32 }
  0xb9   : > { %v830_v6 = vshll.u32 %v829_v51, 23  ;;  %v917_v4 = vadd.s32 536870912, %v916_v8  ;;  %v751_v23 = vsel %vm740_vm15, nan, %v750_v49  ;;  %vm971_vm8 = vcmp.gt.s32.totalorder %v970_v11, 0 }
  0xba   : > { %v10428_v16 = vmul.f32 %v9943_v13, %v359_v12  ;;  %4602 = vst [vmem:[%s10284_s26 + $0x10] sm:$0xff] %v751_v23  ;;  %v834_v53 = vcvt.s32.f32 %v827_v45  ;;  %v972_v39 = vsel %vm971_vm8, %v970_v11, 0  ;;  %v273_v28 = vmul.u32 8, %v10421_v54 }
  0xbb   : > { %v831_v34 = vor.u32 4788187, %v830_v6  ;;  %v918_v57 = vshrl.u32 %v917_v4, 30  ;;  %v974_v7 = vand.u32 31, %v972_v39  ;;  %v10432_v27 = vand.u32 3, %v845_v55 }
  0xbc   : > { %15061 = vst [vmem:[#allocation14_spill] sm:$0xff] %v10428_v16  ;;  %vm858_vm9 = vcmp.lt.s32.totalorder %v10073_v56, 0  ;;  %v912_v22 = vadd.s32 %v10379_v46, %v10376_v62  ;;  %v10436_v32 = vshll.u32 %v968_v38, 8  ;;  %v1064_v13 = vand.u32 2147483647, %v10428_v16 }
  0xbd   : > { %v832_v50 = vand.u32 2147483647, %v831_v34  ;;  %v919_v52 = vshll.u32 %v918_v57, 30  ;;  %v975_v58 = vsub.s32 32, %v974_v7  ;;  %v1067_v12 = vand.u32 2139095040, %v10428_v16 }
  0xbe   : > { %v977_v51 = vshll.u32 %v14743_v59, %v974_v7  ;;  %v980_v10 = vshll.u32 %v14733_v61, %v974_v7  ;;  %v983_v62 = vshll.u32 %v14735_v63, %v974_v7  ;;  %v986_v46 = vshll.u32 %v14737_v3, %v974_v7 }
  0xbf   : > { %v835_v24 = vmul.f32 %v834_v53, %v832_v50  ;;  %v10440_v21 = vsub.s32 %v916_v8, %v919_v52  ;;  %v978_v55 = vshrl.u32 %v14733_v61, %v975_v58  ;;  %v981_v11 = vshrl.u32 %v14735_v63, %v975_v58 }
  0xc0   : > { %v973_v6 = vshrl.u32 %v972_v39, 5  ;;  %v984_v4 = vshrl.u32 %v14737_v3, %v975_v58  ;;  %v942_v8 = vsub.s32 4, %v918_v57  ;;  %v976_v23 = vshrl.u32 %v14743_v59, %v975_v58 }
  0xc1   : > { %v836_v49 = vxor.u32 2147483648, %v835_v24  ;;  %v922_v45 = vsub.s32 0, %v10440_v21  ;;  %v987_v38 = vshrl.u32 %v14741_v5, %v975_v58  ;;  %v989_v34 = vshll.u32 %v14741_v5, %v974_v7 }
  0xc2   : > { %v979_v52 = vor.u32 %v978_v55, %v977_v51  ;;  %v982_v9 = vor.u32 %v981_v11, %v980_v10  ;;  %vm10461_vm10 = vcmp.le.f32.partialorder %v856_v30, 0.7853982  ;;  %v985_v47 = vor.u32 %v984_v4, %v983_v62 }
  0xc3   : > { %v837_v53 = vsel %vm754_vm1, %v836_v49, %v835_v24  ;;  %v8965_v50 = vmin.u32 %v922_v45, %v10440_v21  ;;  %v988_v37 = vor.u32 %v987_v38, %v986_v46  ;;  %v990_v7 = vshrl.u32 %v14739_v14, %v975_v58 }
  0xc4   : > { %v840_v39 = vsel %vm10368_vm0, %v10062_v0, %v837_v53  ;;  %vm992_vm11 = vcmp.lt.s32.totalorder %v973_v6, 1  ;;  %v1068_v49 = vshrl.u32 %v1067_v12, 23  ;;  %v943_v51 = vsel %vm858_vm9, %v942_v8, %v918_v57 }
  0xc5   : > { %9518 = vcosq.f32 %v840_v39  ;;  %v924_v24 = vclz %v8965_v50  ;;  %v991_v60 = vor.u32 %v990_v7, %v989_v34  ;;  %vm993_vm13 = vcmp.lt.s32.totalorder %v973_v6, 2 }
  0xc6   : > { %9520 = vsinq.f32 %v840_v39  ;;  %vm994_vm14 = vcmp.lt.s32.totalorder %v973_v6, 3  ;;  %vm995_vm0 = vcmp.lt.s32.totalorder %v973_v6, 4  ;;  %v996_v30 = vsel %vm992_vm11, %v976_v23, %v979_v52 }
  0xc7   : > { %v8966_v10 = vadd.s32 4294967294, %v924_v24  ;;  %v997_v55 = vsel %vm995_vm0, %v985_v47, 2102212464  ;;  %v1000_v11 = vsel %vm992_vm11, %v979_v52, %v982_v9  ;;  %v1001_v62 = vsel %vm995_vm0, %v988_v37, 920167782 }
  0xc8   : > { %v1004_v46 = vsel %vm992_vm11, %v982_v9, %v985_v47  ;;  %v998_v58 = vsel %vm994_vm14, %v982_v9, %v997_v55  ;;  %v1002_v45 = vsel %vm994_vm14, %v985_v47, %v1001_v62  ;;  %v1005_v4 = vsel %vm995_vm0, %v991_v60, 1326507024 }
  0xc9   : > { %vm8967_vm1 = vcmp.lt.s32.totalorder %v8966_v10, 0  ;;  %vm844_vm2 = vweird.f32 %v10062_v0  ;;  %v999_v38 = vsel %vm993_vm13, %v996_v30, %v998_v58  ;;  %v1003_v57 = vsel %vm993_vm13, %v1000_v11, %v1002_v45 }
  0xca   : > { %v927_v12 = vsel %vm8967_vm1, 0, %v8966_v10  ;;  %v1006_v8 = vsel %vm994_vm14, %v988_v37, %v1005_v4  ;;  %v10478_v47 = vmul.u32.u64.low %v10436_v32, %v1003_v57  ;;  %v10479_v9 = vmul.u32.u64.high %v10436_v32, %v1003_v57, %v10478_v47 }
  0xcb   : > { %v928_v34 = vsub.s32 32, %v927_v12  ;;  %v929_v53 = vshll.u32 %v10440_v21, %v927_v12  ;;  %v932_v23 = vsub.s32 4294967266, %v927_v12  ;;  %v1007_v50 = vsel %vm993_vm13, %v1004_v46, %v1006_v8 }
  0xcc   : > { %v10474_v52 = vmul.u32.u64.low %v10436_v32, %v1007_v50  ;;  %v10475_v39 = vmul.u32.u64.high %v10436_v32, %v1007_v50, %v10474_v52  ;;  %v10484_v37 = vsel %vm10461_vm10, 0, %v943_v51  ;;  %v8972_v60 = vadd.s32 4294967169, %v1068_v49 }
  0xcd   : > { %v930_v7 = vshrl.u32 %v912_v22, %v928_v34  ;;  %v933_v24 = vadd.s32 127, %v932_v23  ;;  %vm847_vm3 = vcmp.lt.s32.totalorder %v10432_v27, 2  ;;  %vm848_vm5 = vcmp.eq.s32.totalorder %v10432_v27, 0 }
  0xce   : > { %vm851_vm6 = vcmp.eq.s32.totalorder %v10432_v27, 2  ;;  %v10491_v21 = vand.u32 8388607, %v1064_v13  ;;  %v1015_v30 = vmul.u32 %v10436_v32, %v999_v38  ;;  %v1074_v55 = vadd.s32 1, %v8972_v60  ;;  %v10533_v27 = vld [vmem:[%s14716_s1] ss:$0 sm:$0xff] }
  0xcf   : > { %v10493_v6 = vpop.eup %9518  ;;  %v931_v10 = vor.u32 %v930_v7, %v929_v53  ;;  %v934_v22 = vshll.u32 %v933_v24, 23  ;;  %v949_v11 = vadd.s32 3, %v10484_v37  ;;  %vm1017_vm7 = vc.u32 %v10475_v39, %v10478_v47 }
  0xd0   : > { %15064 = vst [vmem:[#allocation15_spill] sm:$0xff] %v10493_v6  ;;  %v10496_v51 = vpop.eup %9520  ;;  %v14725_v49 = vxor.u32 2147483648, %v10493_v6  ;;  %v1018_v62 = vadd.s32 1, %v10479_v9  ;;  %vm1075_vm8 = vcmp.gt.s32.totalorder %v1074_v55, 0  ;;  %v313_v38 = vcvt.s32.f32 %v273_v28 }
  0xd1   : > { %15065 = vst [vmem:[#allocation16_spill] sm:$0xff] %v10496_v51  ;;  %v14726_v46 = vxor.u32 2147483648, %v10496_v51  ;;  %v935_v58 = vor.u32 4788187, %v934_v22  ;;  %v938_v45 = vcvt.s32.f32 %v931_v10  ;;  %v1076_v12 = vsel %vm1075_vm8, %v1074_v55, 0 }
  0xd2   : > { %v853_v32 = vsel %vm851_vm6, %v14725_v49, %v10496_v51  ;;  %v1019_v4 = vsel %vm1017_vm7, %v1018_v62, %v10479_v9  ;;  %v192_v53 = vadd.s32 64, %v9928_v1  ;;  %v10520_v50 = vand.u32 3, %v949_v11 }
  0xd3   : > { %v850_v57 = vsel %vm848_vm5, %v10493_v6, %v14726_v46  ;;  %v936_v8 = vand.u32 2147483647, %v935_v58  ;;  %v1020_v34 = vadd.s32 %v1019_v4, %v1015_v30  ;;  %v1078_v52 = vand.u32 31, %v1076_v12 }
  0xd4   : > { %v854_v23 = vsel %vm847_vm3, %v850_v57, %v853_v32  ;;  %v10523_v9 = vadd.s32 72, %v9928_v1  ;;  %v1072_v24 = vor.u32 8388608, %v10491_v21  ;;  %v1077_v60 = vshrl.u32 %v1076_v12, 5 }
  0xd5   : > { %v855_v54 = vsel %vm844_vm2, nan, %v854_v23  ;;  %v939_v28 = vmul.f32 %v938_v45, %v936_v8  ;;  %v1021_v7 = vadd.s32 536870912, %v1020_v34  ;;  %v1079_v10 = vsub.s32 32, %v1078_v52 }
  0xd6   : > { %4603 = vst [vmem:[%s10284_s26 + $0x18] sm:$0xff] %v855_v54  ;;  %v1081_v22 = vshll.u32 %v14743_v59, %v1078_v52  ;;  %v360_v30 = vadd.f32 %v10533_v27, %v313_v38  ;;  %v1084_v62 = vshll.u32 %v14733_v61, %v1078_v52  ;;  %v1090_v58 = vshll.u32 %v14737_v3, %v1078_v52 }
  0xd7   : > { %v940_v55 = vxor.u32 2147483648, %v939_v28  ;;  %v1022_v11 = vshrl.u32 %v1021_v7, 30  ;;  %v1082_v21 = vshrl.u32 %v14733_v61, %v1079_v10  ;;  %v1085_v45 = vshrl.u32 %v14735_v63, %v1079_v10 }
  0xd8   : > { %v1087_v32 = vshll.u32 %v14735_v63, %v1078_v52  ;;  %v1088_v4 = vshrl.u32 %v14737_v3, %v1079_v10  ;;  %v1091_v38 = vshrl.u32 %v14741_v5, %v1079_v10  ;;  %v234_v8 = vadd.s32 %v9930_v2, %v192_v53 }
  0xd9   : > { %v941_v12 = vsel %vm858_vm9, %v940_v55, %v939_v28  ;;  %v1023_v57 = vshll.u32 %v1022_v11, 30  ;;  %v1080_v54 = vshrl.u32 %v14743_v59, %v1079_v10  ;;  %v1083_v7 = vor.u32 %v1082_v21, %v1081_v22 }
  0xda   : > { %v944_v23 = vsel %vm10461_vm10, %v10073_v56, %v941_v12  ;;  %v1093_v49 = vshll.u32 %v14741_v5, %v1078_v52  ;;  %v1086_v35 = vor.u32 %v1085_v45, %v1084_v62  ;;  %v1092_v36 = vor.u32 %v1091_v38, %v1090_v58  ;;  %v10577_v12 = vld [vmem:[#allocation2] ss:$0 sm:$0xff] }
  0xdb   : > { %9522 = vcosq.f32 %v944_v23  ;;  %v10551_v46 = vsub.s32 %v1020_v34, %v1023_v57  ;;  %vm962_vm9 = vcmp.lt.s32.totalorder %v10356_v43, 0  ;;  %v1089_v28 = vor.u32 %v1088_v4, %v1087_v32 }
  0xdc   : > { %9524 = vsinq.f32 %v944_v23  ;;  %v1094_v53 = vshrl.u32 %v14739_v14, %v1079_v10  ;;  %vm1096_vm11 = vcmp.lt.s32.totalorder %v1077_v60, 1  ;;  %vm1098_vm10 = vcmp.lt.s32.totalorder %v1077_v60, 3 }
  0xdd   : > { %v1026_v48 = vsub.s32 0, %v10551_v46  ;;  %vm1099_vm13 = vcmp.lt.s32.totalorder %v1077_v60, 4  ;;  %v10556_v55 = vshll.u32 %v1072_v24, 8  ;;  %vm1097_vm14 = vcmp.lt.s32.totalorder %v1077_v60, 2 }
  0xde   : > { %v1095_v22 = vor.u32 %v1094_v53, %v1093_v49  ;;  %v1100_v34 = vsel %vm1096_vm11, %v1080_v54, %v1083_v7  ;;  %v1101_v52 = vsel %vm1099_vm13, %v1089_v28, 2102212464  ;;  %vm951_vm0 = vcmp.lt.s32.totalorder %v10520_v50, 2 }
  0xdf   : > { %vm10563_vm1 = vcmp.le.f32.partialorder %v960_v20, 0.7853982  ;;  %v8969_v10 = vmin.u32 %v1026_v48, %v10551_v46  ;;  %v1102_v58 = vsel %vm1098_vm10, %v1086_v35, %v1101_v52  ;;  %v1104_v24 = vsel %vm1096_vm11, %v1083_v7, %v1086_v35 }
  0xe0   : > { %v1105_v49 = vsel %vm1099_vm13, %v1092_v36, 920167782  ;;  %vm14798_vm3 = vweird.f32 %v10073_v56  ;;  %vm952_vm5 = vcmp.eq.s32.totalorder %v10520_v50, 0  ;;  %v1108_v45 = vsel %vm1096_vm11, %v1086_v35, %v1089_v28 }
  0xe1   : > { %v1106_v21 = vsel %vm1098_vm10, %v1089_v28, %v1105_v49  ;;  %v1109_v20 = vsel %vm1099_vm13, %v1095_v22, 1326507024  ;;  %vm955_vm6 = vcmp.eq.s32.totalorder %v10520_v50, 2  ;;  %v1028_v32 = vclz %v8969_v10 }
  0xe2   : > { %v1046_v4 = vsub.s32 4, %v1022_v11  ;;  %v10580_v57 = vmul.f32 %v10577_v12, %v360_v30  ;;  %v1103_v38 = vsel %vm1097_vm14, %v1100_v34, %v1102_v58  ;;  %v1107_v23 = vsel %vm1097_vm14, %v1104_v24, %v1106_v21 }
  0xe3   : > { %v1110_v54 = vsel %vm1098_vm10, %v1092_v36, %v1109_v20  ;;  %v274_v7 = vmul.u32 8, %v234_v8  ;;  %v8970_v53 = vadd.s32 4294967294, %v1028_v32  ;;  %v1016_v22 = vadd.s32 %v10478_v47, %v10475_v39 }
  0xe4   : > { %15068 = vst [vmem:[#allocation17_spill] sm:$0xff] %v10580_v57  ;;  %v1111_v35 = vsel %vm1097_vm14, %v1108_v45, %v1110_v54  ;;  %v10587_v28 = vmul.u32.u64.low %v10556_v55, %v1107_v23  ;;  %v10588_v48 = vmul.u32.u64.high %v10556_v55, %v1107_v23, %v10587_v28  ;;  %v235_v34 = vadd.s32 %v9930_v2, %v10523_v9 }
  0xe5   : > { %v10593_v30 = vmul.u32.u64.low %v10556_v55, %v1111_v35  ;;  %v10594_v52 = vmul.u32.u64.high %v10556_v55, %v1111_v35, %v10593_v30  ;;  %v10598_v10 = vpop.eup %9522  ;;  %vm8971_vm7 = vcmp.lt.s32.totalorder %v8970_v53, 0  ;;  %v1047_v36 = vsel %vm962_vm9, %v1046_v4, %v1022_v11 }
  0xe6   : > { %15069 = vst [vmem:[#allocation18_spill] sm:$0xff] %v10598_v10  ;;  %v1119_v60 = vmul.u32 %v10556_v55, %v1103_v38  ;;  %v1171_v8 = vand.u32 2139095040, %v10580_v57  ;;  %v10604_v58 = vpop.eup %9524  ;;  %v14729_v39 = vxor.u32 2147483648, %v10598_v10  ;;  %v1031_v47 = vsel %vm8971_vm7, 0, %v8970_v53 }
  0xe7   : > { %15070 = vst [vmem:[#allocation19_spill] sm:$0xff] %v10604_v58  ;;  %v14732_v24 = vand.u32 2147483647, %v10580_v57  ;;  %v314_v49 = vcvt.s32.f32 %v274_v7  ;;  %v14730_v9 = vxor.u32 2147483648, %v10604_v58  ;;  %v1032_v21 = vsub.s32 32, %v1031_v47 }
  0xe8   : > { %v1033_v45 = vshll.u32 %v10551_v46, %v1031_v47  ;;  %v1036_v20 = vsub.s32 4294967266, %v1031_v47  ;;  %v957_v11 = vsel %vm955_vm6, %v14729_v39, %v10604_v58  ;;  %v10617_v55 = vsel %vm10563_vm1, 0, %v1047_v36 }
  0xe9   : > { %15071 = vst [vmem:[#allocation20_spill] sm:$0xff] %v10617_v55  ;;  %vm1121_vm8 = vc.u32 %v10594_v52, %v10587_v28  ;;  %v1122_v32 = vadd.s32 1, %v10588_v48  ;;  %v954_v46 = vsel %vm952_vm5, %v10598_v10, %v14730_v9  ;;  %v1034_v4 = vshrl.u32 %v1016_v22, %v1032_v21 }
  0xea   : > { %v1037_v38 = vadd.s32 127, %v1036_v20  ;;  %v1172_v23 = vshrl.u32 %v1171_v8, 23  ;;  %v958_v54 = vsel %vm951_vm0, %v954_v46, %v957_v11  ;;  %v1175_v53 = vand.u32 8388607, %v14732_v24 }
  0xeb   : > { %v1123_v7 = vsel %vm1121_vm8, %v1122_v32, %v10588_v48  ;;  %v361_v35 = vadd.f32 %v10533_v27, %v314_v49  ;;  %v959_v30 = vsel %vm14798_vm3, nan, %v958_v54  ;;  %v1035_v36 = vor.u32 %v1034_v4, %v1033_v45 }
  0xec   : > { %v1038_v47 = vshll.u32 %v1037_v38, 23  ;;  %v1124_v39 = vadd.s32 %v1123_v7, %v1119_v60  ;;  %4604 = vst [vmem:[%s10284_s26 + $0x20] sm:$0xff] %v959_v30  ;;  %v8976_v22 = vadd.s32 4294967169, %v1172_v23  ;;  %v275_v50 = vmul.u32 8, %v235_v34 }
  0xed   : > { %v10636_v8 = vmul.f32 %v10577_v12, %v361_v35  ;;  %v1042_v20 = vcvt.s32.f32 %v1035_v36  ;;  %v1053_v11 = vadd.s32 3, %v10617_v55  ;;  %v1176_v9 = vor.u32 8388608, %v1175_v53 }
  0xee   : > { %v1039_v21 = vor.u32 4788187, %v1038_v47  ;;  %v1125_v48 = vadd.s32 536870912, %v1124_v39  ;;  %v1178_v32 = vadd.s32 1, %v8976_v22  ;;  %v315_v4 = vcvt.s32.f32 %v275_v50 }
  0xef   : > { %15072 = vst [vmem:[#allocation21_spill] sm:$0xff] %v10636_v8  ;;  %v14731_v45 = vand.u32 2147483647, %v10636_v8  ;;  %v1275_v60 = vand.u32 2139095040, %v10636_v8  ;;  %v10644_v54 = vand.u32 3, %v1053_v11  ;;  %v10647_v35 = vadd.s32 80, %v9928_v1 }
  0xf0   : > { %v1040_v46 = vand.u32 2147483647, %v1039_v21  ;;  %v10639_v49 = vshrl.u32 %v1125_v48, 30  ;;  %vm1179_vm11 = vcmp.gt.s32.totalorder %v1178_v32, 0  ;;  %v1120_v36 = vadd.s32 %v10587_v28, %v10594_v52 }
  0xf1   : > { %v1180_v34 = vsel %vm1179_vm11, %v1178_v32, 0  ;;  %v10652_v47 = vshll.u32 %v1176_v9, 8  ;;  %v1276_v21 = vshrl.u32 %v1275_v60, 23  ;;  %v10656_v50 = vand.u32 8388607, %v14731_v45 }
  0xf2   : > { %v1043_v38 = vmul.f32 %v1042_v20, %v1040_v46  ;;  %v1127_v23 = vshll.u32 %v10639_v49, 30  ;;  %v1182_v7 = vand.u32 31, %v1180_v34  ;;  %v10659_v20 = vadd.f32 %v10533_v27, %v315_v4 }
  0xf3   : > { %v1181_v4 = vshrl.u32 %v1180_v34, 5  ;;  %vm1056_vm10 = vcmp.eq.s32.totalorder %v10644_v54, 0  ;;  %vm1055_vm13 = vcmp.lt.s32.totalorder %v10644_v54, 2  ;;  %vm1066_vm14 = vcmp.lt.s32.totalorder %v10428_v16, 0 }
  0xf4   : > { %v1044_v30 = vxor.u32 2147483648, %v1043_v38  ;;  %v10650_v53 = vsub.s32 %v1124_v39, %v1127_v23  ;;  %v1183_v22 = vsub.s32 32, %v1182_v7  ;;  %v1185_v28 = vshll.u32 %v14743_v59, %v1182_v7 }
  0xf5   : > { %v1188_v52 = vshll.u32 %v14733_v61, %v1182_v7  ;;  %v1191_v46 = vshll.u32 %v14735_v63, %v1182_v7  ;;  %v1150_v23 = vsub.s32 4, %v10639_v49  ;;  %v1194_v62 = vshll.u32 %v14737_v3, %v1182_v7 }
  0xf6   : > { %v1045_v48 = vsel %vm962_vm9, %v1044_v30, %v1043_v38  ;;  %v1130_v11 = vsub.s32 0, %v10650_v53  ;;  %v1186_v9 = vshrl.u32 %v14733_v61, %v1183_v22  ;;  %v1189_v32 = vshrl.u32 %v14735_v63, %v1183_v22 }
  0xf7   : > { %v1048_v39 = vsel %vm10563_vm1, %v10356_v43, %v1045_v48  ;;  %v1192_v38 = vshrl.u32 %v14737_v3, %v1183_v22  ;;  %v1184_v30 = vshrl.u32 %v14743_v59, %v1183_v22  ;;  %vm1059_vm9 = vcmp.eq.s32.totalorder %v10644_v54, 2 }
  0xf8   : > { %9526 = vcosq.f32 %v1048_v39  ;;  %v8973_v60 = vmin.u32 %v1130_v11, %v10650_v53  ;;  %v1187_v45 = vor.u32 %v1186_v9, %v1185_v28  ;;  %v1190_v24 = vor.u32 %v1189_v32, %v1188_v52 }
  0xf9   : > { %9528 = vsinq.f32 %v1048_v39  ;;  %v8980_v61 = vadd.s32 4294967169, %v1276_v21  ;;  %v1193_v63 = vor.u32 %v1192_v38, %v1191_v46  ;;  %v1195_v34 = vshrl.u32 %v14741_v5, %v1183_v22 }
  0xfa   : > { %v1132_v48 = vclz %v8973_v60  ;;  %v1197_v11 = vshll.u32 %v14741_v5, %v1182_v7  ;;  %v1198_v39 = vshrl.u32 %v14739_v14, %v1183_v22  ;;  %vm1200_vm0 = vcmp.lt.s32.totalorder %v1181_v4, 1 }
  0xfb   : > { %vm1201_vm1 = vcmp.lt.s32.totalorder %v1181_v4, 2  ;;  %vm1202_vm5 = vcmp.lt.s32.totalorder %v1181_v4, 3  ;;  %vm14797_vm6 = vweird.f32 %v10356_v43  ;;  %v1196_v21 = vor.u32 %v1195_v34, %v1194_v62 }
  0xfc   : > { %v8974_v3 = vadd.s32 4294967294, %v1132_v48  ;;  %v1199_v28 = vor.u32 %v1198_v39, %v1197_v11  ;;  %vm1203_vm7 = vcmp.lt.s32.totalorder %v1181_v4, 4  ;;  %v1204_v52 = vsel %vm1200_vm0, %v1184_v30, %v1187_v45 }
  0xfd   : > { %v1205_v9 = vsel %vm1203_vm7, %v1193_v63, 2102212464  ;;  %v1208_v32 = vsel %vm1200_vm0, %v1187_v45, %v1190_v24  ;;  %v1212_v7 = vsel %vm1200_vm0, %v1190_v24, %v1193_v63  ;;  %v1209_v60 = vsel %vm1203_vm7, %v1196_v21, 920167782 }
  0xfe   : > { %vm8975_vm8 = vcmp.lt.s32.totalorder %v8974_v3, 0  ;;  %v1206_v22 = vsel %vm1202_vm5, %v1190_v24, %v1205_v9  ;;  %v1213_v38 = vsel %vm1203_vm7, %v1199_v28, 1326507024  ;;  %vm10690_vm11 = vcmp.le.f32.partialorder %v1064_v13, 0.7853982 }
  0xff   : > { %v1135_v46 = vsel %vm8975_vm8, 0, %v8974_v3  ;;  %v1207_v45 = vsel %vm1201_vm1, %v1204_v52, %v1206_v22  ;;  %v1210_v3 = vsel %vm1202_vm5, %v1193_v63, %v1209_v60  ;;  %v1214_v24 = vsel %vm1202_vm5, %v1196_v21, %v1213_v38 }
 0x100   : > { %v1136_v14 = vsub.s32 32, %v1135_v46  ;;  %v1137_v48 = vshll.u32 %v10650_v53, %v1135_v46  ;;  %v1140_v5 = vsub.s32 4294967266, %v1135_v46  ;;  %v1282_v30 = vadd.s32 1, %v8980_v61 }
 0x101   : > { %v1211_v39 = vsel %vm1201_vm1, %v1208_v32, %v1210_v3  ;;  %v1215_v28 = vsel %vm1201_vm1, %v1212_v7, %v1214_v24  ;;  %v1223_v3 = vmul.u32 %v10652_v47, %v1207_v45  ;;  %v15079_v54 = vmov 2131351028  }
 0x102   : > { %v10697_v34 = vpop.eup %9526  ;;  %v1138_v11 = vshrl.u32 %v1120_v36, %v1136_v14  ;;  %v1141_v53 = vadd.s32 127, %v1140_v5  ;;  %v10705_v46 = vmul.u32.u64.low %v10652_v47, %v1215_v28  ;;  %v10706_v52 = vmul.u32.u64.high %v10652_v47, %v1215_v28, %v10705_v46 }
 0x103   : > { %15075 = vst [vmem:[#allocation22_spill] sm:$0xff] %v10697_v34  ;;  %v10701_v9 = vpop.eup %9528  ;;  %v14745_v13 = vxor.u32 2147483648, %v10697_v34  ;;  %vm1283_vm0 = vcmp.gt.s32.totalorder %v1282_v30, 0  ;;  %v1151_v14 = vsel %vm1066_vm14, %v1150_v23, %v10639_v49  ;;  %v15078_v28 = vmov 2475754826  }
 0x104   : > { %15076 = vst [vmem:[#allocation23_spill] sm:$0xff] %v10701_v9  ;;  %v14746_v63 = vxor.u32 2147483648, %v10701_v9  ;;  %v1139_v61 = vor.u32 %v1138_v11, %v1137_v48  ;;  %v1142_v21 = vshll.u32 %v1141_v53, 23  ;;  %v1284_v22 = vsel %vm1283_vm0, %v1282_v30, 0 }
 0x105   : > { %v1061_v5 = vsel %vm1059_vm9, %v14745_v13, %v10701_v9  ;;  %v10718_v36 = vmul.u32.u64.low %v10652_v47, %v1211_v39  ;;  %v10719_v4 = vmul.u32.u64.high %v10652_v47, %v1211_v39, %v10718_v36  ;;  %v1286_v38 = vand.u32 31, %v1284_v22 }
 0x106   : > { %v1058_v32 = vsel %vm1056_vm10, %v10697_v34, %v14746_v63  ;;  %v1143_v7 = vor.u32 4788187, %v1142_v21  ;;  %v1146_v60 = vcvt.s32.f32 %v1139_v61  ;;  %v1285_v49 = vshrl.u32 %v1284_v22, 5 }
 0x107   : > { %v1062_v48 = vsel %vm1055_vm13, %v1058_v32, %v1061_v5  ;;  %vm1225_vm9 = vc.u32 %v10706_v52, %v10718_v36  ;;  %v1287_v30 = vsub.s32 32, %v1286_v38  ;;  %v15077_v11 = vmov 683565275  }
 0x108   : > { %v1063_v23 = vsel %vm14797_vm6, nan, %v1062_v48  ;;  %v1144_v24 = vand.u32 2147483647, %v1143_v7  ;;  %v1289_v53 = vshll.u32 %v15077_v11, %v1286_v38  ;;  %v1226_v39 = vadd.s32 1, %v10719_v4 }
 0x109   : > { %4605 = vst [vmem:[%s10284_s26 + $0x28] sm:$0xff] %v1063_v23  ;;  %v1292_v46 = vshll.u32 %v15078_v28, %v1286_v38  ;;  %v1295_v61 = vshll.u32 %v15079_v54, %v1286_v38  ;;  %v15080_v21 = vmov 2102212464   ;;  %v10742_v22 = vsel %vm10690_vm11, 0, %v1151_v14 }
 0x10a   : > { %v1298_v47 = vshll.u32 %v15080_v21, %v1286_v38  ;;  %v1147_v45 = vmul.f32 %v1146_v60, %v1144_v24  ;;  %15081 = vst [vmem:[#allocation24_spill] sm:$0xff] %v10742_v22  ;;  %v1290_v5 = vshrl.u32 %v15078_v28, %v1287_v30  ;;  %v1293_v32 = vshrl.u32 %v15079_v54, %v1287_v30 }
 0x10b   : > { %v1227_v7 = vsel %vm1225_vm9, %v1226_v39, %v10719_v4  ;;  %v1296_v48 = vshrl.u32 %v15080_v21, %v1287_v30  ;;  %v15082_v23 = vmov 920167782   ;;  %v15083_v14 = vmov 1326507024  }
 0x10c   : > { %v1299_v13 = vshrl.u32 %v15082_v23, %v1287_v30  ;;  %v1301_v63 = vshll.u32 %v15082_v23, %v1286_v38  ;;  %v1148_v59 = vxor.u32 2147483648, %v1147_v45  ;;  %v1228_v43 = vadd.s32 %v1227_v7, %v1223_v3 }
 0x10d   : > { %v1291_v34 = vor.u32 %v1290_v5, %v1289_v53  ;;  %v1294_v60 = vor.u32 %v1293_v32, %v1292_v46  ;;  %v1297_v24 = vor.u32 %v1296_v48, %v1295_v61  ;;  %v1302_v56 = vshrl.u32 %v15083_v14, %v1287_v30 }
 0x10e   : > { %v1300_v9 = vor.u32 %v1299_v13, %v1298_v47  ;;  %vm1304_vm10 = vcmp.lt.s32.totalorder %v1285_v49, 1  ;;  %v1149_v55 = vsel %vm1066_vm14, %v1148_v59, %v1147_v45  ;;  %v1157_v4 = vadd.s32 3, %v10742_v22 }
 0x10f   : > { %v1229_v39 = vadd.s32 536870912, %v1228_v43  ;;  %vm1307_vm13 = vcmp.lt.s32.totalorder %v1285_v49, 4  ;;  %v1152_v38 = vsel %vm10690_vm11, %v10428_v16, %v1149_v55  ;;  %v1288_v3 = vshrl.u32 %v15077_v11, %v1287_v30 }
 0x110   : > { %v1303_v53 = vor.u32 %v1302_v56, %v1301_v63  ;;  %vm1306_vm1 = vcmp.lt.s32.totalorder %v1285_v49, 3  ;;  %9530 = vcosq.f32 %v1152_v38  ;;  %vm1305_vm5 = vcmp.lt.s32.totalorder %v1285_v49, 2 }
 0x111   : > { %v1230_v13 = vshrl.u32 %v1229_v39, 30  ;;  %v1312_v46 = vsel %vm1304_vm10, %v1291_v34, %v1294_v60  ;;  %9532 = vsinq.f32 %v1152_v38  ;;  %v1309_v61 = vsel %vm1307_vm13, %v1297_v24, 2102212464 }
 0x112   : > { %v1313_v59 = vsel %vm1307_vm13, %v1300_v9, 920167782  ;;  %v1316_v47 = vsel %vm1304_vm10, %v1294_v60, %v1297_v24  ;;  %v1317_v32 = vsel %vm1307_vm13, %v1303_v53, 1326507024  ;;  %v10763_v55 = vmul.f32 %v10577_v12, %v10659_v20 }
 0x113   : > { %v1231_v45 = vshll.u32 %v1230_v13, 30  ;;  %v1314_v5 = vsel %vm1306_vm1, %v1297_v24, %v1313_v59  ;;  %v1254_v56 = vsub.s32 4, %v1230_v13  ;;  %v1318_v63 = vsel %vm1306_vm1, %v1300_v9, %v1317_v32 }
 0x114   : > { %15084 = vst [vmem:[#allocation25_spill] sm:$0xff] %v10763_v55  ;;  %v1315_v62 = vsel %vm1305_vm5, %v1312_v46, %v1314_v5  ;;  %v15085_v30 = vor.u32 8388608, %v10656_v50  ;;  %v1308_v39 = vsel %vm1304_vm10, %v1288_v3, %v1291_v34  ;;  %v1310_v38 = vsel %vm1306_vm1, %v1294_v60, %v1309_v61 }
 0x115   : > { %v1232_v48 = vsub.s32 %v1228_v43, %v1231_v45  ;;  %v1319_v24 = vsel %vm1305_vm5, %v1316_v47, %v1318_v63  ;;  %v1158_v53 = vand.u32 3, %v1157_v4  ;;  %vm1170_vm14 = vcmp.lt.s32.totalorder %v10580_v57, 0 }
 0x116   : > { %v1320_v7 = vshll.u32 %v15085_v30, 8  ;;  %v1255_v50 = vsel %vm1170_vm14, %v1254_v56, %v1230_v13  ;;  %v1311_v43 = vsel %vm1305_vm5, %v1308_v39, %v1310_v38  ;;  %v1379_v34 = vand.u32 2139095040, %v10763_v55 }
 0x117   : > { %v1234_v20 = vsub.s32 0, %v1232_v48  ;;  %v236_v9 = vadd.s32 %v9930_v2, %v10647_v35  ;;  %vm14771_vm7 = vweird.f32 %v10428_v16  ;;  %vm1160_vm8 = vcmp.eq.s32.totalorder %v1158_v53, 0 }
 0x118   : > { %v10772_v59 = vmul.u32.u64.low %v1320_v7, %v1319_v24  ;;  %v10773_v22 = vmul.u32.u64.high %v1320_v7, %v1319_v24, %v10772_v59  ;;  %v10776_v46 = vmul.u32.u64.low %v1320_v7, %v1315_v62  ;;  %v10777_v5 = vmul.u32.u64.high %v1320_v7, %v1315_v62, %v10776_v46 }
 0x119   : > { %v8977_v60 = vmin.u32 %v1234_v20, %v1232_v48  ;;  %vm1163_vm11 = vcmp.eq.s32.totalorder %v1158_v53, 2  ;;  %v15086_v4 = vand.u32 2147483647, %v10580_v57  ;;  %v1380_v61 = vshrl.u32 %v1379_v34, 23 }
 0x11a   : > { %v10792_v13 = vpop.eup %9530  ;;  %v1327_v35 = vmul.u32 %v1320_v7, %v1311_v43  ;;  %vm1329_vm9 = vc.u32 %v10773_v22, %v10776_v46  ;;  %v1330_v56 = vadd.s32 1, %v10777_v5  ;;  %v276_v63 = vmul.u32 8, %v236_v9 }
 0x11b   : > { %vm10788_vm0 = vcmp.le.f32.partialorder %v15086_v4, 0.7853982  ;;  %15089 = vst [vmem:[#allocation26_spill] sm:$0xff] %v10792_v13  ;;  %v1236_v49 = vclz %v8977_v60  ;;  %v10799_v45 = vpop.eup %9532  ;;  %v14755_v32 = vxor.u32 2147483648, %v10792_v13  ;;  %v8984_v62 = vadd.s32 4294967169, %v1380_v61 }
 0x11c   : > { %v10796_v47 = vsel %vm10788_vm0, 0, %v1255_v50  ;;  %15091 = vst [vmem:[#allocation28_spill] sm:$0xff] %v10799_v45  ;;  %vm1159_vm10 = vcmp.lt.s32.totalorder %v1158_v53, 2  ;;  %v14756_v30 = vxor.u32 2147483648, %v10799_v45  ;;  %v1224_v39 = vadd.s32 %v10718_v36, %v10706_v52 }
 0x11d   : > { %15090 = vst [vmem:[#allocation27_spill] sm:$0xff] %v10796_v47  ;;  %v8978_v38 = vadd.s32 4294967294, %v1236_v49  ;;  %v1165_v7 = vsel %vm1163_vm11, %v14755_v32, %v10799_v45  ;;  %v1331_v24 = vsel %vm1329_vm9, %v1330_v56, %v10777_v5  ;;  %v14757_v59 = vand.u32 2147483647, %v10763_v55 }
 0x11e   : > { %v1386_v20 = vadd.s32 1, %v8984_v62  ;;  %v1162_v50 = vsel %vm1160_vm8, %v10792_v13, %v14756_v30  ;;  %v1261_v52 = vadd.s32 3, %v10796_v47  ;;  %v1332_v36 = vadd.s32 %v1331_v24, %v1327_v35 }
 0x11f   : > { %vm8979_vm13 = vcmp.lt.s32.totalorder %v8978_v38, 0  ;;  %v1166_v43 = vsel %vm1159_vm10, %v1162_v50, %v1165_v7  ;;  %v316_v9 = vcvt.s32.f32 %v276_v63  ;;  %v1383_v32 = vand.u32 8388607, %v14757_v59 }
 0x120   : > { %v1239_v34 = vsel %vm8979_vm13, 0, %v8978_v38  ;;  %vm1387_vm1 = vcmp.gt.s32.totalorder %v1386_v20, 0  ;;  %v1167_v60 = vsel %vm14771_vm7, nan, %v1166_v43  ;;  %v1333_v49 = vadd.s32 536870912, %v1332_v36 }
 0x121   : > { %v1240_v5 = vsub.s32 32, %v1239_v34  ;;  %v1241_v4 = vshll.u32 %v1232_v48, %v1239_v34  ;;  %v1244_v61 = vsub.s32 4294967266, %v1239_v34  ;;  %4606 = vst [vmem:[%s10284_s26 + $0x30] sm:$0xff] %v1167_v60  ;;  %v1388_v56 = vsel %vm1387_vm1, %v1386_v20, 0 }
 0x122   : > { %v1390_v30 = vand.u32 31, %v1388_v56  ;;  %v10822_v35 = vand.u32 3, %v1261_v52  ;;  %v1334_v38 = vshrl.u32 %v1333_v49, 30  ;;  %v363_v63 = vadd.f32 %v10533_v27, %v316_v9 }
 0x123   : > { %v1242_v62 = vshrl.u32 %v1224_v39, %v1240_v5  ;;  %v1245_v53 = vadd.s32 127, %v1244_v61  ;;  %vm1274_vm5 = vcmp.lt.s32.totalorder %v10636_v8, 0  ;;  %v10827_v50 = vadd.s32 88, %v9928_v1 }
 0x124   : > { %v1391_v48 = vsub.s32 32, %v1390_v30  ;;  %v10830_v39 = vadd.s32 %v10776_v46, %v10773_v22  ;;  %v1335_v20 = vshll.u32 %v1334_v38, 30  ;;  %v1393_v43 = vshll.u32 %v15077_v11, %v1390_v30 }
 0x125   : > { %v1243_v7 = vor.u32 %v1242_v62, %v1241_v4  ;;  %v1246_v24 = vshll.u32 %v1245_v53, 23  ;;  %v1396_v52 = vshll.u32 %v15078_v28, %v1390_v30  ;;  %v1384_v5 = vor.u32 8388608, %v1383_v32 }
 0x126   : > { %v1394_v9 = vshrl.u32 %v15078_v28, %v1391_v48  ;;  %v10835_v4 = vsub.s32 %v1332_v36, %v1335_v20  ;;  %v1389_v61 = vshrl.u32 %v1388_v56, 5  ;;  %v1397_v49 = vshrl.u32 %v15079_v54, %v1391_v48 }
 0x127   : > { %v1247_v34 = vor.u32 4788187, %v1246_v24  ;;  %v1250_v60 = vcvt.s32.f32 %v1243_v7  ;;  %v10839_v62 = vmul.f32 %v10577_v12, %v363_v63  ;;  %v1399_v46 = vshll.u32 %v15079_v54, %v1390_v30 }
 0x128   : > { %v1400_v53 = vshrl.u32 %v15080_v21, %v1391_v48  ;;  %v1402_v59 = vshll.u32 %v15080_v21, %v1390_v30  ;;  %v1338_v7 = vsub.s32 0, %v10835_v4  ;;  %v1358_v32 = vsub.s32 4, %v1334_v38 }
 0x129   : > { %15092 = vst [vmem:[#allocation29_spill] sm:$0xff] %v10839_v62  ;;  %v1248_v22 = vand.u32 2147483647, %v1247_v34  ;;  %v1395_v24 = vor.u32 %v1394_v9, %v1393_v43  ;;  %v1398_v16 = vor.u32 %v1397_v49, %v1396_v52  ;;  %v1403_v56 = vshrl.u32 %v15082_v23, %v1391_v48 }
 0x12a   : > { %v1405_v20 = vshll.u32 %v15082_v23, %v1390_v30  ;;  %v1406_v63 = vshrl.u32 %v15083_v14, %v1391_v48  ;;  %v8981_v34 = vmin.u32 %v1338_v7, %v10835_v4  ;;  %vm1408_vm8 = vcmp.lt.s32.totalorder %v1389_v61, 1 }
 0x12b   : > { %v1251_v36 = vmul.f32 %v1250_v60, %v1248_v22  ;;  %v10849_v13 = vshll.u32 %v1384_v5, 8  ;;  %v1483_v45 = vand.u32 2139095040, %v10839_v62  ;;  %v1392_v0 = vshrl.u32 %v15077_v11, %v1391_v48 }
 0x12c   : > { %v1401_v10 = vor.u32 %v1400_v53, %v1399_v46  ;;  %v1404_v43 = vor.u32 %v1403_v56, %v1402_v59  ;;  %v15093_v52 = vand.u32 2147483647, %v10636_v8  ;;  %v1340_v30 = vclz %v8981_v34 }
 0x12d   : > { %v1252_v47 = vxor.u32 2147483648, %v1251_v36  ;;  %v1359_v9 = vsel %vm1274_vm5, %v1358_v32, %v1334_v38  ;;  %vm1409_vm9 = vcmp.lt.s32.totalorder %v1389_v61, 2  ;;  %vm1410_vm10 = vcmp.lt.s32.totalorder %v1389_v61, 3 }
 0x12e   : > { %vm10855_vm11 = vcmp.le.f32.partialorder %v15093_v52, 0.7853982  ;;  %v1407_v49 = vor.u32 %v1406_v63, %v1405_v20  ;;  %vm1411_vm13 = vcmp.lt.s32.totalorder %v1389_v61, 4  ;;  %v1416_v48 = vsel %vm1408_vm8, %v1395_v24, %v1398_v16 }
 0x12f   : > { %v1253_v5 = vsel %vm1170_vm14, %v1252_v47, %v1251_v36  ;;  %v8982_v22 = vadd.s32 4294967294, %v1340_v30  ;;  %v1413_v46 = vsel %vm1411_vm13, %v1401_v10, 2102212464  ;;  %v1417_v53 = vsel %vm1411_vm13, %v1404_v43, 920167782 }
 0x130   : > { %v1256_v59 = vsel %vm10788_vm0, %v10580_v57, %v1253_v5  ;;  %v1412_v7 = vsel %vm1408_vm8, %v1392_v0, %v1395_v24  ;;  %v1414_v38 = vsel %vm1410_vm10, %v1398_v16, %v1413_v46  ;;  %v1418_v32 = vsel %vm1410_vm10, %v1401_v10, %v1417_v53 }
 0x131   : > { %9534 = vcosq.f32 %v1256_v59  ;;  %vm8983_vm14 = vcmp.lt.s32.totalorder %v8982_v22, 0  ;;  %v1419_v47 = vsel %vm1409_vm9, %v1416_v48, %v1418_v32  ;;  %v1420_v36 = vsel %vm1408_vm8, %v1398_v16, %v1401_v10 }
 0x132   : > { %9536 = vsinq.f32 %v1256_v59  ;;  %v1343_v56 = vsel %vm8983_vm14, 0, %v8982_v22  ;;  %v1421_v20 = vsel %vm1411_vm13, %v1407_v49, 1326507024  ;;  %v1415_v30 = vsel %vm1409_vm9, %v1412_v7, %v1414_v38 }
 0x133   : > { %v10873_v3 = vmul.u32.u64.low %v10849_v13, %v1419_v47  ;;  %v10874_v63 = vmul.u32.u64.high %v10849_v13, %v1419_v47, %v10873_v3  ;;  %v1344_v34 = vsub.s32 32, %v1343_v56  ;;  %v1345_v0 = vshll.u32 %v10835_v4, %v1343_v56 }
 0x134   : > { %v1348_v24 = vsub.s32 4294967266, %v1343_v56  ;;  %v1422_v52 = vsel %vm1410_vm10, %v1404_v43, %v1421_v20  ;;  %v1484_v48 = vshrl.u32 %v1483_v45, 23  ;;  %v237_v16 = vadd.s32 %v9930_v2, %v10827_v50 }
 0x135   : > { %v1423_v5 = vsel %vm1409_vm9, %v1420_v36, %v1422_v52  ;;  %v1346_v10 = vshrl.u32 %v10830_v39, %v1344_v34  ;;  %v10890_v4 = vsel %vm10855_vm11, 0, %v1359_v9  ;;  %v1434_v43 = vadd.s32 1, %v10874_v63 }
 0x136   : > { %v1349_v49 = vadd.s32 127, %v1348_v24  ;;  %v10885_v59 = vmul.u32.u64.low %v10849_v13, %v1423_v5  ;;  %v10886_v22 = vmul.u32.u64.high %v10849_v13, %v1423_v5, %v10885_v59  ;;  %15096 = vst [vmem:[#allocation30_spill] sm:$0xff] %v10890_v4  ;;  %v8988_v46 = vadd.s32 4294967169, %v1484_v48 }
 0x137   : > { %vm14770_vm0 = vweird.f32 %v10580_v57  ;;  %v1347_v45 = vor.u32 %v1346_v10, %v1345_v0  ;;  %v1431_v50 = vmul.u32 %v10849_v13, %v1415_v30  ;;  %vm1263_vm1 = vcmp.lt.s32.totalorder %v10822_v35, 2 }
 0x138   : > { %v1350_v61 = vshll.u32 %v1349_v49, 23  ;;  %vm1264_vm8 = vcmp.eq.s32.totalorder %v10822_v35, 0  ;;  %v1490_v39 = vadd.s32 1, %v8988_v46  ;;  %v277_v53 = vmul.u32 8, %v237_v16 }
 0x139   : > { %v1354_v38 = vcvt.s32.f32 %v1347_v45  ;;  %v1365_v9 = vadd.s32 3, %v10890_v4  ;;  %vm1433_vm9 = vc.u32 %v10886_v22, %v10873_v3  ;;  %vm1267_vm10 = vcmp.eq.s32.totalorder %v10822_v35, 2 }
 0x13a   : > { %v1351_v7 = vor.u32 4788187, %v1350_v61  ;;  %v1435_v47 = vsel %vm1433_vm9, %v1434_v43, %v10874_v63  ;;  %v14769_v13 = vand.u32 2147483647, %v10839_v62  ;;  %vm1491_vm13 = vcmp.gt.s32.totalorder %v1490_v39, 0 }
 0x13b   : > { %v10900_v32 = vpop.eup %9534  ;;  %v1436_v34 = vadd.s32 %v1435_v47, %v1431_v50  ;;  %v1492_v0 = vsel %vm1491_vm13, %v1490_v39, 0  ;;  %v317_v30 = vcvt.s32.f32 %v277_v53  ;;  %v196_v5 = vadd.s32 96, %v9928_v1 }
 0x13c   : > { %15097 = vst [vmem:[#allocation31_spill] sm:$0xff] %v10900_v32  ;;  %v10905_v36 = vpop.eup %9536  ;;  %v14767_v56 = vxor.u32 2147483648, %v10900_v32  ;;  %v1352_v20 = vand.u32 2147483647, %v1351_v7  ;;  %v1494_v52 = vand.u32 31, %v1492_v0  ;;  %v10913_v16 = vand.u32 3, %v1365_v9 }
 0x13d   : > { %15098 = vst [vmem:[#allocation32_spill] sm:$0xff] %v10905_v36  ;;  %v14768_v24 = vxor.u32 2147483648, %v10905_v36  ;;  %v1437_v10 = vadd.s32 536870912, %v1436_v34  ;;  %v1487_v59 = vand.u32 8388607, %v14769_v13  ;;  %v10922_v43 = vshrl.u32 %v1492_v0, 5 }
 0x13e   : > { %v1269_v63 = vsel %vm1267_vm10, %v14767_v56, %v10905_v36  ;;  %v1355_v48 = vmul.f32 %v1354_v38, %v1352_v20  ;;  %v1495_v46 = vsub.s32 32, %v1494_v52  ;;  %v1497_v39 = vshll.u32 %v15077_v11, %v1494_v52 }
 0x13f   : > { %v1266_v49 = vsel %vm1264_vm8, %v10900_v32, %v14768_v24  ;;  %v10926_v50 = vshrl.u32 %v1437_v10, 30  ;;  %v1500_v38 = vshll.u32 %v15078_v28, %v1494_v52  ;;  %v1503_v20 = vshll.u32 %v15079_v54, %v1494_v52 }
 0x140   : > { %v1270_v45 = vsel %vm1263_vm1, %v1266_v49, %v1269_v63  ;;  %v1356_v61 = vxor.u32 2147483648, %v1355_v48  ;;  %v1498_v7 = vshrl.u32 %v15078_v28, %v1495_v46  ;;  %v1501_v9 = vshrl.u32 %v15079_v54, %v1495_v46 }
 0x141   : > { %v1271_v53 = vsel %vm14770_vm0, nan, %v1270_v45  ;;  %v1439_v35 = vshll.u32 %v10926_v50, 30  ;;  %v1504_v0 = vshrl.u32 %v15080_v21, %v1495_v46  ;;  %v1488_v10 = vor.u32 8388608, %v1487_v59 }
 0x142   : > { %4607 = vst [vmem:[%s10284_s26 + $0x38] sm:$0xff] %v1271_v53  ;;  %v1357_v47 = vsel %vm1274_vm5, %v1356_v61, %v1355_v48  ;;  %v1506_v49 = vshll.u32 %v15080_v21, %v1494_v52  ;;  %v364_v45 = vadd.f32 %v10533_v27, %v317_v30  ;;  %v1496_v48 = vshrl.u32 %v15077_v11, %v1495_v46 }
 0x143   : > { %v1360_v63 = vsel %vm10855_vm11, %v10636_v8, %v1357_v47  ;;  %v10945_v53 = vsub.s32 %v1436_v34, %v1439_v35  ;;  %v1499_v61 = vor.u32 %v1498_v7, %v1497_v39  ;;  %v1502_v56 = vor.u32 %v1501_v9, %v1500_v38 }
 0x144   : > { %9538 = vcosq.f32 %v1360_v63  ;;  %v1507_v24 = vshrl.u32 %v15082_v23, %v1495_v46  ;;  %v1509_v13 = vshll.u32 %v15082_v23, %v1494_v52  ;;  %vm1378_vm5 = vcmp.lt.s32.totalorder %v10763_v55, 0 }
 0x145   : > { %9540 = vsinq.f32 %v1360_v63  ;;  %v1442_v60 = vsub.s32 0, %v10945_v53  ;;  %v1505_v59 = vor.u32 %v1504_v0, %v1503_v20  ;;  %v1510_v47 = vshrl.u32 %v15083_v14, %v1495_v46 }
 0x146   : > { %vm1512_vm11 = vcmp.lt.s32.totalorder %v10922_v43, 1  ;;  %vm1368_vm14 = vcmp.eq.s32.totalorder %v10913_v16, 0  ;;  %vm1371_vm1 = vcmp.eq.s32.totalorder %v10913_v16, 2  ;;  %v1508_v27 = vor.u32 %v1507_v24, %v1506_v49 }
 0x147   : > { %vm1515_vm8 = vcmp.lt.s32.totalorder %v10922_v43, 4  ;;  %v10958_v34 = vadd.s32 %v9930_v2, %v196_v5  ;;  %vm1367_vm9 = vcmp.lt.s32.totalorder %v10913_v16, 2  ;;  %v8985_v52 = vmin.u32 %v1442_v60, %v10945_v53 }
 0x148   : > { %v1511_v30 = vor.u32 %v1510_v47, %v1509_v13  ;;  %vm1514_vm10 = vcmp.lt.s32.totalorder %v10922_v43, 3  ;;  %v1528_v46 = vshll.u32 %v1488_v10, 8  ;;  %vm14780_vm13 = vweird.f32 %v10636_v8 }
 0x149   : > { %v15099_v39 = vand.u32 2147483647, %v10763_v55  ;;  %vm1513_vm7 = vcmp.lt.s32.totalorder %v10922_v43, 2  ;;  %v1517_v24 = vsel %vm1515_vm8, %v1505_v59, 2102212464  ;;  %v1520_v5 = vsel %vm1512_vm11, %v1499_v61, %v1502_v56 }
 0x14a   : > { %v1521_v13 = vsel %vm1515_vm8, %v1508_v27, 920167782  ;;  %v1444_v38 = vclz %v8985_v52  ;;  %v1516_v9 = vsel %vm1512_vm11, %v1496_v48, %v1499_v61  ;;  %v1524_v35 = vsel %vm1512_vm11, %v1502_v56, %v1505_v59 }
 0x14b   : > { %vm10966_vm0 = vcmp.le.f32.partialorder %v15099_v39, 0.7853982  ;;  %v10982_v20 = vmul.f32 %v10577_v12, %v364_v45  ;;  %v1462_v0 = vsub.s32 4, %v10926_v50  ;;  %v1518_v63 = vsel %vm1514_vm10, %v1502_v56, %v1517_v24 }
 0x14c   : > { %v1522_v10 = vsel %vm1514_vm10, %v1505_v59, %v1521_v13  ;;  %v1525_v49 = vsel %vm1515_vm8, %v1511_v30, 1326507024  ;;  %v1432_v48 = vadd.s32 %v10873_v3, %v10886_v22  ;;  %v8986_v61 = vadd.s32 4294967294, %v1444_v38 }
 0x14d   : > { %15102 = vst [vmem:[#allocation33_spill] sm:$0xff] %v10982_v20  ;;  %v1523_v60 = vsel %vm1513_vm7, %v1520_v5, %v1522_v10  ;;  %v1526_v12 = vsel %vm1514_vm10, %v1508_v27, %v1525_v49  ;;  %v1519_v45 = vsel %vm1513_vm7, %v1516_v9, %v1518_v63  ;;  %v1587_v30 = vand.u32 2139095040, %v10982_v20 }
 0x14e   : > { %v1527_v56 = vsel %vm1513_vm7, %v1524_v35, %v1526_v12  ;;  %v11001_v59 = vmul.u32.u64.low %v1528_v46, %v1523_v60  ;;  %v11002_v47 = vmul.u32.u64.high %v1528_v46, %v1523_v60, %v11001_v59  ;;  %v11004_v52 = vpop.eup %9538  ;;  %vm8987_vm11 = vcmp.lt.s32.totalorder %v8986_v61, 0 }
 0x14f   : > { %15103 = vst [vmem:[#allocation34_spill] sm:$0xff] %v11004_v52  ;;  %v11006_v3 = vmul.u32.u64.low %v1528_v46, %v1527_v56  ;;  %v11007_v22 = vmul.u32.u64.high %v1528_v46, %v1527_v56, %v11006_v3  ;;  %v11010_v39 = vpop.eup %9540  ;;  %v14772_v27 = vxor.u32 2147483648, %v11004_v52  ;;  %v1447_v24 = vsel %vm8987_vm11, 0, %v8986_v61 }
 0x150   : > { %15104 = vst [vmem:[#allocation35_spill] sm:$0xff] %v11010_v39  ;;  %v1463_v43 = vsel %vm1378_vm5, %v1462_v0, %v10926_v50  ;;  %v14774_v5 = vand.u32 2147483647, %v10982_v20  ;;  %v14773_v13 = vxor.u32 2147483648, %v11010_v39  ;;  %v1448_v38 = vsub.s32 32, %v1447_v24 }
 0x151   : > { %v1449_v9 = vshll.u32 %v10945_v53, %v1447_v24  ;;  %v1452_v35 = vsub.s32 4294967266, %v1447_v24  ;;  %v1373_v63 = vsel %vm1371_vm1, %v14772_v27, %v11010_v39  ;;  %v1535_v10 = vmul.u32 %v1528_v46, %v1519_v45 }
 0x152   : > { %v1538_v49 = vadd.s32 1, %v11002_v47  ;;  %v1588_v61 = vshrl.u32 %v1587_v30, 23  ;;  %v1370_v50 = vsel %vm1368_vm14, %v11004_v52, %v14773_v13  ;;  %v1450_v0 = vshrl.u32 %v1432_v48, %v1448_v38 }
 0x153   : > { %v1453_v53 = vadd.s32 127, %v1452_v35  ;;  %v11032_v60 = vsel %vm10966_vm0, 0, %v1463_v43  ;;  %v1374_v12 = vsel %vm1367_vm9, %v1370_v50, %v1373_v63  ;;  %vm1537_vm7 = vc.u32 %v11007_v22, %v11001_v59 }
 0x154   : > { %15105 = vst [vmem:[#allocation36_spill] sm:$0xff] %v11032_v60  ;;  %v8992_v46 = vadd.s32 4294967169, %v1588_v61  ;;  %v1591_v45 = vand.u32 8388607, %v14774_v5  ;;  %v1375_v56 = vsel %vm14780_vm13, nan, %v1374_v12  ;;  %v1451_v3 = vor.u32 %v1450_v0, %v1449_v9 }
 0x155   : > { %v1454_v30 = vshll.u32 %v1453_v53, 23  ;;  %v1539_v48 = vsel %vm1537_vm7, %v1538_v49, %v11002_v47  ;;  %4608 = vst [vmem:[%s10284_s26 + $0x40] sm:$0xff] %v1375_v56  ;;  %v1469_v16 = vadd.s32 3, %v11032_v60  ;;  %v278_v61 = vmul.u32 8, %v10958_v34 }
 0x156   : > { %v1540_v24 = vadd.s32 %v1539_v48, %v1535_v10  ;;  %v1594_v43 = vadd.s32 1, %v8992_v46  ;;  %v1458_v35 = vcvt.s32.f32 %v1451_v3  ;;  %v197_v50 = vadd.s32 104, %v9928_v1 }
 0x157   : > { %v1455_v38 = vor.u32 4788187, %v1454_v30  ;;  %v1592_v13 = vor.u32 8388608, %v1591_v45  ;;  %v11048_v49 = vand.u32 3, %v1469_v16  ;;  %v11051_v10 = vadd.s32 %v11001_v59, %v11007_v22 }
 0x158   : > { %v1541_v63 = vadd.s32 536870912, %v1540_v24  ;;  %vm1595_vm14 = vcmp.gt.s32.totalorder %v1594_v43, 0  ;;  %v11054_v53 = vadd.s32 112, %v9928_v1  ;;  %v318_v56 = vcvt.s32.f32 %v278_v61 }
 0x159   : > { %v1456_v27 = vand.u32 2147483647, %v1455_v38  ;;  %v1596_v12 = vsel %vm1595_vm14, %v1594_v43, 0  ;;  %v239_v3 = vadd.s32 %v9930_v2, %v197_v50  ;;  %v11059_v43 = vshll.u32 %v1592_v13, 8  ;;  %v11078_v50 = vld [vmem:[%s14716_s1] ss:$0 sm:$0xff] }
 0x15a   : > { %v11046_v9 = vshrl.u32 %v1541_v63, 30  ;;  %v1598_v0 = vand.u32 31, %v1596_v12  ;;  %v1597_v30 = vshrl.u32 %v1596_v12, 5  ;;  %v365_v12 = vadd.f32 %v11078_v50, %v318_v56 }
 0x15b   : > { %v1459_v47 = vmul.f32 %v1458_v35, %v1456_v27  ;;  %vm1472_vm8 = vcmp.eq.s32.totalorder %v11048_v49, 0  ;;  %vm1471_vm10 = vcmp.lt.s32.totalorder %v11048_v49, 2  ;;  %vm14796_vm14 = vweird.f32 %v10763_v55 }
 0x15c   : > { %v1543_v46 = vshll.u32 %v11046_v9, 30  ;;  %v1599_v34 = vsub.s32 32, %v1598_v0  ;;  %v1601_v48 = vshll.u32 %v15077_v11, %v1598_v0  ;;  %v1604_v22 = vshll.u32 %v15078_v28, %v1598_v0 }
 0x15d   : > { %v1460_v45 = vxor.u32 2147483648, %v1459_v47  ;;  %v1607_v38 = vshll.u32 %v15079_v54, %v1598_v0  ;;  %v1610_v61 = vshll.u32 %v15080_v21, %v1598_v0  ;;  %v1613_v8 = vshll.u32 %v15082_v23, %v1598_v0 }
 0x15e   : > { %v11061_v27 = vsub.s32 %v1540_v24, %v1543_v46  ;;  %v1602_v59 = vshrl.u32 %v15078_v28, %v1599_v34  ;;  %v1605_v16 = vshrl.u32 %v15079_v54, %v1599_v34  ;;  %v1608_v63 = vshrl.u32 %v15080_v21, %v1599_v34 }
 0x15f   : > { %v1461_v35 = vsel %vm1378_vm5, %v1460_v45, %v1459_v47  ;;  %v279_v47 = vmul.u32 8, %v239_v3  ;;  %v1600_v46 = vshrl.u32 %v15077_v11, %v1599_v34  ;;  %v1611_v5 = vshrl.u32 %v15082_v23, %v1599_v34 }
 0x160   : > { %v1464_v13 = vsel %vm10966_vm0, %v10763_v55, %v1461_v35  ;;  %v1546_v24 = vsub.s32 0, %v11061_v27  ;;  %v1603_v45 = vor.u32 %v1602_v59, %v1601_v48  ;;  %vm1482_vm5 = vcmp.lt.s32.totalorder %v10839_v62, 0 }
 0x161   : > { %9542 = vcosq.f32 %v1464_v13  ;;  %v1606_v35 = vor.u32 %v1605_v16, %v1604_v22  ;;  %vm1475_vm0 = vcmp.eq.s32.totalorder %v11048_v49, 2  ;;  %v1609_v52 = vor.u32 %v1608_v63, %v1607_v38 }
 0x162   : > { %9544 = vsinq.f32 %v1464_v13  ;;  %v8989_v7 = vmin.u32 %v1546_v24, %v11061_v27  ;;  %v1612_v39 = vor.u32 %v1611_v5, %v1610_v61  ;;  %v1614_v56 = vshrl.u32 %v15083_v14, %v1599_v34 }
 0x163   : > { %vm1616_vm1 = vcmp.lt.s32.totalorder %v1597_v30, 1  ;;  %v1566_v48 = vsub.s32 4, %v11046_v9  ;;  %vm1617_vm9 = vcmp.lt.s32.totalorder %v1597_v30, 2  ;;  %v319_v59 = vcvt.s32.f32 %v279_v47 }
 0x164   : > { %v1548_v3 = vclz %v8989_v7  ;;  %v1615_v13 = vor.u32 %v1614_v56, %v1613_v8  ;;  %vm1618_vm11 = vcmp.lt.s32.totalorder %v1597_v30, 3  ;;  %vm1619_vm7 = vcmp.lt.s32.totalorder %v1597_v30, 4 }
 0x165   : > { %v1620_v0 = vsel %vm1616_vm1, %v1600_v46, %v1603_v45  ;;  %v1621_v22 = vsel %vm1619_vm7, %v1609_v52, 2102212464  ;;  %v1624_v34 = vsel %vm1616_vm1, %v1603_v45, %v1606_v35  ;;  %v1625_v38 = vsel %vm1619_vm7, %v1612_v39, 920167782 }
 0x166   : > { %v8990_v5 = vadd.s32 4294967294, %v1548_v3  ;;  %v1622_v16 = vsel %vm1618_vm11, %v1606_v35, %v1621_v22  ;;  %v1626_v63 = vsel %vm1618_vm11, %v1609_v52, %v1625_v38  ;;  %v1628_v61 = vsel %vm1616_vm1, %v1606_v35, %v1609_v52 }
 0x167   : > { %v1629_v24 = vsel %vm1619_vm7, %v1615_v13, 1326507024  ;;  %v1623_v47 = vsel %vm1617_vm9, %v1620_v0, %v1622_v16  ;;  %v1627_v8 = vsel %vm1617_vm9, %v1624_v34, %v1626_v63  ;;  %v240_v52 = vadd.s32 %v9930_v2, %v11054_v53  ;;  %v11115_v0 = vld [vmem:[#allocation2] ss:$0 sm:$0xff] }
 0x168   : > { %vm8991_vm13 = vcmp.lt.s32.totalorder %v8990_v5, 0  ;;  %v1630_v7 = vsel %vm1618_vm11, %v1612_v39, %v1629_v24  ;;  %v11099_v3 = vmul.u32.u64.low %v11059_v43, %v1627_v8  ;;  %v11100_v57 = vmul.u32.u64.high %v11059_v43, %v1627_v8, %v11099_v3 }
 0x169   : > { %v1551_v56 = vsel %vm8991_vm13, 0, %v8990_v5  ;;  %v1631_v46 = vsel %vm1617_vm9, %v1628_v61, %v1630_v7  ;;  %v1567_v39 = vsel %vm1482_vm5, %v1566_v48, %v11046_v9  ;;  %v11118_v5 = vmul.f32 %v11115_v0, %v365_v12 }
 0x16a   : > { %v1552_v45 = vsub.s32 32, %v1551_v56  ;;  %v1553_v22 = vshll.u32 %v11061_v27, %v1551_v56  ;;  %v1556_v38 = vsub.s32 4294967266, %v1551_v56  ;;  %v1639_v63 = vmul.u32 %v11059_v43, %v1623_v47 }
 0x16b   : > { %v11106_v35 = vpop.eup %9542  ;;  %v11112_v30 = vmul.u32.u64.low %v11059_v43, %v1631_v46  ;;  %v11113_v13 = vmul.u32.u64.high %v11059_v43, %v1631_v46, %v11112_v30  ;;  %15107 = vst [vmem:[#allocation38_spill] sm:$0xff] %v11118_v5  ;;  %v1642_v48 = vadd.s32 1, %v11100_v57  ;;  %v14785_v61 = vand.u32 2147483647, %v11118_v5 }
 0x16c   : > { %15106 = vst [vmem:[#allocation37_spill] sm:$0xff] %v11106_v35  ;;  %v11120_v27 = vpop.eup %9544  ;;  %v14782_v34 = vxor.u32 2147483648, %v11106_v35  ;;  %v1554_v53 = vshrl.u32 %v11051_v10, %v1552_v45  ;;  %v1557_v16 = vadd.s32 127, %v1556_v38  ;;  %v366_v24 = vadd.f32 %v11078_v50, %v319_v59 }
 0x16d   : > { %15108 = vst [vmem:[#allocation39_spill] sm:$0xff] %v11120_v27  ;;  %v14783_v9 = vxor.u32 2147483648, %v11120_v27  ;;  %v1691_v7 = vand.u32 2139095040, %v11118_v5  ;;  %v15109_v47 = vand.u32 2147483647, %v10839_v62  ;;  %v280_v56 = vmul.u32 8, %v240_v52 }
 0x16e   : > { %v1477_v12 = vsel %vm1475_vm0, %v14782_v34, %v11120_v27  ;;  %v1555_v8 = vor.u32 %v1554_v53, %v1553_v22  ;;  %v1558_v10 = vshll.u32 %v1557_v16, 23  ;;  %vm1641_vm0 = vc.u32 %v11113_v13, %v11099_v3 }
 0x16f   : > { %v1474_v43 = vsel %vm1472_vm8, %v11106_v35, %v14783_v9  ;;  %vm11142_vm13 = vcmp.le.f32.partialorder %v15109_v47, 0.7853982  ;;  %v1643_v38 = vsel %vm1641_vm0, %v1642_v48, %v11100_v57  ;;  %v1692_v47 = vshrl.u32 %v1691_v7, 23 }
 0x170   : > { %v1478_v46 = vsel %vm1471_vm10, %v1474_v43, %v1477_v12  ;;  %v1559_v45 = vor.u32 4788187, %v1558_v10  ;;  %v1562_v22 = vcvt.s32.f32 %v1555_v8  ;;  %v11155_v53 = vsel %vm11142_vm13, 0, %v1567_v39 }
 0x171   : > { %v1479_v30 = vsel %vm14796_vm14, nan, %v1478_v46  ;;  %15112 = vst [vmem:[#allocation40_spill] sm:$0xff] %v11155_v53  ;;  %v1644_v16 = vadd.s32 %v1643_v38, %v1639_v63  ;;  %v1695_v52 = vand.u32 8388607, %v14785_v61  ;;  %v11161_v49 = vmul.f32 %v11115_v0, %v366_v24 }
 0x172   : > { %4609 = vst [vmem:[%s10284_s26 + $0x48] sm:$0xff] %v1479_v30  ;;  %v1560_v34 = vand.u32 2147483647, %v1559_v45  ;;  %v8996_v8 = vadd.s32 4294967169, %v1692_v47  ;;  %v1573_v48 = vadd.s32 3, %v11155_v53  ;;  %v320_v43 = vcvt.s32.f32 %v280_v56 }
 0x173   : > { %15113 = vst [vmem:[#allocation41_spill] sm:$0xff] %v11161_v49  ;;  %v1645_v12 = vadd.s32 536870912, %v1644_v16  ;;  %v1795_v10 = vand.u32 2139095040, %v11161_v49  ;;  %v14784_v63 = vand.u32 2147483647, %v11161_v49  ;;  %vm1586_vm1 = vcmp.lt.s32.totalorder %v10982_v20, 0 }
 0x174   : > { %v1563_v57 = vmul.f32 %v1562_v22, %v1560_v34  ;;  %v1698_v46 = vadd.s32 1, %v8996_v8  ;;  %v1696_v45 = vor.u32 8388608, %v1695_v52  ;;  %v11168_v30 = vadd.s32 120, %v9928_v1 }
 0x175   : > { %v1646_v39 = vshrl.u32 %v1645_v12, 30  ;;  %v1796_v24 = vshrl.u32 %v1795_v10, 23  ;;  %v11172_v22 = vand.u32 3, %v1573_v48  ;;  %v11175_v47 = vadd.f32 %v11078_v50, %v320_v43 }
 0x176   : > { %v1564_v7 = vxor.u32 2147483648, %v1563_v57  ;;  %vm1699_vm8 = vcmp.gt.s32.totalorder %v1698_v46, 0  ;;  %v11184_v10 = vand.u32 8388607, %v14784_v63  ;;  %vm1572_vm11 = vweird.f32 %v10839_v62 }
 0x177   : > { %v1647_v38 = vshll.u32 %v1646_v39, 30  ;;  %v1700_v56 = vsel %vm1699_vm8, %v1698_v46, 0  ;;  %v1670_v8 = vsub.s32 4, %v1646_v39  ;;  %v11188_v46 = vshll.u32 %v1696_v45, 8 }
 0x178   : > { %v1565_v34 = vsel %vm1482_vm5, %v1564_v7, %v1563_v57  ;;  %v1640_v57 = vadd.s32 %v11099_v3, %v11113_v13  ;;  %v1702_v48 = vand.u32 31, %v1700_v56  ;;  %v11191_v7 = vshrl.u32 %v1700_v56, 5 }
 0x179   : > { %v1568_v12 = vsel %vm11142_vm13, %v10839_v62, %v1565_v34  ;;  %v11180_v52 = vsub.s32 %v1644_v16, %v1647_v38  ;;  %v9000_v59 = vadd.s32 4294967169, %v1796_v24  ;;  %vm1579_vm5 = vcmp.eq.s32.totalorder %v11172_v22, 2 }
 0x17a   : > { %9546 = vcosq.f32 %v1568_v12  ;;  %v1703_v16 = vsub.s32 32, %v1702_v48  ;;  %v1705_v38 = vshll.u32 %v15077_v11, %v1702_v48  ;;  %v1708_v34 = vshll.u32 %v15078_v28, %v1702_v48 }
 0x17b   : > { %9548 = vsinq.f32 %v1568_v12  ;;  %v1650_v43 = vsub.s32 0, %v11180_v52  ;;  %v1711_v9 = vshll.u32 %v15079_v54, %v1702_v48  ;;  %vm1576_vm9 = vcmp.eq.s32.totalorder %v11172_v22, 0 }
 0x17c   : > { %v1671_v13 = vsel %vm1586_vm1, %v1670_v8, %v1646_v39  ;;  %v1714_v45 = vshll.u32 %v15080_v21, %v1702_v48  ;;  %vm1575_vm10 = vcmp.lt.s32.totalorder %v11172_v22, 2  ;;  %v1704_v56 = vshrl.u32 %v15077_v11, %v1703_v16 }
 0x17d   : > { %v8993_v3 = vmin.u32 %v1650_v43, %v11180_v52  ;;  %v1706_v12 = vshrl.u32 %v15078_v28, %v1703_v16  ;;  %v1709_v63 = vshrl.u32 %v15079_v54, %v1703_v16  ;;  %v1712_v61 = vshrl.u32 %v15080_v21, %v1703_v16 }
 0x17e   : > { %v1717_v55 = vshll.u32 %v15082_v23, %v1702_v48  ;;  %vm1720_vm7 = vcmp.lt.s32.totalorder %v11191_v7, 1  ;;  %v1802_v39 = vadd.s32 1, %v9000_v59  ;;  %v1715_v27 = vshrl.u32 %v15082_v23, %v1703_v16 }
 0x17f   : > { %v1652_v43 = vclz %v8993_v3  ;;  %v1707_v8 = vor.u32 %v1706_v12, %v1705_v38  ;;  %v1710_v24 = vor.u32 %v1709_v63, %v1708_v34  ;;  %v1713_v35 = vor.u32 %v1712_v61, %v1711_v9 }
 0x180   : > { %v15114_v53 = vand.u32 2147483647, %v10982_v20  ;;  %v1718_v32 = vshrl.u32 %v15083_v14, %v1703_v16  ;;  %vm1721_vm0 = vcmp.lt.s32.totalorder %v11191_v7, 2  ;;  %vm1722_vm8 = vcmp.lt.s32.totalorder %v11191_v7, 3 }
 0x181   : > { %v8994_v4 = vadd.s32 4294967294, %v1652_v43  ;;  %v1716_v48 = vor.u32 %v1715_v27, %v1714_v45  ;;  %vm1723_vm14 = vcmp.lt.s32.totalorder %v11191_v7, 4  ;;  %v1724_v9 = vsel %vm1720_vm7, %v1704_v56, %v1707_v8 }
 0x182   : > { %vm11214_vm13 = vcmp.le.f32.partialorder %v15114_v53, 0.7853982  ;;  %v1728_v61 = vsel %vm1720_vm7, %v1707_v8, %v1710_v24  ;;  %v1719_v53 = vor.u32 %v1718_v32, %v1717_v55  ;;  %v1725_v63 = vsel %vm1723_vm14, %v1713_v35, 2102212464 }
 0x183   : > { %vm8995_vm6 = vcmp.lt.s32.totalorder %v8994_v4, 0  ;;  %v1732_v59 = vsel %vm1720_vm7, %v1710_v24, %v1713_v35  ;;  %v1726_v27 = vsel %vm1722_vm8, %v1710_v24, %v1725_v63  ;;  %v1729_v34 = vsel %vm1723_vm14, %v1716_v48, 920167782 }
 0x184   : > { %v11230_v16 = vpop.eup %9546  ;;  %v1655_v38 = vsel %vm8995_vm6, 0, %v8994_v4  ;;  %vm1803_vm3 = vcmp.gt.s32.totalorder %v1802_v39, 0  ;;  %v1727_v4 = vsel %vm1721_vm0, %v1724_v9, %v1726_v27  ;;  %v1730_v24 = vsel %vm1722_vm8, %v1713_v35, %v1729_v34 }
 0x185   : > { %15117 = vst [vmem:[#allocation42_spill] sm:$0xff] %v11230_v16  ;;  %v11236_v3 = vpop.eup %9548  ;;  %v14799_v55 = vxor.u32 2147483648, %v11230_v16  ;;  %v1656_v32 = vsub.s32 32, %v1655_v38  ;;  %v1657_v45 = vshll.u32 %v11180_v52, %v1655_v38  ;;  %v1660_v56 = vsub.s32 4294967266, %v1655_v38 }
 0x186   : > { %15118 = vst [vmem:[#allocation43_spill] sm:$0xff] %v11236_v3  ;;  %v14800_v12 = vxor.u32 2147483648, %v11236_v3  ;;  %v1733_v43 = vsel %vm1723_vm14, %v1719_v53, 1326507024  ;;  %v1731_v38 = vsel %vm1721_vm0, %v1728_v61, %v1730_v24  ;;  %v11274_v24 = vsel %vm11214_vm13, 0, %v1671_v13 }
 0x187   : > { %v1581_v8 = vsel %vm1579_vm5, %v14799_v55, %v11236_v3  ;;  %v1658_v52 = vshrl.u32 %v1640_v57, %v1656_v32  ;;  %v1661_v63 = vadd.s32 127, %v1660_v56  ;;  %v1734_v9 = vsel %vm1722_vm8, %v1716_v48, %v1733_v43  ;;  %15119 = vst [vmem:[#allocation44_spill] sm:$0xff] %v11274_v24 }
 0x188   : > { %v1578_v35 = vsel %vm1576_vm9, %v11230_v16, %v14800_v12  ;;  %v11262_v53 = vmul.u32.u64.low %v11188_v46, %v1731_v38  ;;  %v11263_v27 = vmul.u32.u64.high %v11188_v46, %v1731_v38, %v11262_v53  ;;  %v1735_v61 = vsel %vm1721_vm0, %v1732_v59, %v1734_v9 }
 0x189   : > { %v1582_v57 = vsel %vm1575_vm10, %v1578_v35, %v1581_v8  ;;  %v1659_v34 = vor.u32 %v1658_v52, %v1657_v45  ;;  %v1662_v32 = vshll.u32 %v1661_v63, 23  ;;  %v1804_v45 = vsel %vm1803_vm3, %v1802_v39, 0 }
 0x18a   : > { %v1583_v56 = vsel %vm1572_vm11, nan, %v1582_v57  ;;  %v11277_v48 = vmul.u32.u64.low %v11188_v46, %v1735_v61  ;;  %v11278_v43 = vmul.u32.u64.high %v11188_v46, %v1735_v61, %v11277_v48  ;;  %v1743_v8 = vmul.u32 %v11188_v46, %v1727_v4 }
 0x18b   : > { %4610 = vst [vmem:[%s10284_s26 + $0x50] sm:$0xff] %v1583_v56  ;;  %v1663_v38 = vor.u32 4788187, %v1662_v32  ;;  %v1666_v22 = vcvt.s32.f32 %v1659_v34  ;;  %v1746_v7 = vadd.s32 1, %v11263_v27  ;;  %v1806_v59 = vand.u32 31, %v1804_v45 }
 0x18c   : > { %v1677_v63 = vadd.s32 3, %v11274_v24  ;;  %v11287_v13 = vmul.f32 %v11115_v0, %v11175_v47  ;;  %v11291_v35 = vadd.s32 %v9930_v2, %v11168_v30  ;;  %vm1745_vm6 = vc.u32 %v11278_v43, %v11262_v53 }
 0x18d   : > { %v1664_v52 = vand.u32 2147483647, %v1663_v38  ;;  %v1807_v39 = vsub.s32 32, %v1806_v59  ;;  %v1809_v46 = vshll.u32 %v15077_v11, %v1806_v59  ;;  %v15121_v4 = vor.u32 8388608, %v11184_v10 }
 0x18e   : > { %15120 = vst [vmem:[#allocation45_spill] sm:$0xff] %v11287_v13  ;;  %v1747_v34 = vsel %vm1745_vm6, %v1746_v7, %v11263_v27  ;;  %v1805_v32 = vshrl.u32 %v1804_v45, 5  ;;  %v1812_v47 = vshll.u32 %v15078_v28, %v1806_v59  ;;  %v1815_v48 = vshll.u32 %v15079_v54, %v1806_v59 }
 0x18f   : > { %v11298_v9 = vshll.u32 %v15121_v4, 8  ;;  %v1667_v57 = vmul.f32 %v1666_v22, %v1664_v52  ;;  %v1748_v61 = vadd.s32 %v1747_v34, %v1743_v8  ;;  %v1810_v30 = vshrl.u32 %v15078_v28, %v1807_v39 }
 0x190   : > { %v1813_v56 = vshrl.u32 %v15079_v54, %v1807_v39  ;;  %v1816_v55 = vshrl.u32 %v15080_v21, %v1807_v39  ;;  %v1818_v10 = vshll.u32 %v15080_v21, %v1806_v59  ;;  %v1819_v4 = vshrl.u32 %v15082_v23, %v1807_v39 }
 0x191   : > { %v1668_v38 = vxor.u32 2147483648, %v1667_v57  ;;  %v1749_v22 = vadd.s32 536870912, %v1748_v61  ;;  %v1808_v27 = vshrl.u32 %v15077_v11, %v1807_v39  ;;  %v1811_v45 = vor.u32 %v1810_v30, %v1809_v46 }
 0x192   : > { %v1821_v7 = vshll.u32 %v15082_v23, %v1806_v59  ;;  %v1814_v52 = vor.u32 %v1813_v56, %v1812_v47  ;;  %v1820_v34 = vor.u32 %v1819_v4, %v1818_v10  ;;  %v1822_v12 = vshrl.u32 %v15083_v14, %v1807_v39 }
 0x193   : > { %v1669_v8 = vsel %vm1586_vm1, %v1668_v38, %v1667_v57  ;;  %v1750_v16 = vshrl.u32 %v1749_v22, 30  ;;  %v1817_v3 = vor.u32 %v1816_v55, %v1815_v48  ;;  %vm1824_vm3 = vcmp.lt.s32.totalorder %v1805_v32, 1 }
 0x194   : > { %v1672_v62 = vsel %vm11214_vm13, %v10982_v20, %v1669_v8  ;;  %v1823_v24 = vor.u32 %v1822_v12, %v1821_v7  ;;  %vm1826_vm14 = vcmp.lt.s32.totalorder %v1805_v32, 3  ;;  %vm1827_vm5 = vcmp.lt.s32.totalorder %v1805_v32, 4 }
 0x195   : > { %9550 = vcosq.f32 %v1672_v62  ;;  %v1751_v59 = vshll.u32 %v1750_v16, 30  ;;  %vm1825_vm9 = vcmp.lt.s32.totalorder %v1805_v32, 2  ;;  %v1899_v46 = vand.u32 2139095040, %v11287_v13 }
 0x196   : > { %9552 = vsinq.f32 %v1672_v62  ;;  %v1828_v57 = vsel %vm1824_vm3, %v1808_v27, %v1811_v45  ;;  %v1829_v47 = vsel %vm1827_vm5, %v1817_v3, 2102212464  ;;  %v1832_v39 = vsel %vm1824_vm3, %v1811_v45, %v1814_v52 }
 0x197   : > { %v1833_v30 = vsel %vm1827_vm5, %v1820_v34, 920167782  ;;  %v11319_v60 = vsub.s32 %v1748_v61, %v1751_v59  ;;  %v1830_v55 = vsel %vm1826_vm14, %v1814_v52, %v1829_v47  ;;  %v1836_v12 = vsel %vm1824_vm3, %v1814_v52, %v1817_v3 }
 0x198   : > { %v1834_v56 = vsel %vm1826_vm14, %v1817_v3, %v1833_v30  ;;  %v1837_v48 = vsel %vm1827_vm5, %v1823_v24, 1326507024  ;;  %v14809_v38 = vand.u32 2147483647, %v11287_v13  ;;  %v281_v10 = vmul.u32 8, %v11291_v35 }
 0x199   : > { %v1835_v62 = vsel %vm1825_vm9, %v1832_v39, %v1834_v56  ;;  %v1678_v4 = vand.u32 3, %v1677_v63  ;;  %v1754_v22 = vsub.s32 0, %v11319_v60  ;;  %v1831_v27 = vsel %vm1825_vm9, %v1828_v57, %v1830_v55 }
 0x19a   : > { %v1838_v61 = vsel %vm1826_vm14, %v1820_v34, %v1837_v48  ;;  %v11332_v7 = vmul.u32.u64.low %v11298_v9, %v1835_v62  ;;  %v11333_v8 = vmul.u32.u64.high %v11298_v9, %v1835_v62, %v11332_v7  ;;  %v1900_v3 = vshrl.u32 %v1899_v46, 23 }
 0x19b   : > { %v1839_v45 = vsel %vm1825_vm9, %v1836_v12, %v1838_v61  ;;  %vm14821_vm1 = vweird.f32 %v10982_v20  ;;  %v8997_v24 = vmin.u32 %v1754_v22, %v11319_v60  ;;  %vm1690_vm10 = vcmp.lt.s32.totalorder %v11118_v5, 0 }
 0x19c   : > { %v11339_v63 = vmul.u32.u64.low %v11298_v9, %v1839_v45  ;;  %v11340_v35 = vmul.u32.u64.high %v11298_v9, %v1839_v45, %v11339_v63  ;;  %v1774_v52 = vsub.s32 4, %v1750_v16  ;;  %v9004_v34 = vadd.s32 4294967169, %v1900_v3 }
 0x19d   : > { %v321_v32 = vcvt.s32.f32 %v281_v10  ;;  %vm1679_vm7 = vcmp.lt.s32.totalorder %v1678_v4, 2  ;;  %vm1680_vm13 = vcmp.eq.s32.totalorder %v1678_v4, 0  ;;  %v1756_v59 = vclz %v8997_v24 }
 0x19e   : > { %v1847_v57 = vmul.u32 %v11298_v9, %v1831_v27  ;;  %vm1683_vm0 = vcmp.eq.s32.totalorder %v1678_v4, 2  ;;  %v1850_v46 = vadd.s32 1, %v11333_v8  ;;  %v1903_v39 = vand.u32 8388607, %v14809_v38 }
 0x19f   : > { %v11344_v47 = vpop.eup %9550  ;;  %v1906_v30 = vadd.s32 1, %v9004_v34  ;;  %v1744_v12 = vadd.s32 %v11262_v53, %v11278_v43  ;;  %v8998_v62 = vadd.s32 4294967294, %v1756_v59  ;;  %vm1849_vm8 = vc.u32 %v11340_v35, %v11332_v7 }
 0x1a0   : > { %15122 = vst [vmem:[#allocation46_spill] sm:$0xff] %v11344_v47  ;;  %v11349_v55 = vpop.eup %9552  ;;  %v14807_v56 = vxor.u32 2147483648, %v11344_v47  ;;  %v1775_v48 = vsel %vm1690_vm10, %v1774_v52, %v1750_v16  ;;  %v1851_v10 = vsel %vm1849_vm8, %v1850_v46, %v11333_v8  ;;  %v15124_v61 = vand.u32 2147483647, %v11118_v5 }
 0x1a1   : > { %15123 = vst [vmem:[#allocation47_spill] sm:$0xff] %v11349_v55  ;;  %v14808_v9 = vxor.u32 2147483648, %v11349_v55  ;;  %vm1907_vm6 = vcmp.gt.s32.totalorder %v1906_v30, 0  ;;  %vm8999_vm3 = vcmp.lt.s32.totalorder %v8998_v62, 0  ;;  %v1852_v27 = vadd.s32 %v1851_v10, %v1847_v57 }
 0x1a2   : > { %v1685_v22 = vsel %vm1683_vm0, %v14807_v56, %v11349_v55  ;;  %v1908_v53 = vsel %vm1907_vm6, %v1906_v30, 0  ;;  %vm11369_vm14 = vcmp.le.f32.partialorder %v15124_v61, 0.7853982  ;;  %v1759_v45 = vsel %vm8999_vm3, 0, %v8998_v62 }
 0x1a3   : > { %v1682_v43 = vsel %vm1680_vm13, %v11344_v47, %v14808_v9  ;;  %v1910_v8 = vand.u32 31, %v1908_v53  ;;  %v1760_v24 = vsub.s32 32, %v1759_v45  ;;  %v1761_v63 = vshll.u32 %v11319_v60, %v1759_v45 }
 0x1a4   : > { %v1686_v3 = vsel %vm1679_vm7, %v1682_v43, %v1685_v22  ;;  %v1764_v52 = vsub.s32 4294967266, %v1759_v45  ;;  %v11379_v59 = vsel %vm11369_vm14, 0, %v1775_v48  ;;  %v1853_v57 = vadd.s32 536870912, %v1852_v27 }
 0x1a5   : > { %v1687_v34 = vsel %vm14821_vm1, nan, %v1686_v3  ;;  %15127 = vst [vmem:[#allocation48_spill] sm:$0xff] %v11379_v59  ;;  %v1911_v46 = vsub.s32 32, %v1910_v8  ;;  %v1762_v30 = vshrl.u32 %v1744_v12, %v1760_v24  ;;  %v1904_v62 = vor.u32 8388608, %v1903_v39 }
 0x1a6   : > { %4611 = vst [vmem:[%s10284_s26 + $0x58] sm:$0xff] %v1687_v34  ;;  %v1765_v10 = vadd.s32 127, %v1764_v52  ;;  %v368_v4 = vadd.f32 %v11078_v50, %v321_v32  ;;  %v11383_v22 = vshrl.u32 %v1853_v57, 30  ;;  %v1913_v60 = vshll.u32 %v15077_v11, %v1910_v8 }
 0x1a7   : > { %v1914_v43 = vshrl.u32 %v15078_v28, %v1911_v46  ;;  %v1916_v61 = vshll.u32 %v15078_v28, %v1910_v8  ;;  %v1763_v45 = vor.u32 %v1762_v30, %v1761_v63  ;;  %v1917_v48 = vshrl.u32 %v15079_v54, %v1911_v46 }
 0x1a8   : > { %v1766_v3 = vshll.u32 %v1765_v10, 23  ;;  %v1922_v56 = vshll.u32 %v15080_v21, %v1910_v8  ;;  %v1855_v12 = vshll.u32 %v11383_v22, 30  ;;  %v1909_v24 = vshrl.u32 %v1908_v53, 5 }
 0x1a9   : > { %v1919_v39 = vshll.u32 %v15079_v54, %v1910_v8  ;;  %v1920_v32 = vshrl.u32 %v15080_v21, %v1911_v46  ;;  %v1770_v34 = vcvt.s32.f32 %v1763_v45  ;;  %v1923_v57 = vshrl.u32 %v15082_v23, %v1911_v46 }
 0x1aa   : > { %v1767_v52 = vor.u32 4788187, %v1766_v3  ;;  %v11394_v9 = vshll.u32 %v1904_v62, 8  ;;  %v11396_v38 = vsub.s32 %v1852_v27, %v1855_v12  ;;  %v1912_v63 = vshrl.u32 %v15077_v11, %v1911_v46 }
 0x1ab   : > { %v1925_v30 = vshll.u32 %v15082_v23, %v1910_v8  ;;  %v1926_v10 = vshrl.u32 %v15083_v14, %v1911_v46  ;;  %v1915_v53 = vor.u32 %v1914_v43, %v1913_v60  ;;  %v1918_v47 = vor.u32 %v1917_v48, %v1916_v61 }
 0x1ac   : > { %v1768_v20 = vand.u32 2147483647, %v1767_v52  ;;  %v1924_v55 = vor.u32 %v1923_v57, %v1922_v56  ;;  %v1858_v36 = vsub.s32 0, %v11396_v38  ;;  %v1921_v3 = vor.u32 %v1920_v32, %v1919_v39 }
 0x1ad   : > { %vm1928_vm5 = vcmp.lt.s32.totalorder %v1909_v24, 1  ;;  %v11403_v45 = vmul.f32 %v11115_v0, %v368_v4  ;;  %v1927_v27 = vor.u32 %v1926_v10, %v1925_v30  ;;  %vm1929_vm9 = vcmp.lt.s32.totalorder %v1909_v24, 2 }
 0x1ae   : > { %v1771_v62 = vmul.f32 %v1770_v34, %v1768_v20  ;;  %vm1931_vm7 = vcmp.lt.s32.totalorder %v1909_v24, 4  ;;  %v9001_v12 = vmin.u32 %v1858_v36, %v11396_v38  ;;  %vm1930_vm13 = vcmp.lt.s32.totalorder %v1909_v24, 3 }
 0x1af   : > { %15128 = vst [vmem:[#allocation49_spill] sm:$0xff] %v11403_v45  ;;  %v1932_v8 = vsel %vm1928_vm5, %v1912_v63, %v1915_v53  ;;  %v1933_v46 = vsel %vm1931_vm7, %v1921_v3, 2102212464  ;;  %v1936_v43 = vsel %vm1928_vm5, %v1915_v53, %v1918_v47  ;;  %v1937_v61 = vsel %vm1931_vm7, %v1924_v55, 920167782 }
 0x1b0   : > { %v1772_v60 = vxor.u32 2147483648, %v1771_v62  ;;  %v1934_v56 = vsel %vm1930_vm13, %v1918_v47, %v1933_v46  ;;  %v1848_v20 = vadd.s32 %v11332_v7, %v11340_v35  ;;  %v1860_v4 = vclz %v9001_v12 }
 0x1b1   : > { %v1878_v48 = vsub.s32 4, %v11383_v22  ;;  %v1940_v36 = vsel %vm1928_vm5, %v1918_v47, %v1921_v3  ;;  %v1935_v32 = vsel %vm1929_vm9, %v1932_v8, %v1934_v56  ;;  %v1938_v52 = vsel %vm1930_vm13, %v1921_v3, %v1937_v61 }
 0x1b2   : > { %v1773_v39 = vsel %vm1690_vm10, %v1772_v60, %v1771_v62  ;;  %v1941_v34 = vsel %vm1931_vm7, %v1927_v27, 1326507024  ;;  %v9002_v63 = vadd.s32 4294967294, %v1860_v4  ;;  %v1939_v7 = vsel %vm1929_vm9, %v1936_v43, %v1938_v52 }
 0x1b3   : > { %v1776_v57 = vsel %vm11369_vm14, %v11118_v5, %v1773_v39  ;;  %v1942_v35 = vsel %vm1930_vm13, %v1924_v55, %v1941_v34  ;;  %v11427_v30 = vmul.u32.u64.low %v11394_v9, %v1939_v7  ;;  %v11428_v10 = vmul.u32.u64.high %v11394_v9, %v1939_v7, %v11427_v30 }
 0x1b4   : > { %9554 = vcosq.f32 %v1776_v57  ;;  %v1943_v47 = vsel %vm1929_vm9, %v1940_v36, %v1942_v35  ;;  %vm9003_vm10 = vcmp.lt.s32.totalorder %v9002_v63, 0  ;;  %v1781_v16 = vadd.s32 3, %v11379_v59 }
 0x1b5   : > { %9556 = vsinq.f32 %v1776_v57  ;;  %v11432_v53 = vmul.u32.u64.low %v11394_v9, %v1943_v47  ;;  %v11433_v3 = vmul.u32.u64.high %v11394_v9, %v1943_v47, %v11432_v53  ;;  %v1863_v62 = vsel %vm9003_vm10, 0, %v9002_v63 }
 0x1b6   : > { %v1951_v27 = vmul.u32 %v11394_v9, %v1935_v32  ;;  %v1864_v55 = vsub.s32 32, %v1863_v62  ;;  %v1865_v24 = vshll.u32 %v11396_v38, %v1863_v62  ;;  %v1868_v12 = vsub.s32 4294967266, %v1863_v62 }
 0x1b7   : > { %v2003_v8 = vand.u32 2139095040, %v11403_v45  ;;  %vm1794_vm0 = vcmp.lt.s32.totalorder %v11161_v49, 0  ;;  %v1954_v46 = vadd.s32 1, %v11428_v10  ;;  %v14819_v60 = vand.u32 2147483647, %v11403_v45 }
 0x1b8   : > { %v200_v56 = vadd.s32 128, %v9928_v1  ;;  %v1866_v43 = vshrl.u32 %v1848_v20, %v1864_v55  ;;  %v1869_v61 = vadd.s32 127, %v1868_v12  ;;  %v1879_v9 = vsel %vm1794_vm0, %v1878_v48, %v11383_v22 }
 0x1b9   : > { %vm1953_vm8 = vc.u32 %v11433_v3, %v11427_v30  ;;  %v1782_v38 = vand.u32 3, %v1781_v16  ;;  %v2004_v36 = vshrl.u32 %v2003_v8, 23  ;;  %v15129_v32 = vand.u32 2147483647, %v11161_v49 }
 0x1ba   : > { %v1955_v4 = vsel %vm1953_vm8, %v1954_v46, %v11428_v10  ;;  %v242_v39 = vadd.s32 %v9930_v2, %v200_v56  ;;  %v1867_v20 = vor.u32 %v1866_v43, %v1865_v24  ;;  %v1870_v34 = vshll.u32 %v1869_v61, 23 }
 0x1bb   : > { %vm11452_vm6 = vcmp.le.f32.partialorder %v15129_v32, 0.7853982  ;;  %v1956_v57 = vadd.s32 %v1955_v4, %v1951_v27  ;;  %vm14820_vm3 = vweird.f32 %v11118_v5  ;;  %v9008_v48 = vadd.s32 4294967169, %v2004_v36 }
 0x1bc   : > { %v11459_v22 = vsel %vm11452_vm6, 0, %v1879_v9  ;;  %v2007_v63 = vand.u32 8388607, %v14819_v60  ;;  %v1871_v7 = vor.u32 4788187, %v1870_v34  ;;  %v1874_v35 = vcvt.s32.f32 %v1867_v20 }
 0x1bd   : > { %15132 = vst [vmem:[#allocation50_spill] sm:$0xff] %v11459_v22  ;;  %v1957_v47 = vadd.s32 536870912, %v1956_v57  ;;  %v282_v10 = vmul.u32 8, %v242_v39  ;;  %vm1783_vm14 = vcmp.lt.s32.totalorder %v1782_v38, 2  ;;  %vm1784_vm5 = vcmp.eq.s32.totalorder %v1782_v38, 0 }
 0x1be   : > { %v11463_v53 = vpop.eup %9554  ;;  %vm1787_vm9 = vcmp.eq.s32.totalorder %v1782_v38, 2  ;;  %v2010_v16 = vadd.s32 1, %v9008_v48  ;;  %v1872_v55 = vand.u32 2147483647, %v1871_v7  ;;  %v1885_v24 = vadd.s32 3, %v11459_v22 }
 0x1bf   : > { %15133 = vst [vmem:[#allocation51_spill] sm:$0xff] %v11463_v53  ;;  %v11465_v62 = vpop.eup %9556  ;;  %v14817_v27 = vxor.u32 2147483648, %v11463_v53  ;;  %v1958_v12 = vshrl.u32 %v1957_v47, 30  ;;  %v2008_v46 = vor.u32 8388608, %v2007_v63  ;;  %v201_v56 = vadd.s32 136, %v9928_v1 }
 0x1c0   : > { %15134 = vst [vmem:[#allocation52_spill] sm:$0xff] %v11465_v62  ;;  %v14818_v8 = vxor.u32 2147483648, %v11465_v62  ;;  %vm2011_vm7 = vcmp.gt.s32.totalorder %v2010_v16, 0  ;;  %v1875_v61 = vmul.f32 %v1874_v35, %v1872_v55  ;;  %v322_v4 = vcvt.s32.f32 %v282_v10 }
 0x1c1   : > { %v1789_v43 = vsel %vm1787_vm9, %v14817_v27, %v11465_v62  ;;  %v1959_v9 = vshll.u32 %v1958_v12, 30  ;;  %v2012_v39 = vsel %vm2011_vm7, %v2010_v16, 0  ;;  %v11479_v34 = vand.u32 3, %v1885_v24 }
 0x1c2   : > { %v1786_v36 = vsel %vm1784_vm5, %v11463_v53, %v14818_v8  ;;  %v1876_v20 = vxor.u32 2147483648, %v1875_v61  ;;  %vm1898_vm13 = vcmp.lt.s32.totalorder %v11287_v13, 0  ;;  %v1952_v7 = vadd.s32 %v11427_v30, %v11433_v3 }
 0x1c3   : > { %v1790_v32 = vsel %vm1783_vm14, %v1786_v36, %v1789_v43  ;;  %v11482_v48 = vsub.s32 %v1956_v57, %v1959_v9  ;;  %v2014_v35 = vand.u32 31, %v2012_v39  ;;  %v11488_v47 = vshll.u32 %v2008_v46, 8 }
 0x1c4   : > { %v1791_v63 = vsel %vm14820_vm3, nan, %v1790_v32  ;;  %v1877_v38 = vsel %vm1794_vm0, %v1876_v20, %v1875_v61  ;;  %v369_v16 = vadd.f32 %v11078_v50, %v322_v4  ;;  %v243_v57 = vadd.s32 %v9930_v2, %v201_v56 }
 0x1c5   : > { %4612 = vst [vmem:[%s10284_s26 + $0x60] sm:$0xff] %v1791_v63  ;;  %v1962_v10 = vsub.s32 0, %v11482_v48  ;;  %v1880_v55 = vsel %vm11452_vm6, %v11161_v49, %v1877_v38  ;;  %v2015_v24 = vsub.s32 32, %v2014_v35  ;;  %v2017_v30 = vshll.u32 %v15077_v11, %v2014_v35 }
 0x1c6   : > { %v2020_v3 = vshll.u32 %v15078_v28, %v2014_v35  ;;  %9558 = vcosq.f32 %v1880_v55  ;;  %v1982_v43 = vsub.s32 4, %v1958_v12  ;;  %v2013_v61 = vshrl.u32 %v2012_v39, 5 }
 0x1c7   : > { %v9005_v46 = vmin.u32 %v1962_v10, %v11482_v48  ;;  %9560 = vsinq.f32 %v1880_v55  ;;  %v2018_v9 = vshrl.u32 %v15078_v28, %v2015_v24  ;;  %v2021_v4 = vshrl.u32 %v15079_v54, %v2015_v24 }
 0x1c8   : > { %v2023_v56 = vshll.u32 %v15079_v54, %v2014_v35  ;;  %vm1891_vm10 = vcmp.eq.s32.totalorder %v11479_v34, 2  ;;  %v15135_v52 = vand.u32 2147483647, %v11287_v13  ;;  %v2016_v20 = vshrl.u32 %v15077_v11, %v2015_v24 }
 0x1c9   : > { %v1964_v32 = vclz %v9005_v46  ;;  %v11514_v39 = vmul.f32 %v11115_v0, %v369_v16  ;;  %v283_v63 = vmul.u32 8, %v243_v57  ;;  %vm1888_vm8 = vcmp.eq.s32.totalorder %v11479_v34, 0 }
 0x1ca   : > { %vm11508_vm0 = vcmp.le.f32.partialorder %v15135_v52, 0.7853982  ;;  %v2019_v38 = vor.u32 %v2018_v9, %v2017_v30  ;;  %v2022_v10 = vor.u32 %v2021_v4, %v2020_v3  ;;  %v2024_v55 = vshrl.u32 %v15080_v21, %v2015_v24 }
 0x1cb   : > { %15138 = vst [vmem:[#allocation53_spill] sm:$0xff] %v11514_v39  ;;  %v2026_v27 = vshll.u32 %v15080_v21, %v2014_v35  ;;  %vm1887_vm6 = vcmp.lt.s32.totalorder %v11479_v34, 2  ;;  %v9006_v52 = vadd.s32 4294967294, %v1964_v32  ;;  %v2027_v8 = vshrl.u32 %v15082_v23, %v2015_v24 }
 0x1cc   : > { %v2029_v46 = vshll.u32 %v15082_v23, %v2014_v35  ;;  %v2030_v60 = vshrl.u32 %v15083_v14, %v2015_v24  ;;  %vm14891_vm14 = vweird.f32 %v11161_v49  ;;  %v1983_v16 = vsel %vm1898_vm13, %v1982_v43, %v1958_v12 }
 0x1cd   : > { %v2025_v57 = vor.u32 %v2024_v55, %v2023_v56  ;;  %vm2032_vm5 = vcmp.lt.s32.totalorder %v2013_v61, 1  ;;  %vm2033_vm9 = vcmp.lt.s32.totalorder %v2013_v61, 2  ;;  %vm9007_vm7 = vcmp.lt.s32.totalorder %v9006_v52, 0 }
 0x1ce   : > { %v2028_v30 = vor.u32 %v2027_v8, %v2026_v27  ;;  %v2031_v3 = vor.u32 %v2030_v60, %v2029_v46  ;;  %vm2035_vm3 = vcmp.lt.s32.totalorder %v2013_v61, 4  ;;  %v1967_v9 = vsel %vm9007_vm7, 0, %v9006_v52 }
 0x1cf   : > { %vm2034_vm1 = vcmp.lt.s32.totalorder %v2013_v61, 3  ;;  %v2036_v4 = vsel %vm2032_vm5, %v2016_v20, %v2019_v38  ;;  %v2037_v32 = vsel %vm2035_vm3, %v2025_v57, 2102212464  ;;  %v1968_v35 = vsub.s32 32, %v1967_v9 }
 0x1d0   : > { %v1969_v24 = vshll.u32 %v11482_v48, %v1967_v9  ;;  %v1972_v5 = vsub.s32 4294967266, %v1967_v9  ;;  %v2040_v22 = vsel %vm2032_vm5, %v2019_v38, %v2022_v10  ;;  %v2038_v53 = vsel %vm2034_vm1, %v2022_v10, %v2037_v32  ;;  %v11530_v55 = vpop.eup %9558 }
 0x1d1   : > { %v2041_v12 = vsel %vm2035_vm3, %v2028_v30, 920167782  ;;  %v2044_v43 = vsel %vm2032_vm5, %v2022_v10, %v2025_v57  ;;  %v2045_v56 = vsel %vm2035_vm3, %v2031_v3, 1326507024  ;;  %15139 = vst [vmem:[#allocation54_spill] sm:$0xff] %v11530_v55  ;;  %v1970_v60 = vshrl.u32 %v1952_v7, %v1968_v35  ;;  %v11532_v46 = vpop.eup %9560 }
 0x1d2   : > { %v1973_v27 = vadd.s32 127, %v1972_v5  ;;  %v2042_v8 = vsel %vm2034_vm1, %v2025_v57, %v2041_v12  ;;  %v2046_v52 = vsel %vm2034_vm1, %v2028_v30, %v2045_v56  ;;  %15140 = vst [vmem:[#allocation55_spill] sm:$0xff] %v11532_v46  ;;  %v14826_v20 = vxor.u32 2147483648, %v11530_v55 }
 0x1d3   : > { %v11537_v48 = vsel %vm11508_vm0, 0, %v1983_v16  ;;  %v2047_v38 = vsel %vm2033_vm9, %v2044_v43, %v2046_v52  ;;  %v323_v9 = vcvt.s32.f32 %v283_v63  ;;  %v14827_v10 = vxor.u32 2147483648, %v11532_v46 }
 0x1d4   : > { %15141 = vst [vmem:[#allocation56_spill] sm:$0xff] %v11537_v48  ;;  %v1971_v3 = vor.u32 %v1970_v60, %v1969_v24  ;;  %v1974_v32 = vshll.u32 %v1973_v27, 23  ;;  %v2043_v5 = vsel %vm2033_vm9, %v2040_v22, %v2042_v8  ;;  %v1893_v7 = vsel %vm1891_vm10, %v14826_v20, %v11532_v46 }
 0x1d5   : > { %v2039_v57 = vsel %vm2033_vm9, %v2036_v4, %v2038_v53  ;;  %v11549_v16 = vmul.u32.u64.low %v11488_v47, %v2047_v38  ;;  %v11550_v30 = vmul.u32.u64.high %v11488_v47, %v2047_v38, %v11549_v16  ;;  %v1890_v63 = vsel %vm1888_vm8, %v11530_v55, %v14827_v10 }
 0x1d6   : > { %v1975_v35 = vor.u32 4788187, %v1974_v32  ;;  %v1978_v22 = vcvt.s32.f32 %v1971_v3  ;;  %v2107_v24 = vand.u32 2139095040, %v11514_v39  ;;  %v1894_v12 = vsel %vm1887_vm6, %v1890_v63, %v1893_v7 }
 0x1d7   : > { %v11561_v61 = vmul.u32.u64.low %v11488_v47, %v2043_v5  ;;  %v11562_v53 = vmul.u32.u64.high %v11488_v47, %v2043_v5, %v11561_v61  ;;  %v1895_v4 = vsel %vm14891_vm14, nan, %v1894_v12  ;;  %v1989_v60 = vadd.s32 3, %v11537_v48 }
 0x1d8   : > { %v1976_v43 = vand.u32 2147483647, %v1975_v35  ;;  %v2108_v56 = vshrl.u32 %v2107_v24, 23  ;;  %4613 = vst [vmem:[%s10284_s26 + $0x68] sm:$0xff] %v1895_v4  ;;  %v2055_v27 = vmul.u32 %v11488_v47, %v2039_v57  ;;  %v14828_v8 = vand.u32 2147483647, %v11514_v39 }
 0x1d9   : > { %v202_v52 = vadd.s32 144, %v9928_v1  ;;  %vm2057_vm1 = vc.u32 %v11550_v30, %v11561_v61  ;;  %v370_v3 = vadd.f32 %v11078_v50, %v323_v9  ;;  %v2058_v32 = vadd.s32 1, %v11562_v53 }
 0x1da   : > { %v1979_v34 = vmul.f32 %v1978_v22, %v1976_v43  ;;  %v9012_v38 = vadd.s32 4294967169, %v2108_v56  ;;  %v11574_v16 = vand.u32 3, %v1989_v60  ;;  %v2111_v47 = vand.u32 8388607, %v14828_v8 }
 0x1db   : > { %v2059_v63 = vsel %vm2057_vm1, %v2058_v32, %v11562_v53  ;;  %v244_v57 = vadd.s32 %v9930_v2, %v202_v52  ;;  %v11583_v50 = vmul.f32 %v11115_v0, %v370_v3  ;;  %v11589_v56 = vadd.s32 152, %v9928_v1 }
 0x1dc   : > { %v1980_v5 = vxor.u32 2147483648, %v1979_v34  ;;  %v2114_v7 = vadd.s32 1, %v9012_v38  ;;  %v2060_v22 = vadd.s32 %v2059_v63, %v2055_v27  ;;  %v2112_v4 = vor.u32 8388608, %v2111_v47 }
 0x1dd   : > { %15142 = vst [vmem:[#allocation57_spill] sm:$0xff] %v11583_v50  ;;  %v284_v43 = vmul.u32 8, %v244_v57  ;;  %v2211_v36 = vand.u32 2139095040, %v11583_v50  ;;  %vm1992_vm10 = vcmp.eq.s32.totalorder %v11574_v16, 0  ;;  %vm14864_vm8 = vweird.f32 %v11287_v13 }
 0x1de   : > { %v1981_v35 = vsel %vm1898_vm13, %v1980_v5, %v1979_v34  ;;  %vm2115_vm3 = vcmp.gt.s32.totalorder %v2114_v7, 0  ;;  %v2061_v12 = vadd.s32 536870912, %v2060_v22  ;;  %vm1995_vm13 = vcmp.eq.s32.totalorder %v11574_v16, 2 }
 0x1df   : > { %v1984_v9 = vsel %vm11508_vm0, %v11287_v13, %v1981_v35  ;;  %v2116_v24 = vsel %vm2115_vm3, %v2114_v7, 0  ;;  %vm1991_vm0 = vcmp.lt.s32.totalorder %v11574_v16, 2  ;;  %v324_v10 = vcvt.s32.f32 %v284_v43 }
 0x1e0   : > { %9562 = vcosq.f32 %v1984_v9  ;;  %v2118_v53 = vand.u32 31, %v2116_v24  ;;  %v11592_v60 = vshrl.u32 %v2061_v12, 30  ;;  %v2117_v52 = vshrl.u32 %v2116_v24, 5 }
 0x1e1   : > { %9564 = vsinq.f32 %v1984_v9  ;;  %v2056_v24 = vadd.s32 %v11561_v61, %v11550_v30  ;;  %vm2002_vm5 = vcmp.lt.s32.totalorder %v11403_v45, 0  ;;  %v2152_v48 = vshll.u32 %v2112_v4, 8 }
 0x1e2   : > { %v2119_v0 = vsub.s32 32, %v2118_v53  ;;  %v2121_v27 = vshll.u32 %v15077_v11, %v2118_v53  ;;  %v2124_v34 = vshll.u32 %v15078_v28, %v2118_v53  ;;  %v2127_v38 = vshll.u32 %v15079_v54, %v2118_v53 }
 0x1e3   : > { %v2130_v3 = vshll.u32 %v15080_v21, %v2118_v53  ;;  %v2063_v32 = vshll.u32 %v11592_v60, 30  ;;  %v2133_v63 = vshll.u32 %v15082_v23, %v2118_v53  ;;  %vm2136_vm6 = vcmp.lt.s32.totalorder %v2117_v52, 1 }
 0x1e4   : > { %v2120_v5 = vshrl.u32 %v15077_v11, %v2119_v0  ;;  %v2122_v7 = vshrl.u32 %v15078_v28, %v2119_v0  ;;  %v2125_v47 = vshrl.u32 %v15079_v54, %v2119_v0  ;;  %v2128_v57 = vshrl.u32 %v15080_v21, %v2119_v0 }
 0x1e5   : > { %v2131_v35 = vshrl.u32 %v15082_v23, %v2119_v0  ;;  %v2134_v9 = vshrl.u32 %v15083_v14, %v2119_v0  ;;  %v11611_v12 = vsub.s32 %v2060_v22, %v2063_v32  ;;  %vm2138_vm9 = vcmp.lt.s32.totalorder %v2117_v52, 3 }
 0x1e6   : > { %v2123_v20 = vor.u32 %v2122_v7, %v2121_v27  ;;  %v2126_v8 = vor.u32 %v2125_v47, %v2124_v34  ;;  %v2129_v49 = vor.u32 %v2128_v57, %v2127_v38  ;;  %vm2137_vm7 = vcmp.lt.s32.totalorder %v2117_v52, 2 }
 0x1e7   : > { %v2132_v55 = vor.u32 %v2131_v35, %v2130_v3  ;;  %v2066_v53 = vsub.s32 0, %v11611_v12  ;;  %v2135_v46 = vor.u32 %v2134_v9, %v2133_v63  ;;  %vm2139_vm1 = vcmp.lt.s32.totalorder %v2117_v52, 4  ;;  %v11667_v52 = vld [vmem:[%s14716_s1] ss:$0 sm:$0xff] }
 0x1e8   : > { %v2140_v0 = vsel %vm2136_vm6, %v2120_v5, %v2123_v20  ;;  %v2212_v30 = vshrl.u32 %v2211_v36, 23  ;;  %v2141_v43 = vsel %vm2139_vm1, %v2129_v49, 2102212464  ;;  %v2144_v27 = vsel %vm2136_vm6, %v2123_v20, %v2126_v8 }
 0x1e9   : > { %v9009_v22 = vmin.u32 %v2066_v53, %v11611_v12  ;;  %v2145_v34 = vsel %vm2139_vm1, %v2132_v55, 920167782  ;;  %v15145_v32 = vand.u32 2147483647, %v11403_v45  ;;  %v2142_v36 = vsel %vm2138_vm9, %v2126_v8, %v2141_v43 }
 0x1ea   : > { %v11616_v61 = vpop.eup %9562  ;;  %v2146_v5 = vsel %vm2138_vm9, %v2129_v49, %v2145_v34  ;;  %v2149_v7 = vsel %vm2139_vm1, %v2135_v46, 1326507024  ;;  %v2148_v20 = vsel %vm2136_vm6, %v2126_v8, %v2129_v49  ;;  %v2086_v9 = vsub.s32 4, %v11592_v60 }
 0x1eb   : > { %15143 = vst [vmem:[#allocation58_spill] sm:$0xff] %v11616_v61  ;;  %v11620_v38 = vpop.eup %9564  ;;  %v14835_v3 = vxor.u32 2147483648, %v11616_v61  ;;  %vm11625_vm3 = vcmp.le.f32.partialorder %v15145_v32, 0.7853982  ;;  %v2068_v47 = vclz %v9009_v22  ;;  %v2147_v53 = vsel %vm2137_vm7, %v2144_v27, %v2146_v5 }
 0x1ec   : > { %15144 = vst [vmem:[#allocation59_spill] sm:$0xff] %v11620_v38  ;;  %v14836_v63 = vxor.u32 2147483648, %v11620_v38  ;;  %v9016_v43 = vadd.s32 4294967169, %v2212_v30  ;;  %v2143_v8 = vsel %vm2137_vm7, %v2140_v0, %v2142_v36  ;;  %v2150_v22 = vsel %vm2138_vm9, %v2132_v55, %v2149_v7 }
 0x1ed   : > { %v1997_v35 = vsel %vm1995_vm13, %v14835_v3, %v11620_v38  ;;  %v9010_v46 = vadd.s32 4294967294, %v2068_v47  ;;  %v2151_v32 = vsel %vm2137_vm7, %v2148_v20, %v2150_v22  ;;  %v2087_v55 = vsel %vm2002_vm5, %v2086_v9, %v11592_v60 }
 0x1ee   : > { %v1994_v49 = vsel %vm1992_vm10, %v11616_v61, %v14836_v63  ;;  %v11651_v3 = vmul.u32.u64.low %v2152_v48, %v2147_v53  ;;  %v11652_v57 = vmul.u32.u64.high %v2152_v48, %v2147_v53, %v11651_v3  ;;  %v2218_v16 = vadd.s32 1, %v9016_v43 }
 0x1ef   : > { %v1998_v34 = vsel %vm1991_vm0, %v1994_v49, %v1997_v35  ;;  %vm9011_vm13 = vcmp.lt.s32.totalorder %v9010_v46, 0  ;;  %v11657_v27 = vmul.u32.u64.low %v2152_v48, %v2151_v32  ;;  %v11658_v5 = vmul.u32.u64.high %v2152_v48, %v2151_v32, %v11657_v27 }
 0x1f0   : > { %v1999_v30 = vsel %vm14864_vm8, nan, %v1998_v34  ;;  %v2071_v0 = vsel %vm9011_vm13, 0, %v9010_v46  ;;  %v371_v36 = vadd.f32 %v11667_v52, %v324_v10  ;;  %v2159_v35 = vmul.u32 %v2152_v48, %v2143_v8  ;;  %v11685_v8 = vld [vmem:[#allocation2] ss:$0 sm:$0xff] }
 0x1f1   : > { %4614 = vst [vmem:[%s10284_s26 + $0x70] sm:$0xff] %v1999_v30  ;;  %v2072_v7 = vsub.s32 32, %v2071_v0  ;;  %v2073_v47 = vshll.u32 %v11611_v12, %v2071_v0  ;;  %v2076_v20 = vsub.s32 4294967266, %v2071_v0  ;;  %v2162_v53 = vadd.s32 1, %v11652_v57 }
 0x1f2   : > { %v15148_v49 = vand.u32 2147483647, %v11583_v50  ;;  %vm2219_vm10 = vcmp.gt.s32.totalorder %v2218_v16, 0  ;;  %v11676_v60 = vadd.s32 %v9930_v2, %v11589_v56  ;;  %v11680_v10 = vsel %vm11625_vm3, 0, %v2087_v55 }
 0x1f3   : > { %v2074_v9 = vshrl.u32 %v2056_v24, %v2072_v7  ;;  %v2077_v43 = vadd.s32 127, %v2076_v20  ;;  %15149 = vst [vmem:[#allocation60_spill] sm:$0xff] %v11680_v10  ;;  %vm2161_vm0 = vc.u32 %v11658_v5, %v11651_v3  ;;  %v2220_v12 = vsel %vm2219_vm10, %v2218_v16, 0 }
 0x1f4   : > { %v2215_v46 = vand.u32 8388607, %v15148_v49  ;;  %v2163_v48 = vsel %vm2161_vm0, %v2162_v53, %v11652_v57  ;;  %v11688_v22 = vmul.f32 %v11685_v8, %v371_v36  ;;  %v2093_v24 = vadd.s32 3, %v11680_v10 }
 0x1f5   : > { %v2075_v34 = vor.u32 %v2074_v9, %v2073_v47  ;;  %v2078_v56 = vshll.u32 %v2077_v43, 23  ;;  %v2164_v32 = vadd.s32 %v2163_v48, %v2159_v35  ;;  %v2222_v30 = vand.u32 31, %v2220_v12 }
 0x1f6   : > { %15150 = vst [vmem:[#allocation61_spill] sm:$0xff] %v11688_v22  ;;  %v11693_v0 = vadd.s32 160, %v9928_v1  ;;  %v2216_v16 = vor.u32 8388608, %v2215_v46  ;;  %v2221_v20 = vshrl.u32 %v2220_v12, 5  ;;  %v2315_v47 = vand.u32 2139095040, %v11688_v22 }
 0x1f7   : > { %v2079_v55 = vor.u32 4788187, %v2078_v56  ;;  %v2082_v7 = vcvt.s32.f32 %v2075_v34  ;;  %v2165_v57 = vadd.s32 536870912, %v2164_v32  ;;  %v2223_v53 = vsub.s32 32, %v2222_v30 }
 0x1f8   : > { %v2225_v36 = vshll.u32 %v15077_v11, %v2222_v30  ;;  %v2228_v9 = vshll.u32 %v15078_v28, %v2222_v30  ;;  %v2231_v43 = vshll.u32 %v15079_v54, %v2222_v30  ;;  %v2234_v46 = vshll.u32 %v15080_v21, %v2222_v30 }
 0x1f9   : > { %v2080_v49 = vand.u32 2147483647, %v2079_v55  ;;  %v2166_v35 = vshrl.u32 %v2165_v57, 30  ;;  %v2226_v48 = vshrl.u32 %v15078_v28, %v2223_v53  ;;  %v2229_v63 = vshrl.u32 %v15079_v54, %v2223_v53 }
 0x1fa   : > { %v2232_v34 = vshrl.u32 %v15080_v21, %v2223_v53  ;;  %v11703_v56 = vand.u32 3, %v2093_v24  ;;  %vm2106_vm6 = vcmp.lt.s32.totalorder %v11514_v39, 0  ;;  %v2235_v55 = vshrl.u32 %v15082_v23, %v2223_v53 }
 0x1fb   : > { %v2083_v12 = vmul.f32 %v2082_v7, %v2080_v49  ;;  %v2167_v27 = vshll.u32 %v2166_v35, 30  ;;  %v2237_v57 = vshll.u32 %v15082_v23, %v2222_v30  ;;  %v2238_v13 = vshrl.u32 %v15083_v14, %v2223_v53 }
 0x1fc   : > { %v11709_v61 = vshll.u32 %v2216_v16, 8  ;;  %v2316_v38 = vshrl.u32 %v2315_v47, 23  ;;  %v2224_v59 = vshrl.u32 %v15077_v11, %v2223_v53  ;;  %vm2240_vm9 = vcmp.lt.s32.totalorder %v2221_v20, 1 }
 0x1fd   : > { %v2084_v10 = vxor.u32 2147483648, %v2083_v12  ;;  %v11711_v62 = vsub.s32 %v2164_v32, %v2167_v27  ;;  %v2227_v24 = vor.u32 %v2226_v48, %v2225_v36  ;;  %v2230_v7 = vor.u32 %v2229_v63, %v2228_v9 }
 0x1fe   : > { %v2233_v49 = vor.u32 %v2232_v34, %v2231_v43  ;;  %v2236_v58 = vor.u32 %v2235_v55, %v2234_v46  ;;  %v15151_v30 = vand.u32 2147483647, %v11514_v39  ;;  %v2190_v32 = vsub.s32 4, %v2166_v35 }
 0x1ff   : > { %v2085_v6 = vsel %vm2002_vm5, %v2084_v10, %v2083_v12  ;;  %v2170_v16 = vsub.s32 0, %v11711_v62  ;;  %vm2243_vm1 = vcmp.lt.s32.totalorder %v2221_v20, 4  ;;  %v2239_v63 = vor.u32 %v2238_v13, %v2237_v57 }
 0x200   : > { %vm11718_vm7 = vcmp.le.f32.partialorder %v15151_v30, 0.7853982  ;;  %v2088_v27 = vsel %vm11625_vm3, %v11403_v45, %v2085_v6  ;;  %vm2241_vm13 = vcmp.lt.s32.totalorder %v2221_v20, 2  ;;  %v2245_v53 = vsel %vm2243_vm1, %v2233_v49, 2102212464 }
 0x201   : > { %9566 = vcosq.f32 %v2088_v27  ;;  %v9013_v10 = vmin.u32 %v2170_v16, %v11711_v62  ;;  %vm2242_vm5 = vcmp.lt.s32.totalorder %v2221_v20, 3  ;;  %v2244_v36 = vsel %vm2240_vm9, %v2224_v59, %v2227_v24 }
 0x202   : > { %9568 = vsinq.f32 %v2088_v27  ;;  %v2246_v47 = vsel %vm2242_vm5, %v2230_v7, %v2245_v53  ;;  %v2248_v9 = vsel %vm2240_vm9, %v2227_v24, %v2230_v7  ;;  %v2249_v43 = vsel %vm2243_vm1, %v2236_v58, 920167782 }
 0x203   : > { %v2160_v6 = vadd.s32 %v11651_v3, %v11658_v5  ;;  %v2172_v13 = vclz %v9013_v10  ;;  %v2252_v4 = vsel %vm2240_vm9, %v2230_v7, %v2233_v49  ;;  %v14854_v48 = vand.u32 2147483647, %v11688_v22 }
 0x204   : > { %v2191_v34 = vsel %vm2106_vm6, %v2190_v32, %v2166_v35  ;;  %v2250_v59 = vsel %vm2242_vm5, %v2233_v49, %v2249_v43  ;;  %v2253_v46 = vsel %vm2243_vm1, %v2239_v63, 1326507024  ;;  %v9020_v12 = vadd.s32 4294967169, %v2316_v38 }
 0x205   : > { %vm2095_vm3 = vcmp.lt.s32.totalorder %v11703_v56, 2  ;;  %v9014_v55 = vadd.s32 4294967294, %v2172_v13  ;;  %v2247_v57 = vsel %vm2241_vm13, %v2244_v36, %v2246_v47  ;;  %v2251_v3 = vsel %vm2241_vm13, %v2248_v9, %v2250_v59 }
 0x206   : > { %v2254_v5 = vsel %vm2242_vm5, %v2236_v58, %v2253_v46  ;;  %vm14863_vm10 = vweird.f32 %v11403_v45  ;;  %v11747_v35 = vmul.u32.u64.low %v11709_v61, %v2251_v3  ;;  %v11748_v7 = vmul.u32.u64.high %v11709_v61, %v2251_v3, %v11747_v35 }
 0x207   : > { %v2255_v24 = vsel %vm2241_vm13, %v2252_v4, %v2254_v5  ;;  %v2322_v49 = vadd.s32 1, %v9020_v12  ;;  %vm9015_vm0 = vcmp.lt.s32.totalorder %v9014_v55, 0  ;;  %v2319_v16 = vand.u32 8388607, %v14854_v48 }
 0x208   : > { %v11752_v38 = vmul.u32.u64.low %v11709_v61, %v2255_v24  ;;  %v11753_v30 = vmul.u32.u64.high %v11709_v61, %v2255_v24, %v11752_v38  ;;  %v2175_v32 = vsel %vm9015_vm0, 0, %v9014_v55  ;;  %v11759_v58 = vsel %vm11718_vm7, 0, %v2191_v34 }
 0x209   : > { %v2263_v20 = vmul.u32 %v11709_v61, %v2247_v57  ;;  %vm2323_vm9 = vcmp.gt.s32.totalorder %v2322_v49, 0  ;;  %v2176_v27 = vsub.s32 32, %v2175_v32  ;;  %v2177_v63 = vshll.u32 %v11711_v62, %v2175_v32 }
 0x20a   : > { %v2180_v53 = vsub.s32 4294967266, %v2175_v32  ;;  %v2324_v10 = vsel %vm2323_vm9, %v2322_v49, 0  ;;  %vm2096_vm1 = vcmp.eq.s32.totalorder %v11703_v56, 0  ;;  %vm2099_vm13 = vcmp.eq.s32.totalorder %v11703_v56, 2 }
 0x20b   : > { %v2266_v36 = vadd.s32 1, %v11748_v7  ;;  %v2326_v47 = vand.u32 31, %v2324_v10  ;;  %v11766_v9 = vpop.eup %9566  ;;  %v2178_v43 = vshrl.u32 %v2160_v6, %v2176_v27  ;;  %vm2265_vm5 = vc.u32 %v11753_v30, %v11747_v35 }
 0x20c   : > { %15154 = vst [vmem:[#allocation62_spill] sm:$0xff] %v11766_v9  ;;  %v2181_v13 = vadd.s32 127, %v2180_v53  ;;  %v2320_v61 = vor.u32 8388608, %v2319_v16  ;;  %v11770_v4 = vpop.eup %9568  ;;  %v14852_v62 = vxor.u32 2147483648, %v11766_v9  ;;  %v2197_v34 = vadd.s32 3, %v11759_v58 }
 0x20d   : > { %15155 = vst [vmem:[#allocation63_spill] sm:$0xff] %v11770_v4  ;;  %v2267_v59 = vsel %vm2265_vm5, %v2266_v36, %v11748_v7  ;;  %v2327_v46 = vsub.s32 32, %v2326_v47  ;;  %v14853_v12 = vxor.u32 2147483648, %v11770_v4  ;;  %v2179_v55 = vor.u32 %v2178_v43, %v2177_v63 }
 0x20e   : > { %v2182_v57 = vshll.u32 %v2181_v13, 23  ;;  %v2268_v3 = vadd.s32 %v2267_v59, %v2263_v20  ;;  %v2101_v6 = vsel %vm2099_vm13, %v14852_v62, %v11770_v4  ;;  %v2329_v5 = vshll.u32 %v15077_v11, %v2326_v47 }
 0x20f   : > { %v2330_v24 = vshrl.u32 %v15078_v28, %v2327_v46  ;;  %v15156_v49 = vmul.u32 8, %v11676_v60  ;;  %v2098_v38 = vsel %vm2096_vm1, %v11766_v9, %v14853_v12  ;;  %v2186_v32 = vcvt.s32.f32 %v2179_v55 }
 0x210   : > { %v2183_v16 = vor.u32 4788187, %v2182_v57  ;;  %v2269_v20 = vadd.s32 536870912, %v2268_v3  ;;  %v2102_v27 = vsel %vm2095_vm3, %v2098_v38, %v2101_v6  ;;  %v2332_v63 = vshll.u32 %v15078_v28, %v2326_v47 }
 0x211   : > { %v325_v7 = vcvt.s32.f32 %v15156_v49  ;;  %v2333_v53 = vshrl.u32 %v15079_v54, %v2327_v46  ;;  %v2335_v36 = vshll.u32 %v15079_v54, %v2326_v47  ;;  %v2103_v60 = vsel %vm14863_vm10, nan, %v2102_v27 }
 0x212   : > { %v2184_v43 = vand.u32 2147483647, %v2183_v16  ;;  %v2270_v13 = vshrl.u32 %v2269_v20, 30  ;;  %v2336_v59 = vshrl.u32 %v15080_v21, %v2327_v46  ;;  %4615 = vst [vmem:[%s10284_s26 + $0x78] sm:$0xff] %v2103_v60  ;;  %v2325_v57 = vshrl.u32 %v2324_v10, 5 }
 0x213   : > { %v2338_v55 = vshll.u32 %v15080_v21, %v2326_v47  ;;  %v2339_v56 = vshrl.u32 %v15082_v23, %v2327_v46  ;;  %v2341_v6 = vshll.u32 %v15082_v23, %v2326_v47  ;;  %v11802_v38 = vand.u32 3, %v2197_v34 }
 0x214   : > { %v2187_v49 = vmul.f32 %v2186_v32, %v2184_v43  ;;  %v2271_v62 = vshll.u32 %v2270_v13, 30  ;;  %v11804_v12 = vshll.u32 %v2320_v61, 8  ;;  %v2328_v27 = vshrl.u32 %v15077_v11, %v2327_v46 }
 0x215   : > { %v2331_v16 = vor.u32 %v2330_v24, %v2329_v5  ;;  %v2340_v20 = vor.u32 %v2339_v56, %v2338_v55  ;;  %v2342_v48 = vshrl.u32 %v15083_v14, %v2327_v46  ;;  %v2334_v45 = vor.u32 %v2333_v53, %v2332_v63 }
 0x216   : > { %v2188_v60 = vxor.u32 2147483648, %v2187_v49  ;;  %v11808_v10 = vsub.s32 %v2268_v3, %v2271_v62  ;;  %v2337_v9 = vor.u32 %v2336_v59, %v2335_v36  ;;  %vm2210_vm3 = vcmp.lt.s32.totalorder %v11583_v50, 0 }
 0x217   : > { %v2343_v47 = vor.u32 %v2342_v48, %v2341_v6  ;;  %vm2344_vm0 = vcmp.lt.s32.totalorder %v2325_v57, 1  ;;  %vm2347_vm9 = vcmp.lt.s32.totalorder %v2325_v57, 4  ;;  %v372_v34 = vadd.f32 %v11667_v52, %v325_v7 }
 0x218   : > { %v2189_v61 = vsel %vm2106_vm6, %v2188_v60, %v2187_v49  ;;  %v2274_v5 = vsub.s32 0, %v11808_v10  ;;  %vm2346_vm1 = vcmp.lt.s32.totalorder %v2325_v57, 3  ;;  %v2349_v46 = vsel %vm2347_vm9, %v2337_v9, 2102212464 }
 0x219   : > { %v2192_v62 = vsel %vm11718_vm7, %v11514_v39, %v2189_v61  ;;  %vm2345_vm13 = vcmp.lt.s32.totalorder %v2325_v57, 2  ;;  %v2348_v3 = vsel %vm2344_vm0, %v2328_v27, %v2331_v16  ;;  %v2353_v48 = vsel %vm2347_vm9, %v2340_v20, 920167782 }
 0x21a   : > { %9570 = vcosq.f32 %v2192_v62  ;;  %v9017_v24 = vmin.u32 %v2274_v5, %v11808_v10  ;;  %v2350_v7 = vsel %vm2346_vm1, %v2334_v45, %v2349_v46  ;;  %v2352_v32 = vsel %vm2344_vm0, %v2331_v16, %v2334_v45 }
 0x21b   : > { %9572 = vsinq.f32 %v2192_v62  ;;  %v2354_v63 = vsel %vm2346_vm1, %v2337_v9, %v2353_v48  ;;  %v2356_v53 = vsel %vm2344_vm0, %v2334_v45, %v2337_v9  ;;  %v2357_v51 = vsel %vm2347_vm9, %v2343_v47, 1326507024 }
 0x21c   : > { %v15157_v36 = vand.u32 2147483647, %v11583_v50  ;;  %v2276_v59 = vclz %v9017_v24  ;;  %v2294_v55 = vsub.s32 4, %v2270_v13  ;;  %v246_v56 = vadd.s32 %v9930_v2, %v11693_v0 }
 0x21d   : > { %v2351_v6 = vsel %vm2345_vm13, %v2348_v3, %v2350_v7  ;;  %v2355_v49 = vsel %vm2345_vm13, %v2352_v32, %v2354_v63  ;;  %v2358_v27 = vsel %vm2346_vm1, %v2340_v20, %v2357_v51  ;;  %v11839_v45 = vmul.f32 %v11685_v8, %v372_v34 }
 0x21e   : > { %vm11829_vm6 = vcmp.le.f32.partialorder %v15157_v36, 0.7853982  ;;  %vm2199_vm7 = vcmp.lt.s32.totalorder %v11802_v38, 2  ;;  %v9018_v9 = vadd.s32 4294967294, %v2276_v59  ;;  %v2359_v16 = vsel %vm2345_vm13, %v2356_v53, %v2358_v27 }
 0x21f   : > { %15160 = vst [vmem:[#allocation64_spill] sm:$0xff] %v11839_v45  ;;  %v11844_v60 = vmul.u32.u64.low %v11804_v12, %v2355_v49  ;;  %v11845_v47 = vmul.u32.u64.high %v11804_v12, %v2355_v49, %v11844_v60  ;;  %vm14862_vm5 = vweird.f32 %v11514_v39  ;;  %vm2200_vm0 = vcmp.eq.s32.totalorder %v11802_v38, 0 }
 0x220   : > { %v2264_v0 = vadd.s32 %v11747_v35, %v11753_v30  ;;  %v11852_v20 = vmul.u32.u64.low %v11804_v12, %v2359_v16  ;;  %v11853_v34 = vmul.u32.u64.high %v11804_v12, %v2359_v16, %v11852_v20  ;;  %vm9019_vm9 = vcmp.lt.s32.totalorder %v9018_v9, 0 }
 0x221   : > { %v2295_v57 = vsel %vm2210_vm3, %v2294_v55, %v2270_v13  ;;  %v14860_v61 = vand.u32 2147483647, %v11839_v45  ;;  %v2419_v5 = vand.u32 2139095040, %v11839_v45  ;;  %v2279_v46 = vsel %vm9019_vm9, 0, %v9018_v9 }
 0x222   : > { %v2367_v62 = vmul.u32 %v11804_v12, %v2351_v6  ;;  %v286_v3 = vmul.u32 8, %v246_v56  ;;  %v205_v48 = vadd.s32 168, %v9928_v1  ;;  %v2280_v24 = vsub.s32 32, %v2279_v46 }
 0x223   : > { %v2281_v35 = vshll.u32 %v11808_v10, %v2279_v46  ;;  %v2284_v30 = vsub.s32 4294967266, %v2279_v46  ;;  %v2370_v7 = vadd.s32 1, %v11845_v47  ;;  %vm2203_vm1 = vcmp.eq.s32.totalorder %v11802_v38, 2 }
 0x224   : > { %v11866_v13 = vsel %vm11829_vm6, 0, %v2295_v57  ;;  %vm2369_vm13 = vc.u32 %v11853_v34, %v11844_v60  ;;  %v2420_v32 = vshrl.u32 %v2419_v5, 23  ;;  %v11869_v63 = vpop.eup %9570  ;;  %v2282_v12 = vshrl.u32 %v2264_v0, %v2280_v24 }
 0x225   : > { %15161 = vst [vmem:[#allocation65_spill] sm:$0xff] %v11869_v63  ;;  %v2285_v53 = vadd.s32 127, %v2284_v30  ;;  %v2371_v51 = vsel %vm2369_vm13, %v2370_v7, %v11845_v47  ;;  %v2423_v10 = vand.u32 8388607, %v14860_v61  ;;  %v11874_v36 = vpop.eup %9572  ;;  %v14858_v59 = vxor.u32 2147483648, %v11869_v63 }
 0x226   : > { %15162 = vst [vmem:[#allocation66_spill] sm:$0xff] %v11874_v36  ;;  %v2372_v55 = vadd.s32 %v2371_v51, %v2367_v62  ;;  %v9024_v56 = vadd.s32 4294967169, %v2420_v32  ;;  %v326_v6 = vcvt.s32.f32 %v286_v3  ;;  %v14859_v49 = vxor.u32 2147483648, %v11874_v36 }
 0x227   : > { %v2283_v27 = vor.u32 %v2282_v12, %v2281_v35  ;;  %v2286_v9 = vshll.u32 %v2285_v53, 23  ;;  %v247_v16 = vadd.s32 %v9930_v2, %v205_v48  ;;  %v2205_v47 = vsel %vm2203_vm1, %v14858_v59, %v11874_v36 }
 0x228   : > { %v2301_v0 = vadd.s32 3, %v11866_v13  ;;  %v2373_v20 = vadd.s32 536870912, %v2372_v55  ;;  %v2426_v57 = vadd.s32 1, %v9024_v56  ;;  %v2202_v5 = vsel %vm2200_vm0, %v11869_v63, %v14859_v49 }
 0x229   : > { %v2287_v46 = vor.u32 4788187, %v2286_v9  ;;  %v2290_v62 = vcvt.s32.f32 %v2283_v27  ;;  %v2424_v3 = vor.u32 8388608, %v2423_v10  ;;  %v2206_v48 = vsel %vm2199_vm7, %v2202_v5, %v2205_v47 }
 0x22a   : > { %v2374_v24 = vshrl.u32 %v2373_v20, 30  ;;  %vm2427_vm9 = vcmp.gt.s32.totalorder %v2426_v57, 0  ;;  %v373_v35 = vadd.f32 %v11667_v52, %v326_v6  ;;  %v2207_v30 = vsel %vm14862_vm5, nan, %v2206_v48 }
 0x22b   : > { %v2288_v7 = vand.u32 2147483647, %v2287_v46  ;;  %v2428_v32 = vsel %vm2427_vm9, %v2426_v57, 0  ;;  %v287_v12 = vmul.u32 8, %v247_v16  ;;  %4616 = vst [vmem:[%s10284_s26 + $0x80] sm:$0xff] %v2207_v30  ;;  %v11896_v9 = vand.u32 3, %v2301_v0 }
 0x22c   : > { %v2375_v53 = vshll.u32 %v2374_v24, 30  ;;  %v2430_v51 = vand.u32 31, %v2428_v32  ;;  %vm2314_vm0 = vcmp.lt.s32.totalorder %v11688_v22, 0  ;;  %v2368_v38 = vadd.s32 %v11844_v60, %v11853_v34 }
 0x22d   : > { %v2291_v56 = vmul.f32 %v2290_v62, %v2288_v7  ;;  %v11902_v6 = vshll.u32 %v2424_v3, 8  ;;  %v11905_v47 = vmul.f32 %v11685_v8, %v373_v35  ;;  %v11909_v5 = vcvt.s32.f32 %v287_v12 }
 0x22e   : > { %v11900_v10 = vsub.s32 %v2372_v55, %v2375_v53  ;;  %v2431_v27 = vsub.s32 32, %v2430_v51  ;;  %v2433_v16 = vshll.u32 %v15077_v11, %v2430_v51  ;;  %v2436_v57 = vshll.u32 %v15078_v28, %v2430_v51 }
 0x22f   : > { %15163 = vst [vmem:[#allocation67_spill] sm:$0xff] %v11905_v47  ;;  %v2292_v20 = vxor.u32 2147483648, %v2291_v56  ;;  %v2398_v46 = vsub.s32 4, %v2374_v24  ;;  %v2439_v34 = vshll.u32 %v15079_v54, %v2430_v51  ;;  %v2442_v48 = vshll.u32 %v15080_v21, %v2430_v51 }
 0x230   : > { %v2378_v0 = vsub.s32 0, %v11900_v10  ;;  %v2434_v60 = vshrl.u32 %v15078_v28, %v2431_v27  ;;  %v2437_v62 = vshrl.u32 %v15079_v54, %v2431_v27  ;;  %v2440_v3 = vshrl.u32 %v15080_v21, %v2431_v27 }
 0x231   : > { %v2293_v55 = vsel %vm2210_vm3, %v2292_v20, %v2291_v56  ;;  %v15164_v30 = vand.u32 2147483647, %v11688_v22  ;;  %v2429_v53 = vshrl.u32 %v2428_v32, 5  ;;  %v2432_v56 = vshrl.u32 %v15077_v11, %v2431_v27 }
 0x232   : > { %v2296_v35 = vsel %vm11829_vm6, %v11583_v50, %v2293_v55  ;;  %v9021_v12 = vmin.u32 %v2378_v0, %v11900_v10  ;;  %v2435_v20 = vor.u32 %v2434_v60, %v2433_v16  ;;  %v2438_v59 = vor.u32 %v2437_v62, %v2436_v57 }
 0x233   : > { %vm11924_vm7 = vcmp.le.f32.partialorder %v15164_v30, 0.7853982  ;;  %9574 = vcosq.f32 %v2296_v35  ;;  %v2443_v49 = vshrl.u32 %v15082_v23, %v2431_v27  ;;  %v2441_v43 = vor.u32 %v2440_v3, %v2439_v34 }
 0x234   : > { %9576 = vsinq.f32 %v2296_v35  ;;  %v2380_v61 = vclz %v9021_v12  ;;  %v2523_v55 = vand.u32 2139095040, %v11905_v47  ;;  %vm2307_vm3 = vcmp.eq.s32.totalorder %v11896_v9, 2 }
 0x235   : > { %v2399_v30 = vsel %vm2314_vm0, %v2398_v46, %v2374_v24  ;;  %v2444_v39 = vor.u32 %v2443_v49, %v2442_v48  ;;  %v2445_v32 = vshll.u32 %v15082_v23, %v2430_v51  ;;  %v2446_v0 = vshrl.u32 %v15083_v14, %v2431_v27 }
 0x236   : > { %vm2304_vm6 = vcmp.eq.s32.totalorder %v11896_v9, 0  ;;  %v9022_v16 = vadd.s32 4294967294, %v2380_v61  ;;  %vm2448_vm1 = vcmp.lt.s32.totalorder %v2429_v53, 1  ;;  %vm2449_vm13 = vcmp.lt.s32.totalorder %v2429_v53, 2 }
 0x237   : > { %vm2450_vm9 = vcmp.lt.s32.totalorder %v2429_v53, 3  ;;  %v2447_v57 = vor.u32 %v2446_v0, %v2445_v32  ;;  %vm2451_vm5 = vcmp.lt.s32.totalorder %v2429_v53, 4  ;;  %v2452_v60 = vsel %vm2448_vm1, %v2432_v56, %v2435_v20 }
 0x238   : > { %v2456_v34 = vsel %vm2448_vm1, %v2435_v20, %v2438_v59  ;;  %vm14872_vm10 = vweird.f32 %v11583_v50  ;;  %vm9023_vm8 = vcmp.lt.s32.totalorder %v9022_v16, 0  ;;  %v2453_v62 = vsel %vm2451_vm5, %v2441_v43, 2102212464 }
 0x239   : > { %v2457_v24 = vsel %vm2451_vm5, %v2444_v39, 920167782  ;;  %v2460_v49 = vsel %vm2448_vm1, %v2438_v59, %v2441_v43  ;;  %v2383_v46 = vsel %vm9023_vm8, 0, %v9022_v16  ;;  %v2454_v51 = vsel %vm2450_vm9, %v2438_v59, %v2453_v62 }
 0x23a   : > { %v2458_v27 = vsel %vm2450_vm9, %v2441_v43, %v2457_v24  ;;  %v2461_v3 = vsel %vm2451_vm5, %v2447_v57, 1326507024  ;;  %v2384_v61 = vsub.s32 32, %v2383_v46  ;;  %v2385_v48 = vshll.u32 %v11900_v10, %v2383_v46 }
 0x23b   : > { %v2388_v35 = vsub.s32 4294967266, %v2383_v46  ;;  %v14867_v12 = vand.u32 2147483647, %v11905_v47  ;;  %v11945_v56 = vsel %vm11924_vm7, 0, %v2399_v30  ;;  %v2459_v20 = vsel %vm2449_vm13, %v2456_v34, %v2458_v27 }
 0x23c   : > { %15167 = vst [vmem:[#allocation68_spill] sm:$0xff] %v11945_v56  ;;  %v2462_v32 = vsel %vm2450_vm9, %v2444_v39, %v2461_v3  ;;  %v2524_v0 = vshrl.u32 %v2523_v55, 23  ;;  %v2386_v16 = vshrl.u32 %v2368_v38, %v2384_v61  ;;  %v2455_v43 = vsel %vm2449_vm13, %v2452_v60, %v2454_v51 }
 0x23d   : > { %v2389_v59 = vadd.s32 127, %v2388_v35  ;;  %v2463_v57 = vsel %vm2449_vm13, %v2460_v49, %v2462_v32  ;;  %v11951_v62 = vpop.eup %9574  ;;  %v11958_v30 = vmul.u32.u64.low %v11902_v6, %v2459_v20  ;;  %v11959_v46 = vmul.u32.u64.high %v11902_v6, %v2459_v20, %v11958_v30 }
 0x23e   : > { %15168 = vst [vmem:[#allocation69_spill] sm:$0xff] %v11951_v62  ;;  %v11954_v10 = vmul.u32.u64.low %v11902_v6, %v2463_v57  ;;  %v11955_v24 = vmul.u32.u64.high %v11902_v6, %v2463_v57, %v11954_v10  ;;  %v11962_v34 = vpop.eup %9576  ;;  %v14865_v39 = vxor.u32 2147483648, %v11951_v62  ;;  %v2387_v38 = vor.u32 %v2386_v16, %v2385_v48 }
 0x23f   : > { %15169 = vst [vmem:[#allocation70_spill] sm:$0xff] %v11962_v34  ;;  %v2390_v55 = vshll.u32 %v2389_v59, 23  ;;  %v9028_v60 = vadd.s32 4294967169, %v2524_v0  ;;  %vm2303_vm8 = vcmp.lt.s32.totalorder %v11896_v9, 2  ;;  %v14866_v53 = vxor.u32 2147483648, %v11962_v34 }
 0x240   : > { %v2405_v49 = vadd.s32 3, %v11945_v56  ;;  %v2471_v51 = vmul.u32 %v11902_v6, %v2455_v43  ;;  %v2309_v27 = vsel %vm2307_vm3, %v14865_v39, %v11962_v34  ;;  %v2394_v61 = vcvt.s32.f32 %v2387_v38 }
 0x241   : > { %v2391_v3 = vor.u32 4788187, %v2390_v55  ;;  %v2530_v48 = vadd.s32 1, %v9028_v60  ;;  %v2306_v35 = vsel %vm2304_vm6, %v11951_v62, %v14866_v53  ;;  %vm2473_vm5 = vc.u32 %v11955_v24, %v11958_v30 }
 0x242   : > { %v2474_v6 = vadd.s32 1, %v11959_v46  ;;  %v2527_v20 = vand.u32 8388607, %v14867_v12  ;;  %v2310_v32 = vsel %vm2303_vm8, %v2306_v35, %v2309_v27  ;;  %v374_v16 = vadd.f32 %v11667_v52, %v11909_v5 }
 0x243   : > { %v2392_v0 = vand.u32 2147483647, %v2391_v3  ;;  %vm2531_vm3 = vcmp.gt.s32.totalorder %v2530_v48, 0  ;;  %v2311_v59 = vsel %vm14872_vm10, nan, %v2310_v32  ;;  %v11990_v55 = vand.u32 3, %v2405_v49 }
 0x244   : > { %v2475_v9 = vsel %vm2473_vm5, %v2474_v6, %v11959_v46  ;;  %v2532_v43 = vsel %vm2531_vm3, %v2530_v48, 0  ;;  %4617 = vst [vmem:[%s10284_s26 + $0x88] sm:$0xff] %v2311_v59  ;;  %v2528_v60 = vor.u32 8388608, %v2527_v20  ;;  %v11993_v35 = vmul.f32 %v11685_v8, %v374_v16 }
 0x245   : > { %v2395_v57 = vmul.f32 %v2394_v61, %v2392_v0  ;;  %v2476_v10 = vadd.s32 %v2475_v9, %v2471_v51  ;;  %v2534_v38 = vand.u32 31, %v2532_v43  ;;  %v2533_v5 = vshrl.u32 %v2532_v43, 5 }
 0x246   : > { %15170 = vst [vmem:[#allocation71_spill] sm:$0xff] %v11993_v35  ;;  %vm2418_vm6 = vcmp.lt.s32.totalorder %v11839_v45, 0  ;;  %v15171_v50 = vand.u32 2147483647, %v11839_v45  ;;  %v2568_v62 = vshll.u32 %v2528_v60, 8  ;;  %vm2407_vm9 = vcmp.lt.s32.totalorder %v11990_v55, 2 }
 0x247   : > { %v2396_v39 = vxor.u32 2147483648, %v2395_v57  ;;  %v2477_v27 = vadd.s32 536870912, %v2476_v10  ;;  %v2535_v3 = vsub.s32 32, %v2534_v38  ;;  %v2537_v53 = vshll.u32 %v15077_v11, %v2534_v38 }
 0x248   : > { %v2540_v32 = vshll.u32 %v15078_v28, %v2534_v38  ;;  %v2546_v46 = vshll.u32 %v15080_v21, %v2534_v38  ;;  %v2543_v48 = vshll.u32 %v15079_v54, %v2534_v38  ;;  %v2549_v9 = vshll.u32 %v15082_v23, %v2534_v38 }
 0x249   : > { %v2397_v51 = vsel %vm2314_vm0, %v2396_v39, %v2395_v57  ;;  %v2478_v61 = vshrl.u32 %v2477_v27, 30  ;;  %v2538_v49 = vshrl.u32 %v15078_v28, %v2535_v3  ;;  %v2541_v20 = vshrl.u32 %v15079_v54, %v2535_v3 }
 0x24a   : > { %v2400_v6 = vsel %vm11924_vm7, %v11688_v22, %v2397_v51  ;;  %v2544_v0 = vshrl.u32 %v15080_v21, %v2535_v3  ;;  %v2547_v16 = vshrl.u32 %v15082_v23, %v2535_v3  ;;  %v2536_v39 = vshrl.u32 %v15077_v11, %v2535_v3 }
 0x24b   : > { %9578 = vcosq.f32 %v2400_v6  ;;  %v2479_v59 = vshll.u32 %v2478_v61, 30  ;;  %v2539_v43 = vor.u32 %v2538_v49, %v2537_v53  ;;  %v2542_v57 = vor.u32 %v2541_v20, %v2540_v32 }
 0x24c   : > { %9580 = vsinq.f32 %v2400_v6  ;;  %v2548_v27 = vor.u32 %v2547_v16, %v2546_v46  ;;  %v2545_v51 = vor.u32 %v2544_v0, %v2543_v48  ;;  %v2550_v12 = vshrl.u32 %v15083_v14, %v2535_v3 }
 0x24d   : > { %v12011_v7 = vsub.s32 %v2476_v10, %v2479_v59  ;;  %vm2552_vm0 = vcmp.lt.s32.totalorder %v2533_v5, 1  ;;  %vm12016_vm7 = vcmp.le.f32.partialorder %v15171_v50, 0.7853982  ;;  %vm2554_vm1 = vcmp.lt.s32.totalorder %v2533_v5, 3 }
 0x24e   : > { %vm2555_vm13 = vcmp.lt.s32.totalorder %v2533_v5, 4  ;;  %v2502_v38 = vsub.s32 4, %v2478_v61  ;;  %v2551_v10 = vor.u32 %v2550_v12, %v2549_v9  ;;  %vm2553_vm8 = vcmp.lt.s32.totalorder %v2533_v5, 2 }
 0x24f   : > { %v2482_v53 = vsub.s32 0, %v12011_v7  ;;  %vm14890_vm5 = vweird.f32 %v11688_v22  ;;  %v2557_v3 = vsel %vm2555_vm13, %v2545_v51, 2102212464  ;;  %v2560_v32 = vsel %vm2552_vm0, %v2539_v43, %v2542_v57 }
 0x250   : > { %v2561_v50 = vsel %vm2555_vm13, %v2548_v27, 920167782  ;;  %v2627_v46 = vand.u32 2139095040, %v11993_v35  ;;  %v2556_v60 = vsel %vm2552_vm0, %v2536_v39, %v2539_v43  ;;  %v2558_v48 = vsel %vm2554_vm1, %v2542_v57, %v2557_v3 }
 0x251   : > { %v9025_v49 = vmin.u32 %v2482_v53, %v12011_v7  ;;  %v2562_v6 = vsel %vm2554_vm1, %v2545_v51, %v2561_v50  ;;  %vm2408_vm3 = vcmp.eq.s32.totalorder %v11990_v55, 0  ;;  %v2564_v20 = vsel %vm2552_vm0, %v2542_v57, %v2545_v51 }
 0x252   : > { %v2563_v12 = vsel %vm2553_vm8, %v2560_v32, %v2562_v6  ;;  %v2565_v0 = vsel %vm2555_vm13, %v2551_v10, 1326507024  ;;  %vm2411_vm10 = vcmp.eq.s32.totalorder %v11990_v55, 2  ;;  %v2472_v16 = vadd.s32 %v11958_v30, %v11955_v24 }
 0x253   : > { %v2484_v59 = vclz %v9025_v49  ;;  %v2503_v39 = vsel %vm2418_vm6, %v2502_v38, %v2478_v61  ;;  %v2559_v9 = vsel %vm2553_vm8, %v2556_v60, %v2558_v48  ;;  %v2566_v43 = vsel %vm2554_vm1, %v2548_v27, %v2565_v0 }
 0x254   : > { %v12042_v53 = vmul.u32.u64.low %v2568_v62, %v2563_v12  ;;  %v12043_v3 = vmul.u32.u64.high %v2568_v62, %v2563_v12, %v12042_v53  ;;  %v2567_v51 = vsel %vm2553_vm8, %v2564_v20, %v2566_v43  ;;  %v14878_v10 = vand.u32 2147483647, %v11993_v35 }
 0x255   : > { %v12045_v32 = vpop.eup %9578  ;;  %v9026_v57 = vadd.s32 4294967294, %v2484_v59  ;;  %v2628_v50 = vshrl.u32 %v2627_v46, 23  ;;  %v12054_v61 = vsel %vm12016_vm7, 0, %v2503_v39  ;;  %v2575_v60 = vmul.u32 %v2568_v62, %v2559_v9 }
 0x256   : > { %15174 = vst [vmem:[#allocation72_spill] sm:$0xff] %v12045_v32  ;;  %v12049_v24 = vpop.eup %9580  ;;  %v14873_v30 = vxor.u32 2147483648, %v12045_v32  ;;  %15176 = vst [vmem:[#allocation74_spill] sm:$0xff] %v12054_v61  ;;  %v12056_v27 = vmul.u32.u64.low %v2568_v62, %v2567_v51  ;;  %v12057_v38 = vmul.u32.u64.high %v2568_v62, %v2567_v51, %v12056_v27  ;;  %v2578_v6 = vadd.s32 1, %v12043_v3 }
 0x257   : > { %15175 = vst [vmem:[#allocation73_spill] sm:$0xff] %v12049_v24  ;;  %v14874_v49 = vxor.u32 2147483648, %v12049_v24  ;;  %vm9027_vm0 = vcmp.lt.s32.totalorder %v9026_v57, 0  ;;  %v9032_v5 = vadd.s32 4294967169, %v2628_v50  ;;  %v206_v12 = vadd.s32 176, %v9928_v1 }
 0x258   : > { %v2413_v46 = vsel %vm2411_vm10, %v14873_v30, %v12049_v24  ;;  %v2487_v48 = vsel %vm9027_vm0, 0, %v9026_v57  ;;  %v2509_v9 = vadd.s32 3, %v12054_v61  ;;  %vm2577_vm10 = vc.u32 %v12057_v38, %v12042_v53 }
 0x259   : > { %v2410_v20 = vsel %vm2408_vm3, %v12045_v32, %v14874_v49  ;;  %v2488_v62 = vsub.s32 32, %v2487_v48  ;;  %v2489_v0 = vshll.u32 %v12011_v7, %v2487_v48  ;;  %v2492_v59 = vsub.s32 4294967266, %v2487_v48 }
 0x25a   : > { %v2414_v39 = vsel %vm2407_vm9, %v2410_v20, %v2413_v46  ;;  %v2634_v43 = vadd.s32 1, %v9032_v5  ;;  %v2579_v27 = vsel %vm2577_vm10, %v2578_v6, %v12043_v3  ;;  %v2631_v7 = vand.u32 8388607, %v14878_v10 }
 0x25b   : > { %v2415_v57 = vsel %vm14890_vm5, nan, %v2414_v39  ;;  %v2490_v51 = vshrl.u32 %v2472_v16, %v2488_v62  ;;  %v2493_v50 = vadd.s32 127, %v2492_v59  ;;  %v2580_v30 = vadd.s32 %v2579_v27, %v2575_v60 }
 0x25c   : > { %4618 = vst [vmem:[%s10284_s26 + $0x90] sm:$0xff] %v2415_v57  ;;  %vm2635_vm1 = vcmp.gt.s32.totalorder %v2634_v43, 0  ;;  %v248_v55 = vadd.s32 %v9930_v2, %v206_v12  ;;  %v12084_v39 = vand.u32 3, %v2509_v9  ;;  %v2632_v3 = vor.u32 8388608, %v2631_v7 }
 0x25d   : > { %v2491_v46 = vor.u32 %v2490_v51, %v2489_v0  ;;  %v2494_v48 = vshll.u32 %v2493_v50, 23  ;;  %v2636_v20 = vsel %vm2635_vm1, %v2634_v43, 0  ;;  %v2581_v49 = vadd.s32 536870912, %v2580_v30 }
 0x25e   : > { %v2638_v5 = vand.u32 31, %v2636_v20  ;;  %v288_v60 = vmul.u32 8, %v248_v55  ;;  %v2637_v59 = vshrl.u32 %v2636_v20, 5  ;;  %v2576_v7 = vadd.s32 %v12042_v53, %v12057_v38 }
 0x25f   : > { %v2495_v32 = vor.u32 4788187, %v2494_v48  ;;  %v2498_v22 = vcvt.s32.f32 %v2491_v46  ;;  %v12086_v16 = vshrl.u32 %v2581_v49, 30  ;;  %v12102_v10 = vshll.u32 %v2632_v3, 8 }
 0x260   : > { %v2639_v6 = vsub.s32 32, %v2638_v5  ;;  %v2641_v57 = vshll.u32 %v15077_v11, %v2638_v5  ;;  %v2644_v12 = vshll.u32 %v15078_v28, %v2638_v5  ;;  %v2647_v51 = vshll.u32 %v15079_v54, %v2638_v5 }
 0x261   : > { %v2496_v62 = vand.u32 2147483647, %v2495_v32  ;;  %v2583_v0 = vshll.u32 %v12086_v16, 30  ;;  %v2650_v9 = vshll.u32 %v15080_v21, %v2638_v5  ;;  %v2653_v46 = vshll.u32 %v15082_v23, %v2638_v5 }
 0x262   : > { %v2642_v43 = vshrl.u32 %v15078_v28, %v2639_v6  ;;  %v2645_v49 = vshrl.u32 %v15079_v54, %v2639_v6  ;;  %v2648_v27 = vshrl.u32 %v15080_v21, %v2639_v6  ;;  %v2651_v32 = vshrl.u32 %v15082_v23, %v2639_v6 }
 0x263   : > { %v2499_v50 = vmul.f32 %v2498_v22, %v2496_v62  ;;  %v12098_v55 = vsub.s32 %v2580_v30, %v2583_v0  ;;  %v2654_v48 = vshrl.u32 %v15083_v14, %v2639_v6  ;;  %v328_v24 = vcvt.s32.f32 %v288_v60 }
 0x264   : > { %v207_v22 = vadd.s32 184, %v9928_v1  ;;  %v2640_v61 = vshrl.u32 %v15077_v11, %v2639_v6  ;;  %v2643_v34 = vor.u32 %v2642_v43, %v2641_v57  ;;  %v2646_v63 = vor.u32 %v2645_v49, %v2644_v12 }
 0x265   : > { %v2500_v20 = vxor.u32 2147483648, %v2499_v50  ;;  %v2586_v62 = vsub.s32 0, %v12098_v55  ;;  %vm2522_vm13 = vcmp.lt.s32.totalorder %v11905_v47, 0  ;;  %v2649_v30 = vor.u32 %v2648_v27, %v2647_v51 }
 0x266   : > { %v2652_v38 = vor.u32 %v2651_v32, %v2650_v9  ;;  %vm2656_vm9 = vcmp.lt.s32.totalorder %v2637_v59, 1  ;;  %v2655_v60 = vor.u32 %v2654_v48, %v2653_v46  ;;  %vm2659_vm8 = vcmp.lt.s32.totalorder %v2637_v59, 4 }
 0x267   : > { %v2501_v53 = vsel %vm2418_vm6, %v2500_v20, %v2499_v50  ;;  %v9029_v3 = vmin.u32 %v2586_v62, %v12098_v55  ;;  %vm2657_vm3 = vcmp.lt.s32.totalorder %v2637_v59, 2  ;;  %vm2658_vm0 = vcmp.lt.s32.totalorder %v2637_v59, 3 }
 0x268   : > { %v2504_v5 = vsel %vm12016_vm7, %v11839_v45, %v2501_v53  ;;  %v2661_v6 = vsel %vm2659_vm8, %v2649_v30, 2102212464  ;;  %v15177_v57 = vand.u32 2147483647, %v11905_v47  ;;  %v2660_v56 = vsel %vm2656_vm9, %v2640_v61, %v2643_v34 }
 0x269   : > { %9582 = vcosq.f32 %v2504_v5  ;;  %v2588_v0 = vclz %v9029_v3  ;;  %v2664_v43 = vsel %vm2656_vm9, %v2643_v34, %v2646_v63  ;;  %v2662_v51 = vsel %vm2658_vm0, %v2646_v63, %v2661_v6 }
 0x26a   : > { %9584 = vsinq.f32 %v2504_v5  ;;  %vm12117_vm6 = vcmp.le.f32.partialorder %v15177_v57, 0.7853982  ;;  %v2665_v9 = vsel %vm2659_vm8, %v2652_v38, 920167782  ;;  %v2668_v50 = vsel %vm2656_vm9, %v2646_v63, %v2649_v30 }
 0x26b   : > { %v249_v49 = vadd.s32 %v9930_v2, %v207_v22  ;;  %v9030_v27 = vadd.s32 4294967294, %v2588_v0  ;;  %v2606_v32 = vsub.s32 4, %v12086_v16  ;;  %v2666_v46 = vsel %vm2658_vm0, %v2649_v30, %v2665_v9 }
 0x26c   : > { %v2669_v48 = vsel %vm2659_vm8, %v2655_v60, 1326507024  ;;  %vm2511_vm7 = vcmp.lt.s32.totalorder %v12084_v39, 2  ;;  %v2663_v61 = vsel %vm2657_vm3, %v2660_v56, %v2662_v51  ;;  %v2667_v34 = vsel %vm2657_vm3, %v2664_v43, %v2666_v46 }
 0x26d   : > { %v2670_v20 = vsel %vm2658_vm0, %v2652_v38, %v2669_v48  ;;  %v375_v62 = vadd.f32 %v11667_v52, %v328_v24  ;;  %vm14889_vm10 = vweird.f32 %v11839_v45  ;;  %vm9031_vm1 = vcmp.lt.s32.totalorder %v9030_v27, 0 }
 0x26e   : > { %v2671_v63 = vsel %vm2657_vm3, %v2668_v50, %v2670_v20  ;;  %v12138_v22 = vmul.u32.u64.low %v12102_v10, %v2667_v34  ;;  %v12139_v53 = vmul.u32.u64.high %v12102_v10, %v2667_v34, %v12138_v22  ;;  %v2591_v30 = vsel %vm9031_vm1, 0, %v9030_v27 }
 0x26f   : > { %v12142_v5 = vmul.u32.u64.low %v12102_v10, %v2671_v63  ;;  %v12143_v3 = vmul.u32.u64.high %v12102_v10, %v2671_v63, %v12142_v5  ;;  %v12146_v60 = vmul.f32 %v11685_v8, %v375_v62  ;;  %v2592_v38 = vsub.s32 32, %v2591_v30 }
 0x270   : > { %v2593_v52 = vshll.u32 %v12098_v55, %v2591_v30  ;;  %v2596_v24 = vsub.s32 4294967266, %v2591_v30  ;;  %v2607_v59 = vsel %vm2522_vm13, %v2606_v32, %v12086_v16  ;;  %vm2512_vm9 = vcmp.eq.s32.totalorder %v12084_v39, 0 }
 0x271   : > { %15180 = vst [vmem:[#allocation75_spill] sm:$0xff] %v12146_v60  ;;  %v2679_v6 = vmul.u32 %v12102_v10, %v2663_v61  ;;  %v2731_v57 = vand.u32 2139095040, %v12146_v60  ;;  %v289_v0 = vmul.u32 8, %v249_v49  ;;  %v2594_v56 = vshrl.u32 %v2576_v7, %v2592_v38 }
 0x272   : > { %v2597_v43 = vadd.s32 127, %v2596_v24  ;;  %v2682_v8 = vadd.s32 1, %v12139_v53  ;;  %v14888_v51 = vand.u32 2147483647, %v12146_v60  ;;  %vm2515_vm8 = vcmp.eq.s32.totalorder %v12084_v39, 2 }
 0x273   : > { %v12157_v9 = vpop.eup %9582  ;;  %v12162_v16 = vsel %vm12117_vm6, 0, %v2607_v59  ;;  %vm2681_vm3 = vc.u32 %v12143_v3, %v12138_v22  ;;  %v2732_v10 = vshrl.u32 %v2731_v57, 23  ;;  %v2595_v50 = vor.u32 %v2594_v56, %v2593_v52 }
 0x274   : > { %15181 = vst [vmem:[#allocation76_spill] sm:$0xff] %v12157_v9  ;;  %15182 = vst [vmem:[#allocation77_spill] sm:$0xff] %v12162_v16  ;;  %v12165_v55 = vpop.eup %9584  ;;  %v14886_v7 = vxor.u32 2147483648, %v12157_v9  ;;  %v2598_v49 = vshll.u32 %v2597_v43, 23  ;;  %v2683_v27 = vsel %vm2681_vm3, %v2682_v8, %v12139_v53  ;;  %v329_v61 = vcvt.s32.f32 %v289_v0  ;;  %v12189_v0 = vld [vmem:[%s14716_s1] ss:$0 sm:$0xff] }
 0x275   : > { %15183 = vst [vmem:[#allocation78_spill] sm:$0xff] %v12165_v55  ;;  %v14887_v32 = vxor.u32 2147483648, %v12165_v55  ;;  %v2684_v46 = vadd.s32 %v2683_v27, %v2679_v6  ;;  %v9036_v48 = vadd.s32 4294967169, %v2732_v10  ;;  %v2602_v62 = vcvt.s32.f32 %v2595_v50 }
 0x276   : > { %v2517_v34 = vsel %vm2515_vm8, %v14886_v7, %v12165_v55  ;;  %v2599_v20 = vor.u32 4788187, %v2598_v49  ;;  %v2735_v63 = vand.u32 8388607, %v14888_v51  ;;  %v2613_v24 = vadd.s32 3, %v12162_v16 }
 0x277   : > { %v2514_v53 = vsel %vm2512_vm9, %v12157_v9, %v14887_v32  ;;  %v2685_v30 = vadd.s32 536870912, %v2684_v46  ;;  %v2738_v5 = vadd.s32 1, %v9036_v48  ;;  %v208_v59 = vadd.s32 192, %v9928_v1 }
 0x278   : > { %v2518_v38 = vsel %vm2511_vm7, %v2514_v53, %v2517_v34  ;;  %v2600_v52 = vand.u32 2147483647, %v2599_v20  ;;  %v376_v56 = vadd.f32 %v12189_v0, %v329_v61  ;;  %v2736_v43 = vor.u32 8388608, %v2735_v63  ;;  %v12201_v53 = vld [vmem:[#allocation2] ss:$0 sm:$0xff] }
 0x279   : > { %v2519_v6 = vsel %vm14889_vm10, nan, %v2518_v38  ;;  %v2686_v57 = vshrl.u32 %v2685_v30, 30  ;;  %vm2739_vm0 = vcmp.gt.s32.totalorder %v2738_v5, 0  ;;  %v12193_v27 = vand.u32 3, %v2613_v24 }
 0x27a   : > { %4619 = vst [vmem:[%s10284_s26 + $0x98] sm:$0xff] %v2519_v6  ;;  %v2603_v39 = vmul.f32 %v2602_v62, %v2600_v52  ;;  %v2740_v8 = vsel %vm2739_vm0, %v2738_v5, 0  ;;  %vm2626_vm7 = vcmp.lt.s32.totalorder %v11993_v35, 0  ;;  %v12197_v48 = vadd.s32 %v12138_v22, %v12143_v3 }
 0x27b   : > { %v2687_v10 = vshll.u32 %v2686_v57, 30  ;;  %v2742_v50 = vand.u32 31, %v2740_v8  ;;  %v12204_v61 = vmul.f32 %v12201_v53, %v376_v56  ;;  %v12207_v62 = vadd.s32 %v9930_v2, %v208_v59 }
 0x27c   : > { %v2604_v49 = vxor.u32 2147483648, %v2603_v39  ;;  %v12213_v22 = vshll.u32 %v2736_v43, 8  ;;  %v2741_v38 = vshrl.u32 %v2740_v8, 5  ;;  %vm2615_vm1 = vcmp.lt.s32.totalorder %v12193_v27, 2 }
 0x27d   : > { %v12199_v34 = vsub.s32 %v2684_v46, %v2687_v10  ;;  %v2743_v20 = vsub.s32 32, %v2742_v50  ;;  %15184 = vst [vmem:[#allocation79_spill] sm:$0xff] %v12204_v61  ;;  %v2745_v30 = vshll.u32 %v15077_v11, %v2742_v50  ;;  %v2748_v5 = vshll.u32 %v15078_v28, %v2742_v50 }
 0x27e   : > { %v2605_v63 = vsel %vm2522_vm13, %v2604_v49, %v2603_v39  ;;  %v2751_v52 = vshll.u32 %v15079_v54, %v2742_v50  ;;  %v2710_v39 = vsub.s32 4, %v2686_v57  ;;  %v2754_v43 = vshll.u32 %v15080_v21, %v2742_v50 }
 0x27f   : > { %v2608_v3 = vsel %vm12117_vm6, %v11905_v47, %v2605_v63  ;;  %v2690_v46 = vsub.s32 0, %v12199_v34  ;;  %v2746_v24 = vshrl.u32 %v15078_v28, %v2743_v20  ;;  %v2749_v59 = vshrl.u32 %v15079_v54, %v2743_v20 }
 0x280   : > { %9586 = vcosq.f32 %v2608_v3  ;;  %v2752_v6 = vshrl.u32 %v15080_v21, %v2743_v20  ;;  %vm2619_vm13 = vcmp.eq.s32.totalorder %v12193_v27, 2  ;;  %v2755_v8 = vshrl.u32 %v15082_v23, %v2743_v20 }
 0x281   : > { %9588 = vsinq.f32 %v2608_v3  ;;  %v9033_v56 = vmin.u32 %v2690_v46, %v12199_v34  ;;  %v2747_v12 = vor.u32 %v2746_v24, %v2745_v30  ;;  %v2750_v10 = vor.u32 %v2749_v59, %v2748_v5 }
 0x282   : > { %vm2616_vm6 = vcmp.eq.s32.totalorder %v12193_v27, 0  ;;  %v2744_v7 = vshrl.u32 %v15077_v11, %v2743_v20  ;;  %v2753_v32 = vor.u32 %v2752_v6, %v2751_v52  ;;  %v2835_v3 = vand.u32 2139095040, %v12204_v61 }
 0x283   : > { %v2692_v63 = vclz %v9033_v56  ;;  %v15185_v46 = vand.u32 2147483647, %v11993_v35  ;;  %v2756_v30 = vor.u32 %v2755_v8, %v2754_v43  ;;  %v2757_v5 = vshll.u32 %v15082_v23, %v2742_v50 }
 0x284   : > { %v2758_v24 = vshrl.u32 %v15083_v14, %v2743_v20  ;;  %vm2760_vm8 = vcmp.lt.s32.totalorder %v2741_v38, 1  ;;  %vm14912_vm3 = vweird.f32 %v11905_v47  ;;  %v2711_v52 = vsel %vm2626_vm7, %v2710_v39, %v2686_v57 }
 0x285   : > { %vm12234_vm9 = vcmp.le.f32.partialorder %v15185_v46, 0.7853982  ;;  %v9034_v59 = vadd.s32 4294967294, %v2692_v63  ;;  %vm2762_vm0 = vcmp.lt.s32.totalorder %v2741_v38, 3  ;;  %vm2763_vm10 = vcmp.lt.s32.totalorder %v2741_v38, 4 }
 0x286   : > { %v2759_v6 = vor.u32 %v2758_v24, %v2757_v5  ;;  %vm2761_vm5 = vcmp.lt.s32.totalorder %v2741_v38, 2  ;;  %v2765_v56 = vsel %vm2763_vm10, %v2753_v32, 2102212464  ;;  %v2768_v46 = vsel %vm2760_vm8, %v2747_v12, %v2750_v10 }
 0x287   : > { %vm9035_vm14 = vcmp.lt.s32.totalorder %v9034_v59, 0  ;;  %v2764_v43 = vsel %vm2760_vm8, %v2744_v7, %v2747_v12  ;;  %v2766_v50 = vsel %vm2762_vm0, %v2750_v10, %v2765_v56  ;;  %v2769_v20 = vsel %vm2763_vm10, %v2756_v30, 920167782 }
 0x288   : > { %v2695_v8 = vsel %vm9035_vm14, 0, %v9034_v59  ;;  %v2770_v49 = vsel %vm2762_vm0, %v2753_v32, %v2769_v20  ;;  %v2772_v63 = vsel %vm2760_vm8, %v2750_v10, %v2753_v32  ;;  %v2773_v45 = vsel %vm2763_vm10, %v2759_v6, 1326507024 }
 0x289   : > { %v2696_v57 = vsub.s32 32, %v2695_v8  ;;  %v2697_v39 = vshll.u32 %v12199_v34, %v2695_v8  ;;  %v2700_v5 = vsub.s32 4294967266, %v2695_v8  ;;  %v2771_v24 = vsel %vm2761_vm5, %v2768_v46, %v2770_v49 }
 0x28a   : > { %v12250_v9 = vpop.eup %9586  ;;  %v2767_v55 = vsel %vm2761_vm5, %v2764_v43, %v2766_v50  ;;  %v2774_v7 = vsel %vm2762_vm0, %v2756_v30, %v2773_v45  ;;  %v12255_v12 = vmul.u32.u64.low %v12213_v22, %v2771_v24  ;;  %v12256_v59 = vmul.u32.u64.high %v12213_v22, %v2771_v24, %v12255_v12 }
 0x28b   : > { %15188 = vst [vmem:[#allocation80_spill] sm:$0xff] %v12250_v9  ;;  %v12259_v56 = vpop.eup %9588  ;;  %v14897_v32 = vxor.u32 2147483648, %v12250_v9  ;;  %v2698_v34 = vshrl.u32 %v12197_v48, %v2696_v57  ;;  %v2701_v10 = vadd.s32 127, %v2700_v5  ;;  %v2775_v49 = vsel %vm2761_vm5, %v2772_v63, %v2774_v7 }
 0x28c   : > { %15189 = vst [vmem:[#allocation81_spill] sm:$0xff] %v12259_v56  ;;  %v14898_v6 = vxor.u32 2147483648, %v12259_v56  ;;  %v12266_v46 = vmul.u32.u64.low %v12213_v22, %v2775_v49  ;;  %v12267_v43 = vmul.u32.u64.high %v12213_v22, %v2775_v49, %v12266_v46  ;;  %v2836_v45 = vshrl.u32 %v2835_v3, 23 }
 0x28d   : > { %v2621_v30 = vsel %vm2619_vm13, %v14897_v32, %v12259_v56  ;;  %v2699_v50 = vor.u32 %v2698_v34, %v2697_v39  ;;  %v2702_v20 = vshll.u32 %v2701_v10, 23  ;;  %v12276_v48 = vsel %vm12234_vm9, 0, %v2711_v52 }
 0x28e   : > { %15190 = vst [vmem:[#allocation82_spill] sm:$0xff] %v12276_v48  ;;  %v2618_v38 = vsel %vm2616_vm6, %v12250_v9, %v14898_v6  ;;  %v2783_v3 = vmul.u32 %v12213_v22, %v2767_v55  ;;  %v2786_v8 = vadd.s32 1, %v12256_v59  ;;  %v9040_v63 = vadd.s32 4294967169, %v2836_v45 }
 0x28f   : > { %v2622_v57 = vsel %vm2615_vm1, %v2618_v38, %v2621_v30  ;;  %v2703_v39 = vor.u32 4788187, %v2702_v20  ;;  %v2706_v5 = vcvt.s32.f32 %v2699_v50  ;;  %vm2785_vm14 = vc.u32 %v12267_v43, %v12255_v12 }
 0x290   : > { %v2623_v52 = vsel %vm14912_vm3, nan, %v2622_v57  ;;  %v2842_v24 = vadd.s32 1, %v9040_v63  ;;  %v2717_v34 = vadd.s32 3, %v12276_v48  ;;  %v2787_v55 = vsel %vm2785_vm14, %v2786_v8, %v12256_v59 }
 0x291   : > { %4620 = vst [vmem:[%s10284_s26 + $0xa0] sm:$0xff] %v2623_v52  ;;  %v2704_v7 = vand.u32 2147483647, %v2703_v39  ;;  %v2788_v22 = vadd.s32 %v2787_v55, %v2783_v3  ;;  %v15191_v10 = vand.u32 2147483647, %v12204_v61  ;;  %v290_v49 = vmul.u32 8, %v12207_v62 }
 0x292   : > { %vm2843_vm5 = vcmp.gt.s32.totalorder %v2842_v24, 0  ;;  %v12297_v38 = vand.u32 3, %v2717_v34  ;;  %vm2730_vm14 = vcmp.lt.s32.totalorder %v12146_v60, 0 }
 0x293   : > { %v2839_v27 = vand.u32 8388607, %v15191_v10  ;;  %v2707_v46 = vmul.f32 %v2706_v5, %v2704_v7  ;;  %v2844_v45 = vsel %vm2843_vm5, %v2842_v24, 0  ;;  %v2789_v30 = vadd.s32 536870912, %v2788_v22 }
 0x294   : > { %v2846_v50 = vand.u32 31, %v2844_v45  ;;  %v330_v52 = vcvt.s32.f32 %v290_v49  ;;  %v2845_v3 = vshrl.u32 %v2844_v45, 5  ;;  %vm2723_vm10 = vcmp.eq.s32.totalorder %v12297_v38, 2 }
 0x295   : > { %v2708_v20 = vxor.u32 2147483648, %v2707_v46  ;;  %v12299_v63 = vshrl.u32 %v2789_v30, 30  ;;  %v2840_v57 = vor.u32 8388608, %v2839_v27  ;;  %vm2719_vm13 = vcmp.lt.s32.totalorder %v12297_v38, 2 }
 0x296   : > { %v2847_v39 = vsub.s32 32, %v2846_v50  ;;  %v2849_v8 = vshll.u32 %v15077_v11, %v2846_v50  ;;  %v2852_v62 = vshll.u32 %v15078_v28, %v2846_v50  ;;  %v2855_v7 = vshll.u32 %v15079_v54, %v2846_v50 }
 0x297   : > { %v2709_v59 = vsel %vm2626_vm7, %v2708_v20, %v2707_v46  ;;  %v2791_v24 = vshll.u32 %v12299_v63, 30  ;;  %v2858_v34 = vshll.u32 %v15080_v21, %v2846_v50  ;;  %v2861_v51 = vshll.u32 %v15082_v23, %v2846_v50 }
 0x298   : > { %v2712_v5 = vsel %vm12234_vm9, %v11993_v35, %v2709_v59  ;;  %v2850_v55 = vshrl.u32 %v15078_v28, %v2847_v39  ;;  %v2853_v10 = vshrl.u32 %v15079_v54, %v2847_v39  ;;  %v2856_v27 = vshrl.u32 %v15080_v21, %v2847_v39 }
 0x299   : > { %9590 = vcosq.f32 %v2712_v5  ;;  %v12314_v49 = vsub.s32 %v2788_v22, %v2791_v24  ;;  %v2859_v46 = vshrl.u32 %v15082_v23, %v2847_v39  ;;  %v2848_v45 = vshrl.u32 %v15077_v11, %v2847_v39 }
 0x29a   : > { %9592 = vsinq.f32 %v2712_v5  ;;  %v2851_v30 = vor.u32 %v2850_v55, %v2849_v8  ;;  %v2854_v20 = vor.u32 %v2853_v10, %v2852_v62  ;;  %v209_v59 = vadd.s32 200, %v9928_v1 }
 0x29b   : > { %vm2720_vm7 = vcmp.eq.s32.totalorder %v12297_v38, 0  ;;  %v2794_v32 = vsub.s32 0, %v12314_v49  ;;  %v2857_v6 = vor.u32 %v2856_v27, %v2855_v7  ;;  %v2860_v5 = vor.u32 %v2859_v46, %v2858_v34 }
 0x29c   : > { %v2862_v22 = vshrl.u32 %v15083_v14, %v2847_v39  ;;  %vm2864_vm6 = vcmp.lt.s32.totalorder %v2845_v3, 1  ;;  %vm2867_vm1 = vcmp.lt.s32.totalorder %v2845_v3, 4  ;;  %v2880_v50 = vshll.u32 %v2840_v57, 8 }
 0x29d   : > { %v377_v24 = vadd.f32 %v12189_v0, %v330_v52  ;;  %vm14911_vm9 = vweird.f32 %v11993_v35  ;;  %v9037_v8 = vmin.u32 %v2794_v32, %v12314_v49  ;;  %vm2865_vm8 = vcmp.lt.s32.totalorder %v2845_v3, 2 }
 0x29e   : > { %v2863_v62 = vor.u32 %v2862_v22, %v2861_v51  ;;  %vm2866_vm0 = vcmp.lt.s32.totalorder %v2845_v3, 3  ;;  %v2868_v7 = vsel %vm2864_vm6, %v2848_v45, %v2851_v30  ;;  %v2869_v39 = vsel %vm2867_vm1, %v2857_v6, 2102212464 }
 0x29f   : > { %v2872_v34 = vsel %vm2864_vm6, %v2851_v30, %v2854_v20  ;;  %v2873_v55 = vsel %vm2867_vm1, %v2860_v5, 920167782  ;;  %v2784_v57 = vadd.s32 %v12255_v12, %v12267_v43  ;;  %v2796_v52 = vclz %v9037_v8 }
 0x2a0   : > { %v2876_v10 = vsel %vm2864_vm6, %v2854_v20, %v2857_v6  ;;  %v251_v32 = vadd.s32 %v9930_v2, %v209_v59  ;;  %v2814_v27 = vsub.s32 4, %v12299_v63  ;;  %v2870_v46 = vsel %vm2866_vm0, %v2854_v20, %v2869_v39 }
 0x2a1   : > { %v2874_v51 = vsel %vm2866_vm0, %v2857_v6, %v2873_v55  ;;  %v2877_v45 = vsel %vm2867_vm1, %v2863_v62, 1326507024  ;;  %v9038_v22 = vadd.s32 4294967294, %v2796_v52  ;;  %v2871_v30 = vsel %vm2865_vm8, %v2868_v7, %v2870_v46 }
 0x2a2   : > { %v2875_v47 = vsel %vm2865_vm8, %v2872_v34, %v2874_v51  ;;  %v2878_v12 = vsel %vm2866_vm0, %v2860_v5, %v2877_v45  ;;  %v12351_v20 = vmul.f32 %v12201_v53, %v377_v24  ;;  %v2887_v55 = vmul.u32 %v2880_v50, %v2871_v30 }
 0x2a3   : > { %v12344_v43 = vpop.eup %9590  ;;  %v2879_v8 = vsel %vm2865_vm8, %v2876_v10, %v2878_v12  ;;  %v12347_v59 = vmul.u32.u64.low %v2880_v50, %v2875_v47  ;;  %v12348_v9 = vmul.u32.u64.high %v2880_v50, %v2875_v47, %v12347_v59  ;;  %vm9039_vm5 = vcmp.lt.s32.totalorder %v9038_v22, 0 }
 0x2a4   : > { %15192 = vst [vmem:[#allocation83_spill] sm:$0xff] %v12344_v43  ;;  %15193 = vst [vmem:[#allocation84_spill] sm:$0xff] %v12351_v20  ;;  %v12353_v6 = vpop.eup %9592  ;;  %v14902_v62 = vxor.u32 2147483648, %v12344_v43  ;;  %v12356_v7 = vmul.u32.u64.low %v2880_v50, %v2879_v8  ;;  %v12357_v39 = vmul.u32.u64.high %v2880_v50, %v2879_v8, %v12356_v7  ;;  %v2799_v34 = vsel %vm9039_vm5, 0, %v9038_v22 }
 0x2a5   : > { %15194 = vst [vmem:[#allocation85_spill] sm:$0xff] %v12353_v6  ;;  %v14903_v5 = vxor.u32 2147483648, %v12353_v6  ;;  %v291_v3 = vmul.u32 8, %v251_v32  ;;  %v2800_v24 = vsub.s32 32, %v2799_v34  ;;  %v2801_v52 = vshll.u32 %v12314_v49, %v2799_v34 }
 0x2a6   : > { %v2725_v47 = vsel %vm2723_vm10, %v14902_v62, %v12353_v6  ;;  %v2804_v10 = vsub.s32 4294967266, %v2799_v34  ;;  %v2890_v50 = vadd.s32 1, %v12348_v9  ;;  %v14904_v32 = vand.u32 2147483647, %v12351_v20 }
 0x2a7   : > { %v2722_v46 = vsel %vm2720_vm7, %v12344_v43, %v14903_v5  ;;  %v2939_v51 = vand.u32 2139095040, %v12351_v20  ;;  %v2802_v22 = vshrl.u32 %v2784_v57, %v2800_v24  ;;  %v2815_v49 = vsel %vm2730_vm14, %v2814_v27, %v12299_v63 }
 0x2a8   : > { %v2726_v45 = vsel %vm2719_vm13, %v2722_v46, %v2725_v47  ;;  %v2805_v30 = vadd.s32 127, %v2804_v10  ;;  %v15195_v8 = vand.u32 2147483647, %v12146_v60  ;;  %vm2889_vm7 = vc.u32 %v12357_v39, %v12347_v59 }
 0x2a9   : > { %v2727_v12 = vsel %vm14911_vm9, nan, %v2726_v45  ;;  %v2940_v34 = vshrl.u32 %v2939_v51, 23  ;;  %v2803_v38 = vor.u32 %v2802_v22, %v2801_v52  ;;  %v2891_v47 = vsel %vm2889_vm7, %v2890_v50, %v12348_v9 }
 0x2aa   : > { %vm12383_vm10 = vcmp.le.f32.partialorder %v15195_v8, 0.7853982  ;;  %4621 = vst [vmem:[%s10284_s26 + $0xa8] sm:$0xff] %v2727_v12  ;;  %v2806_v57 = vshll.u32 %v2805_v30, 23  ;;  %v210_v24 = vadd.s32 208, %v9928_v1  ;;  %v2892_v27 = vadd.s32 %v2891_v47, %v2887_v55 }
 0x2ab   : > { %v12393_v63 = vsel %vm12383_vm10, 0, %v2815_v49  ;;  %v9044_v10 = vadd.s32 4294967169, %v2940_v34  ;;  %v2943_v46 = vand.u32 8388607, %v14904_v32  ;;  %v2810_v8 = vcvt.s32.f32 %v2803_v38 }
 0x2ac   : > { %15198 = vst [vmem:[#allocation86_spill] sm:$0xff] %v12393_v63  ;;  %v2807_v45 = vor.u32 4788187, %v2806_v57  ;;  %v331_v62 = vcvt.s32.f32 %v291_v3  ;;  %v2893_v51 = vadd.s32 536870912, %v2892_v27  ;;  %v2821_v22 = vadd.s32 3, %v12393_v63 }
 0x2ad   : > { %v2946_v12 = vadd.s32 1, %v9044_v10  ;;  %v211_v9 = vadd.s32 216, %v9928_v1  ;;  %v2944_v30 = vor.u32 8388608, %v2943_v46  ;;  %v252_v49 = vadd.s32 %v9930_v2, %v210_v24 }
 0x2ae   : > { %v2808_v52 = vand.u32 2147483647, %v2807_v45  ;;  %v2894_v50 = vshrl.u32 %v2893_v51, 30  ;;  %v378_v47 = vadd.f32 %v12189_v0, %v331_v62  ;;  %v12401_v3 = vand.u32 3, %v2821_v22 }
 0x2af   : > { %vm2947_vm13 = vcmp.gt.s32.totalorder %v2946_v12, 0  ;;  %vm2834_vm6 = vcmp.lt.s32.totalorder %v12204_v61, 0  ;;  %v12405_v10 = vadd.s32 %v12347_v59, %v12357_v39  ;;  %v12408_v45 = vadd.s32 %v9930_v2, %v211_v9 }
 0x2b0   : > { %v2811_v55 = vmul.f32 %v2810_v8, %v2808_v52  ;;  %v2948_v34 = vsel %vm2947_vm13, %v2946_v12, 0  ;;  %v2895_v5 = vshll.u32 %v2894_v50, 30  ;;  %v12412_v8 = vshll.u32 %v2944_v30, 8 }
 0x2b1   : > { %v2950_v57 = vand.u32 31, %v2948_v34  ;;  %v292_v51 = vmul.u32 8, %v252_v49  ;;  %v12419_v22 = vmul.f32 %v12201_v53, %v378_v47  ;;  %v2918_v47 = vsub.s32 4, %v2894_v50 }
 0x2b2   : > { %v2812_v38 = vxor.u32 2147483648, %v2811_v55  ;;  %v12410_v46 = vsub.s32 %v2892_v27, %v2895_v5  ;;  %v2949_v5 = vshrl.u32 %v2948_v34, 5  ;;  %vm2827_vm1 = vcmp.eq.s32.totalorder %v12401_v3, 2 }
 0x2b3   : > { %v2951_v24 = vsub.s32 32, %v2950_v57  ;;  %v2953_v12 = vshll.u32 %v15077_v11, %v2950_v57  ;;  %v2956_v52 = vshll.u32 %v15078_v28, %v2950_v57  ;;  %15199 = vst [vmem:[#allocation87_spill] sm:$0xff] %v12419_v22  ;;  %v2959_v27 = vshll.u32 %v15079_v54, %v2950_v57 }
 0x2b4   : > { %v2813_v62 = vsel %vm2730_vm14, %v2812_v38, %v2811_v55  ;;  %v2898_v39 = vsub.s32 0, %v12410_v46  ;;  %v2962_v38 = vshll.u32 %v15080_v21, %v2950_v57  ;;  %v12433_v32 = vcvt.s32.f32 %v292_v51 }
 0x2b5   : > { %v2816_v59 = vsel %vm12383_vm10, %v12146_v60, %v2813_v62  ;;  %v2954_v9 = vshrl.u32 %v15078_v28, %v2951_v24  ;;  %v2957_v30 = vshrl.u32 %v15079_v54, %v2951_v24  ;;  %v2960_v49 = vshrl.u32 %v15080_v21, %v2951_v24 }
 0x2b6   : > { %9594 = vcosq.f32 %v2816_v59  ;;  %v9041_v55 = vmin.u32 %v2898_v39, %v12410_v46  ;;  %v2963_v34 = vshrl.u32 %v15082_v23, %v2951_v24  ;;  %vm2824_vm8 = vcmp.eq.s32.totalorder %v12401_v3, 0 }
 0x2b7   : > { %9596 = vsinq.f32 %v2816_v59  ;;  %v2955_v7 = vor.u32 %v2954_v9, %v2953_v12  ;;  %v2958_v62 = vor.u32 %v2957_v30, %v2956_v52  ;;  %v2952_v63 = vshrl.u32 %v15077_v11, %v2951_v24 }
 0x2b8   : > { %v2900_v35 = vclz %v9041_v55  ;;  %v2961_v43 = vor.u32 %v2960_v49, %v2959_v27  ;;  %v3043_v59 = vand.u32 2139095040, %v12419_v22  ;;  %vm2823_vm0 = vcmp.lt.s32.totalorder %v12401_v3, 2 }
 0x2b9   : > { %v2964_v39 = vor.u32 %v2963_v34, %v2962_v38  ;;  %v2965_v6 = vshll.u32 %v15082_v23, %v2950_v57  ;;  %v2966_v12 = vshrl.u32 %v15083_v14, %v2951_v24  ;;  %vm2968_vm14 = vcmp.lt.s32.totalorder %v2949_v5, 1 }
 0x2ba   : > { %vm14926_vm5 = vweird.f32 %v12146_v60  ;;  %v15200_v51 = vand.u32 2147483647, %v12204_v61  ;;  %v9042_v9 = vadd.s32 4294967294, %v2900_v35  ;;  %v2919_v27 = vsel %vm2834_vm6, %v2918_v47, %v2894_v50 }
 0x2bb   : > { %vm2970_vm7 = vcmp.lt.s32.totalorder %v2949_v5, 3  ;;  %vm2971_vm13 = vcmp.lt.s32.totalorder %v2949_v5, 4  ;;  %v2967_v30 = vor.u32 %v2966_v12, %v2965_v6  ;;  %vm2969_vm9 = vcmp.lt.s32.totalorder %v2949_v5, 2 }
 0x2bc   : > { %vm12444_vm10 = vcmp.le.f32.partialorder %v15200_v51, 0.7853982  ;;  %v2973_v57 = vsel %vm2971_vm13, %v2961_v43, 2102212464  ;;  %v2976_v24 = vsel %vm2968_vm14, %v2955_v7, %v2958_v62  ;;  %vm9043_vm3 = vcmp.lt.s32.totalorder %v9042_v9, 0 }
 0x2bd   : > { %v2972_v49 = vsel %vm2968_vm14, %v2952_v63, %v2955_v7  ;;  %v2974_v55 = vsel %vm2970_vm7, %v2958_v62, %v2973_v57  ;;  %v2977_v38 = vsel %vm2971_vm13, %v2964_v39, 920167782  ;;  %v2903_v34 = vsel %vm9043_vm3, 0, %v9042_v9 }
 0x2be   : > { %v2978_v51 = vsel %vm2970_vm7, %v2961_v43, %v2977_v38  ;;  %v2980_v35 = vsel %vm2968_vm14, %v2958_v62, %v2961_v43  ;;  %v2981_v56 = vsel %vm2971_vm13, %v2967_v30, 1326507024  ;;  %v2904_v50 = vsub.s32 32, %v2903_v34 }
 0x2bf   : > { %v2905_v47 = vshll.u32 %v12410_v46, %v2903_v34  ;;  %v2908_v6 = vsub.s32 4294967266, %v2903_v34  ;;  %v2979_v12 = vsel %vm2969_vm9, %v2976_v24, %v2978_v51  ;;  %v2975_v16 = vsel %vm2969_vm9, %v2972_v49, %v2974_v55 }
 0x2c0   : > { %v12457_v48 = vpop.eup %9594  ;;  %v2982_v63 = vsel %vm2970_vm7, %v2964_v39, %v2981_v56  ;;  %v12462_v7 = vmul.u32.u64.low %v12412_v8, %v2979_v12  ;;  %v12463_v9 = vmul.u32.u64.high %v12412_v8, %v2979_v12, %v12462_v7  ;;  %v2906_v62 = vshrl.u32 %v12405_v10, %v2904_v50 }
 0x2c1   : > { %15203 = vst [vmem:[#allocation88_spill] sm:$0xff] %v12457_v48  ;;  %v12465_v57 = vpop.eup %9596  ;;  %v14917_v43 = vxor.u32 2147483648, %v12457_v48  ;;  %v2909_v46 = vadd.s32 127, %v2908_v6  ;;  %v2983_v30 = vsel %vm2969_vm9, %v2980_v35, %v2982_v63  ;;  %v14919_v56 = vand.u32 2147483647, %v12419_v22 }
 0x2c2   : > { %15204 = vst [vmem:[#allocation89_spill] sm:$0xff] %v12465_v57  ;;  %v14918_v24 = vxor.u32 2147483648, %v12465_v57  ;;  %v12472_v38 = vmul.u32.u64.low %v12412_v8, %v2983_v30  ;;  %v12473_v49 = vmul.u32.u64.high %v12412_v8, %v2983_v30, %v12472_v38  ;;  %v2907_v55 = vor.u32 %v2906_v62, %v2905_v47 }
 0x2c3   : > { %v2829_v39 = vsel %vm2827_vm1, %v14917_v43, %v12465_v57  ;;  %v2910_v10 = vshll.u32 %v2909_v46, 23  ;;  %v3044_v34 = vshrl.u32 %v3043_v59, 23  ;;  %v12488_v51 = vsel %vm12444_vm10, 0, %v2919_v27 }
 0x2c4   : > { %v2826_v5 = vsel %vm2824_vm8, %v12457_v48, %v14918_v24  ;;  %15205 = vst [vmem:[#allocation90_spill] sm:$0xff] %v12488_v51  ;;  %v2991_v35 = vmul.u32 %v12412_v8, %v2975_v16  ;;  %v2994_v50 = vadd.s32 1, %v12463_v9  ;;  %v2914_v12 = vcvt.s32.f32 %v2907_v55 }
 0x2c5   : > { %v2830_v6 = vsel %vm2823_vm0, %v2826_v5, %v2829_v39  ;;  %v2911_v47 = vor.u32 4788187, %v2910_v10  ;;  %v9048_v59 = vadd.s32 4294967169, %v3044_v34  ;;  %vm2993_vm3 = vc.u32 %v12473_v49, %v12462_v7 }
 0x2c6   : > { %v2831_v63 = vsel %vm14926_vm5, nan, %v2830_v6  ;;  %v2995_v27 = vsel %vm2993_vm3, %v2994_v50, %v12463_v9  ;;  %v2925_v16 = vadd.s32 3, %v12488_v51  ;;  %v379_v3 = vadd.f32 %v12189_v0, %v12433_v32 }
 0x2c7   : > { %4622 = vst [vmem:[%s10284_s26 + $0xb0] sm:$0xff] %v2831_v63  ;;  %v2912_v62 = vand.u32 2147483647, %v2911_v47  ;;  %v3050_v46 = vadd.s32 1, %v9048_v59  ;;  %v2996_v8 = vadd.s32 %v2995_v27, %v2991_v35  ;;  %v293_v30 = vmul.u32 8, %v12408_v45 }
 0x2c8   : > { %v3047_v39 = vand.u32 8388607, %v14919_v56  ;;  %v12505_v6 = vand.u32 3, %v2925_v16  ;;  %vm2938_vm1 = vcmp.lt.s32.totalorder %v12351_v20, 0  ;;  %v12509_v35 = vmul.f32 %v12201_v53, %v379_v3 }
 0x2c9   : > { %v2915_v38 = vmul.f32 %v2914_v12, %v2912_v62  ;;  %vm3051_vm9 = vcmp.gt.s32.totalorder %v3050_v46, 0  ;;  %v2997_v55 = vadd.s32 536870912, %v2996_v8  ;;  %v12511_v32 = vcvt.s32.f32 %v293_v30 }
 0x2ca   : > { %v3052_v10 = vsel %vm3051_vm9, %v3050_v46, 0  ;;  %15206 = vst [vmem:[#allocation91_spill] sm:$0xff] %v12509_v35  ;;  %v3048_v50 = vor.u32 8388608, %v3047_v39  ;;  %v3147_v52 = vand.u32 2139095040, %v12509_v35  ;;  %v2992_v39 = vadd.s32 %v12462_v7, %v12473_v49 }
 0x2cb   : > { %v2916_v34 = vxor.u32 2147483648, %v2915_v38  ;;  %v3054_v5 = vand.u32 31, %v3052_v10  ;;  %v2998_v9 = vshrl.u32 %v2997_v55, 30  ;;  %v3053_v47 = vshrl.u32 %v3052_v10, 5 }
 0x2cc   : > { %vm2928_vm8 = vcmp.eq.s32.totalorder %v12505_v6, 0  ;;  %vm2927_vm0 = vcmp.lt.s32.totalorder %v12505_v6, 2  ;;  %v15207_v49 = vand.u32 2147483647, %v12351_v20 }
 0x2cd   : > { %v2917_v45 = vsel %vm2834_vm6, %v2916_v34, %v2915_v38  ;;  %v3055_v12 = vsub.s32 32, %v3054_v5  ;;  %v2999_v63 = vshll.u32 %v2998_v9, 30  ;;  %v3057_v62 = vshll.u32 %v15077_v11, %v3054_v5 }
 0x2ce   : > { %v2920_v59 = vsel %vm12444_vm10, %v12204_v61, %v2917_v45  ;;  %v3060_v27 = vshll.u32 %v15078_v28, %v3054_v5  ;;  %v3063_v3 = vshll.u32 %v15079_v54, %v3054_v5  ;;  %vm2931_vm6 = vcmp.eq.s32.totalorder %v12505_v6, 2 }
 0x2cf   : > { %9598 = vcosq.f32 %v2920_v59  ;;  %v3058_v46 = vshrl.u32 %v15078_v28, %v3055_v12  ;;  %v3061_v16 = vshrl.u32 %v15079_v54, %v3055_v12  ;;  %v12523_v30 = vsub.s32 %v2996_v8, %v2999_v63 }
 0x2d0   : > { %9600 = vsinq.f32 %v2920_v59  ;;  %v3064_v38 = vshrl.u32 %v15080_v21, %v3055_v12  ;;  %v3022_v55 = vsub.s32 4, %v2998_v9  ;;  %v3056_v10 = vshrl.u32 %v15077_v11, %v3055_v12 }
 0x2d1   : > { %v3066_v34 = vshll.u32 %v15080_v21, %v3054_v5  ;;  %v3002_v45 = vsub.s32 0, %v12523_v30  ;;  %v3059_v59 = vor.u32 %v3058_v46, %v3057_v62  ;;  %v3062_v8 = vor.u32 %v3061_v16, %v3060_v27 }
 0x2d2   : > { %v3067_v63 = vshrl.u32 %v15082_v23, %v3055_v12  ;;  %v3065_v43 = vor.u32 %v3064_v38, %v3063_v3  ;;  %v3069_v24 = vshll.u32 %v15082_v23, %v3054_v5  ;;  %v3070_v7 = vshrl.u32 %v15083_v14, %v3055_v12 }
 0x2d3   : > { %vm3072_vm14 = vcmp.lt.s32.totalorder %v3053_v47, 1  ;;  %vm14948_vm10 = vweird.f32 %v12204_v61  ;;  %vm12540_vm7 = vcmp.le.f32.partialorder %v15207_v49, 0.7853982  ;;  %v9045_v62 = vmin.u32 %v3002_v45, %v12523_v30 }
 0x2d4   : > { %v3068_v27 = vor.u32 %v3067_v63, %v3066_v34  ;;  %v3088_v46 = vshll.u32 %v3048_v50, 8  ;;  %v3148_v16 = vshrl.u32 %v3147_v52, 23  ;;  %v3023_v3 = vsel %vm2938_vm1, %v3022_v55, %v2998_v9 }
 0x2d5   : > { %v3071_v5 = vor.u32 %v3070_v7, %v3069_v24  ;;  %vm3074_vm13 = vcmp.lt.s32.totalorder %v3053_v47, 3  ;;  %vm3075_vm3 = vcmp.lt.s32.totalorder %v3053_v47, 4  ;;  %v3004_v12 = vclz %v9045_v62 }
 0x2d6   : > { %vm3073_vm9 = vcmp.lt.s32.totalorder %v3053_v47, 2  ;;  %v3076_v38 = vsel %vm3072_vm14, %v3056_v10, %v3059_v59  ;;  %v3080_v49 = vsel %vm3072_vm14, %v3059_v59, %v3062_v8  ;;  %v3077_v60 = vsel %vm3075_vm3, %v3065_v43, 2102212464 }
 0x2d7   : > { %v3081_v48 = vsel %vm3075_vm3, %v3068_v27, 920167782  ;;  %v3084_v57 = vsel %vm3072_vm14, %v3062_v8, %v3065_v43  ;;  %v3085_v45 = vsel %vm3075_vm3, %v3071_v5, 1326507024  ;;  %v9046_v34 = vadd.s32 4294967294, %v3004_v12 }
 0x2d8   : > { %v3078_v50 = vsel %vm3074_vm13, %v3062_v8, %v3077_v60  ;;  %v3082_v52 = vsel %vm3074_vm13, %v3065_v43, %v3081_v48  ;;  %v3086_v63 = vsel %vm3074_vm13, %v3068_v27, %v3085_v45  ;;  %v9052_v7 = vadd.s32 4294967169, %v3148_v16 }
 0x2d9   : > { %v12550_v51 = vpop.eup %9598  ;;  %v3079_v24 = vsel %vm3073_vm9, %v3076_v38, %v3078_v50  ;;  %v3083_v9 = vsel %vm3073_vm9, %v3080_v49, %v3082_v52  ;;  %v3087_v55 = vsel %vm3073_vm9, %v3084_v57, %v3086_v63  ;;  %vm9047_vm5 = vcmp.lt.s32.totalorder %v9046_v34, 0 }
 0x2da   : > { %15210 = vst [vmem:[#allocation92_spill] sm:$0xff] %v12550_v51  ;;  %v12552_v62 = vpop.eup %9600  ;;  %v14929_v10 = vxor.u32 2147483648, %v12550_v51  ;;  %v12555_v59 = vmul.u32.u64.low %v3088_v46, %v3087_v55  ;;  %v12556_v36 = vmul.u32.u64.high %v3088_v46, %v3087_v55, %v12555_v59  ;;  %v3007_v5 = vsel %vm9047_vm5, 0, %v9046_v34 }
 0x2db   : > { %15211 = vst [vmem:[#allocation93_spill] sm:$0xff] %v12552_v62  ;;  %v14930_v47 = vxor.u32 2147483648, %v12552_v62  ;;  %v12559_v60 = vmul.u32.u64.low %v3088_v46, %v3083_v9  ;;  %v12560_v48 = vmul.u32.u64.high %v3088_v46, %v3083_v9, %v12559_v60  ;;  %v3008_v43 = vsub.s32 32, %v3007_v5 }
 0x2dc   : > { %v2933_v57 = vsel %vm2931_vm6, %v14929_v10, %v12552_v62  ;;  %v3009_v8 = vshll.u32 %v12523_v30, %v3007_v5  ;;  %v3012_v27 = vsub.s32 4294967266, %v3007_v5  ;;  %v12576_v12 = vsel %vm12540_vm7, 0, %v3023_v3 }
 0x2dd   : > { %v2930_v16 = vsel %vm2928_vm8, %v12550_v51, %v14930_v47  ;;  %15212 = vst [vmem:[#allocation94_spill] sm:$0xff] %v12576_v12  ;;  %v14931_v38 = vand.u32 2147483647, %v12509_v35  ;;  %v3154_v49 = vadd.s32 1, %v9052_v7  ;;  %v3010_v34 = vshrl.u32 %v2992_v39, %v3008_v43 }
 0x2de   : > { %v2934_v45 = vsel %vm2927_vm0, %v2930_v16, %v2933_v57  ;;  %v3013_v50 = vadd.s32 127, %v3012_v27  ;;  %v3095_v30 = vmul.u32 %v3088_v46, %v3079_v24  ;;  %vm3097_vm5 = vc.u32 %v12556_v36, %v12559_v60 }
 0x2df   : > { %v2935_v52 = vsel %vm14948_vm10, nan, %v2934_v45  ;;  %v3098_v63 = vadd.s32 1, %v12560_v48  ;;  %vm3155_vm6 = vcmp.gt.s32.totalorder %v3154_v49, 0  ;;  %v3011_v3 = vor.u32 %v3010_v34, %v3009_v8 }
 0x2e0   : > { %4623 = vst [vmem:[%s10284_s26 + $0xb8] sm:$0xff] %v2935_v52  ;;  %v3014_v9 = vshll.u32 %v3013_v50, 23  ;;  %v3156_v55 = vsel %vm3155_vm6, %v3154_v49, 0  ;;  %v3151_v6 = vand.u32 8388607, %v14931_v38  ;;  %v380_v46 = vadd.f32 %v12189_v0, %v12511_v32 }
 0x2e1   : > { %v3099_v7 = vsel %vm3097_vm5, %v3098_v63, %v12560_v48  ;;  %v3158_v39 = vand.u32 31, %v3156_v55  ;;  %v3018_v59 = vcvt.s32.f32 %v3011_v3  ;;  %v3029_v5 = vadd.s32 3, %v12576_v12 }
 0x2e2   : > { %v3015_v24 = vor.u32 4788187, %v3014_v9  ;;  %v3100_v57 = vadd.s32 %v3099_v7, %v3095_v30  ;;  %v12593_v43 = vshrl.u32 %v3156_v55, 5  ;;  %v3152_v7 = vor.u32 8388608, %v3151_v6 }
 0x2e3   : > { %v3159_v27 = vsub.s32 32, %v3158_v39  ;;  %v3161_v8 = vshll.u32 %v15077_v11, %v3158_v39  ;;  %v3164_v16 = vshll.u32 %v15078_v28, %v3158_v39  ;;  %v3167_v45 = vshll.u32 %v15079_v54, %v3158_v39 }
 0x2e4   : > { %v3016_v48 = vand.u32 2147483647, %v3015_v24  ;;  %v3101_v49 = vadd.s32 536870912, %v3100_v57  ;;  %v3170_v34 = vshll.u32 %v15080_v21, %v3158_v39  ;;  %v3173_v30 = vshll.u32 %v15082_v23, %v3158_v39 }
 0x2e5   : > { %v3162_v0 = vshrl.u32 %v15078_v28, %v3159_v27  ;;  %v3165_v32 = vshrl.u32 %v15079_v54, %v3159_v27  ;;  %v3168_v50 = vshrl.u32 %v15080_v21, %v3159_v27  ;;  %v3171_v3 = vshrl.u32 %v15082_v23, %v3159_v27 }
 0x2e6   : > { %v3019_v52 = vmul.f32 %v3018_v59, %v3016_v48  ;;  %v3102_v63 = vshrl.u32 %v3101_v49, 30  ;;  %v3174_v9 = vshrl.u32 %v15083_v14, %v3159_v27  ;;  %v12605_v55 = vand.u32 3, %v3029_v5 }
 0x2e7   : > { %v12608_v24 = vmul.f32 %v12201_v53, %v380_v46  ;;  %v212_v10 = vadd.s32 224, %v9928_v1  ;;  %v3163_v61 = vor.u32 %v3162_v0, %v3161_v8  ;;  %v3166_v12 = vor.u32 %v3165_v32, %v3164_v16 }
 0x2e8   : > { %v3020_v47 = vxor.u32 2147483648, %v3019_v52  ;;  %v3103_v38 = vshll.u32 %v3102_v63, 30  ;;  %v3160_v39 = vshrl.u32 %v15077_v11, %v3159_v27  ;;  %v3169_v59 = vor.u32 %v3168_v50, %v3167_v45 }
 0x2e9   : > { %15213 = vst [vmem:[#allocation95_spill] sm:$0xff] %v12608_v24  ;;  %v3172_v48 = vor.u32 %v3171_v3, %v3170_v34  ;;  %vm3176_vm8 = vcmp.lt.s32.totalorder %v12593_v43, 1  ;;  %v3175_v6 = vor.u32 %v3174_v9, %v3173_v30  ;;  %vm3179_vm0 = vcmp.lt.s32.totalorder %v12593_v43, 4 }
 0x2ea   : > { %v3021_v5 = vsel %vm2938_vm1, %v3020_v47, %v3019_v52  ;;  %v12615_v49 = vsub.s32 %v3100_v57, %v3103_v38  ;;  %vm3177_vm14 = vcmp.lt.s32.totalorder %v12593_v43, 2  ;;  %vm3178_vm13 = vcmp.lt.s32.totalorder %v12593_v43, 3 }
 0x2eb   : > { %v3024_v53 = vsel %vm12540_vm7, %v12351_v20, %v3021_v5  ;;  %v3192_v46 = vshll.u32 %v3152_v7, 8  ;;  %v3181_v47 = vsel %vm3179_vm0, %v3169_v59, 2102212464  ;;  %v3184_v38 = vsel %vm3176_vm8, %v3163_v61, %v3166_v12 }
 0x2ec   : > { %9602 = vcosq.f32 %v3024_v53  ;;  %v3106_v27 = vsub.s32 0, %v12615_v49  ;;  %v3126_v57 = vsub.s32 4, %v3102_v63  ;;  %v3180_v56 = vsel %vm3176_vm8, %v3160_v39, %v3163_v61 }
 0x2ed   : > { %9604 = vsinq.f32 %v3024_v53  ;;  %v3185_v8 = vsel %vm3179_vm0, %v3172_v48, 920167782  ;;  %v3188_v34 = vsel %vm3176_vm8, %v3166_v12, %v3169_v59  ;;  %v3189_v0 = vsel %vm3179_vm0, %v3175_v6, 1326507024 }
 0x2ee   : > { %v9049_v16 = vmin.u32 %v3106_v27, %v12615_v49  ;;  %v3186_v45 = vsel %vm3178_vm13, %v3169_v59, %v3185_v8  ;;  %v3182_v32 = vsel %vm3178_vm13, %v3166_v12, %v3181_v47  ;;  %v3190_v50 = vsel %vm3178_vm13, %v3172_v48, %v3189_v0 }
 0x2ef   : > { %v3187_v61 = vsel %vm3177_vm14, %v3184_v38, %v3186_v45  ;;  %v3251_v30 = vand.u32 2139095040, %v12608_v24  ;;  %v15214_v52 = vand.u32 2147483647, %v12419_v22  ;;  %vm3042_vm7 = vcmp.lt.s32.totalorder %v12419_v22, 0 }
 0x2f0   : > { %v3108_v9 = vclz %v9049_v16  ;;  %v254_v7 = vadd.s32 %v9930_v2, %v212_v10  ;;  %vm14947_vm3 = vweird.f32 %v12351_v20  ;;  %v3191_v12 = vsel %vm3177_vm14, %v3188_v34, %v3190_v50 }
 0x2f1   : > { %vm12648_vm1 = vcmp.le.f32.partialorder %v15214_v52, 0.7853982  ;;  %v12657_v39 = vmul.u32.u64.low %v3192_v46, %v3187_v61  ;;  %v12658_v59 = vmul.u32.u64.high %v3192_v46, %v3187_v61, %v12657_v39  ;;  %v3252_v48 = vshrl.u32 %v3251_v30, 23 }
 0x2f2   : > { %v9050_v5 = vadd.s32 4294967294, %v3108_v9  ;;  %v3183_v6 = vsel %vm3177_vm14, %v3180_v56, %v3182_v32  ;;  %v12663_v53 = vmul.u32.u64.low %v3192_v46, %v3191_v12  ;;  %v12664_v27 = vmul.u32.u64.high %v3192_v46, %v3191_v12, %v12663_v53 }
 0x2f3   : > { %vm3031_vm9 = vcmp.lt.s32.totalorder %v12605_v55, 2  ;;  %v3127_v10 = vsel %vm3042_vm7, %v3126_v57, %v3102_v63  ;;  %v14936_v47 = vand.u32 2147483647, %v12608_v24  ;;  %v9056_v38 = vadd.s32 4294967169, %v3252_v48 }
 0x2f4   : > { %vm3032_vm5 = vcmp.eq.s32.totalorder %v12605_v55, 0  ;;  %vm3035_vm6 = vcmp.eq.s32.totalorder %v12605_v55, 2  ;;  %v3096_v8 = vadd.s32 %v12559_v60, %v12556_v36  ;;  %vm9051_vm8 = vcmp.lt.s32.totalorder %v9050_v5, 0 }
 0x2f5   : > { %v3111_v43 = vsel %vm9051_vm8, 0, %v9050_v5  ;;  %v3199_v56 = vmul.u32 %v3192_v46, %v3183_v6  ;;  %v3202_v16 = vadd.s32 1, %v12658_v59  ;;  %v3258_v45 = vadd.s32 1, %v9056_v38 }
 0x2f6   : > { %v12675_v34 = vpop.eup %9602  ;;  %v3112_v0 = vsub.s32 32, %v3111_v43  ;;  %v3113_v63 = vshll.u32 %v12615_v49, %v3111_v43  ;;  %v3116_v57 = vsub.s32 4294967266, %v3111_v43  ;;  %v12680_v32 = vsel %vm12648_vm1, 0, %v3127_v10 }
 0x2f7   : > { %15217 = vst [vmem:[#allocation96_spill] sm:$0xff] %v12675_v34  ;;  %15218 = vst [vmem:[#allocation97_spill] sm:$0xff] %v12680_v32  ;;  %v12682_v61 = vpop.eup %9604  ;;  %v14934_v36 = vxor.u32 2147483648, %v12675_v34  ;;  %vm3201_vm0 = vc.u32 %v12664_v27, %v12657_v39  ;;  %v3255_v60 = vand.u32 8388607, %v14936_v47  ;;  %vm3259_vm14 = vcmp.gt.s32.totalorder %v3258_v45, 0 }
 0x2f8   : > { %15219 = vst [vmem:[#allocation98_spill] sm:$0xff] %v12682_v61  ;;  %v14935_v46 = vxor.u32 2147483648, %v12682_v61  ;;  %v3114_v50 = vshrl.u32 %v3096_v8, %v3112_v0  ;;  %v3117_v49 = vadd.s32 127, %v3116_v57  ;;  %v3203_v30 = vsel %vm3201_vm0, %v3202_v16, %v12658_v59 }
 0x2f9   : > { %v3037_v52 = vsel %vm3035_vm6, %v14934_v36, %v12682_v61  ;;  %v3204_v9 = vadd.s32 %v3203_v30, %v3199_v56  ;;  %v3260_v12 = vsel %vm3259_vm14, %v3258_v45, 0  ;;  %v294_v48 = vmul.u32 8, %v254_v7 }
 0x2fa   : > { %v3034_v5 = vsel %vm3032_vm5, %v12675_v34, %v14935_v46  ;;  %v3115_v6 = vor.u32 %v3114_v50, %v3113_v63  ;;  %v3118_v53 = vshll.u32 %v3117_v49, 23  ;;  %v12702_v59 = vadd.s32 232, %v9928_v1 }
 0x2fb   : > { %v3038_v10 = vsel %vm3031_vm9, %v3034_v5, %v3037_v52  ;;  %v3133_v38 = vadd.s32 3, %v12680_v32  ;;  %v3205_v8 = vadd.s32 536870912, %v3204_v9  ;;  %v3262_v43 = vand.u32 31, %v3260_v12 }
 0x2fc   : > { %v3039_v7 = vsel %vm14947_vm3, nan, %v3038_v10  ;;  %v3119_v56 = vor.u32 4788187, %v3118_v53  ;;  %v3122_v16 = vcvt.s32.f32 %v3115_v6  ;;  %v3256_v45 = vor.u32 8388608, %v3255_v60 }
 0x2fd   : > { %4624 = vst [vmem:[%s10284_s26 + $0xc0] sm:$0xff] %v3039_v7  ;;  %v12710_v0 = vshrl.u32 %v3205_v8, 30  ;;  %v12712_v63 = vshrl.u32 %v3260_v12, 5  ;;  %v3263_v57 = vsub.s32 32, %v3262_v43  ;;  %v334_v50 = vcvt.s32.f32 %v294_v48 }
 0x2fe   : > { %v3120_v49 = vand.u32 2147483647, %v3119_v56  ;;  %v3265_v55 = vshll.u32 %v15077_v11, %v3262_v43  ;;  %v3268_v30 = vshll.u32 %v15078_v28, %v3262_v43  ;;  %v3271_v52 = vshll.u32 %v15079_v54, %v3262_v43 }
 0x2ff   : > { %v3207_v5 = vshll.u32 %v12710_v0, 30  ;;  %v3266_v53 = vshrl.u32 %v15078_v28, %v3263_v57  ;;  %v3274_v60 = vshll.u32 %v15080_v21, %v3262_v43  ;;  %v3277_v6 = vshll.u32 %v15082_v23, %v3262_v43  ;;  %v12734_v43 = vld [vmem:[%s14716_s1] ss:$0 sm:$0xff] }
 0x300   : > { %v3123_v10 = vmul.f32 %v3122_v16, %v3120_v49  ;;  %v3269_v12 = vshrl.u32 %v15079_v54, %v3263_v57  ;;  %v3272_v48 = vshrl.u32 %v15080_v21, %v3263_v57  ;;  %v3275_v8 = vshrl.u32 %v15082_v23, %v3263_v57 }
 0x301   : > { %v12724_v7 = vand.u32 3, %v3133_v38  ;;  %v12726_v56 = vsub.s32 %v3204_v9, %v3207_v5  ;;  %v3278_v36 = vshrl.u32 %v15083_v14, %v3263_v57  ;;  %v12729_v46 = vshll.u32 %v3256_v45, 8 }
 0x302   : > { %v3124_v47 = vxor.u32 2147483648, %v3123_v10  ;;  %v3267_v20 = vor.u32 %v3266_v53, %v3265_v55  ;;  %v3270_v34 = vor.u32 %v3269_v12, %v3268_v30  ;;  %v381_v16 = vadd.f32 %v12734_v43, %v334_v50 }
 0x303   : > { %v3210_v49 = vsub.s32 0, %v12726_v56  ;;  %v3264_v38 = vshrl.u32 %v15077_v11, %v3263_v57  ;;  %v3276_v9 = vor.u32 %v3275_v8, %v3274_v60  ;;  %vm3280_vm13 = vcmp.lt.s32.totalorder %v12712_v63, 1  ;;  %v12762_v60 = vld [vmem:[#allocation2] ss:$0 sm:$0xff] }
 0x304   : > { %v3125_v45 = vsel %vm3042_vm7, %v3124_v47, %v3123_v10  ;;  %vm3146_vm9 = vcmp.lt.s32.totalorder %v12509_v35, 0  ;;  %v3273_v55 = vor.u32 %v3272_v48, %v3271_v52  ;;  %v3279_v30 = vor.u32 %v3278_v36, %v3277_v6 }
 0x305   : > { %vm3283_vm5 = vcmp.lt.s32.totalorder %v12712_v63, 4  ;;  %v3128_v50 = vsel %vm12648_vm1, %v12419_v22, %v3125_v45  ;;  %v9053_v5 = vmin.u32 %v3210_v49, %v12726_v56  ;;  %vm3281_vm6 = vcmp.lt.s32.totalorder %v12712_v63, 2 }
 0x306   : > { %vm3282_vm8 = vcmp.lt.s32.totalorder %v12712_v63, 3  ;;  %9606 = vcosq.f32 %v3128_v50  ;;  %v3285_v47 = vsel %vm3283_vm5, %v3273_v55, 2102212464  ;;  %v3288_v57 = vsel %vm3280_vm13, %v3267_v20, %v3270_v34 }
 0x307   : > { %v3289_v36 = vsel %vm3283_vm5, %v3276_v9, 920167782  ;;  %9608 = vsinq.f32 %v3128_v50  ;;  %v15220_v3 = vand.u32 2147483647, %v12509_v35  ;;  %v3212_v53 = vclz %v9053_v5 }
 0x308   : > { %v12765_v6 = vmul.f32 %v12762_v60, %v381_v16  ;;  %v3284_v10 = vsel %vm3280_vm13, %v3264_v38, %v3267_v20  ;;  %v3286_v12 = vsel %vm3282_vm8, %v3270_v34, %v3285_v47  ;;  %v3290_v48 = vsel %vm3282_vm8, %v3273_v55, %v3289_v36 }
 0x309   : > { %vm12758_vm1 = vcmp.le.f32.partialorder %v15220_v3, 0.7853982  ;;  %v3292_v8 = vsel %vm3280_vm13, %v3270_v34, %v3273_v55  ;;  %v9054_v49 = vadd.s32 4294967294, %v3212_v53  ;;  %v3230_v45 = vsub.s32 4, %v12710_v0 }
 0x30a   : > { %15223 = vst [vmem:[#allocation99_spill] sm:$0xff] %v12765_v6  ;;  %v3291_v50 = vsel %vm3281_vm6, %v3288_v57, %v3290_v48  ;;  %v3293_v16 = vsel %vm3283_vm5, %v3279_v30, 1326507024  ;;  %vm3135_vm7 = vcmp.lt.s32.totalorder %v12724_v7, 2  ;;  %vm14946_vm0 = vweird.f32 %v12419_v22 }
 0x30b   : > { %v3294_v20 = vsel %vm3282_vm8, %v3276_v9, %v3293_v16  ;;  %v12784_v38 = vmul.u32.u64.low %v12729_v46, %v3291_v50  ;;  %v12785_v5 = vmul.u32.u64.high %v12729_v46, %v3291_v50, %v12784_v38  ;;  %v3200_v34 = vadd.s32 %v12657_v39, %v12664_v27 }
 0x30c   : > { %vm9055_vm14 = vcmp.lt.s32.totalorder %v9054_v49, 0  ;;  %v3287_v55 = vsel %vm3281_vm6, %v3284_v10, %v3286_v12  ;;  %v3295_v30 = vsel %vm3281_vm6, %v3292_v8, %v3294_v20  ;;  %v3355_v36 = vand.u32 2139095040, %v12765_v6 }
 0x30d   : > { %v3215_v47 = vsel %vm9055_vm14, 0, %v9054_v49  ;;  %v12795_v57 = vmul.u32.u64.low %v12729_v46, %v3295_v30  ;;  %v12796_v9 = vmul.u32.u64.high %v12729_v46, %v3295_v30, %v12795_v57  ;;  %v3231_v39 = vsel %vm3146_vm9, %v3230_v45, %v12710_v0 }
 0x30e   : > { %v3216_v3 = vsub.s32 32, %v3215_v47  ;;  %v3217_v53 = vshll.u32 %v12726_v56, %v3215_v47  ;;  %v3220_v48 = vsub.s32 4294967266, %v3215_v47  ;;  %vm3136_vm13 = vcmp.eq.s32.totalorder %v12724_v7, 0 }
 0x30f   : > { %v3303_v27 = vmul.u32 %v12729_v46, %v3287_v55  ;;  %v3306_v63 = vadd.s32 1, %v12785_v5  ;;  %v3356_v10 = vshrl.u32 %v3355_v36, 23  ;;  %vm3139_vm5 = vcmp.eq.s32.totalorder %v12724_v7, 2 }
 0x310   : > { %v3218_v12 = vshrl.u32 %v3200_v34, %v3216_v3  ;;  %v3221_v8 = vadd.s32 127, %v3220_v48  ;;  %v255_v49 = vadd.s32 %v9930_v2, %v12702_v59  ;;  %v12809_v56 = vpop.eup %9606  ;;  %v12813_v50 = vsel %vm12758_vm1, 0, %v3231_v39 }
 0x311   : > { %15224 = vst [vmem:[#allocation100_spill] sm:$0xff] %v12809_v56  ;;  %15225 = vst [vmem:[#allocation101_spill] sm:$0xff] %v12813_v50  ;;  %vm3305_vm6 = vc.u32 %v12796_v9, %v12784_v38  ;;  %v14942_v46 = vand.u32 2147483647, %v12765_v6  ;;  %v9060_v0 = vadd.s32 4294967169, %v3356_v10  ;;  %v12817_v45 = vpop.eup %9608  ;;  %v14940_v16 = vxor.u32 2147483648, %v12809_v56 }
 0x312   : > { %15226 = vst [vmem:[#allocation102_spill] sm:$0xff] %v12817_v45  ;;  %v3219_v20 = vor.u32 %v3218_v12, %v3217_v53  ;;  %v3222_v34 = vshll.u32 %v3221_v8, 23  ;;  %v3307_v55 = vsel %vm3305_vm6, %v3306_v63, %v12785_v5  ;;  %v14941_v59 = vxor.u32 2147483648, %v12817_v45 }
 0x313   : > { %v3308_v30 = vadd.s32 %v3307_v55, %v3303_v27  ;;  %v3362_v47 = vadd.s32 1, %v9060_v0  ;;  %v214_v57 = vadd.s32 240, %v9928_v1  ;;  %v3141_v36 = vsel %vm3139_vm5, %v14940_v16, %v12817_v45 }
 0x314   : > { %v3223_v3 = vor.u32 4788187, %v3222_v34  ;;  %v3226_v48 = vcvt.s32.f32 %v3219_v20  ;;  %v3237_v53 = vadd.s32 3, %v12813_v50  ;;  %v3138_v5 = vsel %vm3136_vm13, %v12809_v56, %v14941_v59 }
 0x315   : > { %v3309_v39 = vadd.s32 536870912, %v3308_v30  ;;  %v3359_v27 = vand.u32 8388607, %v14942_v46  ;;  %vm3363_vm8 = vcmp.gt.s32.totalorder %v3362_v47, 0  ;;  %v3142_v63 = vsel %vm3135_vm7, %v3138_v5, %v3141_v36 }
 0x316   : > { %v3224_v10 = vand.u32 2147483647, %v3223_v3  ;;  %v3364_v12 = vsel %vm3363_vm8, %v3362_v47, 0  ;;  %v3143_v8 = vsel %vm14946_vm0, nan, %v3142_v63  ;;  %v12843_v55 = vand.u32 3, %v3237_v53 }
 0x317   : > { %v12840_v0 = vshrl.u32 %v3309_v39, 30  ;;  %v3366_v20 = vand.u32 31, %v3364_v12  ;;  %4625 = vst [vmem:[%s10284_s26 + $0xc8] sm:$0xff] %v3143_v8  ;;  %v295_v16 = vmul.u32 8, %v255_v49  ;;  %v3360_v46 = vor.u32 8388608, %v3359_v27 }
 0x318   : > { %v3227_v34 = vmul.f32 %v3226_v48, %v3224_v10  ;;  %v12847_v7 = vadd.s32 %v9930_v2, %v214_v57  ;;  %v12850_v47 = vadd.s32 %v12784_v38, %v12796_v9  ;;  %v3365_v3 = vshrl.u32 %v3364_v12, 5 }
 0x319   : > { %v3311_v59 = vshll.u32 %v12840_v0, 30  ;;  %v3367_v56 = vsub.s32 32, %v3366_v20  ;;  %v3369_v5 = vshll.u32 %v15077_v11, %v3366_v20  ;;  %v3372_v49 = vshll.u32 %v15078_v28, %v3366_v20 }
 0x31a   : > { %v3228_v36 = vxor.u32 2147483648, %v3227_v34  ;;  %v3375_v53 = vshll.u32 %v15079_v54, %v3366_v20  ;;  %v3378_v38 = vshll.u32 %v15080_v21, %v3366_v20  ;;  %v335_v10 = vcvt.s32.f32 %v295_v16 }
 0x31b   : > { %v12853_v39 = vsub.s32 %v3308_v30, %v3311_v59  ;;  %v3370_v48 = vshrl.u32 %v15078_v28, %v3367_v56  ;;  %v3373_v57 = vshrl.u32 %v15079_v54, %v3367_v56  ;;  %v3376_v63 = vshrl.u32 %v15080_v21, %v3367_v56 }
 0x31c   : > { %v3229_v27 = vsel %vm3146_vm9, %v3228_v36, %v3227_v34  ;;  %v12867_v30 = vshll.u32 %v3360_v46, 8  ;;  %v3368_v12 = vshrl.u32 %v15077_v11, %v3367_v56  ;;  %v3379_v34 = vshrl.u32 %v15082_v23, %v3367_v56 }
 0x31d   : > { %v3232_v9 = vsel %vm12758_vm1, %v12509_v35, %v3229_v27  ;;  %v3314_v59 = vsub.s32 0, %v12853_v39  ;;  %v3371_v8 = vor.u32 %v3370_v48, %v3369_v5  ;;  %vm3250_vm9 = vcmp.lt.s32.totalorder %v12608_v24, 0 }
 0x31e   : > { %9610 = vcosq.f32 %v3232_v9  ;;  %v3374_v22 = vor.u32 %v3373_v57, %v3372_v49  ;;  %v3381_v52 = vshll.u32 %v15082_v23, %v3366_v20  ;;  %vm3243_vm1 = vcmp.eq.s32.totalorder %v12843_v55, 2 }
 0x31f   : > { %9612 = vsinq.f32 %v3232_v9  ;;  %v9057_v36 = vmin.u32 %v3314_v59, %v12853_v39  ;;  %v3377_v27 = vor.u32 %v3376_v63, %v3375_v53  ;;  %v3380_v46 = vor.u32 %v3379_v34, %v3378_v38 }
 0x320   : > { %v3382_v16 = vshrl.u32 %v15083_v14, %v3367_v56  ;;  %vm3384_vm7 = vcmp.lt.s32.totalorder %v3365_v3, 1  ;;  %vm3240_vm14 = vcmp.eq.s32.totalorder %v12843_v55, 0  ;;  %v3334_v48 = vsub.s32 4, %v12840_v0 }
 0x321   : > { %v3316_v5 = vclz %v9057_v36  ;;  %vm3385_vm13 = vcmp.lt.s32.totalorder %v3365_v3, 2  ;;  %v382_v9 = vadd.f32 %v12734_v43, %v335_v10  ;;  %vm3239_vm5 = vcmp.lt.s32.totalorder %v12843_v55, 2 }
 0x322   : > { %v3383_v49 = vor.u32 %v3382_v16, %v3381_v52  ;;  %vm3386_vm6 = vcmp.lt.s32.totalorder %v3365_v3, 3  ;;  %vm3387_vm8 = vcmp.lt.s32.totalorder %v3365_v3, 4  ;;  %v3388_v20 = vsel %vm3384_vm7, %v3368_v12, %v3371_v8 }
 0x323   : > { %vm14962_vm0 = vweird.f32 %v12509_v35  ;;  %v15227_v56 = vand.u32 2147483647, %v12608_v24  ;;  %v9058_v57 = vadd.s32 4294967294, %v3316_v5  ;;  %v3389_v63 = vsel %vm3387_vm8, %v3377_v27, 2102212464 }
 0x324   : > { %v3392_v38 = vsel %vm3384_vm7, %v3371_v8, %v3374_v22  ;;  %v3393_v59 = vsel %vm3387_vm8, %v3380_v46, 920167782  ;;  %v3390_v10 = vsel %vm3386_vm6, %v3374_v22, %v3389_v63  ;;  %v3396_v36 = vsel %vm3384_vm7, %v3374_v22, %v3377_v27 }
 0x325   : > { %vm12884_vm3 = vcmp.le.f32.partialorder %v15227_v56, 0.7853982  ;;  %v3394_v34 = vsel %vm3386_vm6, %v3377_v27, %v3393_v59  ;;  %v3397_v52 = vsel %vm3387_vm8, %v3383_v49, 1326507024  ;;  %vm9059_vm10 = vcmp.lt.s32.totalorder %v9058_v57, 0 }
 0x326   : > { %v3395_v12 = vsel %vm3385_vm13, %v3392_v38, %v3394_v34  ;;  %v3398_v16 = vsel %vm3386_vm6, %v3380_v46, %v3397_v52  ;;  %v12892_v45 = vmul.f32 %v12762_v60, %v382_v9  ;;  %v3319_v56 = vsel %vm9059_vm10, 0, %v9058_v57 }
 0x327   : > { %v3399_v61 = vsel %vm3385_vm13, %v3396_v36, %v3398_v16  ;;  %v12896_v5 = vmul.u32.u64.low %v12867_v30, %v3395_v12  ;;  %v12897_v50 = vmul.u32.u64.high %v12867_v30, %v3395_v12, %v12896_v5  ;;  %v3320_v8 = vsub.s32 32, %v3319_v56 }
 0x328   : > { %15230 = vst [vmem:[#allocation103_spill] sm:$0xff] %v12892_v45  ;;  %v3321_v63 = vshll.u32 %v12853_v39, %v3319_v56  ;;  %v3324_v59 = vsub.s32 4294967266, %v3319_v56  ;;  %v3391_v22 = vsel %vm3385_vm13, %v3388_v20, %v3390_v10  ;;  %v12901_v27 = vpop.eup %9610  ;;  %v3335_v46 = vsel %vm3250_vm9, %v3334_v48, %v12840_v0 }
 0x329   : > { %15231 = vst [vmem:[#allocation104_spill] sm:$0xff] %v12901_v27  ;;  %v12907_v9 = vmul.u32.u64.low %v12867_v30, %v3399_v61  ;;  %v12908_v49 = vmul.u32.u64.high %v12867_v30, %v3399_v61, %v12907_v9  ;;  %v296_v57 = vmul.u32 8, %v12847_v7  ;;  %v12911_v38 = vpop.eup %9612  ;;  %v14954_v34 = vxor.u32 2147483648, %v12901_v27 }
 0x32a   : > { %15232 = vst [vmem:[#allocation105_spill] sm:$0xff] %v12911_v38  ;;  %v3322_v39 = vshrl.u32 %v12850_v47, %v3320_v8  ;;  %v3325_v3 = vadd.s32 127, %v3324_v59  ;;  %v3459_v20 = vand.u32 2139095040, %v12892_v45  ;;  %v14955_v10 = vxor.u32 2147483648, %v12911_v38 }
 0x32b   : > { %v3407_v36 = vmul.u32 %v12867_v30, %v3391_v22  ;;  %v3410_v0 = vadd.s32 1, %v12897_v50  ;;  %v14956_v61 = vand.u32 2147483647, %v12892_v45  ;;  %v3245_v7 = vsel %vm3243_vm1, %v14954_v34, %v12911_v38 }
 0x32c   : > { %v3323_v48 = vor.u32 %v3322_v39, %v3321_v63  ;;  %v3326_v47 = vshll.u32 %v3325_v3, 23  ;;  %v3460_v52 = vshrl.u32 %v3459_v20, 23  ;;  %v3242_v30 = vsel %vm3240_vm14, %v12901_v27, %v14955_v10 }
 0x32d   : > { %v12932_v12 = vsel %vm12884_vm3, 0, %v3335_v46  ;;  %vm3409_vm10 = vc.u32 %v12908_v49, %v12896_v5  ;;  %v215_v16 = vadd.s32 248, %v9928_v1  ;;  %v3246_v56 = vsel %vm3239_vm5, %v3242_v30, %v3245_v7 }
 0x32e   : > { %15233 = vst [vmem:[#allocation106_spill] sm:$0xff] %v12932_v12  ;;  %v3327_v8 = vor.u32 4788187, %v3326_v47  ;;  %v3330_v63 = vcvt.s32.f32 %v3323_v48  ;;  %v3411_v59 = vsel %vm3409_vm10, %v3410_v0, %v12897_v50  ;;  %v3247_v22 = vsel %vm14962_vm0, nan, %v3246_v56 }
 0x32f   : > { %v3412_v9 = vadd.s32 %v3411_v59, %v3407_v36  ;;  %v9064_v39 = vadd.s32 4294967169, %v3460_v52  ;;  %v3463_v46 = vand.u32 8388607, %v14956_v61  ;;  %4626 = vst [vmem:[%s10284_s26 + $0xd0] sm:$0xff] %v3247_v22  ;;  %v336_v20 = vcvt.s32.f32 %v296_v57 }
 0x330   : > { %v3328_v3 = vand.u32 2147483647, %v3327_v8  ;;  %v257_v55 = vadd.s32 %v9930_v2, %v215_v16  ;;  %v3341_v48 = vadd.s32 3, %v12932_v12  ;;  %v12955_v16 = vadd.s32 %v12896_v5, %v12908_v49 }
 0x331   : > { %v3413_v34 = vadd.s32 536870912, %v3412_v9  ;;  %v3466_v10 = vadd.s32 1, %v9064_v39  ;;  %v3464_v50 = vor.u32 8388608, %v3463_v46  ;;  %v383_v52 = vadd.f32 %v12734_v43, %v336_v20 }
 0x332   : > { %v3331_v7 = vmul.f32 %v3330_v63, %v3328_v3  ;;  %v297_v8 = vmul.u32 8, %v257_v55  ;;  %v12952_v59 = vand.u32 3, %v3341_v48  ;;  %vm14975_vm14 = vweird.f32 %v12608_v24 }
 0x333   : > { %v12946_v47 = vshrl.u32 %v3413_v34, 30  ;;  %vm3467_vm1 = vcmp.gt.s32.totalorder %v3466_v10, 0  ;;  %v12962_v22 = vshll.u32 %v3464_v50, 8  ;;  %v12967_v3 = vmul.f32 %v12762_v60, %v383_v52 }
 0x334   : > { %v3332_v0 = vxor.u32 2147483648, %v3331_v7  ;;  %v3468_v36 = vsel %vm3467_vm1, %v3466_v10, 0  ;;  %v12970_v20 = vcvt.s32.f32 %v297_v8  ;;  %vm3343_vm7 = vcmp.lt.s32.totalorder %v12952_v59, 2 }
 0x335   : > { %v3415_v30 = vshll.u32 %v12946_v47, 30  ;;  %v3470_v56 = vand.u32 31, %v3468_v36  ;;  %15234 = vst [vmem:[#allocation107_spill] sm:$0xff] %v12967_v3  ;;  %v3469_v49 = vshrl.u32 %v3468_v36, 5  ;;  %vm3354_vm13 = vcmp.lt.s32.totalorder %v12765_v6, 0 }
 0x336   : > { %v3333_v57 = vsel %vm3250_vm9, %v3332_v0, %v3331_v7  ;;  %vm3344_vm9 = vcmp.eq.s32.totalorder %v12952_v59, 0  ;;  %v3563_v35 = vand.u32 2139095040, %v12967_v3 }
 0x337   : > { %v3336_v34 = vsel %vm12884_vm3, %v12608_v24, %v3333_v57  ;;  %v12960_v63 = vsub.s32 %v3412_v9, %v3415_v30  ;;  %v3471_v10 = vsub.s32 32, %v3470_v56  ;;  %v3473_v39 = vshll.u32 %v15077_v11, %v3470_v56 }
 0x338   : > { %9614 = vcosq.f32 %v3336_v34  ;;  %v3476_v46 = vshll.u32 %v15078_v28, %v3470_v56  ;;  %vm3347_vm3 = vcmp.eq.s32.totalorder %v12952_v59, 2  ;;  %v3479_v55 = vshll.u32 %v15079_v54, %v3470_v56 }
 0x339   : > { %9616 = vsinq.f32 %v3336_v34  ;;  %v3418_v5 = vsub.s32 0, %v12960_v63  ;;  %v3474_v53 = vshrl.u32 %v15078_v28, %v3471_v10  ;;  %v3477_v9 = vshrl.u32 %v15079_v54, %v3471_v10 }
 0x33a   : > { %v3480_v7 = vshrl.u32 %v15080_v21, %v3471_v10  ;;  %v3472_v50 = vshrl.u32 %v15077_v11, %v3471_v10  ;;  %v3482_v0 = vshll.u32 %v15080_v21, %v3470_v56  ;;  %v3483_v36 = vshrl.u32 %v15082_v23, %v3471_v10 }
 0x33b   : > { %v9061_v48 = vmin.u32 %v3418_v5, %v12960_v63  ;;  %v3475_v52 = vor.u32 %v3474_v53, %v3473_v39  ;;  %v3478_v30 = vor.u32 %v3477_v9, %v3476_v46  ;;  %v3485_v8 = vshll.u32 %v15082_v23, %v3470_v56 }
 0x33c   : > { %v3438_v5 = vsub.s32 4, %v12946_v47  ;;  %v3481_v61 = vor.u32 %v3480_v7, %v3479_v55  ;;  %v3484_v27 = vor.u32 %v3483_v36, %v3482_v0  ;;  %v3486_v38 = vshrl.u32 %v15083_v14, %v3471_v10 }
 0x33d   : > { %v3420_v34 = vclz %v9061_v48  ;;  %vm3488_vm5 = vcmp.lt.s32.totalorder %v3469_v49, 1  ;;  %vm3489_vm6 = vcmp.lt.s32.totalorder %v3469_v49, 2  ;;  %vm3490_vm8 = vcmp.lt.s32.totalorder %v3469_v49, 3 }
 0x33e   : > { %vm3491_vm10 = vcmp.lt.s32.totalorder %v3469_v49, 4  ;;  %v3492_v56 = vsel %vm3488_vm5, %v3472_v50, %v3475_v52  ;;  %v15235_v46 = vand.u32 2147483647, %v12765_v6  ;;  %v3487_v9 = vor.u32 %v3486_v38, %v3485_v8 }
 0x33f   : > { %v9062_v39 = vadd.s32 4294967294, %v3420_v34  ;;  %v3493_v48 = vsel %vm3491_vm10, %v3481_v61, 2102212464  ;;  %v3496_v55 = vsel %vm3488_vm5, %v3475_v52, %v3478_v30  ;;  %v3497_v7 = vsel %vm3491_vm10, %v3484_v27, 920167782 }
 0x340   : > { %vm12992_vm1 = vcmp.le.f32.partialorder %v15235_v46, 0.7853982  ;;  %v3494_v0 = vsel %vm3490_vm8, %v3478_v30, %v3493_v48  ;;  %v3498_v10 = vsel %vm3490_vm8, %v3481_v61, %v3497_v7  ;;  %v3500_v36 = vsel %vm3488_vm5, %v3478_v30, %v3481_v61 }
 0x341   : > { %vm9063_vm0 = vcmp.lt.s32.totalorder %v9062_v39, 0  ;;  %v3495_v50 = vsel %vm3489_vm6, %v3492_v56, %v3494_v0  ;;  %v3499_v46 = vsel %vm3489_vm6, %v3496_v55, %v3498_v10  ;;  %v3501_v12 = vsel %vm3491_vm10, %v3487_v9, 1326507024 }
 0x342   : > { %v12998_v34 = vpop.eup %9614  ;;  %v3423_v57 = vsel %vm9063_vm0, 0, %v9062_v39  ;;  %v3502_v61 = vsel %vm3490_vm8, %v3484_v27, %v3501_v12  ;;  %v13009_v30 = vmul.u32.u64.low %v12962_v22, %v3499_v46  ;;  %v13010_v39 = vmul.u32.u64.high %v12962_v22, %v3499_v46, %v13009_v30 }
 0x343   : > { %15238 = vst [vmem:[#allocation108_spill] sm:$0xff] %v12998_v34  ;;  %v13002_v32 = vpop.eup %9616  ;;  %v14967_v38 = vxor.u32 2147483648, %v12998_v34  ;;  %v3424_v52 = vsub.s32 32, %v3423_v57  ;;  %v3425_v8 = vshll.u32 %v12960_v63, %v3423_v57  ;;  %v3428_v51 = vsub.s32 4294967266, %v3423_v57 }
 0x344   : > { %15239 = vst [vmem:[#allocation109_spill] sm:$0xff] %v13002_v32  ;;  %v14968_v48 = vxor.u32 2147483648, %v13002_v32  ;;  %v3503_v63 = vsel %vm3489_vm6, %v3500_v36, %v3502_v61  ;;  %v3439_v12 = vsel %vm3354_vm13, %v3438_v5, %v12946_v47  ;;  %v3564_v0 = vshrl.u32 %v3563_v35, 23 }
 0x345   : > { %v3349_v56 = vsel %vm3347_vm3, %v14967_v38, %v13002_v32  ;;  %v3426_v9 = vshrl.u32 %v12955_v16, %v3424_v52  ;;  %v3429_v55 = vadd.s32 127, %v3428_v51  ;;  %v3511_v36 = vmul.u32 %v12962_v22, %v3495_v50 }
 0x346   : > { %v3346_v27 = vsel %vm3344_vm9, %v12998_v34, %v14968_v48  ;;  %v13028_v57 = vmul.u32.u64.low %v12962_v22, %v3503_v63  ;;  %v13029_v7 = vmul.u32.u64.high %v12962_v22, %v3503_v63, %v13028_v57  ;;  %v3514_v46 = vadd.s32 1, %v13010_v39 }
 0x347   : > { %v3350_v16 = vsel %vm3343_vm7, %v3346_v27, %v3349_v56  ;;  %v3427_v51 = vor.u32 %v3426_v9, %v3425_v8  ;;  %v3430_v49 = vshll.u32 %v3429_v55, 23  ;;  %v15240_v52 = vand.u32 2147483647, %v12967_v3 }
 0x348   : > { %v3351_v10 = vsel %vm14975_vm14, nan, %v3350_v16  ;;  %v13042_v59 = vsel %vm12992_vm1, 0, %v3439_v12  ;;  %v9068_v8 = vadd.s32 4294967169, %v3564_v0  ;;  %vm3513_vm0 = vc.u32 %v13029_v7, %v13009_v30 }
 0x349   : > { %v3567_v47 = vand.u32 8388607, %v15240_v52  ;;  %4627 = vst [vmem:[%s10284_s26 + $0xd8] sm:$0xff] %v3351_v10  ;;  %v3431_v5 = vor.u32 4788187, %v3430_v49  ;;  %v3434_v61 = vcvt.s32.f32 %v3427_v51  ;;  %15241 = vst [vmem:[#allocation110_spill] sm:$0xff] %v13042_v59  ;;  %v3515_v56 = vsel %vm3513_vm0, %v3514_v46, %v13010_v39 }
 0x34a   : > { %v3570_v9 = vadd.s32 1, %v9068_v8  ;;  %v216_v22 = vadd.s32 256, %v9928_v1  ;;  %v3445_v50 = vadd.s32 3, %v13042_v59  ;;  %v3516_v55 = vadd.s32 %v3515_v56, %v3511_v36 }
 0x34b   : > { %v3432_v35 = vand.u32 2147483647, %v3431_v5  ;;  %v384_v63 = vadd.f32 %v12734_v43, %v12970_v20  ;;  %v3568_v57 = vor.u32 8388608, %v3567_v47  ;;  %vm3458_vm9 = vcmp.lt.s32.totalorder %v12892_v45, 0 }
 0x34c   : > { %vm3571_vm3 = vcmp.gt.s32.totalorder %v3570_v9, 0  ;;  %v3517_v12 = vadd.s32 536870912, %v3516_v55  ;;  %v13051_v0 = vadd.s32 %v9930_v2, %v216_v22  ;;  %v13053_v39 = vand.u32 3, %v3445_v50 }
 0x34d   : > { %v3435_v27 = vmul.f32 %v3434_v61, %v3432_v35  ;;  %v3572_v16 = vsel %vm3571_vm3, %v3570_v9, 0  ;;  %v13057_v10 = vadd.s32 %v13009_v30, %v13029_v7  ;;  %v13060_v20 = vmul.f32 %v12762_v60, %v384_v63 }
 0x34e   : > { %v3574_v49 = vand.u32 31, %v3572_v16  ;;  %v3518_v36 = vshrl.u32 %v3517_v12, 30  ;;  %v3573_v52 = vshrl.u32 %v3572_v16, 5  ;;  %v13064_v5 = vshll.u32 %v3568_v57, 8 }
 0x34f   : > { %v3436_v51 = vxor.u32 2147483648, %v3435_v27  ;;  %15242 = vst [vmem:[#allocation111_spill] sm:$0xff] %v13060_v20  ;;  %v3667_v53 = vand.u32 2139095040, %v13060_v20  ;;  %vm3451_vm7 = vcmp.eq.s32.totalorder %v13053_v39, 2  ;;  %vm3447_vm5 = vcmp.lt.s32.totalorder %v13053_v39, 2 }
 0x350   : > { %v3575_v47 = vsub.s32 32, %v3574_v49  ;;  %v3519_v8 = vshll.u32 %v3518_v36, 30  ;;  %v3577_v35 = vshll.u32 %v15077_v11, %v3574_v49  ;;  %v3580_v30 = vshll.u32 %v15078_v28, %v3574_v49 }
 0x351   : > { %v3437_v46 = vsel %vm3354_vm13, %v3436_v51, %v3435_v27  ;;  %v3583_v9 = vshll.u32 %v15079_v54, %v3574_v49  ;;  %v3542_v63 = vsub.s32 4, %v3518_v36  ;;  %v3586_v57 = vshll.u32 %v15080_v21, %v3574_v49 }
 0x352   : > { %v3440_v61 = vsel %vm12992_vm1, %v12765_v6, %v3437_v46  ;;  %v3578_v7 = vshrl.u32 %v15078_v28, %v3575_v47  ;;  %v3581_v56 = vshrl.u32 %v15079_v54, %v3575_v47  ;;  %v13074_v22 = vsub.s32 %v3516_v55, %v3519_v8 }
 0x353   : > { %9618 = vcosq.f32 %v3440_v61  ;;  %v3584_v50 = vshrl.u32 %v15080_v21, %v3575_v47  ;;  %v3576_v27 = vshrl.u32 %v15077_v11, %v3575_v47  ;;  %vm3448_vm13 = vcmp.eq.s32.totalorder %v13053_v39, 0 }
 0x354   : > { %9620 = vsinq.f32 %v3440_v61  ;;  %v3522_v16 = vsub.s32 0, %v13074_v22  ;;  %v3579_v51 = vor.u32 %v3578_v7, %v3577_v35  ;;  %v3582_v55 = vor.u32 %v3581_v56, %v3580_v30 }
 0x355   : > { %v3587_v46 = vshrl.u32 %v15082_v23, %v3575_v47  ;;  %v3585_v61 = vor.u32 %v3584_v50, %v3583_v9  ;;  %v3589_v8 = vshll.u32 %v15082_v23, %v3574_v49  ;;  %v3590_v38 = vshrl.u32 %v15083_v14, %v3575_v47 }
 0x356   : > { %vm3592_vm6 = vcmp.lt.s32.totalorder %v3573_v52, 1  ;;  %vm15021_vm8 = vweird.f32 %v12765_v6  ;;  %v15243_v48 = vand.u32 2147483647, %v12892_v45  ;;  %v9065_v35 = vmin.u32 %v3522_v16, %v13074_v22 }
 0x357   : > { %v3588_v30 = vor.u32 %v3587_v46, %v3586_v57  ;;  %v3668_v56 = vshrl.u32 %v3667_v53, 23  ;;  %v3543_v49 = vsel %vm3458_vm9, %v3542_v63, %v3518_v36  ;;  %v3591_v9 = vor.u32 %v3590_v38, %v3589_v8 }
 0x358   : > { %vm13091_vm10 = vcmp.le.f32.partialorder %v15243_v48, 0.7853982  ;;  %vm3594_vm1 = vcmp.lt.s32.totalorder %v3573_v52, 3  ;;  %vm3595_vm0 = vcmp.lt.s32.totalorder %v3573_v52, 4  ;;  %v3524_v47 = vclz %v9065_v35 }
 0x359   : > { %vm3593_vm3 = vcmp.lt.s32.totalorder %v3573_v52, 2  ;;  %v3596_v50 = vsel %vm3592_vm6, %v3576_v27, %v3579_v51  ;;  %v3600_v48 = vsel %vm3592_vm6, %v3579_v51, %v3582_v55  ;;  %v3597_v24 = vsel %vm3595_vm0, %v3585_v61, 2102212464 }
 0x35a   : > { %v3601_v34 = vsel %vm3595_vm0, %v3588_v30, 920167782  ;;  %v3604_v16 = vsel %vm3592_vm6, %v3582_v55, %v3585_v61  ;;  %v3605_v57 = vsel %vm3595_vm0, %v3591_v9, 1326507024  ;;  %v9066_v46 = vadd.s32 4294967294, %v3524_v47 }
 0x35b   : > { %v3598_v7 = vsel %vm3594_vm1, %v3582_v55, %v3597_v24  ;;  %v3602_v53 = vsel %vm3594_vm1, %v3585_v61, %v3601_v34  ;;  %v3606_v32 = vsel %vm3594_vm1, %v3588_v30, %v3605_v57  ;;  %v9072_v8 = vadd.s32 4294967169, %v3668_v56 }
 0x35c   : > { %v3599_v38 = vsel %vm3593_vm3, %v3596_v50, %v3598_v7  ;;  %v3603_v36 = vsel %vm3593_vm3, %v3600_v48, %v3602_v53  ;;  %v3607_v63 = vsel %vm3593_vm3, %v3604_v16, %v3606_v32  ;;  %vm9067_vm14 = vcmp.lt.s32.totalorder %v9066_v46, 0 }
 0x35d   : > { %v13102_v59 = vpop.eup %9618  ;;  %v13108_v51 = vmul.u32.u64.low %v13064_v5, %v3607_v63  ;;  %v13109_v52 = vmul.u32.u64.high %v13064_v5, %v3607_v63, %v13108_v51  ;;  %v3527_v24 = vsel %vm9067_vm14, 0, %v9066_v46  ;;  %v13130_v47 = vsel %vm13091_vm10, 0, %v3543_v49 }
 0x35e   : > { %15246 = vst [vmem:[#allocation112_spill] sm:$0xff] %v13102_v59  ;;  %v13104_v35 = vpop.eup %9620  ;;  %v14976_v27 = vxor.u32 2147483648, %v13102_v59  ;;  %v13113_v34 = vmul.u32.u64.low %v13064_v5, %v3603_v36  ;;  %v13114_v55 = vmul.u32.u64.high %v13064_v5, %v3603_v36, %v13113_v34  ;;  %v3528_v61 = vsub.s32 32, %v3527_v24  ;;  %15248 = vst [vmem:[#allocation114_spill] sm:$0xff] %v13130_v47 }
 0x35f   : > { %15247 = vst [vmem:[#allocation113_spill] sm:$0xff] %v13104_v35  ;;  %v14977_v9 = vxor.u32 2147483648, %v13104_v35  ;;  %v3529_v30 = vshll.u32 %v13074_v22, %v3527_v24  ;;  %v3532_v7 = vsub.s32 4294967266, %v3527_v24  ;;  %v15249_v50 = vand.u32 2147483647, %v13060_v20 }
 0x360   : > { %v3453_v32 = vsel %vm3451_vm7, %v14976_v27, %v13104_v35  ;;  %v3674_v16 = vadd.s32 1, %v9072_v8  ;;  %v3530_v22 = vshrl.u32 %v13057_v10, %v3528_v61  ;;  %v3615_v53 = vmul.u32 %v13064_v5, %v3599_v38 }
 0x361   : > { %v3450_v56 = vsel %vm3448_vm13, %v13102_v59, %v14977_v9  ;;  %v3671_v48 = vand.u32 8388607, %v15249_v50  ;;  %v3533_v46 = vadd.s32 127, %v3532_v7  ;;  %vm3617_vm14 = vc.u32 %v13109_v52, %v13113_v34 }
 0x362   : > { %v3454_v57 = vsel %vm3447_vm5, %v3450_v56, %v3453_v32  ;;  %v3618_v49 = vadd.s32 1, %v13114_v55  ;;  %vm3675_vm7 = vcmp.gt.s32.totalorder %v3674_v16, 0  ;;  %v3531_v63 = vor.u32 %v3530_v22, %v3529_v30 }
 0x363   : > { %v3455_v36 = vsel %vm15021_vm8, nan, %v3454_v57  ;;  %v3534_v8 = vshll.u32 %v3533_v46, 23  ;;  %v3676_v51 = vsel %vm3675_vm7, %v3674_v16, 0  ;;  %v217_v39 = vadd.s32 264, %v9928_v1 }
 0x364   : > { %4628 = vst [vmem:[%s10284_s26 + $0xe0] sm:$0xff] %v3455_v36  ;;  %v3549_v10 = vadd.s32 3, %v13130_v47  ;;  %v3619_v24 = vsel %vm3617_vm14, %v3618_v49, %v13114_v55  ;;  %v3678_v5 = vand.u32 31, %v3676_v51  ;;  %v15250_v38 = vmul.u32 8, %v13051_v0 }
 0x365   : > { %v3535_v61 = vor.u32 4788187, %v3534_v8  ;;  %v3538_v7 = vcvt.s32.f32 %v3531_v63  ;;  %v3620_v56 = vadd.s32 %v3619_v24, %v3615_v53  ;;  %v3672_v50 = vor.u32 8388608, %v3671_v48 }
 0x366   : > { %v338_v32 = vcvt.s32.f32 %v15250_v38  ;;  %v3677_v57 = vshrl.u32 %v3676_v51, 5  ;;  %v3679_v27 = vsub.s32 32, %v3678_v5  ;;  %v3681_v30 = vshll.u32 %v15077_v11, %v3678_v5 }
 0x367   : > { %v3684_v16 = vshll.u32 %v15078_v28, %v3678_v5  ;;  %v3536_v22 = vand.u32 2147483647, %v3535_v61  ;;  %v3621_v46 = vadd.s32 536870912, %v3620_v56  ;;  %v3687_v36 = vshll.u32 %v15079_v54, %v3678_v5 }
 0x368   : > { %v3690_v55 = vshll.u32 %v15080_v21, %v3678_v5  ;;  %v3682_v49 = vshrl.u32 %v15078_v28, %v3679_v27  ;;  %v3685_v0 = vshrl.u32 %v15079_v54, %v3679_v27  ;;  %v3688_v63 = vshrl.u32 %v15080_v21, %v3679_v27 }
 0x369   : > { %v3693_v48 = vshll.u32 %v15082_v23, %v3678_v5  ;;  %v3539_v53 = vmul.f32 %v3538_v7, %v3536_v22  ;;  %v3622_v8 = vshrl.u32 %v3621_v46, 30  ;;  %v3691_v51 = vshrl.u32 %v15082_v23, %v3679_v27 }
 0x36a   : > { %v3694_v24 = vshrl.u32 %v15083_v14, %v3679_v27  ;;  %v13159_v38 = vand.u32 3, %v3549_v10  ;;  %v385_v61 = vadd.f32 %v12734_v43, %v338_v32  ;;  %v13163_v9 = vadd.s32 %v9930_v2, %v217_v39 }
 0x36b   : > { %v3540_v6 = vxor.u32 2147483648, %v3539_v53  ;;  %v3623_v59 = vshll.u32 %v3622_v8, 30  ;;  %v3683_v35 = vor.u32 %v3682_v49, %v3681_v30  ;;  %v3686_v47 = vor.u32 %v3685_v0, %v3684_v16 }
 0x36c   : > { %v3689_v62 = vor.u32 %v3688_v63, %v3687_v36  ;;  %v3692_v4 = vor.u32 %v3691_v51, %v3690_v55  ;;  %vm3696_vm13 = vcmp.lt.s32.totalorder %v3677_v57, 1  ;;  %v13165_v5 = vshll.u32 %v3672_v50, 8 }
 0x36d   : > { %v3541_v7 = vsel %vm3458_vm9, %v3540_v6, %v3539_v53  ;;  %v13169_v22 = vsub.s32 %v3620_v56, %v3623_v59  ;;  %v3695_v10 = vor.u32 %v3694_v24, %v3693_v48  ;;  %vm3699_vm5 = vcmp.lt.s32.totalorder %v3677_v57, 4 }
 0x36e   : > { %v3544_v39 = vsel %vm13091_vm10, %v12892_v45, %v3541_v7  ;;  %v3680_v32 = vshrl.u32 %v15077_v11, %v3679_v27  ;;  %vm3697_vm6 = vcmp.lt.s32.totalorder %v3677_v57, 2  ;;  %vm3698_vm1 = vcmp.lt.s32.totalorder %v3677_v57, 3 }
 0x36f   : > { %9622 = vcosq.f32 %v3544_v39  ;;  %v3626_v30 = vsub.s32 0, %v13169_v22  ;;  %v3701_v50 = vsel %vm3699_vm5, %v3689_v62, 2102212464  ;;  %v3704_v16 = vsel %vm3696_vm13, %v3683_v35, %v3686_v47 }
 0x370   : > { %9624 = vsinq.f32 %v3544_v39  ;;  %v3646_v6 = vsub.s32 4, %v3622_v8  ;;  %v3705_v59 = vsel %vm3699_vm5, %v3692_v4, 920167782  ;;  %v13180_v56 = vmul.f32 %v12762_v60, %v385_v61 }
 0x371   : > { %v9069_v12 = vmin.u32 %v3626_v30, %v13169_v22  ;;  %v3706_v27 = vsel %vm3698_vm1, %v3689_v62, %v3705_v59  ;;  %v3708_v46 = vsel %vm3696_vm13, %v3686_v47, %v3689_v62  ;;  %v3709_v36 = vsel %vm3699_vm5, %v3695_v10, 1326507024 }
 0x372   : > { %15251 = vst [vmem:[#allocation115_spill] sm:$0xff] %v13180_v56  ;;  %v3700_v55 = vsel %vm3696_vm13, %v3680_v32, %v3683_v35  ;;  %v3702_v49 = vsel %vm3698_vm1, %v3686_v47, %v3701_v50  ;;  %v3707_v0 = vsel %vm3697_vm6, %v3704_v16, %v3706_v27  ;;  %v3710_v63 = vsel %vm3698_vm1, %v3692_v4, %v3709_v36 }
 0x373   : > { %v15252_v48 = vand.u32 2147483647, %v12967_v3  ;;  %vm3562_vm10 = vcmp.lt.s32.totalorder %v12967_v3, 0  ;;  %v3628_v51 = vclz %v9069_v12  ;;  %v218_v62 = vadd.s32 272, %v9928_v1 }
 0x374   : > { %vm14991_vm0 = vweird.f32 %v12892_v45  ;;  %v3647_v35 = vsel %vm3562_vm10, %v3646_v6, %v3622_v8  ;;  %v3711_v47 = vsel %vm3697_vm6, %v3708_v46, %v3710_v63  ;;  %v3703_v7 = vsel %vm3697_vm6, %v3700_v55, %v3702_v49 }
 0x375   : > { %vm13192_vm9 = vcmp.le.f32.partialorder %v15252_v48, 0.7853982  ;;  %v13203_v4 = vmul.u32.u64.low %v13165_v5, %v3707_v0  ;;  %v13204_v24 = vmul.u32.u64.high %v13165_v5, %v3707_v0, %v13203_v4  ;;  %v9070_v61 = vadd.s32 4294967294, %v3628_v51 }
 0x376   : > { %v13208_v10 = vmul.u32.u64.low %v13165_v5, %v3711_v47  ;;  %v13209_v39 = vmul.u32.u64.high %v13165_v5, %v3711_v47, %v13208_v10  ;;  %vm3551_vm3 = vcmp.lt.s32.totalorder %v13159_v38, 2  ;;  %vm3552_vm14 = vcmp.eq.s32.totalorder %v13159_v38, 0 }
 0x377   : > { %v3771_v32 = vand.u32 2139095040, %v13180_v56  ;;  %v299_v8 = vmul.u32 8, %v13163_v9  ;;  %vm3555_vm7 = vcmp.eq.s32.totalorder %v13159_v38, 2  ;;  %v3616_v30 = vadd.s32 %v13113_v34, %v13109_v52 }
 0x378   : > { %vm9071_vm13 = vcmp.lt.s32.totalorder %v9070_v61, 0  ;;  %v13220_v57 = vsel %vm13192_vm9, 0, %v3647_v35  ;;  %v3719_v16 = vmul.u32 %v13165_v5, %v3703_v7  ;;  %v3722_v6 = vadd.s32 1, %v13204_v24 }
 0x379   : > { %15255 = vst [vmem:[#allocation116_spill] sm:$0xff] %v13220_v57  ;;  %v3631_v50 = vsel %vm9071_vm13, 0, %v9070_v61  ;;  %v3772_v59 = vshrl.u32 %v3771_v32, 23  ;;  %v13224_v12 = vpop.eup %9622  ;;  %v14990_v36 = vand.u32 2147483647, %v13180_v56  ;;  %vm3721_vm5 = vc.u32 %v13209_v39, %v13203_v4 }
 0x37a   : > { %15256 = vst [vmem:[#allocation117_spill] sm:$0xff] %v13224_v12  ;;  %v3632_v27 = vsub.s32 32, %v3631_v50  ;;  %v3633_v9 = vshll.u32 %v13169_v22, %v3631_v50  ;;  %v3636_v46 = vsub.s32 4294967266, %v3631_v50  ;;  %v13228_v52 = vpop.eup %9624  ;;  %v14988_v34 = vxor.u32 2147483648, %v13224_v12 }
 0x37b   : > { %15257 = vst [vmem:[#allocation118_spill] sm:$0xff] %v13228_v52  ;;  %v9076_v55 = vadd.s32 4294967169, %v3772_v59  ;;  %v339_v49 = vcvt.s32.f32 %v299_v8  ;;  %v14989_v5 = vxor.u32 2147483648, %v13228_v52  ;;  %v3723_v48 = vsel %vm3721_vm5, %v3722_v6, %v13204_v24 }
 0x37c   : > { %v3634_v0 = vshrl.u32 %v3616_v30, %v3632_v27  ;;  %v3637_v63 = vadd.s32 127, %v3636_v46  ;;  %v3557_v22 = vsel %vm3555_vm7, %v14988_v34, %v13228_v52  ;;  %v3653_v51 = vadd.s32 3, %v13220_v57 }
 0x37d   : > { %v3724_v35 = vadd.s32 %v3723_v48, %v3719_v16  ;;  %v3778_v47 = vadd.s32 1, %v9076_v55  ;;  %v3554_v61 = vsel %vm3552_vm14, %v13224_v12, %v14989_v5  ;;  %v3775_v24 = vand.u32 8388607, %v14990_v36 }
 0x37e   : > { %v3635_v7 = vor.u32 %v3634_v0, %v3633_v9  ;;  %v3638_v10 = vshll.u32 %v3637_v63, 23  ;;  %v3558_v32 = vsel %vm3551_vm3, %v3554_v61, %v3557_v22  ;;  %v386_v30 = vadd.f32 %v12734_v43, %v339_v49 }
 0x37f   : > { %v3725_v8 = vadd.s32 536870912, %v3724_v35  ;;  %vm3779_vm6 = vcmp.gt.s32.totalorder %v3778_v47, 0  ;;  %v3559_v50 = vsel %vm14991_vm0, nan, %v3558_v32  ;;  %v13253_v55 = vand.u32 3, %v3653_v51 }
 0x380   : > { %v3639_v16 = vor.u32 4788187, %v3638_v10  ;;  %v3642_v6 = vcvt.s32.f32 %v3635_v7  ;;  %v3780_v59 = vsel %vm3779_vm6, %v3778_v47, 0  ;;  %4629 = vst [vmem:[%s10284_s26 + $0xe8] sm:$0xff] %v3559_v50  ;;  %v13256_v0 = vadd.s32 %v9930_v2, %v218_v62 }
 0x381   : > { %v3726_v27 = vshrl.u32 %v3725_v8, 30  ;;  %v3782_v9 = vand.u32 31, %v3780_v59  ;;  %v13259_v38 = vadd.s32 %v13203_v4, %v13209_v39  ;;  %v3776_v43 = vor.u32 8388608, %v3775_v24 }
 0x382   : > { %v3640_v46 = vand.u32 2147483647, %v3639_v16  ;;  %v3781_v22 = vshrl.u32 %v3780_v59, 5  ;;  %v13263_v47 = vmul.f32 %v12762_v60, %v386_v30  ;;  %vm3666_vm1 = vcmp.lt.s32.totalorder %v13060_v20, 0 }
 0x383   : > { %v3727_v63 = vshll.u32 %v3726_v27, 30  ;;  %v3783_v49 = vsub.s32 32, %v3782_v9  ;;  %v3785_v61 = vshll.u32 %v15077_v11, %v3782_v9  ;;  %v3788_v62 = vshll.u32 %v15078_v28, %v3782_v9 }
 0x384   : > { %v3643_v48 = vmul.f32 %v3642_v6, %v3640_v46  ;;  %15258 = vst [vmem:[#allocation119_spill] sm:$0xff] %v13263_v47  ;;  %v3791_v10 = vshll.u32 %v15079_v54, %v3782_v9  ;;  %v3794_v32 = vshll.u32 %v15080_v21, %v3782_v9  ;;  %v13276_v8 = vshll.u32 %v3776_v43, 8 }
 0x385   : > { %v13265_v7 = vsub.s32 %v3724_v35, %v3727_v63  ;;  %v3786_v51 = vshrl.u32 %v15078_v28, %v3783_v49  ;;  %v3789_v39 = vshrl.u32 %v15079_v54, %v3783_v49  ;;  %v3792_v24 = vshrl.u32 %v15080_v21, %v3783_v49 }
 0x386   : > { %v3644_v4 = vxor.u32 2147483648, %v3643_v48  ;;  %v3795_v35 = vshrl.u32 %v15082_v23, %v3783_v49  ;;  %v3784_v16 = vshrl.u32 %v15077_v11, %v3783_v49  ;;  %v3797_v59 = vshll.u32 %v15082_v23, %v3782_v9 }
 0x387   : > { %v3730_v60 = vsub.s32 0, %v13265_v7  ;;  %v3787_v6 = vor.u32 %v3786_v51, %v3785_v61  ;;  %v3790_v34 = vor.u32 %v3789_v39, %v3788_v62  ;;  %v3793_v5 = vor.u32 %v3792_v24, %v3791_v10 }
 0x388   : > { %v3645_v50 = vsel %vm3562_vm10, %v3644_v4, %v3643_v48  ;;  %v15259_v43 = vand.u32 2147483647, %v13060_v20  ;;  %v3796_v48 = vor.u32 %v3795_v35, %v3794_v32  ;;  %v3798_v61 = vshrl.u32 %v15083_v14, %v3783_v49 }
 0x389   : > { %v3648_v46 = vsel %vm13192_vm9, %v12967_v3, %v3645_v50  ;;  %v9073_v63 = vmin.u32 %v3730_v60, %v13265_v7  ;;  %vm3800_vm10 = vcmp.lt.s32.totalorder %v3781_v22, 1  ;;  %v3750_v51 = vsub.s32 4, %v3726_v27 }
 0x38a   : > { %9626 = vcosq.f32 %v3648_v46  ;;  %vm13289_vm3 = vcmp.le.f32.partialorder %v15259_v43, 0.7853982  ;;  %v3875_v53 = vand.u32 2139095040, %v13263_v47  ;;  %v3799_v4 = vor.u32 %v3798_v61, %v3797_v59 }
 0x38b   : > { %9628 = vsinq.f32 %v3648_v46  ;;  %v3732_v9 = vclz %v9073_v63  ;;  %vm3801_vm9 = vcmp.lt.s32.totalorder %v3781_v22, 2  ;;  %vm3802_vm14 = vcmp.lt.s32.totalorder %v3781_v22, 3 }
 0x38c   : > { %vm3803_vm7 = vcmp.lt.s32.totalorder %v3781_v22, 4  ;;  %vm3656_vm13 = vcmp.eq.s32.totalorder %v13253_v55, 0  ;;  %v3804_v10 = vsel %vm3800_vm10, %v3784_v16, %v3787_v6  ;;  %v3808_v24 = vsel %vm3800_vm10, %v3787_v6, %v3790_v34 }
 0x38d   : > { %v9074_v62 = vadd.s32 4294967294, %v3732_v9  ;;  %v3805_v39 = vsel %vm3803_vm7, %v3793_v5, 2102212464  ;;  %vm3655_vm5 = vcmp.lt.s32.totalorder %v13253_v55, 2  ;;  %v3809_v32 = vsel %vm3803_vm7, %v3796_v48, 920167782 }
 0x38e   : > { %v3806_v49 = vsel %vm3802_vm14, %v3790_v34, %v3805_v39  ;;  %v3812_v60 = vsel %vm3800_vm10, %v3790_v34, %v3793_v5  ;;  %v3813_v35 = vsel %vm3803_vm7, %v3799_v4, 1326507024  ;;  %vm15014_vm6 = vweird.f32 %v12967_v3 }
 0x38f   : > { %vm9075_vm0 = vcmp.lt.s32.totalorder %v9074_v62, 0  ;;  %v3751_v50 = vsel %vm3666_vm1, %v3750_v51, %v3726_v27  ;;  %v3810_v59 = vsel %vm3802_vm14, %v3793_v5, %v3809_v32  ;;  %v3814_v16 = vsel %vm3802_vm14, %v3796_v48, %v3813_v35 }
 0x390   : > { %v3735_v46 = vsel %vm9075_vm0, 0, %v9074_v62  ;;  %v3807_v6 = vsel %vm3801_vm9, %v3804_v10, %v3806_v49  ;;  %v3811_v63 = vsel %vm3801_vm9, %v3808_v24, %v3810_v59  ;;  %v3815_v43 = vsel %vm3801_vm9, %v3812_v60, %v3814_v16 }
 0x391   : > { %v3736_v61 = vsub.s32 32, %v3735_v46  ;;  %v3737_v34 = vshll.u32 %v13265_v7, %v3735_v46  ;;  %v3740_v9 = vsub.s32 4294967266, %v3735_v46  ;;  %v3876_v4 = vshrl.u32 %v3875_v53, 23 }
 0x392   : > { %v13311_v39 = vmul.u32.u64.low %v13276_v8, %v3815_v43  ;;  %v13312_v30 = vmul.u32.u64.high %v13276_v8, %v3815_v43, %v13311_v39  ;;  %v13315_v5 = vmul.u32.u64.low %v13276_v8, %v3811_v63  ;;  %v13316_v27 = vmul.u32.u64.high %v13276_v8, %v3811_v63, %v13315_v5 }
 0x393   : > { %v3738_v48 = vshrl.u32 %v13259_v38, %v3736_v61  ;;  %v3741_v51 = vadd.s32 127, %v3740_v9  ;;  %v13322_v22 = vsel %vm13289_vm3, 0, %v3751_v50  ;;  %v9080_v62 = vadd.s32 4294967169, %v3876_v4 }
 0x394   : > { %15262 = vst [vmem:[#allocation120_spill] sm:$0xff] %v13322_v22  ;;  %v13324_v7 = vpop.eup %9626  ;;  %vm3659_vm0 = vcmp.eq.s32.totalorder %v13253_v55, 2  ;;  %v3823_v53 = vmul.u32 %v13276_v8, %v3807_v6  ;;  %v15264_v10 = vand.u32 2147483647, %v13263_v47  ;;  %v300_v49 = vmul.u32 8, %v13256_v0 }
 0x395   : > { %15263 = vst [vmem:[#allocation121_spill] sm:$0xff] %v13324_v7  ;;  %v13331_v32 = vpop.eup %9628  ;;  %v14992_v38 = vxor.u32 2147483648, %v13324_v7  ;;  %v3739_v60 = vor.u32 %v3738_v48, %v3737_v34  ;;  %v3742_v35 = vshll.u32 %v3741_v51, 23  ;;  %v3882_v50 = vadd.s32 1, %v9080_v62 }
 0x396   : > { %v3879_v24 = vand.u32 8388607, %v15264_v10  ;;  %15265 = vst [vmem:[#allocation122_spill] sm:$0xff] %v13331_v32  ;;  %v14993_v59 = vxor.u32 2147483648, %v13331_v32  ;;  %v3757_v16 = vadd.s32 3, %v13322_v22  ;;  %vm3825_vm10 = vc.u32 %v13312_v30, %v13315_v5 }
 0x397   : > { %v3826_v8 = vadd.s32 1, %v13316_v27  ;;  %v3661_v0 = vsel %vm3659_vm0, %v14992_v38, %v13331_v32  ;;  %v3743_v46 = vor.u32 4788187, %v3742_v35  ;;  %v3746_v6 = vcvt.s32.f32 %v3739_v60 }
 0x398   : > { %vm3883_vm9 = vcmp.gt.s32.totalorder %v3882_v50, 0  ;;  %v3658_v63 = vsel %vm3656_vm13, %v13324_v7, %v14993_v59  ;;  %v340_v34 = vcvt.s32.f32 %v300_v49  ;;  %v219_v10 = vadd.s32 280, %v9928_v1 }
 0x399   : > { %v3827_v43 = vsel %vm3825_vm10, %v3826_v8, %v13316_v27  ;;  %v3884_v61 = vsel %vm3883_vm9, %v3882_v50, 0  ;;  %v3662_v9 = vsel %vm3655_vm5, %v3658_v63, %v3661_v0  ;;  %v3744_v4 = vand.u32 2147483647, %v3743_v46 }
 0x39a   : > { %v3828_v39 = vadd.s32 %v3827_v43, %v3823_v53  ;;  %v3663_v48 = vsel %vm15014_vm6, nan, %v3662_v9  ;;  %v13352_v51 = vshrl.u32 %v3884_v61, 5  ;;  %v3886_v62 = vand.u32 31, %v3884_v61  ;;  %v13363_v53 = vld [vmem:[%s14716_s1] ss:$0 sm:$0xff] }
 0x39b   : > { %4630 = vst [vmem:[%s10284_s26 + $0xf0] sm:$0xff] %v3663_v48  ;;  %v3747_v60 = vmul.f32 %v3746_v6, %v3744_v4  ;;  %v13356_v35 = vand.u32 3, %v3757_v16  ;;  %v3880_v50 = vor.u32 8388608, %v3879_v24  ;;  %v387_v0 = vadd.f32 %v13363_v53, %v340_v34 }
 0x39c   : > { %v3829_v27 = vadd.s32 536870912, %v3828_v39  ;;  %v3887_v49 = vsub.s32 32, %v3886_v62  ;;  %v3889_v55 = vshll.u32 %v15077_v11, %v3886_v62  ;;  %v3892_v8 = vshll.u32 %v15078_v28, %v3886_v62 }
 0x39d   : > { %v3748_v46 = vxor.u32 2147483648, %v3747_v60  ;;  %v3895_v6 = vshll.u32 %v15079_v54, %v3886_v62  ;;  %v3898_v16 = vshll.u32 %v15080_v21, %v3886_v62  ;;  %vm3770_vm14 = vcmp.lt.s32.totalorder %v13180_v56, 0 }
 0x39e   : > { %v3830_v63 = vshrl.u32 %v3829_v27, 30  ;;  %v3890_v24 = vshrl.u32 %v15078_v28, %v3887_v49  ;;  %v3893_v43 = vshrl.u32 %v15079_v54, %v3887_v49  ;;  %v3896_v61 = vshrl.u32 %v15080_v21, %v3887_v49 }
 0x39f   : > { %vm3904_vm7 = vcmp.lt.s32.totalorder %v13352_v51, 1  ;;  %v3749_v9 = vsel %vm3666_vm1, %v3748_v46, %v3747_v60  ;;  %v3899_v4 = vshrl.u32 %v15082_v23, %v3887_v49  ;;  %v3901_v48 = vshll.u32 %v15082_v23, %v3886_v62 }
 0x3a0   : > { %v3831_v34 = vshll.u32 %v3830_v63, 30  ;;  %v3752_v27 = vsel %vm13289_vm3, %v13060_v20, %v3749_v9  ;;  %v3888_v38 = vshrl.u32 %v15077_v11, %v3887_v49  ;;  %v3891_v59 = vor.u32 %v3890_v24, %v3889_v55 }
 0x3a1   : > { %v3894_v3 = vor.u32 %v3893_v43, %v3892_v8  ;;  %9630 = vcosq.f32 %v3752_v27  ;;  %v3897_v32 = vor.u32 %v3896_v61, %v3895_v6  ;;  %v3900_v45 = vor.u32 %v3899_v4, %v3898_v16 }
 0x3a2   : > { %v13381_v7 = vsub.s32 %v3828_v39, %v3831_v34  ;;  %9632 = vsinq.f32 %v3752_v27  ;;  %v15266_v60 = vand.u32 2147483647, %v13180_v56  ;;  %v3902_v62 = vshrl.u32 %v15083_v14, %v3887_v49 }
 0x3a3   : > { %vm3906_vm3 = vcmp.lt.s32.totalorder %v13352_v51, 3  ;;  %v3920_v36 = vshll.u32 %v3880_v50, 8  ;;  %v3854_v8 = vsub.s32 4, %v3830_v63  ;;  %vm3905_vm13 = vcmp.lt.s32.totalorder %v13352_v51, 2 }
 0x3a4   : > { %vm13385_vm1 = vcmp.le.f32.partialorder %v15266_v60, 0.7853982  ;;  %v3834_v55 = vsub.s32 0, %v13381_v7  ;;  %vm3907_vm5 = vcmp.lt.s32.totalorder %v13352_v51, 4  ;;  %v3903_v39 = vor.u32 %v3902_v62, %v3901_v48  ;;  %v13409_v48 = vld [vmem:[#allocation2] ss:$0 sm:$0xff] }
 0x3a5   : > { %v3909_v6 = vsel %vm3907_vm5, %v3897_v32, 2102212464  ;;  %v3912_v16 = vsel %vm3904_vm7, %v3891_v59, %v3894_v3  ;;  %v3913_v24 = vsel %vm3907_vm5, %v3900_v45, 920167782  ;;  %vm3759_vm0 = vcmp.lt.s32.totalorder %v13356_v35, 2 }
 0x3a6   : > { %v9077_v49 = vmin.u32 %v3834_v55, %v13381_v7  ;;  %v3908_v50 = vsel %vm3904_vm7, %v3888_v38, %v3891_v59  ;;  %v3910_v43 = vsel %vm3906_vm3, %v3894_v3, %v3909_v6  ;;  %v3914_v61 = vsel %vm3906_vm3, %v3897_v32, %v3913_v24 }
 0x3a7   : > { %vm15013_vm10 = vweird.f32 %v13060_v20  ;;  %v3915_v9 = vsel %vm3905_vm13, %v3912_v16, %v3914_v61  ;;  %v3916_v34 = vsel %vm3904_vm7, %v3894_v3, %v3897_v32  ;;  %v3917_v4 = vsel %vm3907_vm5, %v3903_v39, 1326507024 }
 0x3a8   : > { %v13412_v27 = vmul.f32 %v13409_v48, %v387_v0  ;;  %vm3760_vm9 = vcmp.eq.s32.totalorder %v13356_v35, 0  ;;  %v3836_v38 = vclz %v9077_v49  ;;  %v3855_v59 = vsel %vm3770_vm14, %v3854_v8, %v3830_v63 }
 0x3a9   : > { %v261_v60 = vadd.s32 %v9930_v2, %v219_v10  ;;  %v3911_v62 = vsel %vm3905_vm13, %v3908_v50, %v3910_v43  ;;  %v3918_v3 = vsel %vm3906_vm3, %v3900_v45, %v3917_v4  ;;  %vm3763_vm7 = vcmp.eq.s32.totalorder %v13356_v35, 2 }
 0x3aa   : > { %v13422_v32 = vmul.u32.u64.low %v3920_v36, %v3915_v9  ;;  %v13423_v55 = vmul.u32.u64.high %v3920_v36, %v3915_v9, %v13422_v32  ;;  %v3824_v0 = vadd.s32 %v13315_v5, %v13312_v30  ;;  %v9078_v39 = vadd.s32 4294967294, %v3836_v38 }
 0x3ab   : > { %v3919_v63 = vsel %vm3905_vm13, %v3916_v34, %v3918_v3  ;;  %v15001_v6 = vand.u32 2147483647, %v13412_v27  ;;  %v3979_v16 = vand.u32 2139095040, %v13412_v27  ;;  %v13435_v45 = vpop.eup %9630  ;;  %v13439_v24 = vsel %vm13385_vm1, 0, %v3855_v59 }
 0x3ac   : > { %v13430_v8 = vmul.u32.u64.low %v3920_v36, %v3919_v63  ;;  %v13431_v10 = vmul.u32.u64.high %v3920_v36, %v3919_v63, %v13430_v8  ;;  %15269 = vst [vmem:[#allocation123_spill] sm:$0xff] %v13435_v45  ;;  %vm9079_vm3 = vcmp.lt.s32.totalorder %v9078_v39, 0  ;;  %15270 = vst [vmem:[#allocation124_spill] sm:$0xff] %v13439_v24  ;;  %v3927_v49 = vmul.u32 %v3920_v36, %v3911_v62  ;;  %v13441_v5 = vpop.eup %9632 }
 0x3ad   : > { %v301_v30 = vmul.u32 8, %v261_v60  ;;  %15271 = vst [vmem:[#allocation125_spill] sm:$0xff] %v13441_v5  ;;  %v15000_v51 = vxor.u32 2147483648, %v13435_v45  ;;  %v3839_v50 = vsel %vm9079_vm3, 0, %v9078_v39  ;;  %v3930_v43 = vadd.s32 1, %v13423_v55 }
 0x3ae   : > { %v3980_v61 = vshrl.u32 %v3979_v16, 23  ;;  %v15004_v9 = vxor.u32 2147483648, %v13441_v5  ;;  %v3840_v34 = vsub.s32 32, %v3839_v50  ;;  %v3841_v4 = vshll.u32 %v13381_v7, %v3839_v50 }
 0x3af   : > { %v3844_v38 = vsub.s32 4294967266, %v3839_v50  ;;  %v3765_v36 = vsel %vm3763_vm7, %v15000_v51, %v13441_v5  ;;  %vm3929_vm13 = vc.u32 %v13431_v10, %v13422_v32  ;;  %v3983_v60 = vand.u32 8388607, %v15001_v6 }
 0x3b0   : > { %v9084_v59 = vadd.s32 4294967169, %v3980_v61  ;;  %v3762_v7 = vsel %vm3760_vm9, %v13435_v45, %v15004_v9  ;;  %v3842_v62 = vshrl.u32 %v3824_v0, %v3840_v34  ;;  %v3931_v39 = vsel %vm3929_vm13, %v3930_v43, %v13423_v55 }
 0x3b1   : > { %v3845_v3 = vadd.s32 127, %v3844_v38  ;;  %v3766_v63 = vsel %vm3759_vm0, %v3762_v7, %v3765_v36  ;;  %v3932_v8 = vadd.s32 %v3931_v39, %v3927_v49  ;;  %v220_v50 = vadd.s32 288, %v9928_v1 }
 0x3b2   : > { %v3986_v16 = vadd.s32 1, %v9084_v59  ;;  %v3767_v61 = vsel %vm15013_vm10, nan, %v3766_v63  ;;  %v3843_v51 = vor.u32 %v3842_v62, %v3841_v4  ;;  %v3861_v5 = vadd.s32 3, %v13439_v24 }
 0x3b3   : > { %v3846_v6 = vshll.u32 %v3845_v3, 23  ;;  %4631 = vst [vmem:[%s10284_s26 + $0xf8] sm:$0xff] %v3767_v61  ;;  %v3933_v9 = vadd.s32 536870912, %v3932_v8  ;;  %v341_v0 = vcvt.s32.f32 %v301_v30  ;;  %v3984_v43 = vor.u32 8388608, %v3983_v60 }
 0x3b4   : > { %vm3987_vm5 = vcmp.gt.s32.totalorder %v3986_v16, 0  ;;  %v3850_v55 = vcvt.s32.f32 %v3843_v51  ;;  %v13468_v59 = vand.u32 3, %v3861_v5  ;;  %v262_v7 = vadd.s32 %v9930_v2, %v220_v50 }
 0x3b5   : > { %v3847_v34 = vor.u32 4788187, %v3846_v6  ;;  %v3988_v35 = vsel %vm3987_vm5, %v3986_v16, 0  ;;  %v3934_v38 = vshrl.u32 %v3933_v9, 30  ;;  %v13472_v4 = vadd.s32 %v13422_v32, %v13431_v10 }
 0x3b6   : > { %v3990_v49 = vand.u32 31, %v3988_v35  ;;  %v388_v39 = vadd.f32 %v13363_v53, %v341_v0  ;;  %v3989_v30 = vshrl.u32 %v3988_v35, 5  ;;  %v13476_v51 = vshll.u32 %v3984_v43, 8 }
 0x3b7   : > { %v3848_v36 = vand.u32 2147483647, %v3847_v34  ;;  %v3935_v62 = vshll.u32 %v3934_v38, 30  ;;  %vm3874_vm0 = vcmp.lt.s32.totalorder %v13263_v47, 0  ;;  %vm3863_vm13 = vcmp.lt.s32.totalorder %v13468_v59, 2 }
 0x3b8   : > { %v3991_v3 = vsub.s32 32, %v3990_v49  ;;  %v3993_v6 = vshll.u32 %v15077_v11, %v3990_v49  ;;  %v3996_v60 = vshll.u32 %v15078_v28, %v3990_v49  ;;  %v3999_v16 = vshll.u32 %v15079_v54, %v3990_v49 }
 0x3b9   : > { %v3851_v63 = vmul.f32 %v3850_v55, %v3848_v36  ;;  %v13478_v9 = vsub.s32 %v3932_v8, %v3935_v62  ;;  %v4002_v61 = vshll.u32 %v15080_v21, %v3990_v49  ;;  %v13490_v34 = vmul.f32 %v13409_v48, %v388_v39 }
 0x3ba   : > { %v3994_v5 = vshrl.u32 %v15078_v28, %v3991_v3  ;;  %v3997_v10 = vshrl.u32 %v15079_v54, %v3991_v3  ;;  %v4000_v50 = vshrl.u32 %v15080_v21, %v3991_v3  ;;  %v4003_v8 = vshrl.u32 %v15082_v23, %v3991_v3 }
 0x3bb   : > { %v3852_v32 = vxor.u32 2147483648, %v3851_v63  ;;  %v3938_v0 = vsub.s32 0, %v13478_v9  ;;  %v302_v55 = vmul.u32 8, %v262_v7  ;;  %v3992_v35 = vshrl.u32 %v15077_v11, %v3991_v3 }
 0x3bc   : > { %v3995_v36 = vor.u32 %v3994_v5, %v3993_v6  ;;  %v4005_v62 = vshll.u32 %v15082_v23, %v3990_v49  ;;  %v3998_v24 = vor.u32 %v3997_v10, %v3996_v60  ;;  %v4001_v22 = vor.u32 %v4000_v50, %v3999_v16 }
 0x3bd   : > { %v3853_v43 = vsel %vm3770_vm14, %v3852_v32, %v3851_v63  ;;  %v9081_v45 = vmin.u32 %v3938_v0, %v13478_v9  ;;  %v4004_v39 = vor.u32 %v4003_v8, %v4002_v61  ;;  %v4006_v7 = vshrl.u32 %v15083_v14, %v3991_v3 }
 0x3be   : > { %v3856_v20 = vsel %vm13385_vm1, %v13180_v56, %v3853_v43  ;;  %vm4008_vm9 = vcmp.lt.s32.totalorder %v3989_v30, 1  ;;  %v15272_v63 = vand.u32 2147483647, %v13263_v47  ;;  %v3958_v5 = vsub.s32 4, %v3934_v38 }
 0x3bf   : > { %9634 = vcosq.f32 %v3856_v20  ;;  %v3940_v49 = vclz %v9081_v45  ;;  %v342_v46 = vcvt.s32.f32 %v302_v55  ;;  %v4007_v32 = vor.u32 %v4006_v7, %v4005_v62 }
 0x3c0   : > { %9636 = vsinq.f32 %v3856_v20  ;;  %vm13503_vm14 = vcmp.le.f32.partialorder %v15272_v63, 0.7853982  ;;  %vm4009_vm1 = vcmp.lt.s32.totalorder %v3989_v30, 2  ;;  %vm4010_vm7 = vcmp.lt.s32.totalorder %v3989_v30, 3 }
 0x3c1   : > { %vm4011_vm3 = vcmp.lt.s32.totalorder %v3989_v30, 4  ;;  %v9082_v60 = vadd.s32 4294967294, %v3940_v49  ;;  %v4012_v16 = vsel %vm4008_vm9, %v3992_v35, %v3995_v36  ;;  %v4016_v3 = vsel %vm4008_vm9, %v3995_v36, %v3998_v24 }
 0x3c2   : > { %v4013_v10 = vsel %vm4011_vm3, %v4001_v22, 2102212464  ;;  %v4017_v50 = vsel %vm4011_vm3, %v4004_v39, 920167782  ;;  %v4020_v61 = vsel %vm4008_vm9, %v3998_v24, %v4001_v22  ;;  %v4021_v0 = vsel %vm4011_vm3, %v4007_v32, 1326507024 }
 0x3c3   : > { %v4014_v20 = vsel %vm4010_vm7, %v3998_v24, %v4013_v10  ;;  %vm9083_vm5 = vcmp.lt.s32.totalorder %v9082_v60, 0  ;;  %v4018_v45 = vsel %vm4010_vm7, %v4001_v22, %v4017_v50  ;;  %v4022_v8 = vsel %vm4010_vm7, %v4004_v39, %v4021_v0 }
 0x3c4   : > { %v4083_v55 = vand.u32 2139095040, %v13490_v34  ;;  %v3943_v43 = vsel %vm9083_vm5, 0, %v9082_v60  ;;  %v3959_v62 = vsel %vm3874_vm0, %v3958_v5, %v3934_v38  ;;  %v4019_v35 = vsel %vm4009_vm1, %v4016_v3, %v4018_v45 }
 0x3c5   : > { %v4023_v36 = vsel %vm4009_vm1, %v4020_v61, %v4022_v8  ;;  %v3944_v7 = vsub.s32 32, %v3943_v43  ;;  %v3945_v63 = vshll.u32 %v13478_v9, %v3943_v43  ;;  %v3948_v49 = vsub.s32 4294967266, %v3943_v43 }
 0x3c6   : > { %v4015_v24 = vsel %vm4009_vm1, %v4012_v16, %v4014_v20  ;;  %v13519_v32 = vmul.u32.u64.low %v13476_v51, %v4023_v36  ;;  %v13520_v22 = vmul.u32.u64.high %v13476_v51, %v4023_v36, %v13519_v32  ;;  %vm3864_vm9 = vcmp.eq.s32.totalorder %v13468_v59, 0 }
 0x3c7   : > { %v13523_v39 = vmul.u32.u64.low %v13476_v51, %v4019_v35  ;;  %v13524_v60 = vmul.u32.u64.high %v13476_v51, %v4019_v35, %v13523_v39  ;;  %v3946_v38 = vshrl.u32 %v13472_v4, %v3944_v7  ;;  %v3949_v5 = vadd.s32 127, %v3948_v49 }
 0x3c8   : > { %v4084_v10 = vshrl.u32 %v4083_v55, 23  ;;  %vm3867_vm7 = vcmp.eq.s32.totalorder %v13468_v59, 2  ;;  %v13533_v30 = vsel %vm13503_vm14, 0, %v3959_v62  ;;  %v4031_v9 = vmul.u32 %v13476_v51, %v4015_v24 }
 0x3c9   : > { %v13528_v3 = vpop.eup %9634  ;;  %15276 = vst [vmem:[#allocation127_spill] sm:$0xff] %v13533_v30  ;;  %v15015_v16 = vand.u32 2147483647, %v13490_v34  ;;  %v3947_v61 = vor.u32 %v3946_v38, %v3945_v63  ;;  %v3950_v4 = vshll.u32 %v3949_v5, 23  ;;  %vm4033_vm1 = vc.u32 %v13520_v22, %v13523_v39 }
 0x3ca   : > { %15275 = vst [vmem:[#allocation126_spill] sm:$0xff] %v13528_v3  ;;  %v13537_v20 = vpop.eup %9636  ;;  %v15010_v50 = vxor.u32 2147483648, %v13528_v3  ;;  %v9088_v0 = vadd.s32 4294967169, %v4084_v10  ;;  %v4034_v8 = vadd.s32 1, %v13524_v60  ;;  %v389_v55 = vadd.f32 %v13363_v53, %v342_v46 }
 0x3cb   : > { %15277 = vst [vmem:[#allocation128_spill] sm:$0xff] %v13537_v20  ;;  %v15011_v45 = vxor.u32 2147483648, %v13537_v20  ;;  %vm15012_vm3 = vweird.f32 %v13180_v56  ;;  %v3951_v43 = vor.u32 4788187, %v3950_v4  ;;  %v3954_v62 = vcvt.s32.f32 %v3947_v61 }
 0x3cc   : > { %v3869_v51 = vsel %vm3867_vm7, %v15010_v50, %v13537_v20  ;;  %v4035_v36 = vsel %vm4033_vm1, %v4034_v8, %v13524_v60  ;;  %v4090_v46 = vadd.s32 1, %v9088_v0  ;;  %v3965_v49 = vadd.s32 3, %v13533_v30 }
 0x3cd   : > { %v3866_v35 = vsel %vm3864_vm9, %v13528_v3, %v15011_v45  ;;  %v3952_v63 = vand.u32 2147483647, %v3951_v43  ;;  %v4036_v24 = vadd.s32 %v4035_v36, %v4031_v9  ;;  %v4087_v38 = vand.u32 8388607, %v15015_v16 }
 0x3ce   : > { %v3870_v7 = vsel %vm3863_vm13, %v3866_v35, %v3869_v51  ;;  %vm4091_vm5 = vcmp.gt.s32.totalorder %v4090_v46, 0  ;;  %v13564_v5 = vmul.f32 %v13409_v48, %v389_v55  ;;  %v13567_v0 = vand.u32 3, %v3965_v49 }
 0x3cf   : > { %v3871_v32 = vsel %vm15012_vm3, nan, %v3870_v7  ;;  %v3955_v60 = vmul.f32 %v3954_v62, %v3952_v63  ;;  %v4037_v10 = vadd.s32 536870912, %v4036_v24  ;;  %v4092_v61 = vsel %vm4091_vm5, %v4090_v46, 0 }
 0x3d0   : > { %4632 = vst [vmem:[%s10284_s26 + $0x100] sm:$0xff] %v3871_v32  ;;  %v4094_v59 = vand.u32 31, %v4092_v61  ;;  %v4088_v9 = vor.u32 8388608, %v4087_v38  ;;  %v4093_v51 = vshrl.u32 %v4092_v61, 5  ;;  %v4187_v35 = vand.u32 2139095040, %v13564_v5 }
 0x3d1   : > { %v3956_v4 = vxor.u32 2147483648, %v3955_v60  ;;  %v4038_v8 = vshrl.u32 %v4037_v10, 30  ;;  %v4032_v61 = vadd.s32 %v13523_v39, %v13520_v22  ;;  %vm3968_vm13 = vcmp.eq.s32.totalorder %v13567_v0, 0 }
 0x3d2   : > { %v4095_v43 = vsub.s32 32, %v4094_v59  ;;  %v4097_v55 = vshll.u32 %v15077_v11, %v4094_v59  ;;  %v4100_v62 = vshll.u32 %v15078_v28, %v4094_v59  ;;  %v4103_v32 = vshll.u32 %v15079_v54, %v4094_v59 }
 0x3d3   : > { %v3957_v36 = vsel %vm3874_vm0, %v3956_v4, %v3955_v60  ;;  %v4039_v7 = vshll.u32 %v4038_v8, 30  ;;  %v4106_v10 = vshll.u32 %v15080_v21, %v4094_v59  ;;  %vm3978_vm0 = vcmp.lt.s32.totalorder %v13412_v27, 0 }
 0x3d4   : > { %v3960_v46 = vsel %vm13503_vm14, %v13263_v47, %v3957_v36  ;;  %v4098_v63 = vshrl.u32 %v15078_v28, %v4095_v43  ;;  %v4101_v49 = vshrl.u32 %v15079_v54, %v4095_v43  ;;  %v4104_v60 = vshrl.u32 %v15080_v21, %v4095_v43 }
 0x3d5   : > { %9638 = vcosq.f32 %v3960_v46  ;;  %v13580_v38 = vsub.s32 %v4036_v24, %v4039_v7  ;;  %v4096_v6 = vshrl.u32 %v15077_v11, %v4095_v43  ;;  %vm3971_vm14 = vcmp.eq.s32.totalorder %v13567_v0, 2 }
 0x3d6   : > { %9640 = vsinq.f32 %v3960_v46  ;;  %v4099_v36 = vor.u32 %v4098_v63, %v4097_v55  ;;  %v4102_v50 = vor.u32 %v4101_v49, %v4100_v62  ;;  %v4107_v24 = vshrl.u32 %v15082_v23, %v4095_v43 }
 0x3d7   : > { %v4042_v4 = vsub.s32 0, %v13580_v38  ;;  %v4105_v7 = vor.u32 %v4104_v60, %v4103_v32  ;;  %v4109_v45 = vshll.u32 %v15082_v23, %v4094_v59  ;;  %v4110_v46 = vshrl.u32 %v15083_v14, %v4095_v43 }
 0x3d8   : > { %vm4112_vm9 = vcmp.lt.s32.totalorder %v4093_v51, 1  ;;  %vm3967_vm7 = vcmp.lt.s32.totalorder %v13567_v0, 2  ;;  %v15278_v22 = vand.u32 2147483647, %v13412_v27  ;;  %v4108_v62 = vor.u32 %v4107_v24, %v4106_v10 }
 0x3d9   : > { %v9085_v55 = vmin.u32 %v4042_v4, %v13580_v38  ;;  %v4128_v63 = vshll.u32 %v4088_v9, 8  ;;  %v4188_v49 = vshrl.u32 %v4187_v35, 23  ;;  %vm15038_vm5 = vweird.f32 %v13263_v47 }
 0x3da   : > { %vm13596_vm1 = vcmp.le.f32.partialorder %v15278_v22, 0.7853982  ;;  %v4062_v32 = vsub.s32 4, %v4038_v8  ;;  %v4111_v59 = vor.u32 %v4110_v46, %v4109_v45  ;;  %vm4114_vm3 = vcmp.lt.s32.totalorder %v4093_v51, 3 }
 0x3db   : > { %vm4115_vm10 = vcmp.lt.s32.totalorder %v4093_v51, 4  ;;  %v4044_v43 = vclz %v9085_v55  ;;  %vm4113_vm6 = vcmp.lt.s32.totalorder %v4093_v51, 2  ;;  %v4116_v60 = vsel %vm4112_vm9, %v4096_v6, %v4099_v36 }
 0x3dc   : > { %v4120_v22 = vsel %vm4112_vm9, %v4099_v36, %v4102_v50  ;;  %v4117_v16 = vsel %vm4115_vm10, %v4105_v7, 2102212464  ;;  %v4121_v56 = vsel %vm4115_vm10, %v4108_v62, 920167782  ;;  %v4124_v3 = vsel %vm4112_vm9, %v4102_v50, %v4105_v7 }
 0x3dd   : > { %v4125_v4 = vsel %vm4115_vm10, %v4111_v59, 1326507024  ;;  %v9086_v10 = vadd.s32 4294967294, %v4044_v43  ;;  %v4118_v9 = vsel %vm4114_vm3, %v4102_v50, %v4117_v16  ;;  %v4122_v35 = vsel %vm4114_vm3, %v4105_v7, %v4121_v56 }
 0x3de   : > { %v4126_v24 = vsel %vm4114_vm3, %v4108_v62, %v4125_v4  ;;  %v4063_v45 = vsel %vm3978_vm0, %v4062_v32, %v4038_v8  ;;  %v4123_v46 = vsel %vm4113_vm6, %v4120_v22, %v4122_v35  ;;  %v9092_v20 = vadd.s32 4294967169, %v4188_v49 }
 0x3df   : > { %v4127_v55 = vsel %vm4113_vm6, %v4124_v3, %v4126_v24  ;;  %v13609_v6 = vpop.eup %9638  ;;  %vm9087_vm8 = vcmp.lt.s32.totalorder %v9086_v10, 0  ;;  %v4119_v36 = vsel %vm4113_vm6, %v4116_v60, %v4118_v9  ;;  %v13631_v51 = vsel %vm13596_vm1, 0, %v4063_v45 }
 0x3e0   : > { %15281 = vst [vmem:[#allocation129_spill] sm:$0xff] %v13609_v6  ;;  %v13612_v30 = vmul.u32.u64.low %v4128_v63, %v4127_v55  ;;  %v13613_v12 = vmul.u32.u64.high %v4128_v63, %v4127_v55, %v13612_v30  ;;  %v13615_v59 = vpop.eup %9640  ;;  %v15025_v56 = vxor.u32 2147483648, %v13609_v6  ;;  %v4047_v16 = vsel %vm9087_vm8, 0, %v9086_v10  ;;  %15283 = vst [vmem:[#allocation131_spill] sm:$0xff] %v13631_v51 }
 0x3e1   : > { %15282 = vst [vmem:[#allocation130_spill] sm:$0xff] %v13615_v59  ;;  %v13618_v50 = vmul.u32.u64.low %v4128_v63, %v4123_v46  ;;  %v13619_v8 = vmul.u32.u64.high %v4128_v63, %v4123_v46, %v13618_v50  ;;  %v15026_v3 = vxor.u32 2147483648, %v13615_v59  ;;  %v4048_v7 = vsub.s32 32, %v4047_v16 }
 0x3e2   : > { %v4049_v62 = vshll.u32 %v13580_v38, %v4047_v16  ;;  %v4052_v49 = vsub.s32 4294967266, %v4047_v16  ;;  %v3973_v30 = vsel %vm3971_vm14, %v15025_v56, %v13615_v59  ;;  %v15027_v32 = vand.u32 2147483647, %v13564_v5 }
 0x3e3   : > { %v4194_v43 = vadd.s32 1, %v9092_v20  ;;  %v3970_v38 = vsel %vm3968_vm13, %v13609_v6, %v15026_v3  ;;  %v4050_v60 = vshrl.u32 %v4032_v61, %v4048_v7  ;;  %v4135_v4 = vmul.u32 %v4128_v63, %v4119_v36 }
 0x3e4   : > { %v4053_v22 = vadd.s32 127, %v4052_v49  ;;  %v3974_v10 = vsel %vm3967_vm7, %v3970_v38, %v3973_v30  ;;  %vm4137_vm8 = vc.u32 %v13613_v12, %v13618_v50  ;;  %v4138_v9 = vadd.s32 1, %v13619_v8 }
 0x3e5   : > { %vm4195_vm6 = vcmp.gt.s32.totalorder %v4194_v43, 0  ;;  %v3975_v20 = vsel %vm15038_vm5, nan, %v3974_v10  ;;  %v4051_v35 = vor.u32 %v4050_v60, %v4049_v62  ;;  %v4191_v63 = vand.u32 8388607, %v15027_v32 }
 0x3e6   : > { %v4054_v24 = vshll.u32 %v4053_v22, 23  ;;  %v4196_v45 = vsel %vm4195_vm6, %v4194_v43, 0  ;;  %4633 = vst [vmem:[%s10284_s26 + $0x108] sm:$0xff] %v3975_v20  ;;  %v4139_v61 = vsel %vm4137_vm8, %v4138_v9, %v13619_v8  ;;  %v221_v46 = vadd.s32 296, %v9928_v1 }
 0x3e7   : > { %v4198_v0 = vand.u32 31, %v4196_v45  ;;  %v4058_v36 = vcvt.s32.f32 %v4051_v35  ;;  %v4069_v16 = vadd.s32 3, %v13631_v51  ;;  %v4140_v7 = vadd.s32 %v4139_v61, %v4135_v4 }
 0x3e8   : > { %v4055_v55 = vor.u32 4788187, %v4054_v24  ;;  %v4197_v49 = vshrl.u32 %v4196_v45, 5  ;;  %v4192_v56 = vor.u32 8388608, %v4191_v63  ;;  %v263_v3 = vadd.s32 %v9930_v2, %v221_v46 }
 0x3e9   : > { %v4199_v30 = vsub.s32 32, %v4198_v0  ;;  %v4201_v62 = vshll.u32 %v15077_v11, %v4198_v0  ;;  %v4204_v43 = vshll.u32 %v15078_v28, %v4198_v0  ;;  %v4141_v60 = vadd.s32 536870912, %v4140_v7 }
 0x3ea   : > { %v4056_v38 = vand.u32 2147483647, %v4055_v55  ;;  %v4207_v8 = vshll.u32 %v15079_v54, %v4198_v0  ;;  %v4210_v22 = vshll.u32 %v15080_v21, %v4198_v0  ;;  %v4213_v4 = vshll.u32 %v15082_v23, %v4198_v0 }
 0x3eb   : > { %v4202_v10 = vshrl.u32 %v15078_v28, %v4199_v30  ;;  %v4205_v9 = vshrl.u32 %v15079_v54, %v4199_v30  ;;  %v4208_v20 = vshrl.u32 %v15080_v21, %v4199_v30  ;;  %v4142_v24 = vshrl.u32 %v4141_v60, 30 }
 0x3ec   : > { %v4059_v35 = vmul.f32 %v4058_v36, %v4056_v38  ;;  %v4211_v45 = vshrl.u32 %v15082_v23, %v4199_v30  ;;  %v4214_v61 = vshrl.u32 %v15083_v14, %v4199_v30  ;;  %v13662_v55 = vand.u32 3, %v4069_v16 }
 0x3ed   : > { %v4143_v47 = vshll.u32 %v4142_v24, 30  ;;  %v4203_v6 = vor.u32 %v4202_v10, %v4201_v62  ;;  %v4206_v59 = vor.u32 %v4205_v9, %v4204_v43  ;;  %v4200_v51 = vshrl.u32 %v15077_v11, %v4199_v30 }
 0x3ee   : > { %v4060_v32 = vxor.u32 2147483648, %v4059_v35  ;;  %v4209_v52 = vor.u32 %v4208_v20, %v4207_v8  ;;  %v4212_v57 = vor.u32 %v4211_v45, %v4210_v22  ;;  %vm4216_vm10 = vcmp.lt.s32.totalorder %v4197_v49, 1 }
 0x3ef   : > { %v13668_v36 = vsub.s32 %v4140_v7, %v4143_v47  ;;  %v4215_v38 = vor.u32 %v4214_v61, %v4213_v4  ;;  %vm4219_vm3 = vcmp.lt.s32.totalorder %v4197_v49, 4  ;;  %vm4217_vm14 = vcmp.lt.s32.totalorder %v4197_v49, 2 }
 0x3f0   : > { %v4061_v0 = vsel %vm3978_vm0, %v4060_v32, %v4059_v35  ;;  %vm4218_vm13 = vcmp.lt.s32.totalorder %v4197_v49, 3  ;;  %v303_v46 = vmul.u32 8, %v263_v3  ;;  %v4221_v30 = vsel %vm4219_vm3, %v4209_v52, 2102212464 }
 0x3f1   : > { %v4064_v63 = vsel %vm13596_vm1, %v13412_v27, %v4061_v0  ;;  %v4146_v16 = vsub.s32 0, %v13668_v36  ;;  %v4224_v62 = vsel %vm4216_vm10, %v4203_v6, %v4206_v59  ;;  %v4220_v47 = vsel %vm4216_vm10, %v4200_v51, %v4203_v6 }
 0x3f2   : > { %9642 = vcosq.f32 %v4064_v63  ;;  %v4225_v32 = vsel %vm4219_vm3, %v4212_v57, 920167782  ;;  %v4232_v7 = vshll.u32 %v4192_v56, 8  ;;  %v4228_v60 = vsel %vm4216_vm10, %v4206_v59, %v4209_v52 }
 0x3f3   : > { %9644 = vsinq.f32 %v4064_v63  ;;  %v9089_v43 = vmin.u32 %v4146_v16, %v13668_v36  ;;  %v4226_v39 = vsel %vm4218_vm13, %v4209_v52, %v4225_v32  ;;  %v4229_v3 = vsel %vm4219_vm3, %v4215_v38, 1326507024 }
 0x3f4   : > { %v4222_v8 = vsel %vm4218_vm13, %v4206_v59, %v4221_v30  ;;  %v4227_v22 = vsel %vm4217_vm14, %v4224_v62, %v4226_v39  ;;  %v4230_v10 = vsel %vm4218_vm13, %v4212_v57, %v4229_v3  ;;  %v343_v9 = vcvt.s32.f32 %v303_v46 }
 0x3f5   : > { %vm4082_vm0 = vcmp.lt.s32.totalorder %v13490_v34, 0  ;;  %v4148_v6 = vclz %v9089_v43  ;;  %v4166_v51 = vsub.s32 4, %v4142_v24  ;;  %vm15037_vm9 = vweird.f32 %v13412_v27 }
 0x3f6   : > { %v4231_v56 = vsel %vm4217_vm14, %v4228_v60, %v4230_v10  ;;  %v13688_v20 = vmul.u32.u64.low %v4232_v7, %v4227_v22  ;;  %v13689_v4 = vmul.u32.u64.high %v4232_v7, %v4227_v22, %v13688_v20  ;;  %v390_v52 = vadd.f32 %v13363_v53, %v343_v9 }
 0x3f7   : > { %v9090_v59 = vadd.s32 4294967294, %v4148_v6  ;;  %v4223_v35 = vsel %vm4217_vm14, %v4220_v47, %v4222_v8  ;;  %v13694_v45 = vmul.u32.u64.low %v4232_v7, %v4231_v56  ;;  %v13695_v57 = vmul.u32.u64.high %v4232_v7, %v4231_v56, %v13694_v45 }
 0x3f8   : > { %vm4071_vm7 = vcmp.lt.s32.totalorder %v13662_v55, 2  ;;  %v15284_v61 = vand.u32 2147483647, %v13490_v34  ;;  %v13705_v38 = vmul.f32 %v13409_v48, %v390_v52  ;;  %v222_v63 = vadd.s32 304, %v9928_v1 }
 0x3f9   : > { %vm4072_vm8 = vcmp.eq.s32.totalorder %v13662_v55, 0  ;;  %vm4075_vm6 = vcmp.eq.s32.totalorder %v13662_v55, 2  ;;  %v4136_v49 = vadd.s32 %v13618_v50, %v13613_v12  ;;  %vm9091_vm10 = vcmp.lt.s32.totalorder %v9090_v59, 0 }
 0x3fa   : > { %vm13700_vm1 = vcmp.le.f32.partialorder %v15284_v61, 0.7853982  ;;  %v4151_v46 = vsel %vm9091_vm10, 0, %v9090_v59  ;;  %v4167_v16 = vsel %vm4082_vm0, %v4166_v51, %v4142_v24  ;;  %v4239_v30 = vmul.u32 %v4232_v7, %v4223_v35 }
 0x3fb   : > { %v4242_v62 = vadd.s32 1, %v13689_v4  ;;  %v4152_v32 = vsub.s32 32, %v4151_v46  ;;  %v4153_v43 = vshll.u32 %v13668_v36, %v4151_v46  ;;  %v4156_v39 = vsub.s32 4294967266, %v4151_v46 }
 0x3fc   : > { %v13715_v47 = vpop.eup %9642  ;;  %v4288_v60 = vand.u32 2147483647, %v13705_v38  ;;  %vm4241_vm3 = vc.u32 %v13695_v57, %v13688_v20  ;;  %v4291_v50 = vand.u32 2139095040, %v13705_v38  ;;  %v264_v24 = vadd.s32 %v9930_v2, %v222_v63 }
 0x3fd   : > { %v13719_v3 = vpop.eup %9644  ;;  %v4076_v12 = vxor.u32 2147483648, %v13715_v47  ;;  %v4154_v8 = vshrl.u32 %v4136_v49, %v4152_v32  ;;  %v4157_v22 = vadd.s32 127, %v4156_v39  ;;  %v4243_v36 = vsel %vm4241_vm3, %v4242_v62, %v13689_v4 }
 0x3fe   : > { %v4073_v7 = vxor.u32 2147483648, %v13719_v3  ;;  %v13735_v9 = vsel %vm13700_vm1, 0, %v4167_v16  ;;  %v4244_v6 = vadd.s32 %v4243_v36, %v4239_v30  ;;  %v4292_v51 = vshrl.u32 %v4291_v50, 23 }
 0x3ff   : > { %v4077_v10 = vsel %vm4075_vm6, %v4076_v12, %v13719_v3  ;;  %v4155_v4 = vor.u32 %v4154_v8, %v4153_v43  ;;  %v4158_v52 = vshll.u32 %v4157_v22, 23  ;;  %v4295_v59 = vand.u32 8388607, %v4288_v60 }
 0x400   : > { %v4074_v56 = vsel %vm4072_vm8, %v13715_v47, %v4073_v7  ;;  %v4245_v45 = vadd.s32 536870912, %v4244_v6  ;;  %v9096_v61 = vadd.s32 4294967169, %v4292_v51  ;;  %v304_v63 = vmul.u32 8, %v264_v24 }
 0x401   : > { %v4078_v35 = vsel %vm4071_vm7, %v4074_v56, %v4077_v10  ;;  %v4159_v46 = vor.u32 4788187, %v4158_v52  ;;  %v4162_v16 = vcvt.s32.f32 %v4155_v4  ;;  %v4173_v30 = vadd.s32 3, %v13735_v9 }
 0x402   : > { %v4079_v49 = vsel %vm15037_vm9, nan, %v4078_v35  ;;  %v4246_v62 = vshrl.u32 %v4245_v45, 30  ;;  %v4298_v32 = vadd.s32 1, %v9096_v61  ;;  %v4296_v39 = vor.u32 8388608, %v4295_v59 }
 0x403   : > { %4634 = vst [vmem:[%s10284_s26 + $0x110] sm:$0xff] %v4079_v49  ;;  %v4160_v43 = vand.u32 2147483647, %v4159_v46  ;;  %v223_v50 = vadd.s32 312, %v9928_v1  ;;  %v344_v55 = vcvt.s32.f32 %v304_v63  ;;  %vm4186_vm13 = vcmp.lt.s32.totalorder %v13564_v5, 0 }
 0x404   : > { %v4247_v8 = vshll.u32 %v4246_v62, 30  ;;  %vm4299_vm14 = vcmp.gt.s32.totalorder %v4298_v32, 0  ;;  %v13752_v36 = vand.u32 3, %v4173_v30  ;;  %v15287_v10 = vand.u32 2147483647, %v13564_v5 }
 0x405   : > { %v4163_v22 = vmul.f32 %v4162_v16, %v4160_v43  ;;  %v4300_v24 = vsel %vm4299_vm14, %v4298_v32, 0  ;;  %v4240_v1 = vadd.s32 %v13688_v20, %v13695_v57  ;;  %v13764_v59 = vshll.u32 %v4296_v39, 8 }
 0x406   : > { %vm13756_vm7 = vcmp.le.f32.partialorder %v15287_v10, 0.7853982  ;;  %v13760_v56 = vsub.s32 %v4244_v6, %v4247_v8  ;;  %v4302_v4 = vand.u32 31, %v4300_v24  ;;  %v13767_v35 = vadd.s32 %v9930_v2, %v223_v50 }
 0x407   : > { %v4164_v52 = vxor.u32 2147483648, %v4163_v22  ;;  %v4270_v61 = vsub.s32 4, %v4246_v62  ;;  %v391_v49 = vadd.f32 %v13363_v53, %v344_v55  ;;  %v13776_v20 = vand.u32 3, %v10140_v33 }
 0x408   : > { %v4250_v45 = vsub.s32 0, %v13760_v56  ;;  %v4303_v63 = vsub.s32 32, %v4302_v4  ;;  %v4308_v46 = vshll.u32 %v15078_v28, %v4302_v4  ;;  %v4311_v16 = vshll.u32 %v15079_v54, %v4302_v4 }
 0x409   : > { %v4165_v6 = vsel %vm4082_vm0, %v4164_v52, %v4163_v22  ;;  %v13782_v30 = vshrl.u32 %v4300_v24, 5  ;;  %v4305_v53 = vshll.u32 %v15077_v11, %v4302_v4  ;;  %v4271_v50 = vsel %vm4186_vm13, %v4270_v61, %v4246_v62 }
 0x40a   : > { %v4168_v2 = vsel %vm13700_vm1, %v13490_v34, %v4165_v6  ;;  %v9093_v57 = vmin.u32 %v4250_v45, %v13760_v56  ;;  %v4306_v32 = vshrl.u32 %v15078_v28, %v4303_v63  ;;  %v4309_v43 = vshrl.u32 %v15079_v54, %v4303_v63 }
 0x40b   : > { %9646 = vcosq.f32 %v4168_v2  ;;  %v4312_v39 = vshrl.u32 %v15080_v21, %v4303_v63  ;;  %v4314_v0 = vshll.u32 %v15080_v21, %v4302_v4  ;;  %vm4179_vm0 = vcmp.eq.s32.totalorder %v13752_v36, 2 }
 0x40c   : > { %9648 = vsinq.f32 %v4168_v2  ;;  %v4252_v33 = vclz %v9093_v57  ;;  %v4310_v8 = vor.u32 %v4309_v43, %v4308_v46  ;;  %v13793_v22 = vmul.f32 %v13409_v48, %v391_v49 }
 0x40d   : > { %v4313_v55 = vor.u32 %v4312_v39, %v4311_v16  ;;  %v13796_v24 = vand.u32 3, %v10176_v15  ;;  %vm4176_vm1 = vcmp.eq.s32.totalorder %v13752_v36, 0  ;;  %v4315_v52 = vshrl.u32 %v15082_v23, %v4303_v63 }
 0x40e   : > { %v9094_v10 = vadd.s32 4294967294, %v4252_v33  ;;  %v4317_v45 = vshll.u32 %v15082_v23, %v4302_v4  ;;  %v4318_v62 = vshrl.u32 %v15083_v14, %v4303_v63  ;;  %vm4175_vm8 = vcmp.lt.s32.totalorder %v13752_v36, 2 }
 0x40f   : > { %v13805_v61 = vsel %vm13756_vm7, 0, %v4271_v50  ;;  %v4304_v48 = vshrl.u32 %v15077_v11, %v4303_v63  ;;  %v4307_v49 = vor.u32 %v4306_v32, %v4305_v53  ;;  %vm4320_vm6 = vcmp.lt.s32.totalorder %v13782_v30, 1 }
 0x410   : > { %vm15042_vm10 = vweird.f32 %v13490_v34  ;;  %vm9095_vm3 = vcmp.lt.s32.totalorder %v9094_v10, 0  ;;  %v4316_v15 = vor.u32 %v4315_v52, %v4314_v0  ;;  %v4319_v6 = vor.u32 %v4318_v62, %v4317_v45 }
 0x411   : > { %vm4323_vm14 = vcmp.lt.s32.totalorder %v13782_v30, 4  ;;  %v4255_v4 = vsel %vm9095_vm3, 0, %v9094_v10  ;;  %vm4321_vm9 = vcmp.lt.s32.totalorder %v13782_v30, 2  ;;  %vm4322_vm5 = vcmp.lt.s32.totalorder %v13782_v30, 3 }
 0x412   : > { %v4325_v46 = vsel %vm4323_vm14, %v4313_v55, 2102212464  ;;  %v4256_v16 = vsub.s32 32, %v4255_v4  ;;  %v4257_v2 = vshll.u32 %v13760_v56, %v4255_v4  ;;  %v4260_v63 = vsub.s32 4294967266, %v4255_v4 }
 0x413   : > { %v4332_v57 = vsel %vm4320_vm6, %v4310_v8, %v4313_v55  ;;  %v4328_v53 = vsel %vm4320_vm6, %v4307_v49, %v4310_v8  ;;  %v4329_v32 = vsel %vm4323_vm14, %v4316_v15, 920167782  ;;  %v4333_v43 = vsel %vm4323_vm14, %v4319_v6, 1326507024 }
 0x414   : > { %v4392_v39 = vand.u32 2147483647, %v13793_v22  ;;  %v4258_v33 = vshrl.u32 %v4240_v1, %v4256_v16  ;;  %v4261_v50 = vadd.s32 127, %v4260_v63  ;;  %v4330_v0 = vsel %vm4322_vm5, %v4313_v55, %v4329_v32 }
 0x415   : > { %v4334_v10 = vsel %vm4322_vm5, %v4316_v15, %v4333_v43  ;;  %v13823_v56 = vpop.eup %9646  ;;  %v4324_v52 = vsel %vm4320_vm6, %v4304_v48, %v4307_v49  ;;  %v4326_v45 = vsel %vm4322_vm5, %v4310_v8, %v4325_v46  ;;  %v4395_v1 = vand.u32 2139095040, %v13793_v22 }
 0x416   : > { %v4335_v62 = vsel %vm4321_vm9, %v4332_v57, %v4334_v10  ;;  %v13832_v6 = vpop.eup %9648  ;;  %v4180_v55 = vxor.u32 2147483648, %v13823_v56  ;;  %v4259_v4 = vor.u32 %v4258_v33, %v4257_v2  ;;  %v4262_v16 = vshll.u32 %v4261_v50, 23 }
 0x417   : > { %v4331_v15 = vsel %vm4321_vm9, %v4328_v53, %v4330_v0  ;;  %v4177_v63 = vxor.u32 2147483648, %v13832_v6  ;;  %v13839_v48 = vmul.u32.u64.low %v13764_v59, %v4335_v62  ;;  %v13840_v49 = vmul.u32.u64.high %v13764_v59, %v4335_v62, %v13839_v48 }
 0x418   : > { %v4396_v8 = vshrl.u32 %v4395_v1, 23  ;;  %v4181_v46 = vsel %vm4179_vm0, %v4180_v55, %v13832_v6  ;;  %v4263_v57 = vor.u32 4788187, %v4262_v16  ;;  %v4266_v2 = vcvt.s32.f32 %v4259_v4 }
 0x419   : > { %v4327_v32 = vsel %vm4321_vm9, %v4324_v52, %v4326_v45  ;;  %v4178_v53 = vsel %vm4176_vm1, %v13823_v56, %v4177_v63  ;;  %v13855_v43 = vmul.u32.u64.low %v13764_v59, %v4331_v15  ;;  %v13856_v33 = vmul.u32.u64.high %v13764_v59, %v4331_v15, %v13855_v43 }
 0x41a   : > { %v9100_v50 = vadd.s32 4294967169, %v4396_v8  ;;  %v4182_v0 = vsel %vm4175_vm8, %v4178_v53, %v4181_v46  ;;  %v4264_v10 = vand.u32 2147483647, %v4263_v57  ;;  %v4277_v62 = vadd.s32 3, %v13805_v61 }
 0x41b   : > { %vm4734_vm5 = vcmp.lt.s32.totalorder %v13776_v20, 2  ;;  %v4183_v30 = vsel %vm15042_vm10, nan, %v4182_v0  ;;  %v4343_v52 = vmul.u32 %v13764_v59, %v4327_v32  ;;  %v13868_v45 = vand.u32 8388607, %v4392_v39 }
 0x41c   : > { %v4402_v1 = vadd.s32 1, %v9100_v50  ;;  %4635 = vst [vmem:[%s10284_s26 + $0x118] sm:$0xff] %v4183_v30  ;;  %v4267_v4 = vmul.f32 %v4266_v2, %v4264_v10  ;;  %vm4345_vm9 = vc.u32 %v13840_v49, %v13855_v43  ;;  %vm4735_vm0 = vcmp.eq.s32.totalorder %v13776_v20, 0 }
 0x41d   : > { %vm4738_vm1 = vcmp.eq.s32.totalorder %v13776_v20, 2  ;;  %v4346_v36 = vadd.s32 1, %v13856_v33  ;;  %v15290_v59 = vxor.u32 2147483648, %v10230_v29  ;;  %v15291_v15 = vxor.u32 2147483648, %v10220_v31 }
 0x41e   : > { %vm4403_vm8 = vcmp.gt.s32.totalorder %v4402_v1, 0  ;;  %v4268_v8 = vxor.u32 2147483648, %v4267_v4  ;;  %v305_v57 = vmul.u32 8, %v13767_v35  ;;  %v13885_v32 = vand.u32 3, %v4277_v62 }
 0x41f   : > { %v4737_v16 = vsel %vm4735_vm0, %v10220_v31, %v15290_v59  ;;  %v4740_v48 = vsel %vm4738_vm1, %v15291_v15, %v10230_v29  ;;  %v4404_v46 = vsel %vm4403_vm8, %v4402_v1, 0  ;;  %v4347_v53 = vsel %vm4345_vm9, %v4346_v36, %v13856_v33 }
 0x420   : > { %v4741_v2 = vsel %vm4734_vm5, %v4737_v16, %v4740_v48  ;;  %v4406_v50 = vand.u32 31, %v4404_v46  ;;  %v4269_v10 = vsel %vm4186_vm13, %v4268_v8, %v4267_v4  ;;  %v4348_v31 = vadd.s32 %v4347_v53, %v4343_v52 }
 0x421   : > { %v4742_v0 = vsel %vm532_vm12, nan, %v4741_v2  ;;  %v4400_v29 = vor.u32 8388608, %v13868_v45  ;;  %v13893_v30 = vshrl.u32 %v4404_v46, 5  ;;  %v4272_v35 = vsel %vm13756_vm7, %v13564_v5, %v4269_v10 }
 0x422   : > { %8760 = vst [vmem:[%s13897_s19] sm:$0xff] %v4742_v0  ;;  %v4407_v20 = vsub.s32 32, %v4406_v50  ;;  %v4409_v18 = vshll.u32 %v15077_v11, %v4406_v50  ;;  %v4412_v33 = vshll.u32 %v15078_v28, %v4406_v50  ;;  %9650 = vcosq.f32 %v4272_v35 }
 0x423   : > { %v4349_v62 = vadd.s32 536870912, %v4348_v31  ;;  %v4415_v52 = vshll.u32 %v15079_v54, %v4406_v50  ;;  %v4418_v45 = vshll.u32 %v15080_v21, %v4406_v50  ;;  %9652 = vsinq.f32 %v4272_v35 }
 0x424   : > { %v4410_v1 = vshrl.u32 %v15078_v28, %v4407_v20  ;;  %v4413_v4 = vshrl.u32 %v15079_v54, %v4407_v20  ;;  %v345_v36 = vcvt.s32.f32 %v305_v57  ;;  %v4416_v51 = vshrl.u32 %v15080_v21, %v4407_v20 }
 0x425   : > { %v4350_v59 = vshrl.u32 %v4349_v62, 30  ;;  %v4419_v16 = vshrl.u32 %v15082_v23, %v4407_v20  ;;  %v4421_v15 = vshll.u32 %v15082_v23, %v4406_v50  ;;  %vm4290_vm12 = vcmp.lt.s32.totalorder %v13705_v38, 0 }
 0x426   : > { %v4408_v48 = vshrl.u32 %v15077_v11, %v4407_v20  ;;  %v4411_v8 = vor.u32 %v4410_v1, %v4409_v18  ;;  %v4414_v46 = vor.u32 %v4413_v4, %v4412_v33  ;;  %v4422_v2 = vshrl.u32 %v15083_v14, %v4407_v20  ;;  %v9678_v20 = vld [vmem:[%s14716_s1] ss:$0 sm:$0xff] }
 0x427   : > { %v4351_v53 = vshll.u32 %v4350_v59, 30  ;;  %v4417_v0 = vor.u32 %v4416_v51, %v4415_v52  ;;  %v4420_v10 = vor.u32 %v4419_v16, %v4418_v45  ;;  %vm4424_vm13 = vcmp.lt.s32.totalorder %v13893_v30, 1 }
 0x428   : > { %vm15041_vm7 = vweird.f32 %v13564_v5  ;;  %vm4279_vm6 = vcmp.lt.s32.totalorder %v13885_v32, 2  ;;  %v4423_v57 = vor.u32 %v4422_v2, %v4421_v15  ;;  %vm4426_vm3 = vcmp.lt.s32.totalorder %v13893_v30, 3  ;;  %v9679_v2 = vld [vmem:[#allocation2] ss:$0 sm:$0xff] }
 0x429   : > { %vm4427_vm14 = vcmp.lt.s32.totalorder %v13893_v30, 4  ;;  %v13920_v50 = vsub.s32 %v4348_v31, %v4351_v53  ;;  %vm4425_vm5 = vcmp.lt.s32.totalorder %v13893_v30, 2  ;;  %v392_v18 = vadd.f32 %v9678_v20, %v345_v36 }
 0x42a   : > { %v4429_v35 = vsel %vm4427_vm14, %v4417_v0, 2102212464  ;;  %vm4280_vm9 = vcmp.eq.s32.totalorder %v13885_v32, 0  ;;  %v4432_v33 = vsel %vm4424_vm13, %v4411_v8, %v4414_v46  ;;  %v4433_v62 = vsel %vm4427_vm14, %v4420_v10, 920167782 }
 0x42b   : > { %v4440_v31 = vshll.u32 %v4400_v29, 8  ;;  %v4354_v52 = vsub.s32 0, %v13920_v50  ;;  %v4374_v45 = vsub.s32 4, %v4350_v59  ;;  %v4428_v1 = vsel %vm4424_vm13, %v4408_v48, %v4411_v8 }
 0x42c   : > { %v4434_v4 = vsel %vm4426_vm3, %v4417_v0, %v4433_v62  ;;  %v4430_v36 = vsel %vm4426_vm3, %v4414_v46, %v4429_v35  ;;  %v4436_v16 = vsel %vm4424_vm13, %v4414_v46, %v4417_v0  ;;  %v4437_v29 = vsel %vm4427_vm14, %v4423_v57, 1326507024  ;;  %v13946_v15 = vpop.eup %9650 }
 0x42d   : > { %v4435_v51 = vsel %vm4425_vm5, %v4432_v33, %v4434_v4  ;;  %vm4283_vm0 = vcmp.eq.s32.totalorder %v13885_v32, 2  ;;  %v9097_v48 = vmin.u32 %v4354_v52, %v13920_v50  ;;  %v4438_v8 = vsel %vm4426_vm3, %v4420_v10, %v4437_v29  ;;  %v13954_v35 = vpop.eup %9652 }
 0x42e   : > { %v13952_v53 = vmul.f32 %v9679_v2, %v392_v18  ;;  %v15039_v20 = vxor.u32 2147483648, %v13946_v15  ;;  %v4439_v46 = vsel %vm4425_vm5, %v4436_v16, %v4438_v8  ;;  %v15040_v33 = vxor.u32 2147483648, %v13954_v35 }
 0x42f   : > { %v13959_v0 = vmul.u32.u64.low %v4440_v31, %v4435_v51  ;;  %v13960_v57 = vmul.u32.u64.high %v4440_v31, %v4435_v51, %v13959_v0  ;;  %v4356_v62 = vclz %v9097_v48  ;;  %v4375_v52 = vsel %vm4290_vm12, %v4374_v45, %v4350_v59 }
 0x430   : > { %v4431_v10 = vsel %vm4425_vm5, %v4428_v1, %v4430_v36  ;;  %v4285_v18 = vsel %vm4283_vm0, %v15039_v20, %v13954_v35  ;;  %v13970_v4 = vmul.u32.u64.low %v4440_v31, %v4439_v46  ;;  %v13971_v29 = vmul.u32.u64.high %v4440_v31, %v4439_v46, %v13970_v4 }
 0x431   : > { %v4496_v51 = vand.u32 2147483647, %v13952_v53  ;;  %v4282_v16 = vsel %vm4280_vm9, %v13946_v15, %v15040_v33  ;;  %vm13981_vm1 = vcmp.le.f32.partialorder %v4288_v60, 0.7853982  ;;  %v4344_v59 = vadd.s32 %v13855_v43, %v13840_v49 }
 0x432   : > { %v9098_v45 = vadd.s32 4294967294, %v4356_v62  ;;  %v4286_v1 = vsel %vm4279_vm6, %v4282_v16, %v4285_v18  ;;  %v4447_v36 = vmul.u32 %v4440_v31, %v4431_v10  ;;  %v4450_v48 = vadd.s32 1, %v13960_v57 }
 0x433   : > { %v4499_v8 = vand.u32 2139095040, %v13952_v53  ;;  %v4287_v2 = vsel %vm15041_vm7, nan, %v4286_v1  ;;  %v13995_v60 = vsel %vm13981_vm1, 0, %v4375_v52  ;;  %vm4838_vm13 = vcmp.eq.s32.totalorder %v13796_v24, 0 }
 0x434   : > { %vm9099_vm8 = vcmp.lt.s32.totalorder %v9098_v45, 0  ;;  %4636 = vst [vmem:[%s10284_s26 + $0x120] sm:$0xff] %v4287_v2  ;;  %vm4449_vm3 = vc.u32 %v13971_v29, %v13959_v0  ;;  %v4503_v32 = vand.u32 8388607, %v4496_v51  ;;  %vm4837_vm6 = vcmp.lt.s32.totalorder %v13796_v24, 2 }
 0x435   : > { %v4359_v49 = vsel %vm9099_vm8, 0, %v9098_v45  ;;  %v4500_v43 = vshrl.u32 %v4499_v8, 23  ;;  %v4451_v10 = vsel %vm4449_vm3, %v4450_v48, %v13960_v57  ;;  %v15294_v52 = vxor.u32 2147483648, %v10307_v44 }
 0x436   : > { %v4360_v31 = vsub.s32 32, %v4359_v49  ;;  %v4361_v46 = vshll.u32 %v13920_v50, %v4359_v49  ;;  %v4364_v62 = vsub.s32 4294967266, %v4359_v49  ;;  %v4452_v18 = vadd.s32 %v4451_v10, %v4447_v36 }
 0x437   : > { %v9104_v4 = vadd.s32 4294967169, %v4500_v43  ;;  %v4840_v16 = vsel %vm4838_vm13, %v10302_v42, %v15294_v52  ;;  %vm4841_vm14 = vcmp.eq.s32.totalorder %v13796_v24, 2  ;;  %v14010_v8 = vand.u32 3, %v10312_v40 }
 0x438   : > { %v4362_v45 = vshrl.u32 %v4344_v59, %v4360_v31  ;;  %v4365_v1 = vadd.s32 127, %v4364_v62  ;;  %v4381_v50 = vadd.s32 3, %v13995_v60  ;;  %v4453_v2 = vadd.s32 536870912, %v4452_v18 }
 0x439   : > { %v4506_v57 = vadd.s32 1, %v9104_v4  ;;  %v15295_v36 = vxor.u32 2147483648, %v10302_v42  ;;  %v4504_v10 = vor.u32 8388608, %v4503_v32  ;;  %vm4394_vm5 = vcmp.lt.s32.totalorder %v13793_v22, 0  ;;  %v15324_v42 = vld [vmem:[#allocation26_spill] sm:$0xff] }
 0x43a   : > { %v4363_v49 = vor.u32 %v4362_v45, %v4361_v46  ;;  %v4366_v43 = vshll.u32 %v4365_v1, 23  ;;  %v4454_v59 = vshrl.u32 %v4453_v2, 30  ;;  %vm4941_vm0 = vcmp.eq.s32.totalorder %v14010_v8, 0 }
 0x43b   : > { %v4843_v48 = vsel %vm4841_vm14, %v15295_v36, %v10307_v44  ;;  %vm4507_vm9 = vcmp.gt.s32.totalorder %v4506_v57, 0  ;;  %vm14023_vm8 = vcmp.le.f32.partialorder %v4392_v39, 0.7853982  ;;  %v14030_v25 = vadd.s32 %v13959_v0, %v13971_v29 }
 0x43c   : > { %v4844_v52 = vsel %vm4837_vm6, %v4840_v16, %v4843_v48  ;;  %v4367_v24 = vor.u32 4788187, %v4366_v43  ;;  %v4370_v31 = vcvt.s32.f32 %v4363_v49  ;;  %v4508_v62 = vsel %vm4507_vm9, %v4506_v57, 0 }
 0x43d   : > { %v4845_v40 = vsel %vm636_vm4, nan, %v4844_v52  ;;  %v4455_v44 = vshll.u32 %v4454_v59, 30  ;;  %v4478_v32 = vsub.s32 4, %v4454_v59  ;;  %v4510_v46 = vand.u32 31, %v4508_v62 }
 0x43e   : > { %8761 = vst [vmem:[%s13897_s19 + $0x8] sm:$0xff] %v4845_v40  ;;  %v4368_v4 = vand.u32 2147483647, %v4367_v24  ;;  %v14027_v16 = vand.u32 3, %v4381_v50  ;;  %v14032_v45 = vshll.u32 %v4504_v10, 8  ;;  %v15298_v57 = vxor.u32 2147483648, %v10401_v17 }
 0x43f   : > { %v14034_v1 = vsub.s32 %v4452_v18, %v4455_v44  ;;  %v4479_v2 = vsel %vm4394_vm5, %v4478_v32, %v4454_v59  ;;  %v4511_v39 = vsub.s32 32, %v4510_v46  ;;  %v4509_v0 = vshrl.u32 %v4508_v62, 5 }
 0x440   : > { %v14041_v36 = vsel %vm4941_vm0, %v10393_v41, %v15298_v57  ;;  %v4371_v48 = vmul.f32 %v4370_v31, %v4368_v4  ;;  %v14045_v50 = vsel %vm14023_vm8, 0, %v4479_v2  ;;  %v4513_v29 = vshll.u32 %v15077_v11, %v4510_v46 }
 0x441   : > { %v4458_v18 = vsub.s32 0, %v14034_v1  ;;  %v4514_v49 = vshrl.u32 %v15078_v28, %v4511_v39  ;;  %v4516_v43 = vshll.u32 %v15078_v28, %v4510_v46  ;;  %v4519_v10 = vshll.u32 %v15079_v54, %v4510_v46 }
 0x442   : > { %vm4944_vm4 = vcmp.eq.s32.totalorder %v14010_v8, 2  ;;  %v4372_v52 = vxor.u32 2147483648, %v4371_v48  ;;  %v4517_v59 = vshrl.u32 %v15079_v54, %v4511_v39  ;;  %v4520_v40 = vshrl.u32 %v15080_v21, %v4511_v39 }
 0x443   : > { %v4522_v24 = vshll.u32 %v15080_v21, %v4510_v46  ;;  %vm4940_vm13 = vcmp.lt.s32.totalorder %v14010_v8, 2  ;;  %v9101_v31 = vmin.u32 %v4458_v18, %v14034_v1  ;;  %v4523_v62 = vshrl.u32 %v15082_v23, %v4511_v39 }
 0x444   : > { %v14060_v44 = vand.u32 3, %v10397_v19  ;;  %v14063_v28 = vand.u32 3, %v10484_v37  ;;  %v4373_v32 = vsel %vm4290_vm12, %v4372_v52, %v4371_v48  ;;  %v4485_v54 = vadd.s32 3, %v14045_v50 }
 0x445   : > { %v4512_v4 = vshrl.u32 %v15077_v11, %v4511_v39  ;;  %v4525_v21 = vshll.u32 %v15082_v23, %v4510_v46  ;;  %v4376_v2 = vsel %vm13981_vm1, %v13705_v38, %v4373_v32  ;;  %v4460_v57 = vclz %v9101_v31 }
 0x446   : > { %v4515_v18 = vor.u32 %v4514_v49, %v4513_v29  ;;  %v4518_v19 = vor.u32 %v4517_v59, %v4516_v43  ;;  %9654 = vcosq.f32 %v4376_v2  ;;  %v4521_v20 = vor.u32 %v4520_v40, %v4519_v10 }
 0x447   : > { %v4524_v37 = vor.u32 %v4523_v62, %v4522_v24  ;;  %v4526_v33 = vshrl.u32 %v15083_v14, %v4511_v39  ;;  %9656 = vsinq.f32 %v4376_v2  ;;  %v9102_v48 = vadd.s32 4294967294, %v4460_v57 }
 0x448   : > { %vm4528_vm12 = vcmp.lt.s32.totalorder %v4509_v0, 1  ;;  %vm4529_vm3 = vcmp.lt.s32.totalorder %v4509_v0, 2  ;;  %vm4387_vm6 = vcmp.eq.s32.totalorder %v14027_v16, 2  ;;  %vm4530_vm14 = vcmp.lt.s32.totalorder %v4509_v0, 3 }
 0x449   : > { %v4527_v11 = vor.u32 %v4526_v33, %v4525_v21  ;;  %vm4531_vm9 = vcmp.lt.s32.totalorder %v4509_v0, 4  ;;  %v4532_v23 = vsel %vm4528_vm12, %v4512_v4, %v4515_v18  ;;  %vm4384_vm1 = vcmp.eq.s32.totalorder %v14027_v16, 0 }
 0x44a   : > { %vm9103_vm0 = vcmp.lt.s32.totalorder %v9102_v48, 0  ;;  %v4533_v30 = vsel %vm4531_vm9, %v4521_v20, 2102212464  ;;  %v4536_v46 = vsel %vm4528_vm12, %v4515_v18, %v4518_v19  ;;  %v4537_v14 = vsel %vm4531_vm9, %v4524_v37, 920167782 }
 0x44b   : > { %vm4383_vm7 = vcmp.lt.s32.totalorder %v14027_v16, 2  ;;  %v4463_v39 = vsel %vm9103_vm0, 0, %v9102_v48  ;;  %v14081_v29 = vand.u32 3, %v4485_v54  ;;  %v4534_v33 = vsel %vm4530_vm14, %v4518_v19, %v4533_v30  ;;  %v15302_v30 = vld [vmem:[#allocation15_spill] sm:$0xff] }
 0x44c   : > { %v4538_v49 = vsel %vm4530_vm14, %v4521_v20, %v4537_v14  ;;  %vm4380_vm10 = vweird.f32 %v13705_v38  ;;  %v4464_v43 = vsub.s32 32, %v4463_v39  ;;  %v4465_v10 = vshll.u32 %v14034_v1, %v4463_v39 }
 0x44d   : > { %v4468_v52 = vsub.s32 4294967266, %v4463_v39  ;;  %v4540_v59 = vsel %vm4528_vm12, %v4518_v19, %v4521_v20  ;;  %v4535_v40 = vsel %vm4529_vm3, %v4532_v23, %v4534_v33  ;;  %v4539_v24 = vsel %vm4529_vm3, %v4536_v46, %v4538_v49 }
 0x44e   : > { %v4541_v31 = vsel %vm4531_vm9, %v4527_v11, 1326507024  ;;  %v15299_v62 = vxor.u32 2147483648, %v10393_v41  ;;  %v4466_v54 = vshrl.u32 %v14030_v25, %v4464_v43  ;;  %v4551_v8 = vmul.u32 %v14032_v45, %v4535_v40  ;;  %v15300_v11 = vld [vmem:[#allocation16_spill] sm:$0xff]  ;;  %v15304_v40 = vld [vmem:[#allocation19_spill] sm:$0xff] }
 0x44f   : > { %v4469_v4 = vadd.s32 127, %v4468_v52  ;;  %v4542_v1 = vsel %vm4530_vm14, %v4524_v37, %v4541_v31  ;;  %v14103_v2 = vmul.u32.u64.low %v14032_v45, %v4539_v24  ;;  %v14104_v57 = vmul.u32.u64.high %v14032_v45, %v4539_v24, %v14103_v2  ;;  %v15306_v31 = vld [vmem:[#allocation18_spill] sm:$0xff] }
 0x450   : > { %v4946_v32 = vsel %vm4944_vm4, %v15299_v62, %v10401_v17  ;;  %v4543_v21 = vsel %vm4529_vm3, %v4540_v59, %v4542_v1  ;;  %v4467_v17 = vor.u32 %v4466_v54, %v4465_v10  ;;  %v14114_v37 = vpop.eup %9654  ;;  %vm5043_vm4 = vcmp.lt.s32.totalorder %v14060_v44, 2 }
 0x451   : > { %v4947_v20 = vsel %vm4940_vm13, %v14041_v36, %v4946_v32  ;;  %v4470_v18 = vshll.u32 %v4469_v4, 23  ;;  %v14110_v25 = vmul.u32.u64.low %v14032_v45, %v4543_v21  ;;  %v14111_v19 = vmul.u32.u64.high %v14032_v45, %v4543_v21, %v14110_v25  ;;  %v14120_v36 = vpop.eup %9656 }
 0x452   : > { %v4948_v41 = vsel %vm740_vm15, nan, %v4947_v20  ;;  %vm5044_vm13 = vcmp.eq.s32.totalorder %v14060_v44, 0  ;;  %vm5047_vm12 = vcmp.eq.s32.totalorder %v14060_v44, 2  ;;  %v4388_v26 = vxor.u32 2147483648, %v14114_v37 }
 0x453   : > { %8762 = vst [vmem:[%s13897_s19 + $0x10] sm:$0xff] %v4948_v41  ;;  %v4471_v0 = vor.u32 4788187, %v4470_v18  ;;  %v4474_v48 = vcvt.s32.f32 %v4467_v17  ;;  %v15301_v23 = vxor.u32 2147483648, %v15300_v11  ;;  %v4385_v14 = vxor.u32 2147483648, %v14120_v36  ;;  %v15311_v41 = vld [vmem:[#allocation24_spill] sm:$0xff] }
 0x454   : > { %v4554_v45 = vadd.s32 1, %v14104_v57  ;;  %v15303_v39 = vxor.u32 2147483648, %v15302_v30  ;;  %vm5147_vm15 = vcmp.eq.s32.totalorder %v14063_v28, 0  ;;  %v4389_v49 = vsel %vm4387_vm6, %v4388_v26, %v14120_v36 }
 0x455   : > { %v5046_v46 = vsel %vm5044_vm13, %v15302_v30, %v15301_v23  ;;  %v4472_v43 = vand.u32 2147483647, %v4471_v0  ;;  %vm4553_vm3 = vc.u32 %v14111_v19, %v14103_v2  ;;  %vm5146_vm14 = vcmp.lt.s32.totalorder %v14063_v28, 2  ;;  %v15313_v0 = vld [vmem:[#allocation27_spill] sm:$0xff] }
 0x456   : > { %v5049_v33 = vsel %vm5047_vm12, %v15303_v39, %v15300_v11  ;;  %v4386_v10 = vsel %vm4384_vm1, %v14114_v37, %v4385_v14  ;;  %vm4498_vm9 = vcmp.lt.s32.totalorder %v13952_v53, 0  ;;  %v4555_v52 = vsel %vm4553_vm3, %v4554_v45, %v14104_v57  ;;  %v15310_v57 = vld [vmem:[#allocation20_spill] sm:$0xff]  ;;  %v15316_v39 = vld [vmem:[#allocation23_spill] sm:$0xff] }
 0x457   : > { %v5050_v59 = vsel %vm5043_vm4, %v5046_v46, %v5049_v33  ;;  %v15305_v24 = vxor.u32 2147483648, %v15304_v40  ;;  %v4390_v32 = vsel %vm4383_vm7, %v4386_v10, %v4389_v49  ;;  %v4475_v54 = vmul.f32 %v4474_v48, %v4472_v43  ;;  %v15314_v46 = vld [vmem:[#allocation12_spill] sm:$0xff]  ;;  %v15318_v49 = vld [vmem:[#allocation22_spill] sm:$0xff] }
 0x458   : > { %vm14156_vm6 = vcmp.le.f32.partialorder %v4496_v51, 0.7853982  ;;  %v4556_v1 = vadd.s32 %v4555_v52, %v4551_v8  ;;  %v5051_v21 = vsel %vm844_vm2, nan, %v5050_v59  ;;  %v4391_v44 = vsel %vm4380_vm10, nan, %v4390_v32  ;;  %v15322_v32 = vld [vmem:[#allocation28_spill] sm:$0xff] }
 0x459   : > { %v5149_v62 = vsel %vm5147_vm15, %v15306_v31, %v15305_v24  ;;  %8763 = vst [vmem:[%s13897_s19 + $0x18] sm:$0xff] %v5051_v21  ;;  %vm5150_vm1 = vcmp.eq.s32.totalorder %v14063_v28, 2  ;;  %v5248_v16 = vand.u32 3, %v15310_v57  ;;  %v5351_v17 = vand.u32 3, %v15311_v41  ;;  %4637 = vst [vmem:[%s10284_s26 + $0x128] sm:$0xff] %v4391_v44 }
 0x45a   : > { %v4476_v51 = vxor.u32 2147483648, %v4475_v54  ;;  %v4557_v18 = vadd.s32 536870912, %v4556_v1  ;;  %v15312_v25 = vxor.u32 2147483648, %v15306_v31  ;;  %v5454_v48 = vand.u32 3, %v15313_v0  ;;  %v15320_v31 = vld [vmem:[#allocation13_spill] sm:$0xff]  ;;  %v15328_v0 = vld [vmem:[#allocation32_spill] sm:$0xff] }
 0x45b   : > { %vm5249_vm2 = vcmp.lt.s32.totalorder %v5248_v16, 2  ;;  %vm5250_vm7 = vcmp.eq.s32.totalorder %v5248_v16, 0  ;;  %vm5253_vm0 = vcmp.eq.s32.totalorder %v5248_v16, 2  ;;  %vm15315_vm4 = vweird.f32 %v15314_v46 }
 0x45c   : > { %v5152_v8 = vsel %vm5150_vm1, %v15312_v25, %v15304_v40  ;;  %v4477_v23 = vsel %vm4394_vm5, %v4476_v51, %v4475_v54  ;;  %v4558_v30 = vshrl.u32 %v4557_v18, 30  ;;  %v15317_v33 = vxor.u32 2147483648, %v15316_v39  ;;  %v15326_v25 = vld [vmem:[#allocation14_spill] sm:$0xff] }
 0x45d   : > { %v5153_v11 = vsel %vm5146_vm14, %v5149_v62, %v5152_v8  ;;  %v4480_v28 = vsel %vm14023_vm8, %v13793_v22, %v4477_v23  ;;  %v15319_v10 = vxor.u32 2147483648, %v15318_v49  ;;  %vm5352_vm13 = vcmp.lt.s32.totalorder %v5351_v17, 2  ;;  %v15330_v23 = vld [vmem:[#allocation31_spill] sm:$0xff] }
 0x45e   : > { %v5154_v45 = vsel %vm15315_vm4, nan, %v5153_v11  ;;  %v5252_v43 = vsel %vm5250_vm7, %v15318_v49, %v15317_v33  ;;  %vm5353_vm5 = vcmp.eq.s32.totalorder %v5351_v17, 0  ;;  %9658 = vcosq.f32 %v4480_v28  ;;  %v15333_v33 = vld [vmem:[#allocation36_spill] sm:$0xff] }
 0x45f   : > { %8764 = vst [vmem:[%s13897_s19 + $0x20] sm:$0xff] %v5154_v45  ;;  %v5255_v52 = vsel %vm5253_vm0, %v15319_v10, %v15316_v39  ;;  %v4559_v59 = vshll.u32 %v4558_v30, 30  ;;  %v4582_v40 = vsub.s32 4, %v4558_v30  ;;  %9660 = vsinq.f32 %v4480_v28  ;;  %v15332_v45 = vld [vmem:[#allocation30_spill] sm:$0xff]  ;;  %v15334_v10 = vld [vmem:[#allocation40_spill] sm:$0xff] }
 0x460   : > { %v5256_v24 = vsel %vm5249_vm2, %v5252_v43, %v5255_v52  ;;  %vm15321_vm12 = vweird.f32 %v15320_v31  ;;  %v15323_v54 = vxor.u32 2147483648, %v15322_v32  ;;  %vm5356_vm8 = vcmp.eq.s32.totalorder %v5351_v17, 2 }
 0x461   : > { %v5257_v62 = vsel %vm15321_vm12, nan, %v5256_v24  ;;  %v14194_v21 = vsub.s32 %v4556_v1, %v4559_v59  ;;  %v4583_v44 = vsel %vm4498_vm9, %v4582_v40, %v4558_v30  ;;  %v15325_v57 = vxor.u32 2147483648, %v15324_v42  ;;  %v15335_v59 = vld [vmem:[#allocation17_spill] sm:$0xff] }
 0x462   : > { %v5355_v20 = vsel %vm5353_vm5, %v15324_v42, %v15323_v54  ;;  %8765 = vst [vmem:[%s13897_s19 + $0x28] sm:$0xff] %v5257_v62  ;;  %vm5455_vm15 = vcmp.lt.s32.totalorder %v5454_v48, 2  ;;  %v14204_v41 = vsel %vm14156_vm6, 0, %v4583_v44  ;;  %vm5456_vm3 = vcmp.eq.s32.totalorder %v5454_v48, 0  ;;  %v15338_v42 = vld [vmem:[#allocation35_spill] sm:$0xff] }
 0x463   : > { %v5358_v16 = vsel %vm5356_vm8, %v15325_v57, %v15322_v32  ;;  %vm5459_vm14 = vcmp.eq.s32.totalorder %v5454_v48, 2  ;;  %vm4487_vm1 = vcmp.lt.s32.totalorder %v14081_v29, 2  ;;  %v4562_v1 = vsub.s32 0, %v14194_v21  ;;  %v15337_v32 = vld [vmem:[#allocation44_spill] sm:$0xff] }
 0x464   : > { %v5359_v51 = vsel %vm5352_vm13, %v5355_v20, %v5358_v16  ;;  %v4589_v18 = vadd.s32 3, %v14204_v41  ;;  %vm15327_vm2 = vweird.f32 %v15326_v25  ;;  %v15329_v11 = vxor.u32 2147483648, %v15328_v0  ;;  %v15340_v20 = vld [vmem:[#allocation34_spill] sm:$0xff]  ;;  %v15344_v25 = vld [vmem:[#allocation37_spill] sm:$0xff] }
 0x465   : > { %v5360_v8 = vsel %vm15327_vm2, nan, %v5359_v51  ;;  %vm4484_vm7 = vweird.f32 %v13793_v22  ;;  %vm4488_vm0 = vcmp.eq.s32.totalorder %v14081_v29, 0  ;;  %v15331_v17 = vxor.u32 2147483648, %v15330_v23 }
 0x466   : > { %v5458_v30 = vsel %vm5456_vm3, %v15330_v23, %v15329_v11  ;;  %8766 = vst [vmem:[%s13897_s19 + $0x30] sm:$0xff] %v5360_v8  ;;  %v5557_v39 = vand.u32 3, %v15332_v45  ;;  %v5660_v49 = vand.u32 3, %v15333_v33  ;;  %vm4491_vm4 = vcmp.eq.s32.totalorder %v14081_v29, 2  ;;  %v15345_v23 = vld [vmem:[#allocation21_spill] sm:$0xff]  ;;  %v15356_v29 = vld [vmem:[#allocation46_spill] sm:$0xff] }
 0x467   : > { %v5461_v46 = vsel %vm5459_vm14, %v15331_v17, %v15328_v0  ;;  %v9105_v43 = vmin.u32 %v4562_v1, %v14194_v21  ;;  %v5763_v52 = vand.u32 3, %v15334_v10  ;;  %vm15336_vm13 = vweird.f32 %v15335_v59  ;;  %v15342_v1 = vld [vmem:[#allocation39_spill] sm:$0xff] }
 0x468   : > { %v5462_v28 = vsel %vm5455_vm15, %v5458_v30, %v5461_v46  ;;  %vm5558_vm5 = vcmp.lt.s32.totalorder %v5557_v39, 2  ;;  %vm5559_vm12 = vcmp.eq.s32.totalorder %v5557_v39, 0  ;;  %vm5562_vm8 = vcmp.eq.s32.totalorder %v5557_v39, 2  ;;  %v14241_v51 = vpop.eup %9658  ;;  %v15350_v10 = vld [vmem:[#allocation43_spill] sm:$0xff] }
 0x469   : > { %v5463_v40 = vsel %vm15336_vm13, nan, %v5462_v28  ;;  %v4552_v24 = vadd.s32 %v14103_v2, %v14111_v19  ;;  %v4564_v31 = vclz %v9105_v43  ;;  %v14231_v62 = vand.u32 3, %v4589_v18  ;;  %v14246_v0 = vpop.eup %9660  ;;  %v15348_v43 = vld [vmem:[#allocation25_spill] sm:$0xff] }
 0x46a   : > { %8767 = vst [vmem:[%s13897_s19 + $0x38] sm:$0xff] %v5463_v40  ;;  %v5866_v54 = vand.u32 3, %v15337_v32  ;;  %v15339_v48 = vxor.u32 2147483648, %v15338_v42  ;;  %v15341_v57 = vxor.u32 2147483648, %v15340_v20  ;;  %vm5661_vm15 = vcmp.lt.s32.totalorder %v5660_v49, 2  ;;  %v15352_v40 = vld [vmem:[#allocation42_spill] sm:$0xff] }
 0x46b   : > { %vm5662_vm3 = vcmp.eq.s32.totalorder %v5660_v49, 0  ;;  %v9106_v2 = vadd.s32 4294967294, %v4564_v31  ;;  %v15343_v18 = vxor.u32 2147483648, %v15342_v1  ;;  %vm5665_vm14 = vcmp.eq.s32.totalorder %v5660_v49, 2 }
 0x46c   : > { %v5561_v44 = vsel %vm5559_vm12, %v15340_v20, %v15339_v48  ;;  %v5564_v16 = vsel %vm5562_vm8, %v15341_v57, %v15338_v42  ;;  %v4492_v11 = vxor.u32 2147483648, %v14241_v51  ;;  %vm15346_vm2 = vweird.f32 %v15345_v23  ;;  %v15357_v23 = vld [vmem:[#allocation48_spill] sm:$0xff] }
 0x46d   : > { %v5565_v19 = vsel %vm5558_vm5, %v5561_v44, %v5564_v16  ;;  %v5664_v8 = vsel %vm5662_vm3, %v15344_v25, %v15343_v18  ;;  %v15347_v17 = vxor.u32 2147483648, %v15344_v25  ;;  %vm5764_vm13 = vcmp.lt.s32.totalorder %v5763_v52, 2  ;;  %v15354_v18 = vld [vmem:[#allocation47_spill] sm:$0xff] }
 0x46e   : > { %v5566_v30 = vsel %vm15346_vm2, nan, %v5565_v19  ;;  %v4489_v45 = vxor.u32 2147483648, %v14246_v0  ;;  %vm9107_vm5 = vcmp.lt.s32.totalorder %v9106_v2, 0  ;;  %vm5765_vm12 = vcmp.eq.s32.totalorder %v5763_v52, 0 }
 0x46f   : > { %v5667_v46 = vsel %vm5665_vm14, %v15347_v17, %v15342_v1  ;;  %8768 = vst [vmem:[%s13897_s19 + $0x40] sm:$0xff] %v5566_v30  ;;  %v4493_v33 = vsel %vm4491_vm4, %v4492_v11, %v14246_v0  ;;  %v4567_v49 = vsel %vm9107_vm5, 0, %v9106_v2  ;;  %vm15349_vm8 = vweird.f32 %v15348_v43 }
 0x470   : > { %v5668_v39 = vsel %vm5661_vm15, %v5664_v8, %v5667_v46  ;;  %v15351_v59 = vxor.u32 2147483648, %v15350_v10  ;;  %v4490_v32 = vsel %vm4488_vm0, %v14241_v51, %v4489_v45  ;;  %v4568_v42 = vsub.s32 32, %v4567_v49 }
 0x471   : > { %v5669_v28 = vsel %vm15349_vm8, nan, %v5668_v39  ;;  %v4569_v48 = vshll.u32 %v14194_v21, %v4567_v49  ;;  %v4572_v20 = vsub.s32 4294967266, %v4567_v49  ;;  %v4494_v44 = vsel %vm4487_vm1, %v4490_v32, %v4493_v33  ;;  %v15364_v32 = vld [vmem:[#allocation51_spill] sm:$0xff] }
 0x472   : > { %v5767_v31 = vsel %vm5765_vm12, %v15352_v40, %v15351_v59  ;;  %8769 = vst [vmem:[%s13897_s19 + $0x48] sm:$0xff] %v5669_v28  ;;  %vm5768_vm4 = vcmp.eq.s32.totalorder %v5763_v52, 2  ;;  %vm5867_vm15 = vcmp.lt.s32.totalorder %v5866_v54, 2  ;;  %vm5868_vm3 = vcmp.eq.s32.totalorder %v5866_v54, 0 }
 0x473   : > { %v4495_v57 = vsel %vm4484_vm7, nan, %v4494_v44  ;;  %v4570_v16 = vshrl.u32 %v4552_v24, %v4568_v42  ;;  %v4573_v2 = vadd.s32 127, %v4572_v20  ;;  %v15353_v19 = vxor.u32 2147483648, %v15352_v40  ;;  %v15362_v40 = vld [vmem:[#allocation52_spill] sm:$0xff] }
 0x474   : > { %4638 = vst [vmem:[%s10284_s26 + $0x130] sm:$0xff] %v4495_v57  ;;  %v15355_v25 = vxor.u32 2147483648, %v15354_v18  ;;  %vm5871_vm1 = vcmp.eq.s32.totalorder %v5866_v54, 2  ;;  %v5969_v30 = vand.u32 3, %v15357_v23  ;;  %v15359_v33 = vxor.u32 2147483648, %v15356_v29  ;;  %v15366_v54 = vld [vmem:[#allocation50_spill] sm:$0xff] }
 0x475   : > { %v5770_v1 = vsel %vm5768_vm4, %v15353_v19, %v15350_v10  ;;  %v4571_v17 = vor.u32 %v4570_v16, %v4569_v48  ;;  %v4574_v46 = vshll.u32 %v4573_v2, 23  ;;  %v15360_v10 = vld [vmem:[#allocation33_spill] sm:$0xff]  ;;  %v15365_v48 = vxor.u32 2147483648, %v15364_v32  ;;  %v15367_v57 = vld [vmem:[#allocation56_spill] sm:$0xff] }
 0x476   : > { %v5771_v21 = vsel %vm5764_vm13, %v5767_v31, %v5770_v1  ;;  %v5870_v8 = vsel %vm5868_vm3, %v15356_v29, %v15355_v25  ;;  %v5873_v49 = vsel %vm5871_vm1, %v15359_v33, %v15354_v18  ;;  %vm5970_vm0 = vcmp.lt.s32.totalorder %v5969_v30, 2  ;;  %v15368_v2 = vld [vmem:[#allocation60_spill] sm:$0xff]  ;;  %v15369_v29 = vld [vmem:[#allocation38_spill] sm:$0xff] }
 0x477   : > { %v5772_v24 = vsel %vm1572_vm11, nan, %v5771_v21  ;;  %v5874_v52 = vsel %vm5867_vm15, %v5870_v8, %v5873_v49  ;;  %vm5971_vm14 = vcmp.eq.s32.totalorder %v5969_v30, 0  ;;  %vm5974_vm2 = vcmp.eq.s32.totalorder %v5969_v30, 2  ;;  %v15371_v30 = vld [vmem:[#allocation55_spill] sm:$0xff]  ;;  %v15375_v49 = vld [vmem:[#allocation41_spill] sm:$0xff] }
 0x478   : > { %8770 = vst [vmem:[%s13897_s19 + $0x50] sm:$0xff] %v5772_v24  ;;  %v4575_v43 = vor.u32 4788187, %v4574_v46  ;;  %v4578_v28 = vcvt.s32.f32 %v4571_v17  ;;  %vm15361_vm13 = vweird.f32 %v15360_v10  ;;  %v15363_v31 = vxor.u32 2147483648, %v15362_v40  ;;  %v15373_v46 = vld [vmem:[#allocation54_spill] sm:$0xff] }
 0x479   : > { %v5875_v59 = vsel %vm15361_vm13, nan, %v5874_v52  ;;  %v5976_v20 = vsel %vm5974_vm2, %v15365_v48, %v15362_v40  ;;  %v6072_v44 = vand.u32 3, %v15366_v54  ;;  %v6175_v16 = vand.u32 3, %v15367_v57  ;;  %v15379_v10 = vld [vmem:[#allocation58_spill] sm:$0xff]  ;;  %v15381_v48 = vld [vmem:[#allocation45_spill] sm:$0xff]  ;;  %v15383_v54 = vld [vmem:[#allocation63_spill] sm:$0xff] }
 0x47a   : > { %v5973_v42 = vsel %vm5971_vm14, %v15364_v32, %v15363_v31  ;;  %8771 = vst [vmem:[%s13897_s19 + $0x58] sm:$0xff] %v5875_v59  ;;  %v6278_v19 = vand.u32 3, %v15368_v2  ;;  %v4576_v1 = vand.u32 2147483647, %v4575_v43  ;;  %v6381_v18 = vand.u32 3, %v11759_v58  ;;  %v15377_v43 = vld [vmem:[#allocation59_spill] sm:$0xff] }
 0x47b   : > { %v5977_v21 = vsel %vm5970_vm0, %v5973_v42, %v5976_v20  ;;  %v6484_v25 = vand.u32 3, %v11866_v13  ;;  %vm15370_vm11 = vweird.f32 %v15369_v29  ;;  %vm6073_vm5 = vcmp.lt.s32.totalorder %v6072_v44, 2  ;;  %v15385_v57 = vld [vmem:[#allocation62_spill] sm:$0xff] }
 0x47c   : > { %v5978_v8 = vsel %vm15370_vm11, nan, %v5977_v21  ;;  %vm6074_vm12 = vcmp.eq.s32.totalorder %v6072_v44, 0  ;;  %vm6077_vm8 = vcmp.eq.s32.totalorder %v6072_v44, 2  ;;  %v4579_v23 = vmul.f32 %v4578_v28, %v4576_v1 }
 0x47d   : > { %8772 = vst [vmem:[%s13897_s19 + $0x60] sm:$0xff] %v5978_v8  ;;  %v15372_v17 = vxor.u32 2147483648, %v15371_v30  ;;  %v15374_v24 = vxor.u32 2147483648, %v15373_v46  ;;  %vm6176_vm4 = vcmp.lt.s32.totalorder %v6175_v16, 2  ;;  %vm6177_vm15 = vcmp.eq.s32.totalorder %v6175_v16, 0  ;;  %v15387_v8 = vld [vmem:[#allocation49_spill] sm:$0xff] }
 0x47e   : > { %vm6180_vm3 = vcmp.eq.s32.totalorder %v6175_v16, 2  ;;  %vm6279_vm1 = vcmp.lt.s32.totalorder %v6278_v19, 2  ;;  %v4580_v13 = vxor.u32 2147483648, %v4579_v23  ;;  %vm15376_vm0 = vweird.f32 %v15375_v49 }
 0x47f   : > { %v6076_v39 = vsel %vm6074_vm12, %v15373_v46, %v15372_v17  ;;  %v6079_v33 = vsel %vm6077_vm8, %v15374_v24, %v15371_v30  ;;  %v15378_v28 = vxor.u32 2147483648, %v15377_v43  ;;  %v15380_v40 = vxor.u32 2147483648, %v15379_v10  ;;  %v15389_v30 = vld [vmem:[#allocation66_spill] sm:$0xff]  ;;  %v15391_v46 = vld [vmem:[#allocation65_spill] sm:$0xff] }
 0x480   : > { %v6080_v58 = vsel %vm6073_vm5, %v6076_v39, %v6079_v33  ;;  %vm6280_vm14 = vcmp.eq.s32.totalorder %v6278_v19, 0  ;;  %vm6283_vm2 = vcmp.eq.s32.totalorder %v6278_v19, 2  ;;  %vm6382_vm13 = vcmp.lt.s32.totalorder %v6381_v18, 2  ;;  %v15393_v19 = vld [vmem:[#allocation53_spill] sm:$0xff] }
 0x481   : > { %v6081_v52 = vsel %vm15376_vm0, nan, %v6080_v58  ;;  %v6179_v59 = vsel %vm6177_vm15, %v15379_v10, %v15378_v28  ;;  %v6182_v31 = vsel %vm6180_vm3, %v15380_v40, %v15377_v43  ;;  %v4581_v42 = vsel %vm4498_vm9, %v4580_v13, %v4579_v23  ;;  %v15395_v13 = vld [vmem:[#allocation70_spill] sm:$0xff]  ;;  %v15398_v28 = vld [vmem:[#allocation68_spill] sm:$0xff] }
 0x482   : > { %8773 = vst [vmem:[%s13897_s19 + $0x68] sm:$0xff] %v6081_v52  ;;  %v6183_v32 = vsel %vm6176_vm4, %v6179_v59, %v6182_v31  ;;  %vm15382_vm11 = vweird.f32 %v15381_v48  ;;  %v15384_v44 = vxor.u32 2147483648, %v15383_v54  ;;  %v15386_v2 = vxor.u32 2147483648, %v15385_v57  ;;  %v15397_v52 = vld [vmem:[#allocation69_spill] sm:$0xff]  ;;  %v15400_v40 = vld [vmem:[#allocation74_spill] sm:$0xff] }
 0x483   : > { %v6184_v20 = vsel %vm15382_vm11, nan, %v6183_v32  ;;  %v4584_v21 = vsel %vm14156_vm6, %v13952_v53, %v4581_v42  ;;  %vm6383_vm5 = vcmp.eq.s32.totalorder %v6381_v18, 0  ;;  %vm6386_vm9 = vcmp.eq.s32.totalorder %v6381_v18, 2  ;;  %v15401_v32 = vld [vmem:[#allocation77_spill] sm:$0xff]  ;;  %v15402_v48 = vld [vmem:[#allocation82_spill] sm:$0xff] }
 0x484   : > { %v6282_v16 = vsel %vm6280_vm14, %v15385_v57, %v15384_v44  ;;  %v6285_v1 = vsel %vm6283_vm2, %v15386_v2, %v15383_v54  ;;  %8774 = vst [vmem:[%s13897_s19 + $0x70] sm:$0xff] %v6184_v20  ;;  %9662 = vcosq.f32 %v4584_v21  ;;  %vm15388_vm12 = vweird.f32 %v15387_v8  ;;  %v15405_v57 = vld [vmem:[#allocation73_spill] sm:$0xff]  ;;  %v15407_v2 = vld [vmem:[#allocation72_spill] sm:$0xff] }
 0x485   : > { %v6286_v29 = vsel %vm6279_vm1, %v6282_v16, %v6285_v1  ;;  %v15390_v17 = vxor.u32 2147483648, %v15389_v30  ;;  %v15392_v24 = vxor.u32 2147483648, %v15391_v46  ;;  %9664 = vsinq.f32 %v4584_v21 }
 0x486   : > { %v6287_v23 = vsel %vm15388_vm12, nan, %v6286_v29  ;;  %vm6485_vm6 = vcmp.lt.s32.totalorder %v6484_v25, 2  ;;  %vm6486_vm8 = vcmp.eq.s32.totalorder %v6484_v25, 0  ;;  %vm4595_vm4 = vcmp.eq.s32.totalorder %v14231_v62, 2 }
 0x487   : > { %v6385_v39 = vsel %vm6383_vm5, %v15391_v46, %v15390_v17  ;;  %v6388_v33 = vsel %vm6386_vm9, %v15392_v24, %v15389_v30  ;;  %8775 = vst [vmem:[%s13897_s19 + $0x78] sm:$0xff] %v6287_v23  ;;  %vm15394_vm15 = vweird.f32 %v15393_v19  ;;  %v15396_v49 = vxor.u32 2147483648, %v15395_v13  ;;  %v15409_v23 = vld [vmem:[#allocation61_spill] sm:$0xff]  ;;  %v15411_v17 = vld [vmem:[#allocation78_spill] sm:$0xff] }
 0x488   : > { %v6389_v4 = vsel %vm6382_vm13, %v6385_v39, %v6388_v33  ;;  %vm6489_vm3 = vcmp.eq.s32.totalorder %v6484_v25, 2  ;;  %v6587_v10 = vand.u32 3, %v15398_v28  ;;  %vm4592_vm1 = vcmp.eq.s32.totalorder %v14231_v62, 0  ;;  %v15403_v25 = vld [vmem:[#allocation57_spill] sm:$0xff]  ;;  %v15413_v39 = vld [vmem:[#allocation76_spill] sm:$0xff] }
 0x489   : > { %v6390_v58 = vsel %vm15394_vm15, nan, %v6389_v4  ;;  %v6488_v43 = vsel %vm6486_vm8, %v15397_v52, %v15396_v49  ;;  %v15399_v18 = vxor.u32 2147483648, %v15397_v52  ;;  %v6690_v31 = vand.u32 3, %v15400_v40  ;;  %v15417_v49 = vld [vmem:[#allocation80_spill] sm:$0xff] }
 0x48a   : > { %8776 = vst [vmem:[%s13897_s19 + $0x80] sm:$0xff] %v6390_v58  ;;  %v6793_v42 = vand.u32 3, %v15401_v32  ;;  %v6896_v20 = vand.u32 3, %v15402_v48  ;;  %vm4591_vm0 = vcmp.lt.s32.totalorder %v14231_v62, 2  ;;  %vm6588_vm14 = vcmp.lt.s32.totalorder %v6587_v10, 2  ;;  %v15415_v58 = vld [vmem:[#allocation81_spill] sm:$0xff] }
 0x48b   : > { %v6491_v59 = vsel %vm6489_vm3, %v15399_v18, %v15395_v13  ;;  %vm6589_vm2 = vcmp.eq.s32.totalorder %v6587_v10, 0  ;;  %vm6592_vm13 = vcmp.eq.s32.totalorder %v6587_v10, 2  ;;  %vm4588_vm11 = vweird.f32 %v13952_v53  ;;  %v15423_v48 = vld [vmem:[#allocation83_spill] sm:$0xff] }
 0x48c   : > { %v6492_v54 = vsel %vm6485_vm6, %v6488_v43, %v6491_v59  ;;  %vm15404_vm5 = vweird.f32 %v15403_v25  ;;  %v15406_v16 = vxor.u32 2147483648, %v15405_v57  ;;  %v15408_v21 = vxor.u32 2147483648, %v15407_v2  ;;  %v15418_v43 = vld [vmem:[#allocation64_spill] sm:$0xff]  ;;  %v15442_v62 = vld [vmem:[#allocation79_spill] sm:$0xff] }
 0x48d   : > { %v6493_v44 = vsel %vm15404_vm5, nan, %v6492_v54  ;;  %vm6691_vm9 = vcmp.lt.s32.totalorder %v6690_v31, 2  ;;  %vm6692_vm12 = vcmp.eq.s32.totalorder %v6690_v31, 0  ;;  %vm6695_vm6 = vcmp.eq.s32.totalorder %v6690_v31, 2  ;;  %v15421_v31 = vld [vmem:[#allocation85_spill] sm:$0xff] }
 0x48e   : > { %v6591_v1 = vsel %vm6589_vm2, %v15407_v2, %v15406_v16  ;;  %v6594_v29 = vsel %vm6592_vm13, %v15408_v21, %v15405_v57  ;;  %8777 = vst [vmem:[%s13897_s19 + $0x88] sm:$0xff] %v6493_v44  ;;  %vm6794_vm8 = vcmp.lt.s32.totalorder %v6793_v42, 2  ;;  %vm15410_vm15 = vweird.f32 %v15409_v23  ;;  %v14393_v59 = vpop.eup %9662  ;;  %v15425_v57 = vld [vmem:[#allocation86_spill] sm:$0xff] }
 0x48f   : > { %v6595_v8 = vsel %vm6588_vm14, %v6591_v1, %v6594_v29  ;;  %v15412_v46 = vxor.u32 2147483648, %v15411_v17  ;;  %v15414_v33 = vxor.u32 2147483648, %v15413_v39  ;;  %vm6795_vm3 = vcmp.eq.s32.totalorder %v6793_v42, 0  ;;  %v14404_v2 = vpop.eup %9664  ;;  %v15426_v1 = vld [vmem:[#allocation67_spill] sm:$0xff]  ;;  %v15428_v29 = vld [vmem:[#allocation90_spill] sm:$0xff] }
 0x490   : > { %v6596_v30 = vsel %vm15410_vm15, nan, %v6595_v8  ;;  %v15416_v13 = vxor.u32 2147483648, %v15415_v58  ;;  %vm6798_vm14 = vcmp.eq.s32.totalorder %v6793_v42, 2  ;;  %vm6897_vm2 = vcmp.lt.s32.totalorder %v6896_v20, 2 }
 0x491   : > { %v6694_v24 = vsel %vm6692_vm12, %v15413_v39, %v15412_v46  ;;  %v6697_v4 = vsel %vm6695_vm6, %v15414_v33, %v15411_v17  ;;  %8778 = vst [vmem:[%s13897_s19 + $0x90] sm:$0xff] %v6596_v30  ;;  %vm15419_vm13 = vweird.f32 %v15418_v43  ;;  %v15420_v10 = vxor.u32 2147483648, %v15417_v49  ;;  %v15429_v30 = vld [vmem:[#allocation71_spill] sm:$0xff]  ;;  %v15431_v39 = vld [vmem:[#allocation89_spill] sm:$0xff]  ;;  %v15433_v33 = vld [vmem:[#allocation88_spill] sm:$0xff] }
 0x492   : > { %v6698_v19 = vsel %vm6691_vm9, %v6694_v24, %v6697_v4  ;;  %v6797_v52 = vsel %vm6795_vm3, %v15417_v49, %v15416_v13  ;;  %vm6898_vm5 = vcmp.eq.s32.totalorder %v6896_v20, 0  ;;  %vm6901_vm12 = vcmp.eq.s32.totalorder %v6896_v20, 2  ;;  %v15435_v43 = vld [vmem:[#allocation93_spill] sm:$0xff] }
 0x493   : > { %v6699_v28 = vsel %vm15419_vm13, nan, %v6698_v19  ;;  %v6800_v18 = vsel %vm6798_vm14, %v15420_v10, %v15415_v58  ;;  %v15422_v32 = vxor.u32 2147483648, %v15421_v31  ;;  %v15424_v25 = vxor.u32 2147483648, %v15423_v48  ;;  %v15437_v10 = vld [vmem:[#allocation92_spill] sm:$0xff] }
 0x494   : > { %8779 = vst [vmem:[%s13897_s19 + $0x98] sm:$0xff] %v6699_v28  ;;  %v6801_v40 = vsel %vm6794_vm8, %v6797_v52, %v6800_v18  ;;  %v6999_v16 = vand.u32 3, %v15425_v57  ;;  %v4596_v20 = vxor.u32 2147483648, %v14393_v59  ;;  %vm15427_vm9 = vweird.f32 %v15426_v1  ;;  %v15444_v1 = vld [vmem:[#allocation97_spill] sm:$0xff] }
 0x495   : > { %v6900_v54 = vsel %vm6898_vm5, %v15423_v48, %v15422_v32  ;;  %v6903_v44 = vsel %vm6901_vm12, %v15424_v25, %v15421_v31  ;;  %v6802_v21 = vsel %vm15427_vm9, nan, %v6801_v40  ;;  %v7102_v8 = vand.u32 3, %v15428_v29  ;;  %v15439_v48 = vld [vmem:[#allocation75_spill] sm:$0xff] }
 0x496   : > { %v6904_v42 = vsel %vm6897_vm2, %v6900_v54, %v6903_v44  ;;  %v4593_v23 = vxor.u32 2147483648, %v14404_v2  ;;  %8780 = vst [vmem:[%s13897_s19 + $0xa0] sm:$0xff] %v6802_v21  ;;  %vm15430_vm6 = vweird.f32 %v15429_v30  ;;  %vm7000_vm8 = vcmp.lt.s32.totalorder %v6999_v16, 2  ;;  %v15441_v44 = vld [vmem:[#allocation94_spill] sm:$0xff] }
 0x497   : > { %v6905_v17 = vsel %vm15430_vm6, nan, %v6904_v42  ;;  %vm7001_vm15 = vcmp.eq.s32.totalorder %v6999_v16, 0  ;;  %v4597_v46 = vsel %vm4595_vm4, %v4596_v20, %v14404_v2  ;;  %v15432_v24 = vxor.u32 2147483648, %v15431_v39  ;;  %v15445_v42 = vld [vmem:[#allocation101_spill] sm:$0xff] }
 0x498   : > { %8781 = vst [vmem:[%s13897_s19 + $0xa8] sm:$0xff] %v6905_v17  ;;  %vm7004_vm3 = vcmp.eq.s32.totalorder %v6999_v16, 2  ;;  %vm7103_vm14 = vcmp.lt.s32.totalorder %v7102_v8, 2  ;;  %v4594_v19 = vsel %vm4592_vm1, %v14393_v59, %v4593_v23  ;;  %v15434_v58 = vxor.u32 2147483648, %v15433_v33  ;;  %v15447_v17 = vld [vmem:[#allocation110_spill] sm:$0xff] }
 0x499   : > { %v7003_v4 = vsel %vm7001_vm15, %v15433_v33, %v15432_v24  ;;  %vm7104_vm4 = vcmp.eq.s32.totalorder %v7102_v8, 0  ;;  %vm7107_vm2 = vcmp.eq.s32.totalorder %v7102_v8, 2  ;;  %v4598_v49 = vsel %vm4591_vm0, %v4594_v19, %v4597_v46  ;;  %v15446_v8 = vld [vmem:[#allocation106_spill] sm:$0xff]  ;;  %v15450_v33 = vld [vmem:[#allocation96_spill] sm:$0xff] }
 0x49a   : > { %v7006_v13 = vsel %vm7004_vm3, %v15434_v58, %v15431_v39  ;;  %v15436_v28 = vxor.u32 2147483648, %v15435_v43  ;;  %v15438_v40 = vxor.u32 2147483648, %v15437_v10  ;;  %v4599_v32 = vsel %vm4588_vm11, nan, %v4598_v49  ;;  %v15448_v39 = vld [vmem:[#allocation98_spill] sm:$0xff] }
 0x49b   : > { %v7007_v52 = vsel %vm7000_vm8, %v7003_v4, %v7006_v13  ;;  %vm15440_vm1 = vweird.f32 %v15439_v48  ;;  %v7205_v57 = vand.u32 3, %v15441_v44  ;;  %4639 = vst [vmem:[%s10284_s26 + $0x138] sm:$0xff] %v4599_v32  ;;  %vm15443_vm0 = vweird.f32 %v15442_v62  ;;  %v15452_v49 = vld [vmem:[#allocation102_spill] sm:$0xff]  ;;  %v15458_v48 = vld [vmem:[#allocation105_spill] sm:$0xff] }
 0x49c   : > { %v7106_v18 = vsel %vm7104_vm4, %v15437_v10, %v15436_v28  ;;  %v7109_v31 = vsel %vm7107_vm2, %v15438_v40, %v15435_v43  ;;  %v7008_v54 = vsel %vm15440_vm1, nan, %v7007_v52  ;;  %v7308_v21 = vand.u32 3, %v15444_v1  ;;  %v15454_v43 = vld [vmem:[#allocation100_spill] sm:$0xff] }
 0x49d   : > { %v7110_v25 = vsel %vm7103_vm14, %v7106_v18, %v7109_v31  ;;  %8782 = vst [vmem:[%s13897_s19 + $0xb0] sm:$0xff] %v7008_v54  ;;  %v7411_v29 = vand.u32 3, %v15445_v42  ;;  %v7514_v30 = vand.u32 3, %v15446_v8  ;;  %vm7206_vm13 = vcmp.lt.s32.totalorder %v7205_v57, 2  ;;  %v15455_v10 = vld [vmem:[#allocation84_spill] sm:$0xff]  ;;  %v15464_v42 = vld [vmem:[#allocation91_spill] sm:$0xff] }
 0x49e   : > { %v7111_v16 = vsel %vm15443_vm0, nan, %v7110_v25  ;;  %vm7207_vm5 = vcmp.eq.s32.totalorder %v7205_v57, 0  ;;  %vm7210_vm12 = vcmp.eq.s32.totalorder %v7205_v57, 2  ;;  %v7617_v46 = vand.u32 3, %v15447_v17  ;;  %v15460_v25 = vld [vmem:[#allocation104_spill] sm:$0xff]  ;;  %v15466_v8 = vld [vmem:[#allocation109_spill] sm:$0xff] }
 0x49f   : > { %8783 = vst [vmem:[%s13897_s19 + $0xb8] sm:$0xff] %v7111_v16  ;;  %v15449_v24 = vxor.u32 2147483648, %v15448_v39  ;;  %v15451_v19 = vxor.u32 2147483648, %v15450_v33  ;;  %vm7309_vm9 = vcmp.lt.s32.totalorder %v7308_v21, 2  ;;  %vm7310_vm6 = vcmp.eq.s32.totalorder %v7308_v21, 0  ;;  %v15462_v16 = vld [vmem:[#allocation87_spill] sm:$0xff] }
 0x4a0   : > { %v15453_v52 = vxor.u32 2147483648, %v15452_v49  ;;  %vm7313_vm8 = vcmp.eq.s32.totalorder %v7308_v21, 2  ;;  %vm7412_vm15 = vcmp.lt.s32.totalorder %v7411_v29, 2  ;;  %vm15456_vm3 = vweird.f32 %v15455_v10 }
 0x4a1   : > { %v7209_v4 = vsel %vm7207_vm5, %v15450_v33, %v15449_v24  ;;  %v7212_v58 = vsel %vm7210_vm12, %v15451_v19, %v15448_v39  ;;  %v15457_v40 = vxor.u32 2147483648, %v15454_v43  ;;  %vm7413_vm14 = vcmp.eq.s32.totalorder %v7411_v29, 0  ;;  %v15468_v39 = vld [vmem:[#allocation108_spill] sm:$0xff] }
 0x4a2   : > { %v7213_v13 = vsel %vm7206_vm13, %v7209_v4, %v7212_v58  ;;  %v7312_v28 = vsel %vm7310_vm6, %v15454_v43, %v15453_v52  ;;  %vm7416_vm4 = vcmp.eq.s32.totalorder %v7411_v29, 2  ;;  %v15459_v54 = vxor.u32 2147483648, %v15458_v48  ;;  %v15470_v58 = vld [vmem:[#allocation114_spill] sm:$0xff]  ;;  %v15473_v52 = vld [vmem:[#allocation113_spill] sm:$0xff] }
 0x4a3   : > { %v7214_v18 = vsel %vm15456_vm3, nan, %v7213_v13  ;;  %v7315_v31 = vsel %vm7313_vm8, %v15457_v40, %v15452_v49  ;;  %v15461_v57 = vxor.u32 2147483648, %v15460_v25  ;;  %vm7515_vm2 = vcmp.lt.s32.totalorder %v7514_v30, 2  ;;  %v15471_v13 = vld [vmem:[#allocation95_spill] sm:$0xff] }
 0x4a4   : > { %8784 = vst [vmem:[%s13897_s19 + $0xc0] sm:$0xff] %v7214_v18  ;;  %v7316_v32 = vsel %vm7309_vm9, %v7312_v28, %v7315_v31  ;;  %v7415_v44 = vsel %vm7413_vm14, %v15460_v25, %v15459_v54  ;;  %vm15463_vm1 = vweird.f32 %v15462_v16  ;;  %vm7516_vm0 = vcmp.eq.s32.totalorder %v7514_v30, 0  ;;  %v15475_v28 = vld [vmem:[#allocation112_spill] sm:$0xff]  ;;  %v15480_v25 = vld [vmem:[#allocation118_spill] sm:$0xff] }
 0x4a5   : > { %v7418_v62 = vsel %vm7416_vm4, %v15461_v57, %v15458_v48  ;;  %v7317_v1 = vsel %vm15463_vm1, nan, %v7316_v32  ;;  %vm7519_vm13 = vcmp.eq.s32.totalorder %v7514_v30, 2  ;;  %vm15465_vm5 = vweird.f32 %v15464_v42  ;;  %v15477_v31 = vld [vmem:[#allocation116_spill] sm:$0xff]  ;;  %v15482_v57 = vld [vmem:[#allocation117_spill] sm:$0xff] }
 0x4a6   : > { %v7419_v21 = vsel %vm7412_vm15, %v7415_v44, %v7418_v62  ;;  %8785 = vst [vmem:[%s13897_s19 + $0xc8] sm:$0xff] %v7317_v1  ;;  %v15467_v17 = vxor.u32 2147483648, %v15466_v8  ;;  %v15469_v33 = vxor.u32 2147483648, %v15468_v39  ;;  %vm7618_vm12 = vcmp.lt.s32.totalorder %v7617_v46, 2  ;;  %v15484_v42 = vld [vmem:[#allocation120_spill] sm:$0xff] }
 0x4a7   : > { %v7420_v29 = vsel %vm15465_vm5, nan, %v7419_v21  ;;  %vm7619_vm9 = vcmp.eq.s32.totalorder %v7617_v46, 0  ;;  %vm7622_vm6 = vcmp.eq.s32.totalorder %v7617_v46, 2  ;;  %v7720_v30 = vand.u32 3, %v15470_v58  ;;  %v15478_v46 = vld [vmem:[#allocation99_spill] sm:$0xff] }
 0x4a8   : > { %v7518_v24 = vsel %vm7516_vm0, %v15468_v39, %v15467_v17  ;;  %v7521_v4 = vsel %vm7519_vm13, %v15469_v33, %v15466_v8  ;;  %8786 = vst [vmem:[%s13897_s19 + $0xd0] sm:$0xff] %v7420_v29  ;;  %vm15472_vm8 = vweird.f32 %v15471_v13  ;;  %v15474_v43 = vxor.u32 2147483648, %v15473_v52  ;;  %v15485_v8 = vld [vmem:[#allocation103_spill] sm:$0xff]  ;;  %v15487_v39 = vld [vmem:[#allocation122_spill] sm:$0xff]  ;;  %v15489_v33 = vld [vmem:[#allocation121_spill] sm:$0xff] }
 0x4a9   : > { %v7522_v19 = vsel %vm7515_vm2, %v7518_v24, %v7521_v4  ;;  %v15476_v18 = vxor.u32 2147483648, %v15475_v28  ;;  %v7823_v32 = vand.u32 3, %v15477_v31  ;;  %vm7721_vm15 = vcmp.lt.s32.totalorder %v7720_v30, 2 }
 0x4aa   : > { %v7523_v49 = vsel %vm15472_vm8, nan, %v7522_v19  ;;  %v7621_v10 = vsel %vm7619_vm9, %v15475_v28, %v15474_v43  ;;  %vm7722_vm3 = vcmp.eq.s32.totalorder %v7720_v30, 0  ;;  %vm7725_vm14 = vcmp.eq.s32.totalorder %v7720_v30, 2  ;;  %v15491_v30 = vld [vmem:[#allocation124_spill] sm:$0xff]  ;;  %v15494_v28 = vld [vmem:[#allocation125_spill] sm:$0xff] }
 0x4ab   : > { %v7624_v40 = vsel %vm7622_vm6, %v15476_v18, %v15473_v52  ;;  %8787 = vst [vmem:[%s13897_s19 + $0xd8] sm:$0xff] %v7523_v49  ;;  %vm15479_vm4 = vweird.f32 %v15478_v46  ;;  %v15481_v44 = vxor.u32 2147483648, %v15480_v25  ;;  %v15483_v16 = vxor.u32 2147483648, %v15482_v57  ;;  %v15492_v52 = vld [vmem:[#allocation107_spill] sm:$0xff] }
 0x4ac   : > { %v7625_v48 = vsel %vm7618_vm12, %v7621_v10, %v7624_v40  ;;  %vm7824_vm2 = vcmp.lt.s32.totalorder %v7823_v32, 2  ;;  %vm7825_vm1 = vcmp.eq.s32.totalorder %v7823_v32, 0  ;;  %vm7828_vm0 = vcmp.eq.s32.totalorder %v7823_v32, 2  ;;  %v15496_v18 = vld [vmem:[#allocation123_spill] sm:$0xff] }
 0x4ad   : > { %v7626_v54 = vsel %vm15479_vm4, nan, %v7625_v48  ;;  %v7724_v62 = vsel %vm7722_vm3, %v15482_v57, %v15481_v44  ;;  %v7727_v1 = vsel %vm7725_vm14, %v15483_v16, %v15480_v25  ;;  %v7926_v29 = vand.u32 3, %v15484_v42  ;;  %v15498_v46 = vld [vmem:[#allocation127_spill] sm:$0xff]  ;;  %v15501_v57 = vld [vmem:[#allocation128_spill] sm:$0xff]  ;;  %v15503_v16 = vld [vmem:[#allocation126_spill] sm:$0xff] }
 0x4ae   : > { %8788 = vst [vmem:[%s13897_s19 + $0xe0] sm:$0xff] %v7626_v54  ;;  %v7728_v21 = vsel %vm7721_vm15, %v7724_v62, %v7727_v1  ;;  %vm15486_vm13 = vweird.f32 %v15485_v8  ;;  %v15488_v24 = vxor.u32 2147483648, %v15487_v39  ;;  %v15490_v19 = vxor.u32 2147483648, %v15489_v33  ;;  %v15499_v25 = vld [vmem:[#allocation111_spill] sm:$0xff] }
 0x4af   : > { %v7729_v17 = vsel %vm15486_vm13, nan, %v7728_v21  ;;  %v8029_v13 = vand.u32 3, %v15491_v30  ;;  %vm7927_vm5 = vcmp.lt.s32.totalorder %v7926_v29, 2  ;;  %vm7928_vm12 = vcmp.eq.s32.totalorder %v7926_v29, 0 }
 0x4b0   : > { %v7827_v4 = vsel %vm7825_vm1, %v15489_v33, %v15488_v24  ;;  %v7830_v58 = vsel %vm7828_vm0, %v15490_v19, %v15487_v39  ;;  %8789 = vst [vmem:[%s13897_s19 + $0xe8] sm:$0xff] %v7729_v17  ;;  %vm7931_vm9 = vcmp.eq.s32.totalorder %v7926_v29, 2  ;;  %vm15493_vm6 = vweird.f32 %v15492_v52  ;;  %v15505_v29 = vld [vmem:[#allocation131_spill] sm:$0xff]  ;;  %v15508_v33 = vld [vmem:[#allocation130_spill] sm:$0xff]  ;;  %v15510_v19 = vld [vmem:[#allocation129_spill] sm:$0xff] }
 0x4b1   : > { %v7831_v49 = vsel %vm7824_vm2, %v7827_v4, %v7830_v58  ;;  %v15495_v10 = vxor.u32 2147483648, %v15494_v28  ;;  %v15497_v31 = vxor.u32 2147483648, %v15496_v18  ;;  %vm8030_vm8 = vcmp.lt.s32.totalorder %v8029_v13, 2  ;;  %v15506_v39 = vld [vmem:[#allocation115_spill] sm:$0xff] }
 0x4b2   : > { %v7832_v43 = vsel %vm15493_vm6, nan, %v7831_v49  ;;  %vm8031_vm15 = vcmp.eq.s32.totalorder %v8029_v13, 0  ;;  %vm8034_vm3 = vcmp.eq.s32.totalorder %v8029_v13, 2  ;;  %v8132_v54 = vand.u32 3, %v15498_v46 }
 0x4b3   : > { %v7930_v40 = vsel %vm7928_vm12, %v15496_v18, %v15495_v10  ;;  %v7933_v32 = vsel %vm7931_vm9, %v15497_v31, %v15494_v28  ;;  %8790 = vst [vmem:[%s13897_s19 + $0xf0] sm:$0xff] %v7832_v43  ;;  %vm15500_vm14 = vweird.f32 %v15499_v25  ;;  %v15502_v62 = vxor.u32 2147483648, %v15501_v57  ;;  %v15512_v43 = vld [vmem:[#allocation119_spill] sm:$0xff] }
 0x4b4   : > { %v7934_v48 = vsel %vm7927_vm5, %v7930_v40, %v7933_v32  ;;  %v15504_v21 = vxor.u32 2147483648, %v15503_v16  ;;  %v8235_v8 = vand.u32 3, %v15505_v29  ;;  %vm8133_vm4 = vcmp.lt.s32.totalorder %v8132_v54, 2 }
 0x4b5   : > { %v7935_v44 = vsel %vm15500_vm14, nan, %v7934_v48  ;;  %v8033_v1 = vsel %vm8031_vm15, %v15503_v16, %v15502_v62  ;;  %vm8134_vm2 = vcmp.eq.s32.totalorder %v8132_v54, 0  ;;  %vm8137_vm1 = vcmp.eq.s32.totalorder %v8132_v54, 2 }
 0x4b6   : > { %v8036_v42 = vsel %vm8034_vm3, %v15504_v21, %v15501_v57  ;;  %8791 = vst [vmem:[%s13897_s19 + $0xf8] sm:$0xff] %v7935_v44  ;;  %vm15507_vm0 = vweird.f32 %v15506_v39  ;;  %v15509_v4 = vxor.u32 2147483648, %v15508_v33  ;;  %v15511_v30 = vxor.u32 2147483648, %v15510_v19 }
 0x4b7   : > { %v8037_v17 = vsel %vm8030_vm8, %v8033_v1, %v8036_v42  ;;  %vm8236_vm13 = vcmp.lt.s32.totalorder %v8235_v8, 2  ;;  %vm8237_vm5 = vcmp.eq.s32.totalorder %v8235_v8, 0  ;;  %vm8240_vm12 = vcmp.eq.s32.totalorder %v8235_v8, 2 }
 0x4b8   : > { %v8038_v24 = vsel %vm15507_vm0, nan, %v8037_v17  ;;  %v8136_v58 = vsel %vm8134_vm2, %v15510_v19, %v15509_v4  ;;  %v8139_v13 = vsel %vm8137_vm1, %v15511_v30, %v15508_v33  ;;  %v8338_v52 = vand.u32 3, %v13735_v9 }
 0x4b9   : > { %8792 = vst [vmem:[%s13897_s19 + $0x100] sm:$0xff] %v8038_v24  ;;  %v8140_v49 = vsel %vm8133_vm4, %v8136_v58, %v8139_v13  ;;  %vm15513_vm9 = vweird.f32 %v15512_v43  ;;  %v8239_v10 = vsel %vm8237_vm5, %v13715_v47, %v4073_v7  ;;  %v8242_v18 = vsel %vm8240_vm12, %v4076_v12, %v13719_v3 }
 0x4ba   : > { %v8141_v28 = vsel %vm15513_vm9, nan, %v8140_v49  ;;  %v8441_v40 = vand.u32 3, %v13805_v61  ;;  %v8243_v31 = vsel %vm8236_vm13, %v8239_v10, %v8242_v18  ;;  %vm8339_vm6 = vcmp.lt.s32.totalorder %v8338_v52, 2 }
 0x4bb   : > { %8793 = vst [vmem:[%s13897_s19 + $0x108] sm:$0xff] %v8141_v28  ;;  %vm8340_vm8 = vcmp.eq.s32.totalorder %v8338_v52, 0  ;;  %vm8343_vm15 = vcmp.eq.s32.totalorder %v8338_v52, 2  ;;  %vm15514_vm3 = vweird.f32 %v13412_v27  ;;  %v8544_v12 = vand.u32 3, %v13995_v60 }
 0x4bc   : > { %v8244_v9 = vsel %vm15514_vm3, nan, %v8243_v31  ;;  %v8342_v32 = vsel %vm8340_vm8, %v13823_v56, %v4177_v63  ;;  %v8345_v47 = vsel %vm8343_vm15, %v4180_v55, %v13832_v6  ;;  %vm8442_vm14 = vcmp.lt.s32.totalorder %v8441_v40, 2 }
 0x4bd   : > { %8794 = vst [vmem:[%s13897_s19 + $0x110] sm:$0xff] %v8244_v9  ;;  %v8346_v3 = vsel %vm8339_vm6, %v8342_v32, %v8345_v47  ;;  %vm8443_vm4 = vcmp.eq.s32.totalorder %v8441_v40, 0  ;;  %vm8446_vm2 = vcmp.eq.s32.totalorder %v8441_v40, 2  ;;  %vm15515_vm1 = vweird.f32 %v13490_v34 }
 0x4be   : > { %v8347_v27 = vsel %vm15515_vm1, nan, %v8346_v3  ;;  %v15516_v7 = vxor.u32 2147483648, %v13954_v35  ;;  %v15517_v63 = vxor.u32 2147483648, %v13946_v15  ;;  %v8647_v6 = vand.u32 3, %v14045_v50 }
 0x4bf   : > { %8795 = vst [vmem:[%s13897_s19 + $0x118] sm:$0xff] %v8347_v27  ;;  %vm8545_vm0 = vcmp.lt.s32.totalorder %v8544_v12, 2  ;;  %vm8546_vm13 = vcmp.eq.s32.totalorder %v8544_v12, 0  ;;  %vm8549_vm5 = vcmp.eq.s32.totalorder %v8544_v12, 2  ;;  %vm15518_vm12 = vweird.f32 %v13564_v5 }
 0x4c0   : > { %v8445_v61 = vsel %vm8443_vm4, %v13946_v15, %v15516_v7  ;;  %v8448_v56 = vsel %vm8446_vm2, %v15517_v63, %v13954_v35  ;;  %v8548_v60 = vsel %vm8546_vm13, %v14114_v37, %v4385_v14  ;;  %v8551_v15 = vsel %vm8549_vm5, %v4388_v26, %v14120_v36 }
 0x4c1   : > { %v8449_v55 = vsel %vm8442_vm14, %v8445_v61, %v8448_v56  ;;  %vm8648_vm9 = vcmp.lt.s32.totalorder %v8647_v6, 2  ;;  %v8552_v35 = vsel %vm8545_vm0, %v8548_v60, %v8551_v15  ;;  %vm8649_vm6 = vcmp.eq.s32.totalorder %v8647_v6, 0 }
 0x4c2   : > { %v8450_v34 = vsel %vm15518_vm12, nan, %v8449_v55  ;;  %vm8652_vm8 = vcmp.eq.s32.totalorder %v8647_v6, 2  ;;  %v8750_v50 = vand.u32 3, %v14204_v41  ;;  %v8553_v5 = vsel %vm4380_vm10, nan, %v8552_v35  ;;  %8812 = sbr.rel (!%p15519_p5) target bundleno = 1253 (0x4e5), region = 36 }
 0x4c3   : > { %8796 = vst [vmem:[%s13897_s19 + $0x120] sm:$0xff] %v8450_v34  ;;  %v8651_v14 = vsel %vm8649_vm6, %v14241_v51, %v4489_v45  ;;  %v8654_v37 = vsel %vm8652_vm8, %v4492_v11, %v14246_v0  ;;  %8797 = vst [vmem:[%s13897_s19 + $0x128] sm:$0xff] %v8553_v5 }
 0x4c4   : > { %v8655_v36 = vsel %vm8648_vm9, %v8651_v14, %v8654_v37  ;;  %vm8751_vm15 = vcmp.lt.s32.totalorder %v8750_v50, 2  ;;  %vm8752_vm3 = vcmp.eq.s32.totalorder %v8750_v50, 0  ;;  %vm8755_vm14 = vcmp.eq.s32.totalorder %v8750_v50, 2 }
 0x4c5   : > { %v8656_v26 = vsel %vm4484_vm7, nan, %v8655_v36  ;;  %v8754_v38 = vsel %vm8752_vm3, %v14393_v59, %v4593_v23  ;;  %v8757_v41 = vsel %vm8755_vm14, %v4596_v20, %v14404_v2 }
 0x4c6   : > { %8798 = vst [vmem:[%s13897_s19 + $0x130] sm:$0xff] %v8656_v26  ;;  %v8758_v45 = vsel %vm8751_vm15, %v8754_v38, %v8757_v41 }
 0x4c7   : > { %v8759_v51 = vsel %vm4588_vm11, nan, %v8758_v45 }
 0x4c8   : > { %8799 = vst [vmem:[%s13897_s19 + $0x138] sm:$0xff] %v8759_v51 }
 0x4c9   : > { %s15527_s29 = smov (!%p8815_p6, %s8814_s29), 40 }
 0x4ca   : > { %s14613_s30 = sshll.u32 %s15527_s29, 7 }
 0x4cb   : > { %s8819_s4 = ssub.s32 5120, %s14613_s30 }
 0x4cc   : > { %8820 = vsyncadd %s8801_s25, %s8819_s4  ;;  %p9269_p9 = scmp.ne.s32.totalorder %s14613_s30, 0  ;;  %s9280_s5 = smul.u32 5120, %s9862_s16 }
 0x4cd   : > { %s8825_s6 = sshll.u32 %s10284_s26, 4  ;;  %s9815_s11 = smov [#allocation5]   ;;  %s14626_s6 = int_to_ptr.vmem [resolvable:$true] %s8825_s6 }
 0x4ce   : > { %s14624_s9 = scalar_lea.hbm %s14717_s2, %s9280_s5  ;;  %s9708_s10 = scalar_lea.vmem %s14626_s6, %s14613_s30 }
 0x4cf   : > { %p9709_p10 = scmp.ne.s32.totalorder %s14626_s6, %s9708_s10  ;;  %s9712_s20 = sshll.u32 %s9815_s11, 4  ;;  %s9713_s20 = int_to_ptr.vmem [resolvable:$false] %s9712_s20 }
 0x4d0   : > { %s9714_s24 = scalar_lea.vmem %s9713_s20, 10240  ;;  %p9715_p3 = scmp.lt.s32.totalorder %s14626_s6, %s9713_s20 }
 0x4d1   : > { %p9710_p12 = pnand %p9709_p10, %p9269_p9  ;;  %p9716_p4 = scmp.lt.s32.totalorder %s9714_s24, %s9708_s10 }
 0x4d3   : > { %p9711_p2 = pneg %p9710_p12  ;;  %p9717_p7 = por %p9716_p4, %p9715_p3 }
 0x4d5   : > { %p9718_p8 = pnand %p9717_p7, %p9711_p2 }
 0x4d7   : > { %9721 = shalt.err (!%p9718_p8)
}
 0x4d8   : > { %s9722_s26 = scalar_lea.hbm %s14624_s9, %s14613_s30  ;;  %s9726_s4 = scalar_lea.hbm %s14717_s2, 10112 }
 0x4d9   : > { %p9723_p11 = scmp.ne.s32.totalorder %s14624_s9, %s9722_s26  ;;  %p9727_p0 = scmp.lt.u32.totalorder %s14624_s9, %s14717_s2 }
 0x4da   : > { %p9728_p5 = scmp.lt.u32.totalorder %s9726_s4, %s9722_s26  ;;  %p9730_p10 = scmp.lt.u32.totalorder %s9722_s26, %s14624_s9 }
 0x4db   : > { %p9724_p13 = pnand %p9723_p11, %p9269_p9 }
 0x4dc   : > { %p9729_p6 = por %p9728_p5, %p9727_p0 }
 0x4dd   : > { %p9725_p1 = pneg %p9724_p13 }
 0x4de   : > { %p9731_p12 = por %p9730_p10, %p9729_p6 }
 0x4e0   : > { %p9732_p2 = pnand %p9731_p12, %p9725_p1 }
 0x4e2   : > { %9735 = shalt.err (!%p9732_p2)
}
 0x4e3   : > { %s9816_s8 = smov 128   ;;  %s9817_s10 = smov 8  }
 0x4e4   : > { %8831 = dma.vmem_to_hbm [thread:$0]  (%p9269_p9), %s14626_s6, %s14613_s30, %s14624_s9, %s8801_s25, %s9816_s8, %s9816_s8, %s9817_s10  }
 0x4e5 PF: > { %p15520_p3 = scmp.ne.s32.totalorder %s15043_s22, 0 }
 0x4e6   : > { %s8835_s11 = smul.u32 (%p15520_p3), 40, %s9862_s16 }
 0x4e7   : > { %8834 = sbr.rel (!%p15520_p3) target bundleno = 1290 (0x50a), region = 40 }
 0x4e8   : > { %s8836_s20 = ssub.s32 (%p15520_p3), 79, %s8835_s11 }
 0x4e9   : > { %p8837_p4 = scmp.lt.s32.totalorder (%p15520_p3), %s8836_s20, 40 }
 0x4ee   : > { %s15529_s20 = smov (!%p8837_p4, %s8836_s20), 40 }
 0x4ef   : > { %s14657_s24 = sshll.u32 %s15529_s20, 7 }
 0x4f0   : > { %s8841_s26 = ssub.s32 5120, %s14657_s24 }
 0x4f1   : > { %8842 = vsyncadd %s8806_s27, %s8841_s26  ;;  %p9274_p9 = scmp.ne.s32.totalorder %s14657_s24, 0  ;;  %s9281_s22 = smul.u32 5120, %s9862_s16 }
 0x4f2   : > { %s8847_s25 = sshll.u32 %s13897_s19, 4  ;;  %s9818_s29 = smov [#allocation6]   ;;  %s14670_s25 = int_to_ptr.vmem [resolvable:$true] %s8847_s25 }
 0x4f3   : > { %s14668_s9 = scalar_lea.hbm %s14718_s3, %s9281_s22  ;;  %s9736_s28 = scalar_lea.vmem %s14670_s25, %s14657_s24 }
 0x4f4   : > { %p9737_p7 = scmp.ne.s32.totalorder %s14670_s25, %s9736_s28  ;;  %s9740_s4 = sshll.u32 %s9818_s29, 4  ;;  %s9741_s4 = int_to_ptr.vmem [resolvable:$false] %s9740_s4 }
 0x4f5   : > { %s9742_s16 = scalar_lea.vmem %s9741_s4, 10240  ;;  %p9743_p13 = scmp.lt.s32.totalorder %s14670_s25, %s9741_s4 }
 0x4f6   : > { %p9738_p8 = pnand %p9737_p7, %p9274_p9  ;;  %p9744_p1 = scmp.lt.s32.totalorder %s9742_s16, %s9736_s28 }
 0x4f8   : > { %p9739_p11 = pneg %p9738_p8  ;;  %p9745_p0 = por %p9744_p1, %p9743_p13 }
 0x4fa   : > { %p9746_p5 = pnand %p9745_p0, %p9739_p11 }
 0x4fc   : > { %9749 = shalt.err (!%p9746_p5)
}
 0x4fd   : > { %s9750_s19 = scalar_lea.hbm %s14668_s9, %s14657_s24  ;;  %s9754_s8 = scalar_lea.hbm %s14718_s3, 10112 }
 0x4fe   : > { %p9751_p6 = scmp.ne.s32.totalorder %s14668_s9, %s9750_s19  ;;  %p9755_p2 = scmp.lt.u32.totalorder %s14668_s9, %s14718_s3 }
 0x4ff   : > { %p9756_p3 = scmp.lt.u32.totalorder %s9754_s8, %s9750_s19  ;;  %p9758_p7 = scmp.lt.u32.totalorder %s9750_s19, %s14668_s9 }
 0x500   : > { %p9752_p10 = pnand %p9751_p6, %p9274_p9 }
 0x501   : > { %p9757_p4 = por %p9756_p3, %p9755_p2 }
 0x502   : > { %p9753_p12 = pneg %p9752_p10 }
 0x503   : > { %p9759_p8 = por %p9758_p7, %p9757_p4 }
 0x505   : > { %p9760_p11 = pnand %p9759_p8, %p9753_p12 }
 0x507   : > { %9763 = shalt.err (!%p9760_p11)
}
 0x508   : > { %s9819_s20 = smov 128   ;;  %s9820_s26 = smov 8  }
 0x509   : > { %8853 = dma.vmem_to_hbm [thread:$0]  (%p9274_p9), %s14670_s25, %s14657_s24, %s14668_s9, %s8806_s27, %s9819_s20, %s9819_s20, %s9820_s26  }
 0x50a PF: > { %p9462_p13 = scmp.ge.s32.totalorder %s9806_s15, 2  ;;  %s8862_s22 = sand.u32 1, %s9794_s12  }
 0x50b   : > { %p15521_p1 = scmp.ne.s32.totalorder %s15044_s23, 0  ;;  %s8863_s30 = scalar_lea.sflag [#allocation4], %s8862_s22 }
 0x50d   : > { %p9454_p0 = pnand %p9462_p13, %p15521_p1 }
 0x50f   : > { %9785 = dma.done.wait (!%p9454_p0), %s8863_s30, 5120  }
 0x510   : > { %9787 = vsyncadd (!%p9454_p0), %s8863_s30, 4294962176  ;;  %s8872_s6 = scalar_lea.sflag [#allocation7], %s8862_s22 }
 0x511   : > { %9789 = dma.done.wait (!%p9454_p0), %s8872_s6, 5120  }
 0x512   : > { %9791 = vsyncadd (!%p9454_p0), %s8872_s6, 4294962176  ;;  %p18_p9 = scmp.ge.s32.totalorder %s9866_s18, 4   ;;  %s15522_s12 = smov %s9798_s13 }
 0x513   : > { %s15523_s13 = smov %s9802_s14  ;;  %s15524_s14 = smov %s9877_s21 }
 0x514   : > { %s15525_s15 = smov %s9866_s18  ;;  %20 = sbr.rel (!%p18_p9) target bundleno = 6 (0x6), region = 82 }
 0x51b   :  { %8877 = vsyncpa [#allocation3], 1 }
 0x51c   :  { %8879 = vsyncpa [#allocation3 + $0x1], 1 }
 0x51d   :  { %8880 = vsyncpa [#allocation4], 1 }
 0x51e   :  { %8882 = vsyncpa [#allocation4 + $0x1], 1 }
 0x51f   :  { %8883 = vsyncpa [#allocation7], 1 }
 0x520   :  { %8885 = vsyncpa [#allocation7 + $0x1], 1 }

</bundles_post_ra>
